<compile_context>
chip_gen: v6e
topology: v6e:2x2x1
jax: 0.10.0
libtpu: 0.0.40
codegen_flags: <defaults>
</compile_context>

<pallas_src>
import numpy as np

import jax
import jax.numpy as jnp
from jax.experimental import pallas as pl
from jax.experimental.pallas import tpu as pltpu

NEG_SLOPE = 0.01  # PyTorch F.leaky_relu default


def _leaky(v):
    return jnp.where(v > 0, v, NEG_SLOPE * v)


# --------------------------------------------------------------------------
# Precomputed conv2 gather matrix G (25*128, 256), bf16 at call time.
# Row t*128 + r, with t = kh*5 + kw the conv2 tap and r = q*32 + p where
# q = dh*2 + dw is the 2x2 pool quadrant and p = ph*5 + pw the pooled output
# position.  G[t*128+r, :] is the one-hot row selecting, from the padded
# (256, 64) pooled-conv1 activation p1, the 14x14-grid row-major element
# 28*ph + 2*pw + 14*dh + dw + 14*kh + kw (<= 195, so conv1's pad rows 196..255
# are never selected).  Rows with p >= 25 are all-zero pad rows.
# --------------------------------------------------------------------------
def _conv2_gather_matrix():
    G = np.zeros((25 * 128, 256), np.float32)
    for kh in range(5):
        for kw in range(5):
            t = kh * 5 + kw
            for dh in range(2):
                for dw in range(2):
                    for ph in range(5):
                        for pw in range(5):
                            r = (dh * 2 + dw) * 32 + ph * 5 + pw
                            src = 28 * ph + 2 * pw + 14 * dh + dw + 14 * kh + kw
                            G[t * 128 + r, src] = 1.0
    return G


_CONV2_GATHER = _conv2_gather_matrix()


# ------------------------------- fused kernel ------------------------------
def _fused_kernel(a1_ref, g_ref, w1_ref, b1_ref, w2_ref, b2_ref,
                  fw1_ref, fb1_ref, fw2_ref, fb2_ref, fw3_ref, fb3_ref,
                  o_ref, a2_ref, flat_ref):
    f32 = jnp.float32
    bf16 = jnp.bfloat16

    # ---- conv1: one bf16 matmul over quadrant-stacked patches, bias+leaky,
    #      2x2 max-pool as elementwise max of 4 sublane-aligned row slices.
    y1 = jnp.dot(a1_ref[0], w1_ref[...], preferred_element_type=f32)      # (800, 64)
    y1 = _leaky(y1 + b1_ref[...])
    p1 = jnp.maximum(jnp.maximum(y1[0:200], y1[200:400]),
                     jnp.maximum(y1[400:600], y1[600:800]))               # (200, 64)
    # pad pooled positions 196(+4 pad) -> 256 so the gather matmul is clean
    p1 = jnp.concatenate([p1, jnp.zeros((56, 64), f32)], axis=0)          # (256, 64)
    p1 = p1.astype(bf16)

    # ---- conv2 im2col in-kernel: 25 precomputed one-hot gather matmuls
    #      (bf16 x bf16, exact row selection) -> bf16 (128, 1600) scratch.
    for t in range(25):
        g_t = g_ref[t * 128:(t + 1) * 128, :]                             # (128, 256)
        a2_ref[:, t * 64:(t + 1) * 64] = jnp.dot(
            g_t, p1, preferred_element_type=f32).astype(bf16)             # (128, 64)

    # ---- conv2: single (128,1600)@(1600,64) bf16 matmul, bias+leaky, pool
    y2 = jnp.dot(a2_ref[...], w2_ref[...], preferred_element_type=f32)    # (128, 64)
    y2 = _leaky(y2 + b2_ref[...])
    p2 = jnp.maximum(jnp.maximum(y2[0:32], y2[32:64]),
                     jnp.maximum(y2[64:96], y2[96:128]))                  # (32, 64)

    # ---- flatten: 25 valid pooled rows -> one lane-dense (1, 1600) bf16 row.
    # (fc1 weights were row-permuted in glue to match this (p, c) order.)
    for p in range(25):
        flat_ref[:, p * 64:(p + 1) * 64] = p2[p:p + 1, :].astype(bf16)
    flat = flat_ref[...]                                                  # (1, 1600)

    # ---- MLP: bf16 x bf16 MXU dots, f32 accumulation and activations
    h = _leaky(jnp.dot(flat, fw1_ref[...], preferred_element_type=f32)
               + fb1_ref[...])                                            # (1, 384)
    h = _leaky(jnp.dot(h.astype(bf16), fw2_ref[...], preferred_element_type=f32)
               + fb2_ref[...])                                            # (1, 192)
    o = jnp.dot(h.astype(bf16), fw3_ref[...], preferred_element_type=f32) \
        + fb3_ref[...]                                                    # (1, 10)
    o_ref[0] = o.astype(o_ref.dtype)


# ------------------------------- glue helpers ------------------------------
def _conv1_patches(x_nhwc):
    """(B,32,32,3) -> (B,800,75) conv1 im2col, grouped by 2x2 pool quadrant.

    Rows: 4 blocks of 200 (196 pooled positions row-major + 4 zero pad rows).
    Cols: (kh, kw, cin) order, K = 75."""
    B = x_nhwc.shape[0]
    cols = [x_nhwc[:, kh:kh + 28, kw:kw + 28, :]
            for kh in range(5) for kw in range(5)]
    pat = jnp.concatenate(cols, axis=-1)                        # (B,28,28,75)
    quads = []
    for di in (0, 1):
        for dj in (0, 1):
            q = pat[:, di::2, dj::2, :].reshape(B, 196, 75)
            quads.append(jnp.pad(q, ((0, 0), (0, 4), (0, 0))))
    return jnp.concatenate(quads, axis=1)                       # (B,800,75)


def _prep_params(params):
    """PyTorch layouts -> kernel layouts; weights cast to bf16 for streaming."""
    bf16 = jnp.bfloat16
    w1 = jnp.transpose(params["conv1_w"], (2, 3, 1, 0)).reshape(75, 64).astype(bf16)
    w2 = jnp.transpose(params["conv2_w"], (2, 3, 1, 0)).reshape(1600, 64).astype(bf16)
    # PyTorch flatten index is c*25 + ph*5 + pw; kernel produces (p, c) order ->
    # permute fc1's input axis here (free) instead of transposing activations.
    fw1 = (params["fc1_w"].reshape(384, 64, 25)
           .transpose(2, 1, 0).reshape(1600, 384).astype(bf16))
    fw2 = params["fc2_w"].T.astype(bf16)
    fw3 = params["fc3_w"].T.astype(bf16)
    b1 = params["conv1_b"].reshape(1, 64)
    b2 = params["conv2_b"].reshape(1, 64)
    fb1 = params["fc1_b"].reshape(1, 384)
    fb2 = params["fc2_b"].reshape(1, 192)
    fb3 = params["fc3_b"].reshape(1, 10)
    return w1, b1, w2, b2, fw1, fb1, fw2, fb2, fw3, fb3


# ------------------------------- full forward ------------------------------
def weak_learner_conv_forward(x_nchw, params):
    B = x_nchw.shape[0]
    x = jnp.transpose(x_nchw, (0, 2, 3, 1)).astype(jnp.float32)   # NCHW -> NHWC
    a1 = _conv1_patches(x).astype(jnp.bfloat16)                   # (B, 800, 75)
    g = jnp.asarray(_CONV2_GATHER, dtype=jnp.bfloat16)            # (3200, 256)
    w1, b1, w2, b2, fw1, fb1, fw2, fb2, fw3, fb3 = _prep_params(params)

    const2 = lambda i: (0, 0)
    out = pl.pallas_call(
        _fused_kernel,
        out_shape=jax.ShapeDtypeStruct((B, 1, 10), jnp.float32),
        grid=(B,),
        in_specs=[
            pl.BlockSpec((1, 800, 75), lambda i: (i, 0, 0)),   # conv1 patches (bf16)
            pl.BlockSpec((3200, 256), const2),                 # conv2 gather matrix
            pl.BlockSpec((75, 64), const2),                    # conv1 w (bf16)
            pl.BlockSpec((1, 64), const2),                     # conv1 b (f32)
            pl.BlockSpec((1600, 64), const2),                  # conv2 w (bf16)
            pl.BlockSpec((1, 64), const2),                     # conv2 b (f32)
            pl.BlockSpec((1600, 384), const2),                 # fc1 w (bf16)
            pl.BlockSpec((1, 384), const2),                    # fc1 b (f32)
            pl.BlockSpec((384, 192), const2),                  # fc2 w (bf16)
            pl.BlockSpec((1, 192), const2),                    # fc2 b (f32)
            pl.BlockSpec((192, 10), const2),                   # fc3 w (bf16)
            pl.BlockSpec((1, 10), const2),                     # fc3 b (f32)
        ],
        out_specs=pl.BlockSpec((1, 1, 10), lambda i: (i, 0, 0)),
        scratch_shapes=[pltpu.VMEM((128, 1600), jnp.bfloat16),  # conv2 im2col
                        pltpu.VMEM((1, 1600), jnp.bfloat16)],   # flatten row
        compiler_params=pltpu.CompilerParams(
            dimension_semantics=("parallel",)),
    )(a1, g, w1, b1, w2, b2, fw1, fb1, fw2, fb2, fw3, fb3)
    return out.reshape(B, 10)


# ------------------------------ pure-JAX reference ---------------------------
def reference_forward(x, params):
    hi = jax.lax.Precision.HIGHEST

    def conv_block(h, w, b):
        h = jax.lax.conv_general_dilated(
            h, w, window_strides=(1, 1), padding="VALID",
            dimension_numbers=("NCHW", "OIHW", "NCHW"), precision=hi)
        h = _leaky(h + b[None, :, None, None])
        return jax.lax.reduce_window(h, -jnp.inf, jax.lax.max,
                                     (1, 1, 2, 2), (1, 1, 2, 2), "VALID")

    h = conv_block(x, params["conv1_w"], params["conv1_b"])
    h = conv_block(h, params["conv2_w"], params["conv2_b"])
    h = h.reshape(h.shape[0], -1)
    h = _leaky(jnp.dot(h, params["fc1_w"].T, precision=hi) + params["fc1_b"])
    h = _leaky(jnp.dot(h, params["fc2_w"].T, precision=hi) + params["fc2_b"])
    return jnp.dot(h, params["fc3_w"].T, precision=hi) + params["fc3_b"]


# ------------------------------ params ---------------------------------------
def _init_params(key):
    ks = jax.random.split(key, 10)

    def w_init(k, shape, fan_in):
        return jax.random.normal(k, shape, jnp.float32) * (1.5 / fan_in ** 0.5)

    def b_init(k, shape):
        return jax.random.normal(k, shape, jnp.float32) * 0.1

    return {
        "conv1_w": w_init(ks[0], (64, 3, 5, 5), 3 * 5 * 5),    # PyTorch OIHW
        "conv1_b": b_init(ks[1], (64,)),
        "conv2_w": w_init(ks[2], (64, 64, 5, 5), 64 * 5 * 5),
        "conv2_b": b_init(ks[3], (64,)),
        "fc1_w": w_init(ks[4], (384, 1600), 1600),             # PyTorch (out, in)
        "fc1_b": b_init(ks[5], (384,)),
        "fc2_w": w_init(ks[6], (192, 384), 384),
        "fc2_b": b_init(ks[7], (192,)),
        "fc3_w": w_init(ks[8], (10, 192), 192),
        "fc3_b": b_init(ks[9], (10,)),
    }


if __name__ == "__main__":
    key = jax.random.PRNGKey(0)
    pkey, xkey = jax.random.split(key)
    params = _init_params(pkey)
    x = jax.random.normal(xkey, (2, 3, 32, 32), jnp.float32)  # NCHW; module requires 32x32

    fwd = jax.jit(weak_learner_conv_forward)
    out = jax.block_until_ready(fwd(x, params))
    assert out.shape == (2, 10), out.shape

    ref = reference_forward(x, params)
    # bf16 x bf16 MXU operands (per perf review) with f32 accumulation widen the
    # numerical band slightly vs. the all-f32 HIGHEST-precision reference.
    if not bool(jnp.allclose(out, ref, rtol=2e-2, atol=5e-2)):
        max_err = float(jnp.max(jnp.abs(out - ref)))
        raise AssertionError(f"mismatch vs reference, max abs err={max_err}")
    print("KERNEL_OK")
</pallas_src>

<mosaic_0001>
module attributes {stable_mosaic.version = 11 : i64} {
  func.func @_fused_kernel(%arg0: i32, %arg1: memref<1x800x75xbf16, #tpu.memory_space<vmem>>, %arg2: memref<3200x256xbf16, #tpu.memory_space<vmem>>, %arg3: memref<75x64xbf16, #tpu.memory_space<vmem>>, %arg4: memref<1x64xf32, #tpu.memory_space<vmem>>, %arg5: memref<1600x64xbf16, #tpu.memory_space<vmem>>, %arg6: memref<1x64xf32, #tpu.memory_space<vmem>>, %arg7: memref<1600x384xbf16, #tpu.memory_space<vmem>>, %arg8: memref<1x384xf32, #tpu.memory_space<vmem>>, %arg9: memref<384x192xbf16, #tpu.memory_space<vmem>>, %arg10: memref<1x192xf32, #tpu.memory_space<vmem>>, %arg11: memref<192x10xbf16, #tpu.memory_space<vmem>>, %arg12: memref<1x10xf32, #tpu.memory_space<vmem>>, %arg13: memref<1x1x10xf32, #tpu.memory_space<vmem>>, %arg14: memref<128x1600xbf16, #tpu.memory_space<vmem>>, %arg15: memref<1x1600xbf16, #tpu.memory_space<vmem>>) attributes {dimension_semantics = [#tpu.dimension_semantics<parallel>], iteration_bounds = array<i64: 2>, scalar_prefetch = 0 : i64, scratch_operands = 2 : i64, tpu.core_type = #tpu.core_type<tc>, window_params = [{transform_indices = @transform_0, window_bounds = array<i64: 1, 800, 75>}, {pipeline_mode = #tpu.pipeline_mode<synchronous>, transform_indices = @transform_1, window_bounds = array<i64: 3200, 256>}, {pipeline_mode = #tpu.pipeline_mode<synchronous>, transform_indices = @transform_2, window_bounds = array<i64: 75, 64>}, {pipeline_mode = #tpu.pipeline_mode<synchronous>, transform_indices = @transform_3, window_bounds = array<i64: 1, 64>}, {pipeline_mode = #tpu.pipeline_mode<synchronous>, transform_indices = @transform_4, window_bounds = array<i64: 1600, 64>}, {pipeline_mode = #tpu.pipeline_mode<synchronous>, transform_indices = @transform_5, window_bounds = array<i64: 1, 64>}, {pipeline_mode = #tpu.pipeline_mode<synchronous>, transform_indices = @transform_6, window_bounds = array<i64: 1600, 384>}, {pipeline_mode = #tpu.pipeline_mode<synchronous>, transform_indices = @transform_7, window_bounds = array<i64: 1, 384>}, {pipeline_mode = #tpu.pipeline_mode<synchronous>, transform_indices = @transform_8, window_bounds = array<i64: 384, 192>}, {pipeline_mode = #tpu.pipeline_mode<synchronous>, transform_indices = @transform_9, window_bounds = array<i64: 1, 192>}, {pipeline_mode = #tpu.pipeline_mode<synchronous>, transform_indices = @transform_10, window_bounds = array<i64: 192, 10>}, {pipeline_mode = #tpu.pipeline_mode<synchronous>, transform_indices = @transform_11, window_bounds = array<i64: 1, 10>}, {transform_indices = @transform_12, window_bounds = array<i64: 1, 1, 10>}]} {
    %c0 = arith.constant 0 : index
    %c0_0 = arith.constant 0 : index
    %c0_1 = arith.constant 0 : index
    %0 = vector.load %arg1[%c0, %c0_0, %c0_1] : memref<1x800x75xbf16, #tpu.memory_space<vmem>>, vector<1x800x75xbf16>
    %1 = vector.shape_cast %0 : vector<1x800x75xbf16> to vector<800x75xbf16>
    %c0_2 = arith.constant 0 : index
    %c0_3 = arith.constant 0 : index
    %2 = vector.load %arg3[%c0_2, %c0_3] : memref<75x64xbf16, #tpu.memory_space<vmem>>, vector<75x64xbf16>
    %cst = arith.constant dense<0.000000e+00> : vector<800x64xf32>
    %3 = tpu.matmul %1, %2, %cst {dimension_numbers = #tpu.dot_dimension_numbers<[1], [0], [0], [1], [0, 0, 1, 1], [], []>} : vector<800x75xbf16>, vector<75x64xbf16>, vector<800x64xf32> -> vector<800x64xf32>
    %c0_4 = arith.constant 0 : index
    %c0_5 = arith.constant 0 : index
    %4 = vector.load %arg4[%c0_4, %c0_5] : memref<1x64xf32, #tpu.memory_space<vmem>>, vector<1x64xf32>
    %5 = vector.broadcast %4 : vector<1x64xf32> to vector<800x64xf32>
    %6 = arith.addf %3, %5 : vector<800x64xf32>
    %cst_6 = arith.constant 0.000000e+00 : f32
    %7 = vector.broadcast %cst_6 : f32 to vector<800x64xf32>
    %8 = arith.cmpf ogt, %6, %7 : vector<800x64xf32>
    %cst_7 = arith.constant 0.00999999977 : f32
    %9 = vector.broadcast %cst_7 : f32 to vector<800x64xf32>
    %10 = arith.mulf %9, %6 : vector<800x64xf32>
    %11 = arith.select %8, %6, %10 : vector<800x64xi1>, vector<800x64xf32>
    %12 = vector.extract_strided_slice %11 {offsets = [0, 0], sizes = [200, 64], strides = [1, 1]} : vector<800x64xf32> to vector<200x64xf32>
    %13 = vector.extract_strided_slice %11 {offsets = [200, 0], sizes = [200, 64], strides = [1, 1]} : vector<800x64xf32> to vector<200x64xf32>
    %14 = arith.maximumf %12, %13 : vector<200x64xf32>
    %15 = vector.extract_strided_slice %11 {offsets = [400, 0], sizes = [200, 64], strides = [1, 1]} : vector<800x64xf32> to vector<200x64xf32>
    %16 = vector.extract_strided_slice %11 {offsets = [600, 0], sizes = [200, 64], strides = [1, 1]} : vector<800x64xf32> to vector<200x64xf32>
    %17 = arith.maximumf %15, %16 : vector<200x64xf32>
    %18 = arith.maximumf %14, %17 : vector<200x64xf32>
    %cst_8 = arith.constant 0.000000e+00 : f32
    %19 = vector.broadcast %cst_8 : f32 to vector<56x64xf32>
    %20 = tpu.concatenate %18, %19 in 0 : vector<200x64xf32>, vector<56x64xf32> -> vector<256x64xf32>
    %21 = arith.truncf %20 : vector<256x64xf32> to vector<256x64xbf16>
    %c0_9 = arith.constant 0 : index
    %c0_10 = arith.constant 0 : index
    %22 = vector.load %arg2[%c0_9, %c0_10] : memref<3200x256xbf16, #tpu.memory_space<vmem>>, vector<128x256xbf16>
    %cst_11 = arith.constant dense<0.000000e+00> : vector<128x64xf32>
    %23 = tpu.matmul %22, %21, %cst_11 {dimension_numbers = #tpu.dot_dimension_numbers<[1], [0], [0], [1], [0, 0, 1, 1], [], []>} : vector<128x256xbf16>, vector<256x64xbf16>, vector<128x64xf32> -> vector<128x64xf32>
    %24 = arith.truncf %23 : vector<128x64xf32> to vector<128x64xbf16>
    %c0_12 = arith.constant 0 : index
    %c0_13 = arith.constant 0 : index
    %25 = vector.load %arg14[%c0_12, %c0_13] : memref<128x1600xbf16, #tpu.memory_space<vmem>>, vector<128x64xbf16>
    tpu.vector_store %arg14[%c0_12, %c0_13], %24 {strides = array<i32>} : memref<128x1600xbf16, #tpu.memory_space<vmem>>, vector<128x64xbf16>,
    %c128 = arith.constant 128 : index
    %c0_14 = arith.constant 0 : index
    %26 = vector.load %arg2[%c128, %c0_14] : memref<3200x256xbf16, #tpu.memory_space<vmem>>, vector<128x256xbf16>
    %cst_15 = arith.constant dense<0.000000e+00> : vector<128x64xf32>
    %27 = tpu.matmul %26, %21, %cst_15 {dimension_numbers = #tpu.dot_dimension_numbers<[1], [0], [0], [1], [0, 0, 1, 1], [], []>} : vector<128x256xbf16>, vector<256x64xbf16>, vector<128x64xf32> -> vector<128x64xf32>
    %28 = arith.truncf %27 : vector<128x64xf32> to vector<128x64xbf16>
    %c0_16 = arith.constant 0 : index
    %c64 = arith.constant 64 : index
    %29 = vector.load %arg14[%c0_16, %c64] : memref<128x1600xbf16, #tpu.memory_space<vmem>>, vector<128x64xbf16>
    tpu.vector_store %arg14[%c0_16, %c64], %28 {strides = array<i32>} : memref<128x1600xbf16, #tpu.memory_space<vmem>>, vector<128x64xbf16>,
    %c256 = arith.constant 256 : index
    %c0_17 = arith.constant 0 : index
    %30 = vector.load %arg2[%c256, %c0_17] : memref<3200x256xbf16, #tpu.memory_space<vmem>>, vector<128x256xbf16>
    %cst_18 = arith.constant dense<0.000000e+00> : vector<128x64xf32>
    %31 = tpu.matmul %30, %21, %cst_18 {dimension_numbers = #tpu.dot_dimension_numbers<[1], [0], [0], [1], [0, 0, 1, 1], [], []>} : vector<128x256xbf16>, vector<256x64xbf16>, vector<128x64xf32> -> vector<128x64xf32>
    %32 = arith.truncf %31 : vector<128x64xf32> to vector<128x64xbf16>
    %c0_19 = arith.constant 0 : index
    %c128_20 = arith.constant 128 : index
    %33 = vector.load %arg14[%c0_19, %c128_20] : memref<128x1600xbf16, #tpu.memory_space<vmem>>, vector<128x64xbf16>
    tpu.vector_store %arg14[%c0_19, %c128_20], %32 {strides = array<i32>} : memref<128x1600xbf16, #tpu.memory_space<vmem>>, vector<128x64xbf16>,
    %c384 = arith.constant 384 : index
    %c0_21 = arith.constant 0 : index
    %34 = vector.load %arg2[%c384, %c0_21] : memref<3200x256xbf16, #tpu.memory_space<vmem>>, vector<128x256xbf16>
    %cst_22 = arith.constant dense<0.000000e+00> : vector<128x64xf32>
    %35 = tpu.matmul %34, %21, %cst_22 {dimension_numbers = #tpu.dot_dimension_numbers<[1], [0], [0], [1], [0, 0, 1, 1], [], []>} : vector<128x256xbf16>, vector<256x64xbf16>, vector<128x64xf32> -> vector<128x64xf32>
    %36 = arith.truncf %35 : vector<128x64xf32> to vector<128x64xbf16>
    %c0_23 = arith.constant 0 : index
    %c192 = arith.constant 192 : index
    %37 = vector.load %arg14[%c0_23, %c192] : memref<128x1600xbf16, #tpu.memory_space<vmem>>, vector<128x64xbf16>
    tpu.vector_store %arg14[%c0_23, %c192], %36 {strides = array<i32>} : memref<128x1600xbf16, #tpu.memory_space<vmem>>, vector<128x64xbf16>,
    %c512 = arith.constant 512 : index
    %c0_24 = arith.constant 0 : index
    %38 = vector.load %arg2[%c512, %c0_24] : memref<3200x256xbf16, #tpu.memory_space<vmem>>, vector<128x256xbf16>
    %cst_25 = arith.constant dense<0.000000e+00> : vector<128x64xf32>
    %39 = tpu.matmul %38, %21, %cst_25 {dimension_numbers = #tpu.dot_dimension_numbers<[1], [0], [0], [1], [0, 0, 1, 1], [], []>} : vector<128x256xbf16>, vector<256x64xbf16>, vector<128x64xf32> -> vector<128x64xf32>
    %40 = arith.truncf %39 : vector<128x64xf32> to vector<128x64xbf16>
    %c0_26 = arith.constant 0 : index
    %c256_27 = arith.constant 256 : index
    %41 = vector.load %arg14[%c0_26, %c256_27] : memref<128x1600xbf16, #tpu.memory_space<vmem>>, vector<128x64xbf16>
    tpu.vector_store %arg14[%c0_26, %c256_27], %40 {strides = array<i32>} : memref<128x1600xbf16, #tpu.memory_space<vmem>>, vector<128x64xbf16>,
    %c640 = arith.constant 640 : index
    %c0_28 = arith.constant 0 : index
    %42 = vector.load %arg2[%c640, %c0_28] : memref<3200x256xbf16, #tpu.memory_space<vmem>>, vector<128x256xbf16>
    %cst_29 = arith.constant dense<0.000000e+00> : vector<128x64xf32>
    %43 = tpu.matmul %42, %21, %cst_29 {dimension_numbers = #tpu.dot_dimension_numbers<[1], [0], [0], [1], [0, 0, 1, 1], [], []>} : vector<128x256xbf16>, vector<256x64xbf16>, vector<128x64xf32> -> vector<128x64xf32>
    %44 = arith.truncf %43 : vector<128x64xf32> to vector<128x64xbf16>
    %c0_30 = arith.constant 0 : index
    %c320 = arith.constant 320 : index
    %45 = vector.load %arg14[%c0_30, %c320] : memref<128x1600xbf16, #tpu.memory_space<vmem>>, vector<128x64xbf16>
    tpu.vector_store %arg14[%c0_30, %c320], %44 {strides = array<i32>} : memref<128x1600xbf16, #tpu.memory_space<vmem>>, vector<128x64xbf16>,
    %c768 = arith.constant 768 : index
    %c0_31 = arith.constant 0 : index
    %46 = vector.load %arg2[%c768, %c0_31] : memref<3200x256xbf16, #tpu.memory_space<vmem>>, vector<128x256xbf16>
    %cst_32 = arith.constant dense<0.000000e+00> : vector<128x64xf32>
    %47 = tpu.matmul %46, %21, %cst_32 {dimension_numbers = #tpu.dot_dimension_numbers<[1], [0], [0], [1], [0, 0, 1, 1], [], []>} : vector<128x256xbf16>, vector<256x64xbf16>, vector<128x64xf32> -> vector<128x64xf32>
    %48 = arith.truncf %47 : vector<128x64xf32> to vector<128x64xbf16>
    %c0_33 = arith.constant 0 : index
    %c384_34 = arith.constant 384 : index
    %49 = vector.load %arg14[%c0_33, %c384_34] : memref<128x1600xbf16, #tpu.memory_space<vmem>>, vector<128x64xbf16>
    tpu.vector_store %arg14[%c0_33, %c384_34], %48 {strides = array<i32>} : memref<128x1600xbf16, #tpu.memory_space<vmem>>, vector<128x64xbf16>,
    %c896 = arith.constant 896 : index
    %c0_35 = arith.constant 0 : index
    %50 = vector.load %arg2[%c896, %c0_35] : memref<3200x256xbf16, #tpu.memory_space<vmem>>, vector<128x256xbf16>
    %cst_36 = arith.constant dense<0.000000e+00> : vector<128x64xf32>
    %51 = tpu.matmul %50, %21, %cst_36 {dimension_numbers = #tpu.dot_dimension_numbers<[1], [0], [0], [1], [0, 0, 1, 1], [], []>} : vector<128x256xbf16>, vector<256x64xbf16>, vector<128x64xf32> -> vector<128x64xf32>
    %52 = arith.truncf %51 : vector<128x64xf32> to vector<128x64xbf16>
    %c0_37 = arith.constant 0 : index
    %c448 = arith.constant 448 : index
    %53 = vector.load %arg14[%c0_37, %c448] : memref<128x1600xbf16, #tpu.memory_space<vmem>>, vector<128x64xbf16>
    tpu.vector_store %arg14[%c0_37, %c448], %52 {strides = array<i32>} : memref<128x1600xbf16, #tpu.memory_space<vmem>>, vector<128x64xbf16>,
    %c1024 = arith.constant 1024 : index
    %c0_38 = arith.constant 0 : index
    %54 = vector.load %arg2[%c1024, %c0_38] : memref<3200x256xbf16, #tpu.memory_space<vmem>>, vector<128x256xbf16>
    %cst_39 = arith.constant dense<0.000000e+00> : vector<128x64xf32>
    %55 = tpu.matmul %54, %21, %cst_39 {dimension_numbers = #tpu.dot_dimension_numbers<[1], [0], [0], [1], [0, 0, 1, 1], [], []>} : vector<128x256xbf16>, vector<256x64xbf16>, vector<128x64xf32> -> vector<128x64xf32>
    %56 = arith.truncf %55 : vector<128x64xf32> to vector<128x64xbf16>
    %c0_40 = arith.constant 0 : index
    %c512_41 = arith.constant 512 : index
    %57 = vector.load %arg14[%c0_40, %c512_41] : memref<128x1600xbf16, #tpu.memory_space<vmem>>, vector<128x64xbf16>
    tpu.vector_store %arg14[%c0_40, %c512_41], %56 {strides = array<i32>} : memref<128x1600xbf16, #tpu.memory_space<vmem>>, vector<128x64xbf16>,
    %c1152 = arith.constant 1152 : index
    %c0_42 = arith.constant 0 : index
    %58 = vector.load %arg2[%c1152, %c0_42] : memref<3200x256xbf16, #tpu.memory_space<vmem>>, vector<128x256xbf16>
    %cst_43 = arith.constant dense<0.000000e+00> : vector<128x64xf32>
    %59 = tpu.matmul %58, %21, %cst_43 {dimension_numbers = #tpu.dot_dimension_numbers<[1], [0], [0], [1], [0, 0, 1, 1], [], []>} : vector<128x256xbf16>, vector<256x64xbf16>, vector<128x64xf32> -> vector<128x64xf32>
    %60 = arith.truncf %59 : vector<128x64xf32> to vector<128x64xbf16>
    %c0_44 = arith.constant 0 : index
    %c576 = arith.constant 576 : index
    %61 = vector.load %arg14[%c0_44, %c576] : memref<128x1600xbf16, #tpu.memory_space<vmem>>, vector<128x64xbf16>
    tpu.vector_store %arg14[%c0_44, %c576], %60 {strides = array<i32>} : memref<128x1600xbf16, #tpu.memory_space<vmem>>, vector<128x64xbf16>,
    %c1280 = arith.constant 1280 : index
    %c0_45 = arith.constant 0 : index
    %62 = vector.load %arg2[%c1280, %c0_45] : memref<3200x256xbf16, #tpu.memory_space<vmem>>, vector<128x256xbf16>
    %cst_46 = arith.constant dense<0.000000e+00> : vector<128x64xf32>
    %63 = tpu.matmul %62, %21, %cst_46 {dimension_numbers = #tpu.dot_dimension_numbers<[1], [0], [0], [1], [0, 0, 1, 1], [], []>} : vector<128x256xbf16>, vector<256x64xbf16>, vector<128x64xf32> -> vector<128x64xf32>
    %64 = arith.truncf %63 : vector<128x64xf32> to vector<128x64xbf16>
    %c0_47 = arith.constant 0 : index
    %c640_48 = arith.constant 640 : index
    %65 = vector.load %arg14[%c0_47, %c640_48] : memref<128x1600xbf16, #tpu.memory_space<vmem>>, vector<128x64xbf16>
    tpu.vector_store %arg14[%c0_47, %c640_48], %64 {strides = array<i32>} : memref<128x1600xbf16, #tpu.memory_space<vmem>>, vector<128x64xbf16>,
    %c1408 = arith.constant 1408 : index
    %c0_49 = arith.constant 0 : index
    %66 = vector.load %arg2[%c1408, %c0_49] : memref<3200x256xbf16, #tpu.memory_space<vmem>>, vector<128x256xbf16>
    %cst_50 = arith.constant dense<0.000000e+00> : vector<128x64xf32>
    %67 = tpu.matmul %66, %21, %cst_50 {dimension_numbers = #tpu.dot_dimension_numbers<[1], [0], [0], [1], [0, 0, 1, 1], [], []>} : vector<128x256xbf16>, vector<256x64xbf16>, vector<128x64xf32> -> vector<128x64xf32>
    %68 = arith.truncf %67 : vector<128x64xf32> to vector<128x64xbf16>
    %c0_51 = arith.constant 0 : index
    %c704 = arith.constant 704 : index
    %69 = vector.load %arg14[%c0_51, %c704] : memref<128x1600xbf16, #tpu.memory_space<vmem>>, vector<128x64xbf16>
    tpu.vector_store %arg14[%c0_51, %c704], %68 {strides = array<i32>} : memref<128x1600xbf16, #tpu.memory_space<vmem>>, vector<128x64xbf16>,
    %c1536 = arith.constant 1536 : index
    %c0_52 = arith.constant 0 : index
    %70 = vector.load %arg2[%c1536, %c0_52] : memref<3200x256xbf16, #tpu.memory_space<vmem>>, vector<128x256xbf16>
    %cst_53 = arith.constant dense<0.000000e+00> : vector<128x64xf32>
    %71 = tpu.matmul %70, %21, %cst_53 {dimension_numbers = #tpu.dot_dimension_numbers<[1], [0], [0], [1], [0, 0, 1, 1], [], []>} : vector<128x256xbf16>, vector<256x64xbf16>, vector<128x64xf32> -> vector<128x64xf32>
    %72 = arith.truncf %71 : vector<128x64xf32> to vector<128x64xbf16>
    %c0_54 = arith.constant 0 : index
    %c768_55 = arith.constant 768 : index
    %73 = vector.load %arg14[%c0_54, %c768_55] : memref<128x1600xbf16, #tpu.memory_space<vmem>>, vector<128x64xbf16>
    tpu.vector_store %arg14[%c0_54, %c768_55], %72 {strides = array<i32>} : memref<128x1600xbf16, #tpu.memory_space<vmem>>, vector<128x64xbf16>,
    %c1664 = arith.constant 1664 : index
    %c0_56 = arith.constant 0 : index
    %74 = vector.load %arg2[%c1664, %c0_56] : memref<3200x256xbf16, #tpu.memory_space<vmem>>, vector<128x256xbf16>
    %cst_57 = arith.constant dense<0.000000e+00> : vector<128x64xf32>
    %75 = tpu.matmul %74, %21, %cst_57 {dimension_numbers = #tpu.dot_dimension_numbers<[1], [0], [0], [1], [0, 0, 1, 1], [], []>} : vector<128x256xbf16>, vector<256x64xbf16>, vector<128x64xf32> -> vector<128x64xf32>
    %76 = arith.truncf %75 : vector<128x64xf32> to vector<128x64xbf16>
    %c0_58 = arith.constant 0 : index
    %c832 = arith.constant 832 : index
    %77 = vector.load %arg14[%c0_58, %c832] : memref<128x1600xbf16, #tpu.memory_space<vmem>>, vector<128x64xbf16>
    tpu.vector_store %arg14[%c0_58, %c832], %76 {strides = array<i32>} : memref<128x1600xbf16, #tpu.memory_space<vmem>>, vector<128x64xbf16>,
    %c1792 = arith.constant 1792 : index
    %c0_59 = arith.constant 0 : index
    %78 = vector.load %arg2[%c1792, %c0_59] : memref<3200x256xbf16, #tpu.memory_space<vmem>>, vector<128x256xbf16>
    %cst_60 = arith.constant dense<0.000000e+00> : vector<128x64xf32>
    %79 = tpu.matmul %78, %21, %cst_60 {dimension_numbers = #tpu.dot_dimension_numbers<[1], [0], [0], [1], [0, 0, 1, 1], [], []>} : vector<128x256xbf16>, vector<256x64xbf16>, vector<128x64xf32> -> vector<128x64xf32>
    %80 = arith.truncf %79 : vector<128x64xf32> to vector<128x64xbf16>
    %c0_61 = arith.constant 0 : index
    %c896_62 = arith.constant 896 : index
    %81 = vector.load %arg14[%c0_61, %c896_62] : memref<128x1600xbf16, #tpu.memory_space<vmem>>, vector<128x64xbf16>
    tpu.vector_store %arg14[%c0_61, %c896_62], %80 {strides = array<i32>} : memref<128x1600xbf16, #tpu.memory_space<vmem>>, vector<128x64xbf16>,
    %c1920 = arith.constant 1920 : index
    %c0_63 = arith.constant 0 : index
    %82 = vector.load %arg2[%c1920, %c0_63] : memref<3200x256xbf16, #tpu.memory_space<vmem>>, vector<128x256xbf16>
    %cst_64 = arith.constant dense<0.000000e+00> : vector<128x64xf32>
    %83 = tpu.matmul %82, %21, %cst_64 {dimension_numbers = #tpu.dot_dimension_numbers<[1], [0], [0], [1], [0, 0, 1, 1], [], []>} : vector<128x256xbf16>, vector<256x64xbf16>, vector<128x64xf32> -> vector<128x64xf32>
    %84 = arith.truncf %83 : vector<128x64xf32> to vector<128x64xbf16>
    %c0_65 = arith.constant 0 : index
    %c960 = arith.constant 960 : index
    %85 = vector.load %arg14[%c0_65, %c960] : memref<128x1600xbf16, #tpu.memory_space<vmem>>, vector<128x64xbf16>
    tpu.vector_store %arg14[%c0_65, %c960], %84 {strides = array<i32>} : memref<128x1600xbf16, #tpu.memory_space<vmem>>, vector<128x64xbf16>,
    %c2048 = arith.constant 2048 : index
    %c0_66 = arith.constant 0 : index
    %86 = vector.load %arg2[%c2048, %c0_66] : memref<3200x256xbf16, #tpu.memory_space<vmem>>, vector<128x256xbf16>
    %cst_67 = arith.constant dense<0.000000e+00> : vector<128x64xf32>
    %87 = tpu.matmul %86, %21, %cst_67 {dimension_numbers = #tpu.dot_dimension_numbers<[1], [0], [0], [1], [0, 0, 1, 1], [], []>} : vector<128x256xbf16>, vector<256x64xbf16>, vector<128x64xf32> -> vector<128x64xf32>
    %88 = arith.truncf %87 : vector<128x64xf32> to vector<128x64xbf16>
    %c0_68 = arith.constant 0 : index
    %c1024_69 = arith.constant 1024 : index
    %89 = vector.load %arg14[%c0_68, %c1024_69] : memref<128x1600xbf16, #tpu.memory_space<vmem>>, vector<128x64xbf16>
    tpu.vector_store %arg14[%c0_68, %c1024_69], %88 {strides = array<i32>} : memref<128x1600xbf16, #tpu.memory_space<vmem>>, vector<128x64xbf16>,
    %c2176 = arith.constant 2176 : index
    %c0_70 = arith.constant 0 : index
    %90 = vector.load %arg2[%c2176, %c0_70] : memref<3200x256xbf16, #tpu.memory_space<vmem>>, vector<128x256xbf16>
    %cst_71 = arith.constant dense<0.000000e+00> : vector<128x64xf32>
    %91 = tpu.matmul %90, %21, %cst_71 {dimension_numbers = #tpu.dot_dimension_numbers<[1], [0], [0], [1], [0, 0, 1, 1], [], []>} : vector<128x256xbf16>, vector<256x64xbf16>, vector<128x64xf32> -> vector<128x64xf32>
    %92 = arith.truncf %91 : vector<128x64xf32> to vector<128x64xbf16>
    %c0_72 = arith.constant 0 : index
    %c1088 = arith.constant 1088 : index
    %93 = vector.load %arg14[%c0_72, %c1088] : memref<128x1600xbf16, #tpu.memory_space<vmem>>, vector<128x64xbf16>
    tpu.vector_store %arg14[%c0_72, %c1088], %92 {strides = array<i32>} : memref<128x1600xbf16, #tpu.memory_space<vmem>>, vector<128x64xbf16>,
    %c2304 = arith.constant 2304 : index
    %c0_73 = arith.constant 0 : index
    %94 = vector.load %arg2[%c2304, %c0_73] : memref<3200x256xbf16, #tpu.memory_space<vmem>>, vector<128x256xbf16>
    %cst_74 = arith.constant dense<0.000000e+00> : vector<128x64xf32>
    %95 = tpu.matmul %94, %21, %cst_74 {dimension_numbers = #tpu.dot_dimension_numbers<[1], [0], [0], [1], [0, 0, 1, 1], [], []>} : vector<128x256xbf16>, vector<256x64xbf16>, vector<128x64xf32> -> vector<128x64xf32>
    %96 = arith.truncf %95 : vector<128x64xf32> to vector<128x64xbf16>
    %c0_75 = arith.constant 0 : index
    %c1152_76 = arith.constant 1152 : index
    %97 = vector.load %arg14[%c0_75, %c1152_76] : memref<128x1600xbf16, #tpu.memory_space<vmem>>, vector<128x64xbf16>
    tpu.vector_store %arg14[%c0_75, %c1152_76], %96 {strides = array<i32>} : memref<128x1600xbf16, #tpu.memory_space<vmem>>, vector<128x64xbf16>,
    %c2432 = arith.constant 2432 : index
    %c0_77 = arith.constant 0 : index
    %98 = vector.load %arg2[%c2432, %c0_77] : memref<3200x256xbf16, #tpu.memory_space<vmem>>, vector<128x256xbf16>
    %cst_78 = arith.constant dense<0.000000e+00> : vector<128x64xf32>
    %99 = tpu.matmul %98, %21, %cst_78 {dimension_numbers = #tpu.dot_dimension_numbers<[1], [0], [0], [1], [0, 0, 1, 1], [], []>} : vector<128x256xbf16>, vector<256x64xbf16>, vector<128x64xf32> -> vector<128x64xf32>
    %100 = arith.truncf %99 : vector<128x64xf32> to vector<128x64xbf16>
    %c0_79 = arith.constant 0 : index
    %c1216 = arith.constant 1216 : index
    %101 = vector.load %arg14[%c0_79, %c1216] : memref<128x1600xbf16, #tpu.memory_space<vmem>>, vector<128x64xbf16>
    tpu.vector_store %arg14[%c0_79, %c1216], %100 {strides = array<i32>} : memref<128x1600xbf16, #tpu.memory_space<vmem>>, vector<128x64xbf16>,
    %c2560 = arith.constant 2560 : index
    %c0_80 = arith.constant 0 : index
    %102 = vector.load %arg2[%c2560, %c0_80] : memref<3200x256xbf16, #tpu.memory_space<vmem>>, vector<128x256xbf16>
    %cst_81 = arith.constant dense<0.000000e+00> : vector<128x64xf32>
    %103 = tpu.matmul %102, %21, %cst_81 {dimension_numbers = #tpu.dot_dimension_numbers<[1], [0], [0], [1], [0, 0, 1, 1], [], []>} : vector<128x256xbf16>, vector<256x64xbf16>, vector<128x64xf32> -> vector<128x64xf32>
    %104 = arith.truncf %103 : vector<128x64xf32> to vector<128x64xbf16>
    %c0_82 = arith.constant 0 : index
    %c1280_83 = arith.constant 1280 : index
    %105 = vector.load %arg14[%c0_82, %c1280_83] : memref<128x1600xbf16, #tpu.memory_space<vmem>>, vector<128x64xbf16>
    tpu.vector_store %arg14[%c0_82, %c1280_83], %104 {strides = array<i32>} : memref<128x1600xbf16, #tpu.memory_space<vmem>>, vector<128x64xbf16>,
    %c2688 = arith.constant 2688 : index
    %c0_84 = arith.constant 0 : index
    %106 = vector.load %arg2[%c2688, %c0_84] : memref<3200x256xbf16, #tpu.memory_space<vmem>>, vector<128x256xbf16>
    %cst_85 = arith.constant dense<0.000000e+00> : vector<128x64xf32>
    %107 = tpu.matmul %106, %21, %cst_85 {dimension_numbers = #tpu.dot_dimension_numbers<[1], [0], [0], [1], [0, 0, 1, 1], [], []>} : vector<128x256xbf16>, vector<256x64xbf16>, vector<128x64xf32> -> vector<128x64xf32>
    %108 = arith.truncf %107 : vector<128x64xf32> to vector<128x64xbf16>
    %c0_86 = arith.constant 0 : index
    %c1344 = arith.constant 1344 : index
    %109 = vector.load %arg14[%c0_86, %c1344] : memref<128x1600xbf16, #tpu.memory_space<vmem>>, vector<128x64xbf16>
    tpu.vector_store %arg14[%c0_86, %c1344], %108 {strides = array<i32>} : memref<128x1600xbf16, #tpu.memory_space<vmem>>, vector<128x64xbf16>,
    %c2816 = arith.constant 2816 : index
    %c0_87 = arith.constant 0 : index
    %110 = vector.load %arg2[%c2816, %c0_87] : memref<3200x256xbf16, #tpu.memory_space<vmem>>, vector<128x256xbf16>
    %cst_88 = arith.constant dense<0.000000e+00> : vector<128x64xf32>
    %111 = tpu.matmul %110, %21, %cst_88 {dimension_numbers = #tpu.dot_dimension_numbers<[1], [0], [0], [1], [0, 0, 1, 1], [], []>} : vector<128x256xbf16>, vector<256x64xbf16>, vector<128x64xf32> -> vector<128x64xf32>
    %112 = arith.truncf %111 : vector<128x64xf32> to vector<128x64xbf16>
    %c0_89 = arith.constant 0 : index
    %c1408_90 = arith.constant 1408 : index
    %113 = vector.load %arg14[%c0_89, %c1408_90] : memref<128x1600xbf16, #tpu.memory_space<vmem>>, vector<128x64xbf16>
    tpu.vector_store %arg14[%c0_89, %c1408_90], %112 {strides = array<i32>} : memref<128x1600xbf16, #tpu.memory_space<vmem>>, vector<128x64xbf16>,
    %c2944 = arith.constant 2944 : index
    %c0_91 = arith.constant 0 : index
    %114 = vector.load %arg2[%c2944, %c0_91] : memref<3200x256xbf16, #tpu.memory_space<vmem>>, vector<128x256xbf16>
    %cst_92 = arith.constant dense<0.000000e+00> : vector<128x64xf32>
    %115 = tpu.matmul %114, %21, %cst_92 {dimension_numbers = #tpu.dot_dimension_numbers<[1], [0], [0], [1], [0, 0, 1, 1], [], []>} : vector<128x256xbf16>, vector<256x64xbf16>, vector<128x64xf32> -> vector<128x64xf32>
    %116 = arith.truncf %115 : vector<128x64xf32> to vector<128x64xbf16>
    %c0_93 = arith.constant 0 : index
    %c1472 = arith.constant 1472 : index
    %117 = vector.load %arg14[%c0_93, %c1472] : memref<128x1600xbf16, #tpu.memory_space<vmem>>, vector<128x64xbf16>
    tpu.vector_store %arg14[%c0_93, %c1472], %116 {strides = array<i32>} : memref<128x1600xbf16, #tpu.memory_space<vmem>>, vector<128x64xbf16>,
    %c3072 = arith.constant 3072 : index
    %c0_94 = arith.constant 0 : index
    %118 = vector.load %arg2[%c3072, %c0_94] : memref<3200x256xbf16, #tpu.memory_space<vmem>>, vector<128x256xbf16>
    %cst_95 = arith.constant dense<0.000000e+00> : vector<128x64xf32>
    %119 = tpu.matmul %118, %21, %cst_95 {dimension_numbers = #tpu.dot_dimension_numbers<[1], [0], [0], [1], [0, 0, 1, 1], [], []>} : vector<128x256xbf16>, vector<256x64xbf16>, vector<128x64xf32> -> vector<128x64xf32>
    %120 = arith.truncf %119 : vector<128x64xf32> to vector<128x64xbf16>
    %c0_96 = arith.constant 0 : index
    %c1536_97 = arith.constant 1536 : index
    %121 = vector.load %arg14[%c0_96, %c1536_97] : memref<128x1600xbf16, #tpu.memory_space<vmem>>, vector<128x64xbf16>
    tpu.vector_store %arg14[%c0_96, %c1536_97], %120 {strides = array<i32>} : memref<128x1600xbf16, #tpu.memory_space<vmem>>, vector<128x64xbf16>,
    %c0_98 = arith.constant 0 : index
    %c0_99 = arith.constant 0 : index
    %122 = vector.load %arg14[%c0_98, %c0_99] : memref<128x1600xbf16, #tpu.memory_space<vmem>>, vector<128x1600xbf16>
    %c0_100 = arith.constant 0 : index
    %c0_101 = arith.constant 0 : index
    %123 = vector.load %arg5[%c0_100, %c0_101] : memref<1600x64xbf16, #tpu.memory_space<vmem>>, vector<1600x64xbf16>
    %cst_102 = arith.constant dense<0.000000e+00> : vector<128x64xf32>
    %124 = tpu.matmul %122, %123, %cst_102 {dimension_numbers = #tpu.dot_dimension_numbers<[1], [0], [0], [1], [0, 0, 1, 1], [], []>} : vector<128x1600xbf16>, vector<1600x64xbf16>, vector<128x64xf32> -> vector<128x64xf32>
    %c0_103 = arith.constant 0 : index
    %c0_104 = arith.constant 0 : index
    %125 = vector.load %arg6[%c0_103, %c0_104] : memref<1x64xf32, #tpu.memory_space<vmem>>, vector<1x64xf32>
    %126 = vector.broadcast %125 : vector<1x64xf32> to vector<128x64xf32>
    %127 = arith.addf %124, %126 : vector<128x64xf32>
    %cst_105 = arith.constant 0.000000e+00 : f32
    %128 = vector.broadcast %cst_105 : f32 to vector<128x64xf32>
    %129 = arith.cmpf ogt, %127, %128 : vector<128x64xf32>
    %cst_106 = arith.constant 0.00999999977 : f32
    %130 = vector.broadcast %cst_106 : f32 to vector<128x64xf32>
    %131 = arith.mulf %130, %127 : vector<128x64xf32>
    %132 = arith.select %129, %127, %131 : vector<128x64xi1>, vector<128x64xf32>
    %133 = vector.extract_strided_slice %132 {offsets = [0, 0], sizes = [32, 64], strides = [1, 1]} : vector<128x64xf32> to vector<32x64xf32>
    %134 = vector.extract_strided_slice %132 {offsets = [32, 0], sizes = [32, 64], strides = [1, 1]} : vector<128x64xf32> to vector<32x64xf32>
    %135 = arith.maximumf %133, %134 : vector<32x64xf32>
    %136 = vector.extract_strided_slice %132 {offsets = [64, 0], sizes = [32, 64], strides = [1, 1]} : vector<128x64xf32> to vector<32x64xf32>
    %137 = vector.extract_strided_slice %132 {offsets = [96, 0], sizes = [32, 64], strides = [1, 1]} : vector<128x64xf32> to vector<32x64xf32>
    %138 = arith.maximumf %136, %137 : vector<32x64xf32>
    %139 = arith.maximumf %135, %138 : vector<32x64xf32>
    %140 = vector.extract_strided_slice %139 {offsets = [0, 0], sizes = [1, 64], strides = [1, 1]} : vector<32x64xf32> to vector<1x64xf32>
    %141 = arith.truncf %140 : vector<1x64xf32> to vector<1x64xbf16>
    %c0_107 = arith.constant 0 : index
    %c0_108 = arith.constant 0 : index
    %142 = vector.load %arg15[%c0_107, %c0_108] : memref<1x1600xbf16, #tpu.memory_space<vmem>>, vector<1x64xbf16>
    tpu.vector_store %arg15[%c0_107, %c0_108], %141 {strides = array<i32>} : memref<1x1600xbf16, #tpu.memory_space<vmem>>, vector<1x64xbf16>,
    %143 = vector.extract_strided_slice %139 {offsets = [1, 0], sizes = [1, 64], strides = [1, 1]} : vector<32x64xf32> to vector<1x64xf32>
    %144 = arith.truncf %143 : vector<1x64xf32> to vector<1x64xbf16>
    %c0_109 = arith.constant 0 : index
    %c64_110 = arith.constant 64 : index
    %145 = vector.load %arg15[%c0_109, %c64_110] : memref<1x1600xbf16, #tpu.memory_space<vmem>>, vector<1x64xbf16>
    tpu.vector_store %arg15[%c0_109, %c64_110], %144 {strides = array<i32>} : memref<1x1600xbf16, #tpu.memory_space<vmem>>, vector<1x64xbf16>,
    %146 = vector.extract_strided_slice %139 {offsets = [2, 0], sizes = [1, 64], strides = [1, 1]} : vector<32x64xf32> to vector<1x64xf32>
    %147 = arith.truncf %146 : vector<1x64xf32> to vector<1x64xbf16>
    %c0_111 = arith.constant 0 : index
    %c128_112 = arith.constant 128 : index
    %148 = vector.load %arg15[%c0_111, %c128_112] : memref<1x1600xbf16, #tpu.memory_space<vmem>>, vector<1x64xbf16>
    tpu.vector_store %arg15[%c0_111, %c128_112], %147 {strides = array<i32>} : memref<1x1600xbf16, #tpu.memory_space<vmem>>, vector<1x64xbf16>,
    %149 = vector.extract_strided_slice %139 {offsets = [3, 0], sizes = [1, 64], strides = [1, 1]} : vector<32x64xf32> to vector<1x64xf32>
    %150 = arith.truncf %149 : vector<1x64xf32> to vector<1x64xbf16>
    %c0_113 = arith.constant 0 : index
    %c192_114 = arith.constant 192 : index
    %151 = vector.load %arg15[%c0_113, %c192_114] : memref<1x1600xbf16, #tpu.memory_space<vmem>>, vector<1x64xbf16>
    tpu.vector_store %arg15[%c0_113, %c192_114], %150 {strides = array<i32>} : memref<1x1600xbf16, #tpu.memory_space<vmem>>, vector<1x64xbf16>,
    %152 = vector.extract_strided_slice %139 {offsets = [4, 0], sizes = [1, 64], strides = [1, 1]} : vector<32x64xf32> to vector<1x64xf32>
    %153 = arith.truncf %152 : vector<1x64xf32> to vector<1x64xbf16>
    %c0_115 = arith.constant 0 : index
    %c256_116 = arith.constant 256 : index
    %154 = vector.load %arg15[%c0_115, %c256_116] : memref<1x1600xbf16, #tpu.memory_space<vmem>>, vector<1x64xbf16>
    tpu.vector_store %arg15[%c0_115, %c256_116], %153 {strides = array<i32>} : memref<1x1600xbf16, #tpu.memory_space<vmem>>, vector<1x64xbf16>,
    %155 = vector.extract_strided_slice %139 {offsets = [5, 0], sizes = [1, 64], strides = [1, 1]} : vector<32x64xf32> to vector<1x64xf32>
    %156 = arith.truncf %155 : vector<1x64xf32> to vector<1x64xbf16>
    %c0_117 = arith.constant 0 : index
    %c320_118 = arith.constant 320 : index
    %157 = vector.load %arg15[%c0_117, %c320_118] : memref<1x1600xbf16, #tpu.memory_space<vmem>>, vector<1x64xbf16>
    tpu.vector_store %arg15[%c0_117, %c320_118], %156 {strides = array<i32>} : memref<1x1600xbf16, #tpu.memory_space<vmem>>, vector<1x64xbf16>,
    %158 = vector.extract_strided_slice %139 {offsets = [6, 0], sizes = [1, 64], strides = [1, 1]} : vector<32x64xf32> to vector<1x64xf32>
    %159 = arith.truncf %158 : vector<1x64xf32> to vector<1x64xbf16>
    %c0_119 = arith.constant 0 : index
    %c384_120 = arith.constant 384 : index
    %160 = vector.load %arg15[%c0_119, %c384_120] : memref<1x1600xbf16, #tpu.memory_space<vmem>>, vector<1x64xbf16>
    tpu.vector_store %arg15[%c0_119, %c384_120], %159 {strides = array<i32>} : memref<1x1600xbf16, #tpu.memory_space<vmem>>, vector<1x64xbf16>,
    %161 = vector.extract_strided_slice %139 {offsets = [7, 0], sizes = [1, 64], strides = [1, 1]} : vector<32x64xf32> to vector<1x64xf32>
    %162 = arith.truncf %161 : vector<1x64xf32> to vector<1x64xbf16>
    %c0_121 = arith.constant 0 : index
    %c448_122 = arith.constant 448 : index
    %163 = vector.load %arg15[%c0_121, %c448_122] : memref<1x1600xbf16, #tpu.memory_space<vmem>>, vector<1x64xbf16>
    tpu.vector_store %arg15[%c0_121, %c448_122], %162 {strides = array<i32>} : memref<1x1600xbf16, #tpu.memory_space<vmem>>, vector<1x64xbf16>,
    %164 = vector.extract_strided_slice %139 {offsets = [8, 0], sizes = [1, 64], strides = [1, 1]} : vector<32x64xf32> to vector<1x64xf32>
    %165 = arith.truncf %164 : vector<1x64xf32> to vector<1x64xbf16>
    %c0_123 = arith.constant 0 : index
    %c512_124 = arith.constant 512 : index
    %166 = vector.load %arg15[%c0_123, %c512_124] : memref<1x1600xbf16, #tpu.memory_space<vmem>>, vector<1x64xbf16>
    tpu.vector_store %arg15[%c0_123, %c512_124], %165 {strides = array<i32>} : memref<1x1600xbf16, #tpu.memory_space<vmem>>, vector<1x64xbf16>,
    %167 = vector.extract_strided_slice %139 {offsets = [9, 0], sizes = [1, 64], strides = [1, 1]} : vector<32x64xf32> to vector<1x64xf32>
    %168 = arith.truncf %167 : vector<1x64xf32> to vector<1x64xbf16>
    %c0_125 = arith.constant 0 : index
    %c576_126 = arith.constant 576 : index
    %169 = vector.load %arg15[%c0_125, %c576_126] : memref<1x1600xbf16, #tpu.memory_space<vmem>>, vector<1x64xbf16>
    tpu.vector_store %arg15[%c0_125, %c576_126], %168 {strides = array<i32>} : memref<1x1600xbf16, #tpu.memory_space<vmem>>, vector<1x64xbf16>,
    %170 = vector.extract_strided_slice %139 {offsets = [10, 0], sizes = [1, 64], strides = [1, 1]} : vector<32x64xf32> to vector<1x64xf32>
    %171 = arith.truncf %170 : vector<1x64xf32> to vector<1x64xbf16>
    %c0_127 = arith.constant 0 : index
    %c640_128 = arith.constant 640 : index
    %172 = vector.load %arg15[%c0_127, %c640_128] : memref<1x1600xbf16, #tpu.memory_space<vmem>>, vector<1x64xbf16>
    tpu.vector_store %arg15[%c0_127, %c640_128], %171 {strides = array<i32>} : memref<1x1600xbf16, #tpu.memory_space<vmem>>, vector<1x64xbf16>,
    %173 = vector.extract_strided_slice %139 {offsets = [11, 0], sizes = [1, 64], strides = [1, 1]} : vector<32x64xf32> to vector<1x64xf32>
    %174 = arith.truncf %173 : vector<1x64xf32> to vector<1x64xbf16>
    %c0_129 = arith.constant 0 : index
    %c704_130 = arith.constant 704 : index
    %175 = vector.load %arg15[%c0_129, %c704_130] : memref<1x1600xbf16, #tpu.memory_space<vmem>>, vector<1x64xbf16>
    tpu.vector_store %arg15[%c0_129, %c704_130], %174 {strides = array<i32>} : memref<1x1600xbf16, #tpu.memory_space<vmem>>, vector<1x64xbf16>,
    %176 = vector.extract_strided_slice %139 {offsets = [12, 0], sizes = [1, 64], strides = [1, 1]} : vector<32x64xf32> to vector<1x64xf32>
    %177 = arith.truncf %176 : vector<1x64xf32> to vector<1x64xbf16>
    %c0_131 = arith.constant 0 : index
    %c768_132 = arith.constant 768 : index
    %178 = vector.load %arg15[%c0_131, %c768_132] : memref<1x1600xbf16, #tpu.memory_space<vmem>>, vector<1x64xbf16>
    tpu.vector_store %arg15[%c0_131, %c768_132], %177 {strides = array<i32>} : memref<1x1600xbf16, #tpu.memory_space<vmem>>, vector<1x64xbf16>,
    %179 = vector.extract_strided_slice %139 {offsets = [13, 0], sizes = [1, 64], strides = [1, 1]} : vector<32x64xf32> to vector<1x64xf32>
    %180 = arith.truncf %179 : vector<1x64xf32> to vector<1x64xbf16>
    %c0_133 = arith.constant 0 : index
    %c832_134 = arith.constant 832 : index
    %181 = vector.load %arg15[%c0_133, %c832_134] : memref<1x1600xbf16, #tpu.memory_space<vmem>>, vector<1x64xbf16>
    tpu.vector_store %arg15[%c0_133, %c832_134], %180 {strides = array<i32>} : memref<1x1600xbf16, #tpu.memory_space<vmem>>, vector<1x64xbf16>,
    %182 = vector.extract_strided_slice %139 {offsets = [14, 0], sizes = [1, 64], strides = [1, 1]} : vector<32x64xf32> to vector<1x64xf32>
    %183 = arith.truncf %182 : vector<1x64xf32> to vector<1x64xbf16>
    %c0_135 = arith.constant 0 : index
    %c896_136 = arith.constant 896 : index
    %184 = vector.load %arg15[%c0_135, %c896_136] : memref<1x1600xbf16, #tpu.memory_space<vmem>>, vector<1x64xbf16>
    tpu.vector_store %arg15[%c0_135, %c896_136], %183 {strides = array<i32>} : memref<1x1600xbf16, #tpu.memory_space<vmem>>, vector<1x64xbf16>,
    %185 = vector.extract_strided_slice %139 {offsets = [15, 0], sizes = [1, 64], strides = [1, 1]} : vector<32x64xf32> to vector<1x64xf32>
    %186 = arith.truncf %185 : vector<1x64xf32> to vector<1x64xbf16>
    %c0_137 = arith.constant 0 : index
    %c960_138 = arith.constant 960 : index
    %187 = vector.load %arg15[%c0_137, %c960_138] : memref<1x1600xbf16, #tpu.memory_space<vmem>>, vector<1x64xbf16>
    tpu.vector_store %arg15[%c0_137, %c960_138], %186 {strides = array<i32>} : memref<1x1600xbf16, #tpu.memory_space<vmem>>, vector<1x64xbf16>,
    %188 = vector.extract_strided_slice %139 {offsets = [16, 0], sizes = [1, 64], strides = [1, 1]} : vector<32x64xf32> to vector<1x64xf32>
    %189 = arith.truncf %188 : vector<1x64xf32> to vector<1x64xbf16>
    %c0_139 = arith.constant 0 : index
    %c1024_140 = arith.constant 1024 : index
    %190 = vector.load %arg15[%c0_139, %c1024_140] : memref<1x1600xbf16, #tpu.memory_space<vmem>>, vector<1x64xbf16>
    tpu.vector_store %arg15[%c0_139, %c1024_140], %189 {strides = array<i32>} : memref<1x1600xbf16, #tpu.memory_space<vmem>>, vector<1x64xbf16>,
    %191 = vector.extract_strided_slice %139 {offsets = [17, 0], sizes = [1, 64], strides = [1, 1]} : vector<32x64xf32> to vector<1x64xf32>
    %192 = arith.truncf %191 : vector<1x64xf32> to vector<1x64xbf16>
    %c0_141 = arith.constant 0 : index
    %c1088_142 = arith.constant 1088 : index
    %193 = vector.load %arg15[%c0_141, %c1088_142] : memref<1x1600xbf16, #tpu.memory_space<vmem>>, vector<1x64xbf16>
    tpu.vector_store %arg15[%c0_141, %c1088_142], %192 {strides = array<i32>} : memref<1x1600xbf16, #tpu.memory_space<vmem>>, vector<1x64xbf16>,
    %194 = vector.extract_strided_slice %139 {offsets = [18, 0], sizes = [1, 64], strides = [1, 1]} : vector<32x64xf32> to vector<1x64xf32>
    %195 = arith.truncf %194 : vector<1x64xf32> to vector<1x64xbf16>
    %c0_143 = arith.constant 0 : index
    %c1152_144 = arith.constant 1152 : index
    %196 = vector.load %arg15[%c0_143, %c1152_144] : memref<1x1600xbf16, #tpu.memory_space<vmem>>, vector<1x64xbf16>
    tpu.vector_store %arg15[%c0_143, %c1152_144], %195 {strides = array<i32>} : memref<1x1600xbf16, #tpu.memory_space<vmem>>, vector<1x64xbf16>,
    %197 = vector.extract_strided_slice %139 {offsets = [19, 0], sizes = [1, 64], strides = [1, 1]} : vector<32x64xf32> to vector<1x64xf32>
    %198 = arith.truncf %197 : vector<1x64xf32> to vector<1x64xbf16>
    %c0_145 = arith.constant 0 : index
    %c1216_146 = arith.constant 1216 : index
    %199 = vector.load %arg15[%c0_145, %c1216_146] : memref<1x1600xbf16, #tpu.memory_space<vmem>>, vector<1x64xbf16>
    tpu.vector_store %arg15[%c0_145, %c1216_146], %198 {strides = array<i32>} : memref<1x1600xbf16, #tpu.memory_space<vmem>>, vector<1x64xbf16>,
    %200 = vector.extract_strided_slice %139 {offsets = [20, 0], sizes = [1, 64], strides = [1, 1]} : vector<32x64xf32> to vector<1x64xf32>
    %201 = arith.truncf %200 : vector<1x64xf32> to vector<1x64xbf16>
    %c0_147 = arith.constant 0 : index
    %c1280_148 = arith.constant 1280 : index
    %202 = vector.load %arg15[%c0_147, %c1280_148] : memref<1x1600xbf16, #tpu.memory_space<vmem>>, vector<1x64xbf16>
    tpu.vector_store %arg15[%c0_147, %c1280_148], %201 {strides = array<i32>} : memref<1x1600xbf16, #tpu.memory_space<vmem>>, vector<1x64xbf16>,
    %203 = vector.extract_strided_slice %139 {offsets = [21, 0], sizes = [1, 64], strides = [1, 1]} : vector<32x64xf32> to vector<1x64xf32>
    %204 = arith.truncf %203 : vector<1x64xf32> to vector<1x64xbf16>
    %c0_149 = arith.constant 0 : index
    %c1344_150 = arith.constant 1344 : index
    %205 = vector.load %arg15[%c0_149, %c1344_150] : memref<1x1600xbf16, #tpu.memory_space<vmem>>, vector<1x64xbf16>
    tpu.vector_store %arg15[%c0_149, %c1344_150], %204 {strides = array<i32>} : memref<1x1600xbf16, #tpu.memory_space<vmem>>, vector<1x64xbf16>,
    %206 = vector.extract_strided_slice %139 {offsets = [22, 0], sizes = [1, 64], strides = [1, 1]} : vector<32x64xf32> to vector<1x64xf32>
    %207 = arith.truncf %206 : vector<1x64xf32> to vector<1x64xbf16>
    %c0_151 = arith.constant 0 : index
    %c1408_152 = arith.constant 1408 : index
    %208 = vector.load %arg15[%c0_151, %c1408_152] : memref<1x1600xbf16, #tpu.memory_space<vmem>>, vector<1x64xbf16>
    tpu.vector_store %arg15[%c0_151, %c1408_152], %207 {strides = array<i32>} : memref<1x1600xbf16, #tpu.memory_space<vmem>>, vector<1x64xbf16>,
    %209 = vector.extract_strided_slice %139 {offsets = [23, 0], sizes = [1, 64], strides = [1, 1]} : vector<32x64xf32> to vector<1x64xf32>
    %210 = arith.truncf %209 : vector<1x64xf32> to vector<1x64xbf16>
    %c0_153 = arith.constant 0 : index
    %c1472_154 = arith.constant 1472 : index
    %211 = vector.load %arg15[%c0_153, %c1472_154] : memref<1x1600xbf16, #tpu.memory_space<vmem>>, vector<1x64xbf16>
    tpu.vector_store %arg15[%c0_153, %c1472_154], %210 {strides = array<i32>} : memref<1x1600xbf16, #tpu.memory_space<vmem>>, vector<1x64xbf16>,
    %212 = vector.extract_strided_slice %139 {offsets = [24, 0], sizes = [1, 64], strides = [1, 1]} : vector<32x64xf32> to vector<1x64xf32>
    %213 = arith.truncf %212 : vector<1x64xf32> to vector<1x64xbf16>
    %c0_155 = arith.constant 0 : index
    %c1536_156 = arith.constant 1536 : index
    %214 = vector.load %arg15[%c0_155, %c1536_156] : memref<1x1600xbf16, #tpu.memory_space<vmem>>, vector<1x64xbf16>
    tpu.vector_store %arg15[%c0_155, %c1536_156], %213 {strides = array<i32>} : memref<1x1600xbf16, #tpu.memory_space<vmem>>, vector<1x64xbf16>,
    %c0_157 = arith.constant 0 : index
    %c0_158 = arith.constant 0 : index
    %215 = vector.load %arg15[%c0_157, %c0_158] : memref<1x1600xbf16, #tpu.memory_space<vmem>>, vector<1x1600xbf16>
    %c0_159 = arith.constant 0 : index
    %c0_160 = arith.constant 0 : index
    %216 = vector.load %arg7[%c0_159, %c0_160] : memref<1600x384xbf16, #tpu.memory_space<vmem>>, vector<1600x384xbf16>
    %cst_161 = arith.constant dense<0.000000e+00> : vector<1x384xf32>
    %217 = tpu.matmul %215, %216, %cst_161 {dimension_numbers = #tpu.dot_dimension_numbers<[1], [0], [0], [1], [0, 0, 1, 1], [], []>} : vector<1x1600xbf16>, vector<1600x384xbf16>, vector<1x384xf32> -> vector<1x384xf32>
    %c0_162 = arith.constant 0 : index
    %c0_163 = arith.constant 0 : index
    %218 = vector.load %arg8[%c0_162, %c0_163] : memref<1x384xf32, #tpu.memory_space<vmem>>, vector<1x384xf32>
    %219 = arith.addf %217, %218 : vector<1x384xf32>
    %cst_164 = arith.constant 0.000000e+00 : f32
    %220 = vector.broadcast %cst_164 : f32 to vector<1x384xf32>
    %221 = arith.cmpf ogt, %219, %220 : vector<1x384xf32>
    %cst_165 = arith.constant 0.00999999977 : f32
    %222 = vector.broadcast %cst_165 : f32 to vector<1x384xf32>
    %223 = arith.mulf %222, %219 : vector<1x384xf32>
    %224 = arith.select %221, %219, %223 : vector<1x384xi1>, vector<1x384xf32>
    %225 = arith.truncf %224 : vector<1x384xf32> to vector<1x384xbf16>
    %c0_166 = arith.constant 0 : index
    %c0_167 = arith.constant 0 : index
    %226 = vector.load %arg9[%c0_166, %c0_167] : memref<384x192xbf16, #tpu.memory_space<vmem>>, vector<384x192xbf16>
    %cst_168 = arith.constant dense<0.000000e+00> : vector<1x192xf32>
    %227 = tpu.matmul %225, %226, %cst_168 {dimension_numbers = #tpu.dot_dimension_numbers<[1], [0], [0], [1], [0, 0, 1, 1], [], []>} : vector<1x384xbf16>, vector<384x192xbf16>, vector<1x192xf32> -> vector<1x192xf32>
    %c0_169 = arith.constant 0 : index
    %c0_170 = arith.constant 0 : index
    %228 = vector.load %arg10[%c0_169, %c0_170] : memref<1x192xf32, #tpu.memory_space<vmem>>, vector<1x192xf32>
    %229 = arith.addf %227, %228 : vector<1x192xf32>
    %cst_171 = arith.constant 0.000000e+00 : f32
    %230 = vector.broadcast %cst_171 : f32 to vector<1x192xf32>
    %231 = arith.cmpf ogt, %229, %230 : vector<1x192xf32>
    %cst_172 = arith.constant 0.00999999977 : f32
    %232 = vector.broadcast %cst_172 : f32 to vector<1x192xf32>
    %233 = arith.mulf %232, %229 : vector<1x192xf32>
    %234 = arith.select %231, %229, %233 : vector<1x192xi1>, vector<1x192xf32>
    %235 = arith.truncf %234 : vector<1x192xf32> to vector<1x192xbf16>
    %c0_173 = arith.constant 0 : index
    %c0_174 = arith.constant 0 : index
    %236 = vector.load %arg11[%c0_173, %c0_174] : memref<192x10xbf16, #tpu.memory_space<vmem>>, vector<192x10xbf16>
    %cst_175 = arith.constant dense<0.000000e+00> : vector<1x10xf32>
    %237 = tpu.matmul %235, %236, %cst_175 {dimension_numbers = #tpu.dot_dimension_numbers<[1], [0], [0], [1], [0, 0, 1, 1], [], []>} : vector<1x192xbf16>, vector<192x10xbf16>, vector<1x10xf32> -> vector<1x10xf32>
    %c0_176 = arith.constant 0 : index
    %c0_177 = arith.constant 0 : index
    %238 = vector.load %arg12[%c0_176, %c0_177] : memref<1x10xf32, #tpu.memory_space<vmem>>, vector<1x10xf32>
    %239 = arith.addf %237, %238 : vector<1x10xf32>
    %c0_178 = arith.constant 0 : index
    %c0_179 = arith.constant 0 : index
    %c0_180 = arith.constant 0 : index
    %240 = vector.load %arg13[%c0_178, %c0_179, %c0_180] : memref<1x1x10xf32, #tpu.memory_space<vmem>>, vector<1x1x10xf32>
    %241 = vector.shape_cast %240 : vector<1x1x10xf32> to vector<1x10xf32>
    %242 = vector.shape_cast %239 : vector<1x10xf32> to vector<1x1x10xf32>
    tpu.vector_store %arg13[%c0_178, %c0_179, %c0_180], %242 {strides = array<i32>} : memref<1x1x10xf32, #tpu.memory_space<vmem>>, vector<1x1x10xf32>,
    return
  }
  func.func @transform_0(%arg0: i32) -> (i32, i32, i32) {
    %c0_i32 = arith.constant 0 : i32
    %c0_i32_0 = arith.constant 0 : i32
    %c0_i32_1 = arith.constant 0 : i32
    return %arg0, %c0_i32, %c0_i32_0 : i32, i32, i32
  }
  func.func @transform_1(%arg0: i32) -> (i32, i32) {
    %c0_i32 = arith.constant 0 : i32
    %c0_i32_0 = arith.constant 0 : i32
    %c0_i32_1 = arith.constant 0 : i32
    return %c0_i32, %c0_i32_0 : i32, i32
  }
  func.func @transform_2(%arg0: i32) -> (i32, i32) {
    %c0_i32 = arith.constant 0 : i32
    %c0_i32_0 = arith.constant 0 : i32
    %c0_i32_1 = arith.constant 0 : i32
    return %c0_i32, %c0_i32_0 : i32, i32
  }
  func.func @transform_3(%arg0: i32) -> (i32, i32) {
    %c0_i32 = arith.constant 0 : i32
    %c0_i32_0 = arith.constant 0 : i32
    %c0_i32_1 = arith.constant 0 : i32
    return %c0_i32, %c0_i32_0 : i32, i32
  }
  func.func @transform_4(%arg0: i32) -> (i32, i32) {
    %c0_i32 = arith.constant 0 : i32
    %c0_i32_0 = arith.constant 0 : i32
    %c0_i32_1 = arith.constant 0 : i32
    return %c0_i32, %c0_i32_0 : i32, i32
  }
  func.func @transform_5(%arg0: i32) -> (i32, i32) {
    %c0_i32 = arith.constant 0 : i32
    %c0_i32_0 = arith.constant 0 : i32
    %c0_i32_1 = arith.constant 0 : i32
    return %c0_i32, %c0_i32_0 : i32, i32
  }
  func.func @transform_6(%arg0: i32) -> (i32, i32) {
    %c0_i32 = arith.constant 0 : i32
    %c0_i32_0 = arith.constant 0 : i32
    %c0_i32_1 = arith.constant 0 : i32
    return %c0_i32, %c0_i32_0 : i32, i32
  }
  func.func @transform_7(%arg0: i32) -> (i32, i32) {
    %c0_i32 = arith.constant 0 : i32
    %c0_i32_0 = arith.constant 0 : i32
    %c0_i32_1 = arith.constant 0 : i32
    return %c0_i32, %c0_i32_0 : i32, i32
  }
  func.func @transform_8(%arg0: i32) -> (i32, i32) {
    %c0_i32 = arith.constant 0 : i32
    %c0_i32_0 = arith.constant 0 : i32
    %c0_i32_1 = arith.constant 0 : i32
    return %c0_i32, %c0_i32_0 : i32, i32
  }
  func.func @transform_9(%arg0: i32) -> (i32, i32) {
    %c0_i32 = arith.constant 0 : i32
    %c0_i32_0 = arith.constant 0 : i32
    %c0_i32_1 = arith.constant 0 : i32
    return %c0_i32, %c0_i32_0 : i32, i32
  }
  func.func @transform_10(%arg0: i32) -> (i32, i32) {
    %c0_i32 = arith.constant 0 : i32
    %c0_i32_0 = arith.constant 0 : i32
    %c0_i32_1 = arith.constant 0 : i32
    return %c0_i32, %c0_i32_0 : i32, i32
  }
  func.func @transform_11(%arg0: i32) -> (i32, i32) {
    %c0_i32 = arith.constant 0 : i32
    %c0_i32_0 = arith.constant 0 : i32
    %c0_i32_1 = arith.constant 0 : i32
    return %c0_i32, %c0_i32_0 : i32, i32
  }
  func.func @transform_12(%arg0: i32) -> (i32, i32, i32) {
    %c0_i32 = arith.constant 0 : i32
    %c0_i32_0 = arith.constant 0 : i32
    %c0_i32_1 = arith.constant 0 : i32
    return %arg0, %c0_i32, %c0_i32_0 : i32, i32, i32
  }
}

</mosaic_0001>

<bundles_post_ra>
// kernel: weak_learner_conv_forward.1
= control target key start
LH: loop header
LB: loop body
LE: loop exit
PB: predicated region body
PF: predicated region fallthrough
CT: control target
= control target key end

     0   :  { %s25154_s0 = inlined_call_operand.vmem [shape: bf16[2,800,75], index: 0, kind: input, shape index: {}]   ;;  %s25155_s1 = inlined_call_operand.vmem [shape: bf16[3200,256], index: 1, kind: input, shape index: {}]   ;;  %s25156_s2 = inlined_call_operand.vmem [shape: bf16[75,64], index: 2, kind: input, shape index: {}]   ;;  %s25157_s3 = inlined_call_operand.vmem [shape: f32[1,64], index: 3, kind: input, shape index: {}]   ;;  %s25158_s4 = inlined_call_operand.vmem [shape: bf16[1600,64], index: 4, kind: input, shape index: {}]   ;;  %s25159_s5 = inlined_call_operand.vmem [shape: f32[1,64], index: 5, kind: input, shape index: {}]   ;;  %s25160_s6 = inlined_call_operand.vmem [shape: bf16[1600,384], index: 6, kind: input, shape index: {}]   ;;  %s25161_s7 = inlined_call_operand.vmem [shape: f32[1,384], index: 7, kind: input, shape index: {}]   ;;  %s25162_s8 = inlined_call_operand.vmem [shape: bf16[384,192], index: 8, kind: input, shape index: {}]   ;;  %s25163_s9 = inlined_call_operand.vmem [shape: f32[1,192], index: 9, kind: input, shape index: {}]   ;;  %s25164_s10 = inlined_call_operand.vmem [shape: bf16[192,10], index: 10, kind: input, shape index: {}]   ;;  %s25165_s11 = inlined_call_operand.vmem [shape: f32[1,10], index: 11, kind: input, shape index: {}]   ;;  %s25166_s12 = inlined_call_operand.hbm [shape: f32[2,1,10], index: 12, kind: output, shape index: {}]  }
   0x1   :  { %25208 = sst [smem:[#allocation49_spill]] %s25154_s0 }
   0x2   :  { %17 = vsyncpa [#allocation5], 0 }
   0x3   :  { %19 = vsyncpa [#allocation5 + $0x1], 0  ;;  %s18976_s21 = smov 0   ;;  %s18978_s22 = smov 0  }
   0x4   :  { %s18980_s23 = smov 0   ;;  %s18982_s24 = smov 0  }
   0x5 LB: > { %s18997_s25 = sadd.s32 4294967295, %s18902_s24   ;;  %s14769_s26 = sadd.s32 4294967294, %s18902_s24   ;;  %s18902_s24 = sphi %s18982_s24, %s25342_s24   ;;  %s18898_s23 = sphi %s18980_s23, %s25341_s23   ;;  %s18894_s22 = sphi %s18978_s22, %s25340_s22   ;;  %s18890_s21 = sphi %s18976_s21, %s25339_s21  }
   0x6   : > { %s19001_s27 = sadd.s32 1, %s18902_s24   ;;  %s289_s28 = sadd.s32 1, %s18898_s23 }
   0x7   : > { %s286_s29 = ssub.s32 %s18902_s24, %s19001_s27  ;;  %p299_p0 = scmp.ne.s32.totalorder %s18898_s23, %s18894_s22 }
   0x8   : > { %p287_p1 = scmp.eq.s32.totalorder %s286_s29, 0  ;;  %p300_p2 = scmp.eq.s32.totalorder %s18997_s25, 1 }
   0x9   : > { %p305_p3 = scmp.ne.s32.totalorder %s18894_s22, %s18890_s21  ;;  %p306_p4 = scmp.eq.s32.totalorder %s14769_s26, 1 }
   0xa   : > { %s19012_s30 = scalar_select %p287_p1, %s18898_s23, %s289_s28  }
   0xb   : > { %p19014_p5 = por %p300_p2, %p299_p0  ;;  %p19018_p6 = por %p306_p4, %p305_p3 }
   0xc   : > { %25209 = sst [smem:[#allocation7_spill]] %s19012_s30  ;;  %p14772_p7 = scmp.ge.s32.totalorder %s18902_s24, 1 }
   0xd   : > { %p365_p8 = scmp.lt.s32.totalorder %s18902_s24, 3 }
   0xf   : > { %p366_p9 = pnand %p14772_p7, %p365_p8 }
  0x11   : > { %369 = sbr.rel (%p366_p9) target bundleno = 2810 (0xafa), region = 68 }
  0x16   : > { %v17451_v0 = vld [vmem:[%s25156_s2 + $0x20] sm:$0x3f]   ;;  %vm959_vm0 = vcmask 1044480   ;;  %vm960_vm1 = vcmask 1045504   ;;  %v18904_v1 = vmov 65535   ;;  %v17452_v4 = vld [vmem:[%s25156_s2 + $0x18] sm:$0xff]  }
  0x17   : > { %v961_v2 = vsel %vm959_vm0, 4294967295, %v18904_v1  ;;  %p406_p10 = scmp.lt.s32.totalorder %s18997_s25, 1  ;;  %v17453_v6 = vld [vmem:[%s25156_s2 + $0x10] sm:$0xff]   ;;  %v17454_v7 = vld [vmem:[%s25156_s2 + $0x8] sm:$0xff]   ;;  %s25212_s0 = sld [smem:[#allocation49_spill]]  ;;  %vm808_vm2 = vcmask 613376  }
  0x18   : > { %v962_v3 = vsel %vm960_vm1, %v961_v2, 0  ;;  %v17455_v9 = vld [vmem:[%s25156_s2] sm:$0xff]   ;;  %s25203_s29 = smov 64   ;;  %s404_s19 = sand.u32 1, %s18894_s22  }
  0x19   : > { %v964_v5 = vand.u32 %v17451_v0, %v962_v3  ;;  %s407_s26 = scalar_select %p406_p10, %s18997_s25, 1 }
  0x1a   : > { %s14702_s18 = scalar_lea.sflag [#allocation5], %s404_s19  ;;  %s18910_s30 = smov [#allocation4]  }
  0x1b   : > { %17259 = vmatprep.subr.bf16.mxu0 %v964_v5  ;;  %s17405_s28 = smul.u32 400, %s407_s26  ;;  %s16268_s26 = sshll.u32 %s18997_s25, 4 }
  0x1c   : > { %17260 = vmatpush3.bf16.msra.mxu0 %v964_v5  ;;  %s18846_s20 = sshll.u32 %s18910_s30, 4  ;;  %s18847_s20 = int_to_ptr.vmem [resolvable:$false] %s18846_s20 }
  0x1d   : > { %17261 = vmatprep.subr.bf16.mxu0 %v17452_v4  ;;  %s19041_s17 = scalar_lea.vmem %s25212_s0, %s17405_s28  ;;  %s405_s28 = scalar_lea.vmem [#allocation4], %s404_s19 }
  0x1e   : > { %v17456_v8 = vld [vmem:[%s19041_s17] sm:$0xff]   ;;  %v17457_v10 = vld [vmem:[%s19041_s17 + $0x8] sm:$0xff]   ;;  %v17458_v11 = vld [vmem:[%s19041_s17 + $0x10] sm:$0xff]   ;;  %s14714_s15 = sshll.u32 %s405_s28, 4  ;;  %s25115_s15 = int_to_ptr.vmem [resolvable:$true] %s14714_s15 }
  0x1f   : > { %17269 = vmatprep.mubr.msk.bf16.mxu0 %vm808_vm2, %v17456_v8  ;;  %v17459_v12 = vld [vmem:[%s19041_s17 + $0x18] sm:$0xff]   ;;  %v17460_v13 = vld [vmem:[%s19041_s17 + $0x20] sm:$0xff]   ;;  %v17461_v14 = vld [vmem:[%s19041_s17 + $0x28] sm:$0xff]   ;;  %s18842_s25 = scalar_lea.vmem %s25115_s15, 16  ;;  %p18849_p0 = scmp.lt.s32.totalorder %s25115_s15, %s18847_s20 }
  0x20   : > { %17262 = vmatpush3.bf16.msra.mxu0 %v17452_v4  ;;  %v17462_v15 = vld [vmem:[%s19041_s17 + $0x30] sm:$0xff]   ;;  %v17463_v16 = vld [vmem:[%s19041_s17 + $0x38] sm:$0xff]   ;;  %v17464_v17 = vld [vmem:[%s19041_s17 + $0x40] sm:$0xff]   ;;  %p18843_p11 = scmp.ne.s32.totalorder %s25115_s15, %s18842_s25 }
  0x21   : > { %17263 = vmatprep.subr.bf16.mxu0 %v17453_v6  ;;  %v17465_v18 = vld [vmem:[%s19041_s17 + $0x48] sm:$0xff]   ;;  %v17466_v19 = vld [vmem:[%s19041_s17 + $0x50] sm:$0xff]   ;;  %v17467_v20 = vld [vmem:[%s19041_s17 + $0x58] sm:$0xff]  }
  0x22   : > { %v17468_v21 = vld [vmem:[%s19041_s17 + $0x60] sm:$0xff]   ;;  %v17469_v22 = vld [vmem:[%s19041_s17 + $0x68] sm:$0xff]   ;;  %v17470_v23 = vld [vmem:[%s19041_s17 + $0x70] sm:$0xff]   ;;  %p18844_p12 = pnand %p18843_p11, %p19014_p5 }
  0x23   : > { %v17471_v24 = vld [vmem:[%s19041_s17 + $0x78] sm:$0xff]   ;;  %v17472_v25 = vld [vmem:[%s19041_s17 + $0x80] sm:$0xff]   ;;  %v17473_v26 = vld [vmem:[%s19041_s17 + $0x88] sm:$0xff]  }
  0x24   : > { %17264 = vmatpush3.bf16.msra.mxu0 %v17453_v6  ;;  %v17474_v27 = vld [vmem:[%s19041_s17 + $0x90] sm:$0xff]   ;;  %v17475_v28 = vld [vmem:[%s19041_s17 + $0x98] sm:$0xff]   ;;  %v17476_v29 = vld [vmem:[%s19041_s17 + $0xa0] sm:$0xff]   ;;  %p18845_p13 = pneg %p18844_p12 }
  0x25   : > { %17265 = vmatprep.subr.bf16.mxu0 %v17454_v7  ;;  %v17477_v30 = vld [vmem:[%s19041_s17 + $0xa8] sm:$0xff]   ;;  %v17478_v31 = vld [vmem:[%s19041_s17 + $0xb0] sm:$0xff]   ;;  %v17479_v32 = vld [vmem:[%s19041_s17 + $0xb8] sm:$0xff]  }
  0x26   : > { %v17480_v33 = vld [vmem:[%s19041_s17 + $0xc0] sm:$0xff]   ;;  %v17481_v34 = vld [vmem:[%s19041_s17 + $0xc8] sm:$0xff]   ;;  %v17482_v35 = vld [vmem:[%s19041_s17 + $0xd0] sm:$0xff]  }
  0x27   : > { %v17483_v36 = vld [vmem:[%s19041_s17 + $0xd8] sm:$0xff]   ;;  %v17484_v37 = vld [vmem:[%s19041_s17 + $0xe0] sm:$0xff]   ;;  %v17485_v38 = vld [vmem:[%s19041_s17 + $0xe8] sm:$0xff]  }
  0x28   : > { %17266 = vmatpush3.bf16.msra.mxu0 %v17454_v7  ;;  %v17486_v39 = vld [vmem:[%s19041_s17 + $0xf0] sm:$0xff]   ;;  %v17487_v40 = vld [vmem:[%s19041_s17 + $0xf8] sm:$0xff]   ;;  %v17488_v41 = vld [vmem:[%s19041_s17 + $0x100] sm:$0xff]  }
  0x29   : > { %17267 = vmatprep.subr.bf16.mxu0 %v17455_v9  ;;  %v17489_v42 = vld [vmem:[%s19041_s17 + $0x108] sm:$0xff]   ;;  %v17490_v43 = vld [vmem:[%s19041_s17 + $0x110] sm:$0xff]   ;;  %v17491_v44 = vld [vmem:[%s19041_s17 + $0x118] sm:$0xff]  }
  0x2a   : > { %v17492_v45 = vld [vmem:[%s19041_s17 + $0x120] sm:$0xff]   ;;  %v17493_v46 = vld [vmem:[%s19041_s17 + $0x128] sm:$0xff]   ;;  %v17494_v47 = vld [vmem:[%s19041_s17 + $0x130] sm:$0xff]  }
  0x2b   : > { %v17495_v48 = vld [vmem:[%s19041_s17 + $0x138] sm:$0xff]   ;;  %v17496_v49 = vld [vmem:[%s19041_s17 + $0x140] sm:$0xff]   ;;  %v17497_v50 = vld [vmem:[%s19041_s17 + $0x148] sm:$0xff]  }
  0x2c   : > { %17268 = vmatpush3.bf16.msra.mxu0 %v17455_v9  ;;  %v17498_v51 = vld [vmem:[%s19041_s17 + $0x150] sm:$0xff]   ;;  %v17499_v52 = vld [vmem:[%s19041_s17 + $0x158] sm:$0xff]   ;;  %v17500_v53 = vld [vmem:[%s19041_s17 + $0x160] sm:$0xff]  }
  0x2d   : > { %v17501_v54 = vld [vmem:[%s19041_s17 + $0x168] sm:$0xff]   ;;  %v17502_v55 = vld [vmem:[%s19041_s17 + $0x170] sm:$0xff]   ;;  %v17503_v56 = vld [vmem:[%s19041_s17 + $0x178] sm:$0xff]  }
  0x2e   : > { %v17504_v57 = vld [vmem:[%s19041_s17 + $0x180] sm:$0xff]   ;;  %v17505_v58 = vld [vmem:[%s19041_s17 + $0x188] sm:$0xff]   ;;  %s25333_s17 = smov 64  }
  0x2f   : > { %17270 = vmatmul.mubr.msk.bf16.vlgmr.msra.gmra.mxu0 %vm808_vm2, %v17457_v10 }
  0x30   : > { %17273 = vmatprep.mubr.msk.bf16.mxu0 %vm808_vm2, %v17458_v11 }
  0x37   : > { %17274 = vmatmul.mubr.msk.bf16.gmra.mxu0 %vm808_vm2, %v17459_v12 }
  0x38   : > { %17277 = vmatprep.mubr.msk.bf16.mxu0 %vm808_vm2, %v17460_v13 }
  0x3f   : > { %17278 = vmatmul.mubr.msk.bf16.gmra.mxu0 %vm808_vm2, %v17461_v14 }
  0x40   : > { %17281 = vmatprep.mubr.msk.bf16.mxu0 %vm808_vm2, %v17462_v15 }
  0x47   : > { %17282 = vmatmul.mubr.msk.bf16.gmra.mxu0 %vm808_vm2, %v17463_v16 }
  0x48   : > { %17285 = vmatprep.mubr.msk.bf16.mxu0 %vm808_vm2, %v17464_v17 }
  0x4f   : > { %17286 = vmatmul.mubr.msk.bf16.gmra.mxu0 %vm808_vm2, %v17465_v18  ;;  %v19185_v18 = vld [vmem:[%s25157_s3] ss:$0 sm:$0xff] }
  0x50   : > { %17289 = vmatprep.mubr.msk.bf16.mxu0 %vm808_vm2, %v17466_v19 }
  0x57   : > { %17290 = vmatmul.mubr.msk.bf16.gmra.mxu0 %vm808_vm2, %v17467_v20 }
  0x58   : > { %17293 = vmatprep.mubr.msk.bf16.mxu0 %vm808_vm2, %v17468_v21 }
  0x5f   : > { %17294 = vmatmul.mubr.msk.bf16.gmra.mxu0 %vm808_vm2, %v17469_v22 }
  0x60   : > { %17297 = vmatprep.mubr.msk.bf16.mxu0 %vm808_vm2, %v17470_v23 }
  0x67   : > { %17298 = vmatmul.mubr.msk.bf16.gmra.mxu0 %vm808_vm2, %v17471_v24 }
  0x68   : > { %17301 = vmatprep.mubr.msk.bf16.mxu0 %vm808_vm2, %v17472_v25 }
  0x6f   : > { %17302 = vmatmul.mubr.msk.bf16.gmra.mxu0 %vm808_vm2, %v17473_v26 }
  0x70   : > { %17305 = vmatprep.mubr.msk.bf16.mxu0 %vm808_vm2, %v17474_v27 }
  0x77   : > { %17306 = vmatmul.mubr.msk.bf16.gmra.mxu0 %vm808_vm2, %v17475_v28 }
  0x78   : > { %17309 = vmatprep.mubr.msk.bf16.mxu0 %vm808_vm2, %v17476_v29 }
  0x7f   : > { %17310 = vmatmul.mubr.msk.bf16.gmra.mxu0 %vm808_vm2, %v17477_v30 }
  0x80   : > { %17313 = vmatprep.mubr.msk.bf16.mxu0 %vm808_vm2, %v17478_v31 }
  0x87   : > { %17314 = vmatmul.mubr.msk.bf16.gmra.mxu0 %vm808_vm2, %v17479_v32 }
  0x88   : > { %17317 = vmatprep.mubr.msk.bf16.mxu0 %vm808_vm2, %v17480_v33 }
  0x8f   : > { %17318 = vmatmul.mubr.msk.bf16.gmra.mxu0 %vm808_vm2, %v17481_v34 }
  0x90   : > { %17321 = vmatprep.mubr.msk.bf16.mxu0 %vm808_vm2, %v17482_v35 }
  0x97   : > { %17322 = vmatmul.mubr.msk.bf16.gmra.mxu0 %vm808_vm2, %v17483_v36 }
  0x98   : > { %17325 = vmatprep.mubr.msk.bf16.mxu0 %vm808_vm2, %v17484_v37 }
  0x9f   : > { %17326 = vmatmul.mubr.msk.bf16.gmra.mxu0 %vm808_vm2, %v17485_v38 }
  0xa0   : > { %17329 = vmatprep.mubr.msk.bf16.mxu0 %vm808_vm2, %v17486_v39 }
  0xa7   : > { %17330 = vmatmul.mubr.msk.bf16.gmra.mxu0 %vm808_vm2, %v17487_v40 }
  0xa8   : > { %17333 = vmatprep.mubr.msk.bf16.mxu0 %vm808_vm2, %v17488_v41 }
  0xaf   : > { %17334 = vmatmul.mubr.msk.bf16.gmra.mxu0 %vm808_vm2, %v17489_v42 }
  0xb0   : > { %17337 = vmatprep.mubr.msk.bf16.mxu0 %vm808_vm2, %v17490_v43 }
  0xb7   : > { %17338 = vmatmul.mubr.msk.bf16.gmra.mxu0 %vm808_vm2, %v17491_v44 }
  0xb8   : > { %17341 = vmatprep.mubr.msk.bf16.mxu0 %vm808_vm2, %v17492_v45 }
  0xbf   : > { %17342 = vmatmul.mubr.msk.bf16.gmra.mxu0 %vm808_vm2, %v17493_v46 }
  0xc0   : > { %17345 = vmatprep.mubr.msk.bf16.mxu0 %vm808_vm2, %v17494_v47 }
  0xc7   : > { %17346 = vmatmul.mubr.msk.bf16.gmra.mxu0 %vm808_vm2, %v17495_v48 }
  0xc8   : > { %17349 = vmatprep.mubr.msk.bf16.mxu0 %vm808_vm2, %v17496_v49 }
  0xcf   : > { %17350 = vmatmul.mubr.msk.bf16.gmra.mxu0 %vm808_vm2, %v17497_v50 }
  0xd0   : > { %17353 = vmatprep.mubr.msk.bf16.mxu0 %vm808_vm2, %v17498_v51  ;;  %v25167_v51 = vmov 0  }
  0xd1   : > { %1884 = vmatprep.subr.bf16.mxu1 %v25167_v51  ;;  %2737 = vmatprep.subr.bf16.mxu0 %v25167_v51 }
  0xd7   : > { %17354 = vmatmul.mubr.msk.bf16.gmra.mxu0 %vm808_vm2, %v17499_v52 }
  0xd8   : > { %17357 = vmatprep.mubr.msk.bf16.mxu0 %vm808_vm2, %v17500_v53 }
  0xdf   : > { %17358 = vmatmul.mubr.msk.bf16.gmra.mxu0 %vm808_vm2, %v17501_v54 }
  0xe0   : > { %17361 = vmatprep.mubr.msk.bf16.mxu0 %vm808_vm2, %v17502_v55 }
  0xe7   : > { %17362 = vmatmul.mubr.msk.bf16.gmra.mxu0 %vm808_vm2, %v17503_v56 }
  0xe8   : > { %17365 = vmatprep.mubr.msk.bf16.mxu0 %vm808_vm2, %v17504_v57 }
  0xef   : > { %v17271_v59 = vpop.f32.mrf.mxu0  ;;  %17366 = vmatmul.mubr.msk.bf16.gmra.mxu0 %vm808_vm2, %v17505_v58 }
  0xf0   : > { %v1009_v21 = vadd.f32 %v17271_v59, %v19185_v18 }
  0xf1   : > { %v19146_v60 = vpop.f32.mrf.mxu0 }
  0xf2   : > { %v1501_v24 = vmul.f32 0.01, %v1009_v21  ;;  %vm1401_vm3 = vcmp.gt.f32.partialorder %v1009_v21, 0.0 }
  0xf3   : > { %v17272_v61 = vpop.f32.mrf.mxu0 }
  0xf4   : > { %v1012_v26 = vadd.f32 %v17272_v61, %v19185_v18  ;;  %v19201_v31 = vsel %vm1401_vm3, %v1009_v21, %v1501_v24 }
  0xf5   : > { %v19148_v62 = vpop.f32.mrf.mxu0  ;;  %25213 = vst [vmem:[#allocation8_spill] sm:$0xff] %v19201_v31 }
  0xf6   : > { %v1502_v33 = vmul.f32 0.01, %v1012_v26  ;;  %vm1402_vm5 = vcmp.gt.f32.partialorder %v1012_v26, 0.0 }
  0xf7   : > { %v17275_v63 = vpop.f32.mrf.mxu0 }
  0xf8   : > { %v1025_v29 = vadd.f32 %v17275_v63, %v19185_v18  ;;  %v19209_v41 = vsel %vm1402_vm5, %v1012_v26, %v1502_v33 }
  0xf9   : > { %v19150_v0 = vpop.f32.mrf.mxu0  ;;  %25215 = vst [vmem:[#allocation10_spill] sm:$0xff] %v19209_v41 }
  0xfa   : > { %v1505_v37 = vmul.f32 0.01, %v1025_v29  ;;  %vm1405_vm7 = vcmp.gt.f32.partialorder %v1025_v29, 0.0 }
  0xfb   : > { %v17276_v1 = vpop.f32.mrf.mxu0 }
  0xfc   : > { %v1028_v43 = vadd.f32 %v17276_v1, %v19185_v18  ;;  %v19221_v49 = vsel %vm1405_vm7, %v1025_v29, %v1505_v37 }
  0xfd   : > { %v19152_v2 = vpop.f32.mrf.mxu0  ;;  %25217 = vst [vmem:[#allocation12_spill] sm:$0xff] %v19221_v49 }
  0xfe   : > { %v1506_v54 = vmul.f32 0.01, %v1028_v43  ;;  %vm1406_vm9 = vcmp.gt.f32.partialorder %v1028_v43, 0.0 }
  0xff   : > { %v17279_v3 = vpop.f32.mrf.mxu0 }
 0x100   : > { %v1041_v46 = vadd.f32 %v17279_v3, %v19185_v18  ;;  %v19235_v1 = vsel %vm1406_vm9, %v1028_v43, %v1506_v54 }
 0x101   : > { %v19154_v4 = vpop.f32.mrf.mxu0  ;;  %25219 = vst [vmem:[#allocation14_spill] sm:$0xff] %v19235_v1 }
 0x102   : > { %v1509_v56 = vmul.f32 0.01, %v1041_v46  ;;  %vm1409_vm11 = vcmp.gt.f32.partialorder %v1041_v46, 0.0 }
 0x103   : > { %v19156_v5 = vpop.f32.mrf.mxu0 }
 0x104   : > { %v1044_v61 = vadd.f32 %v19156_v5, %v19185_v18  ;;  %v19245_v26 = vsel %vm1409_vm11, %v1041_v46, %v1509_v56 }
 0x105   : > { %v19158_v6 = vpop.f32.mrf.mxu0  ;;  %25221 = vst [vmem:[#allocation16_spill] sm:$0xff] %v19245_v26 }
 0x106   : > { %v1510_v5 = vmul.f32 0.01, %v1044_v61  ;;  %vm1410_vm13 = vcmp.gt.f32.partialorder %v1044_v61, 0.0 }
 0x107   : > { %v19160_v7 = vpop.f32.mrf.mxu0 }
 0x109   : > { %v19162_v8 = vpop.f32.mrf.mxu0 }
 0x10b   : > { %v19164_v9 = vpop.f32.mrf.mxu0 }
 0x10c   : > { %v1060_v43 = vadd.f32 %v19164_v9, %v19185_v18 }
 0x10d   : > { %v19166_v10 = vpop.f32.mrf.mxu0 }
 0x10e   : > { %vm1414_vm1 = vcmp.gt.f32.partialorder %v1060_v43, 0.0 }
 0x10f   : > { %v19168_v11 = vpop.f32.mrf.mxu0 }
 0x111   : > { %v19170_v12 = vpop.f32.mrf.mxu0 }
 0x113   : > { %v19172_v13 = vpop.f32.mrf.mxu0 }
 0x115   : > { %v19174_v14 = vpop.f32.mrf.mxu0 }
 0x117   : > { %v19176_v15 = vpop.f32.mrf.mxu0 }
 0x119   : > { %v19178_v16 = vpop.f32.mrf.mxu0 }
 0x11b   : > { %v19180_v17 = vpop.f32.mrf.mxu0 }
 0x11d   : > { %v19187_v19 = vpop.f32.mrf.mxu0 }
 0x11f   : > { %v19189_v20 = vpop.f32.mrf.mxu0 }
 0x121   : > { %v19192_v22 = vpop.f32.mrf.mxu0 }
 0x123   : > { %v17296_v23 = vpop.f32.mrf.mxu0 }
 0x124   : > { %v1108_v25 = vadd.f32 %v17296_v23, %v19185_v18  ;;  %v1057_v23 = vadd.f32 %v19160_v7, %v19185_v18 }
 0x125   : > { %v19196_v27 = vpop.f32.mrf.mxu0 }
 0x126   : > { %vm1426_vm4 = vcmp.gt.f32.partialorder %v1108_v25, 0.0  ;;  %v1526_v28 = vmul.f32 0.01, %v1108_v25  ;;  %vm1413_vm15 = vcmp.gt.f32.partialorder %v1057_v23, 0.0 }
 0x127   : > { %v19199_v30 = vpop.f32.mrf.mxu0 }
 0x128   : > { %v19203_v32 = vsel %vm1426_vm4, %v1108_v25, %v1526_v28 }
 0x129   : > { %25214 = vst [vmem:[#allocation9_spill] sm:$0xff] %v19203_v32  ;;  %v1112_v35 = vpop.f32.mrf.mxu0 }
 0x12a   : > { %v1113_v36 = vadd.f32 %v19185_v18, %v1112_v35 }
 0x12b   : > { %v17300_v38 = vpop.f32.mrf.mxu0 }
 0x12c   : > { %vm1427_vm6 = vcmp.gt.f32.partialorder %v1113_v36, 0.0  ;;  %v1527_v39 = vmul.f32 0.01, %v1113_v36  ;;  %v1124_v40 = vadd.f32 %v17300_v38, %v19185_v18 }
 0x12d   : > { %v19211_v42 = vpop.f32.mrf.mxu0 }
 0x12e   : > { %v19214_v44 = vsel %vm1427_vm6, %v1113_v36, %v1527_v39  ;;  %vm1430_vm8 = vcmp.gt.f32.partialorder %v1124_v40, 0.0  ;;  %v1530_v45 = vmul.f32 0.01, %v1124_v40  ;;  %v1513_v36 = vmul.f32 0.01, %v1057_v23 }
 0x12f   : > { %25216 = vst [vmem:[#allocation11_spill] sm:$0xff] %v19214_v44  ;;  %v19219_v48 = vpop.f32.mrf.mxu0  ;;  %v19253_v39 = vsel %vm1410_vm13, %v1044_v61, %v1510_v5 }
 0x130   : > { %v19223_v50 = vsel %vm1430_vm8, %v1124_v40, %v1530_v45  ;;  %25223 = vst [vmem:[#allocation18_spill] sm:$0xff] %v19253_v39  ;;  %v19267_v56 = vsel %vm1413_vm15, %v1057_v23, %v1513_v36  ;;  %v1076_v23 = vadd.f32 %v19172_v13, %v19185_v18 }
 0x131   : > { %25218 = vst [vmem:[#allocation13_spill] sm:$0xff] %v19223_v50  ;;  %v1128_v53 = vpop.f32.mrf.mxu0  ;;  %25225 = vst [vmem:[#allocation20_spill] sm:$0xff] %v19267_v56  ;;  %v19460_v50 = vadd.f32 %v19185_v18, %v19211_v42 }
 0x132   : > { %v1129_v55 = vadd.f32 %v19185_v18, %v1128_v53  ;;  %v1073_v53 = vadd.f32 %v19168_v11, %v19185_v18  ;;  %v1518_v13 = vmul.f32 0.01, %v1076_v23  ;;  %vm1418_vm5 = vcmp.gt.f32.partialorder %v1076_v23, 0.0 }
 0x133   : > { %v17304_v57 = vpop.f32.mrf.mxu0 }
 0x134   : > { %vm1431_vm10 = vcmp.gt.f32.partialorder %v1129_v55, 0.0  ;;  %v1531_v58 = vmul.f32 0.01, %v1129_v55  ;;  %v1140_v59 = vadd.f32 %v17304_v57, %v19185_v18  ;;  %vm1417_vm3 = vcmp.gt.f32.partialorder %v1073_v53, 0.0 }
 0x135   : > { %v19233_v63 = vpop.f32.mrf.mxu0  ;;  %v19297_v29 = vsel %vm1418_vm5, %v1076_v23, %v1518_v13  ;;  %v19336_v23 = vadd.f32 %v19185_v18, %v19148_v62 }
 0x136   : > { %v19237_v3 = vsel %vm1431_vm10, %v1129_v55, %v1531_v58  ;;  %vm1434_vm12 = vcmp.gt.f32.partialorder %v1140_v59, 0.0  ;;  %v1534_v21 = vmul.f32 0.01, %v1140_v59  ;;  %25231 = vst [vmem:[#allocation26_spill] sm:$0xff] %v19297_v29  ;;  %v19409_v29 = vadd.f32 %v19185_v18, %v19178_v16 }
 0x137   : > { %25220 = vst [vmem:[#allocation15_spill] sm:$0xff] %v19237_v3  ;;  %v19243_v25 = vpop.f32.mrf.mxu0  ;;  %v1500_v62 = vmul.f32 0.01, %v19336_v23  ;;  %v19468_v49 = vadd.f32 %v19185_v18, %v19233_v63 }
 0x138   : > { %v19247_v28 = vsel %vm1434_vm12, %v1140_v59, %v1534_v21  ;;  %v1514_v59 = vmul.f32 0.01, %v1060_v43  ;;  %v1517_v21 = vmul.f32 0.01, %v1073_v53  ;;  %vm1400_vm12 = vcmp.gt.f32.partialorder %v19336_v23, 0.0 }
 0x139   : > { %25222 = vst [vmem:[#allocation17_spill] sm:$0xff] %v19247_v28  ;;  %v1144_v33 = vpop.f32.mrf.mxu0  ;;  %vm1419_vm5 = vcmp.gt.f32.partialorder %v19409_v29, 0.0  ;;  %v19472_v3 = vadd.f32 %v19243_v25, %v19185_v18  ;;  %v19497_v31 = vsel %vm1400_vm12, %v19336_v23, %v1500_v62  ;;  %vm1432_vm12 = vcmp.gt.f32.partialorder %v19468_v49, 0.0 }
 0x13a   : > { %v1145_v35 = vadd.f32 %v19185_v18, %v1144_v33  ;;  %v19279_v36 = vsel %vm1414_vm1, %v1060_v43, %v1514_v59 }
 0x13b   : > { %v17308_v37 = vpop.f32.mrf.mxu0  ;;  %25227 = vst [vmem:[#allocation22_spill] sm:$0xff] %v19279_v36  ;;  %v1537_v62 = vmul.f32 0.01, %v19472_v3 }
 0x13c   : > { %vm1435_vm14 = vcmp.gt.f32.partialorder %v1145_v35, 0.0  ;;  %v1535_v7 = vmul.f32 0.01, %v1145_v35  ;;  %v1156_v38 = vadd.f32 %v17308_v37, %v19185_v18 }
 0x13d   : > { %v19255_v40 = vpop.f32.mrf.mxu0 }
 0x13e   : > { %v19259_v45 = vsel %vm1435_vm14, %v1145_v35, %v1535_v7  ;;  %vm1438_vm0 = vcmp.gt.f32.partialorder %v1156_v38, 0.0  ;;  %v1538_v46 = vmul.f32 0.01, %v1156_v38  ;;  %v19480_v42 = vadd.f32 %v19185_v18, %v19255_v40 }
 0x13f   : > { %25224 = vst [vmem:[#allocation19_spill] sm:$0xff] %v19259_v45  ;;  %v19265_v55 = vpop.f32.mrf.mxu0  ;;  %v19447_v45 = vadd.f32 %v19199_v30, %v19185_v18  ;;  %v19464_v30 = vadd.f32 %v19219_v48, %v19185_v18  ;;  %v1528_v40 = vmul.f32 0.01, %v19460_v50 }
 0x140   : > { %v19269_v57 = vsel %vm1438_vm0, %v1156_v38, %v1538_v46  ;;  %v1089_v38 = vadd.f32 %v19176_v15, %v19185_v18  ;;  %v19484_v48 = vadd.f32 %v19265_v55, %v19185_v18  ;;  %v19520_v41 = vmul.f32 0.01, %v19480_v42 }
 0x141   : > { %25226 = vst [vmem:[#allocation21_spill] sm:$0xff] %v19269_v57  ;;  %v1160_v9 = vpop.f32.mrf.mxu0  ;;  %v1529_v32 = vmul.f32 0.01, %v19447_v45  ;;  %v1533_v23 = vmul.f32 0.01, %v19464_v30 }
 0x142   : > { %v1161_v61 = vadd.f32 %v19185_v18, %v1160_v9  ;;  %vm1421_vm7 = vcmp.gt.f32.partialorder %v1089_v38, 0.0 }
 0x143   : > { %v17312_v5 = vpop.f32.mrf.mxu0 }
 0x144   : > { %vm1439_vm2 = vcmp.gt.f32.partialorder %v1161_v61, 0.0  ;;  %v1539_v11 = vmul.f32 0.01, %v1161_v61  ;;  %v1172_v33 = vadd.f32 %v17312_v5, %v19185_v18  ;;  %v19289_v5 = vsel %vm1417_vm3, %v1073_v53, %v1517_v21 }
 0x145   : > { %v19277_v35 = vpop.f32.mrf.mxu0  ;;  %25229 = vst [vmem:[#allocation24_spill] sm:$0xff] %v19289_v5  ;;  %v1092_v21 = vadd.f32 %v19180_v17, %v19185_v18 }
 0x146   : > { %v19281_v37 = vsel %vm1439_vm2, %v1161_v61, %v1539_v11  ;;  %vm1442_vm4 = vcmp.gt.f32.partialorder %v1172_v33, 0.0  ;;  %v1542_v7 = vmul.f32 0.01, %v1172_v33  ;;  %v1521_v11 = vmul.f32 0.01, %v1089_v38 }
 0x147   : > { %25228 = vst [vmem:[#allocation23_spill] sm:$0xff] %v19281_v37  ;;  %v19287_v9 = vpop.f32.mrf.mxu0  ;;  %v1522_v52 = vmul.f32 0.01, %v1092_v21  ;;  %vm1422_vm9 = vcmp.gt.f32.partialorder %v1092_v21, 0.0  ;;  %v19505_v55 = vadd.f32 %v19185_v18, %v19277_v35  ;;  %v19523_v35 = vmul.f32 0.01, %v19484_v48 }
 0x148   : > { %v19291_v51 = vsel %vm1442_vm4, %v1172_v33, %v1542_v7  ;;  %v19309_v54 = vsel %vm1421_vm7, %v1089_v38, %v1521_v11 }
 0x149   : > { %25230 = vst [vmem:[#allocation25_spill] sm:$0xff] %v19291_v51  ;;  %v1176_v59 = vpop.f32.mrf.mxu0  ;;  %25233 = vst [vmem:[#allocation28_spill] sm:$0xff] %v19309_v54 }
 0x14a   : > { %v1177_v61 = vadd.f32 %v19185_v18, %v1176_v59  ;;  %v19320_v59 = vsel %vm1422_vm9, %v1092_v21, %v1522_v52  ;;  %v19345_v21 = vadd.f32 %v19185_v18, %v19150_v0 }
 0x14b   : > { %v17316_v58 = vpop.f32.mrf.mxu0  ;;  %25235 = vst [vmem:[#allocation30_spill] sm:$0xff] %v19320_v59  ;;  %v19387_v59 = vadd.f32 %v19185_v18, %v19166_v10  ;;  %v19405_v10 = vadd.f32 %v19185_v18, %v19174_v14  ;;  %v19423_v14 = vadd.f32 %v19185_v18, %v19192_v22  ;;  %v1519_v22 = vmul.f32 0.01, %v19409_v29 }
 0x14c   : > { %vm1443_vm6 = vcmp.gt.f32.partialorder %v1177_v61, 0.0  ;;  %v1543_v15 = vmul.f32 0.01, %v1177_v61  ;;  %v1188_v46 = vadd.f32 %v17316_v58, %v19185_v18  ;;  %v19365_v0 = vmul.f32 0.01, %v19345_v21 }
 0x14d   : > { %v19299_v53 = vpop.f32.mrf.mxu0  ;;  %vm1403_vm13 = vcmp.gt.f32.partialorder %v19345_v21, 0.0  ;;  %vm1412_vm2 = vcmp.gt.f32.partialorder %v19387_v59, 0.0  ;;  %v19443_v26 = vmul.f32 0.01, %v19423_v14  ;;  %vm1416_vm4 = vcmp.gt.f32.partialorder %v19405_v10, 0.0 }
 0x14e   : > { %v19303_v33 = vsel %vm1443_vm6, %v1177_v61, %v1543_v15  ;;  %vm1446_vm8 = vcmp.gt.f32.partialorder %v1188_v46, 0.0  ;;  %v1546_v7 = vmul.f32 0.01, %v1188_v46 }
 0x14f   : > { %25232 = vst [vmem:[#allocation27_spill] sm:$0xff] %v19303_v33  ;;  %v19307_v43 = vpop.f32.mrf.mxu0  ;;  %v19400_v33 = vadd.f32 %v19185_v18, %v19170_v12  ;;  %v1512_v12 = vmul.f32 0.01, %v19387_v59 }
 0x150   : > { %v19311_v58 = vsel %vm1446_vm8, %v1188_v46, %v1546_v7  ;;  %v19330_v7 = vadd.f32 %v19185_v18, %v19146_v60  ;;  %v19353_v60 = vadd.f32 %v19185_v18, %v19154_v4  ;;  %v19360_v46 = vadd.f32 %v19185_v18, %v19158_v6  ;;  %v17508_v6 = vld [vmem:[%s25155_s1 + $0x4] ss:$8 sps:$4 sm:$0xff]  }
 0x151   : > { %25234 = vst [vmem:[#allocation29_spill] sm:$0xff] %v19311_v58  ;;  %v1192_v13 = vpop.f32.mrf.mxu0  ;;  %1916 = vmatprep.mubr.bf16.mxu1 %v17508_v6  ;;  %v19413_v6 = vadd.f32 %v19185_v18, %v19187_v19  ;;  %v1515_v16 = vmul.f32 0.01, %v19400_v33  ;;  %v19434_v19 = vadd.f32 %v19185_v18, %v19196_v27  ;;  %vm1415_vm3 = vcmp.gt.f32.partialorder %v19400_v33, 0.0 }
 0x152   : > { %v1193_v17 = vadd.f32 %v19185_v18, %v1192_v13  ;;  %v19341_v52 = vmul.f32 0.01, %v19330_v7  ;;  %v19375_v58 = vmul.f32 0.01, %v19353_v60  ;;  %vm1399_vm11 = vcmp.gt.f32.partialorder %v19330_v7, 0.0 }
 0x153   : > { %v19316_v61 = vpop.f32.mrf.mxu0  ;;  %vm1407_vm15 = vcmp.gt.f32.partialorder %v19353_v60, 0.0  ;;  %vm1408_vm0 = vcmp.gt.f32.partialorder %v19360_v46, 0.0  ;;  %v1520_v37 = vmul.f32 0.01, %v19413_v6  ;;  %vm1420_vm6 = vcmp.gt.f32.partialorder %v19413_v6, 0.0 }
 0x154   : > { %vm1447_vm10 = vcmp.gt.f32.partialorder %v1193_v17, 0.0  ;;  %v1547_v15 = vmul.f32 0.01, %v1193_v17  ;;  %v19456_v39 = vmul.f32 0.01, %v19434_v19  ;;  %v19490_v63 = vsel %vm1399_vm11, %v19330_v7, %v19341_v52 }
 0x155   : > { %v19318_v24 = vpop.f32.mrf.mxu0  ;;  %vm1424_vm9 = vcmp.gt.f32.partialorder %v19434_v19, 0.0  ;;  %vm1428_vm8 = vcmp.gt.f32.partialorder %v19460_v50, 0.0  ;;  %v19511_v7 = vsel %vm1403_vm13, %v19345_v21, %v19365_v0  ;;  %v1532_v52 = vmul.f32 0.01, %v19468_v49 }
 0x156   : > { %v19322_v38 = vsel %vm1447_vm10, %v1193_v17, %v1547_v15  ;;  %v19349_v17 = vadd.f32 %v19185_v18, %v19152_v2  ;;  %v19369_v2 = vadd.f32 %v19185_v18, %v19162_v8  ;;  %v17511_v8 = vld [vmem:[%s25155_s1 + $0x184] ss:$8 sps:$4 sm:$0xff]   ;;  %vm1429_vm10 = vcmp.gt.f32.partialorder %v19447_v45, 0.0 }
 0x157   : > { %25236 = vst [vmem:[#allocation31_spill] sm:$0xff] %v19322_v38  ;;  %v19326_v11 = vpop.f32.mrf.mxu0  ;;  %v19383_v38 = vmul.f32 0.01, %v19360_v46  ;;  %2769 = vmatprep.mubr.bf16.mxu0 %v17511_v8  ;;  %v1105_v8 = vadd.f32 %v19189_v20, %v19185_v18  ;;  %v1516_v20 = vmul.f32 0.01, %v19405_v10  ;;  %vm1433_vm11 = vcmp.gt.f32.partialorder %v19464_v30, 0.0 }
 0x158   : > { %v19372_v4 = vmul.f32 0.01, %v19349_v17  ;;  %v19396_v5 = vmul.f32 0.01, %v19369_v2  ;;  %vm1404_vm14 = vcmp.gt.f32.partialorder %v19349_v17, 0.0  ;;  %vm1411_vm1 = vcmp.gt.f32.partialorder %v19369_v2, 0.0 }
 0x159   : > { %v19332_v13 = vpop.f32.mrf.mxu0  ;;  %v1525_v28 = vmul.f32 0.01, %v1105_v8  ;;  %vm1425_vm7 = vcmp.gt.f32.partialorder %v1105_v8, 0.0  ;;  %v19527_v21 = vadd.f32 %v19287_v9, %v19185_v18  ;;  %vm1437_vm13 = vcmp.gt.f32.partialorder %v19472_v3, 0.0 }
 0x15a   : > { %v19533_v0 = vsel %vm1404_vm14, %v19349_v17, %v19372_v4  ;;  %v19551_v9 = vsel %vm1411_vm1, %v19369_v2, %v19396_v5  ;;  %v19558_v4 = vsel %vm1412_vm2, %v19387_v59, %v1512_v12  ;;  %v19573_v5 = vadd.f32 %v19307_v43, %v19185_v18 }
 0x15b   : > { %v19338_v34 = vpop.f32.mrf.mxu0  ;;  %25240 = vst [vmem:[#allocation35_spill] sm:$0xff] %v19558_v4  ;;  %v19577_v59 = vadd.f32 %v19316_v61, %v19185_v18  ;;  %v19595_v43 = vadd.f32 %v19185_v18, %v19332_v13  ;;  %v19605_v61 = vsel %vm1416_vm4, %v19405_v10, %v1516_v20  ;;  %v19610_v12 = vsel %vm1419_vm5, %v19409_v29, %v1519_v22 }
 0x15c   : > { %25241 = vst [vmem:[#allocation36_spill] sm:$0xff] %v19605_v61  ;;  %25242 = vst [vmem:[#allocation37_spill] sm:$0xff] %v19610_v12  ;;  %vm1436_vm14 = vcmp.gt.f32.partialorder %v19480_v42, 0.0  ;;  %v19627_v29 = vadd.f32 %v19338_v34, %v19185_v18  ;;  %vm25244_vm1 = vcmp.gt.f32.partialorder %v19423_v14, 0.0  ;;  %vm1445_vm2 = vcmp.gt.f32.partialorder %v19527_v21, 0.0 }
 0x15d   : > { %v19355_v15 = vpop.f32.mrf.mxu0  ;;  %v19651_v22 = vmul.f32 0.01, %v19595_v43  ;;  %vm1449_vm4 = vcmp.gt.f32.partialorder %v19573_v5, 0.0  ;;  %vm1450_vm5 = vcmp.gt.f32.partialorder %v19577_v59, 0.0 }
 0x15f   : > { %v19362_v47 = vpop.f32.mrf.mxu0 }
 0x161   : > { %v19377_v54 = vpop.f32.mrf.mxu0 }
 0x163   : > { %v19392_v51 = vpop.f32.mrf.mxu0 }
 0x165   : > { %v19415_v57 = vpop.f32.mrf.mxu0 }
 0x167   : > { %v19425_v56 = vpop.f32.mrf.mxu0 }
 0x169   : > { %v19439_v36 = vpop.f32.mrf.mxu0 }
 0x16b   : > { %v19449_v27 = vpop.f32.mrf.mxu0 }
 0x16d   : > { %v19474_v1 = vpop.f32.mrf.mxu0 }
 0x16f   : > { %v19492_v25 = vpop.f32.mrf.mxu0 }
 0x170   : > { %25237 = vst [vmem:[#allocation32_spill] sm:$0xff] %v19492_v25  ;;  %v19545_v25 = vsel %vm1408_vm0, %v19360_v46, %v19383_v38  ;;  %v19566_v38 = vadd.f32 %v19185_v18, %v19299_v53  ;;  %v19569_v46 = vsel %vm1425_vm7, %v1105_v8, %v1525_v28  ;;  %v19587_v53 = vmul.f32 0.01, %v19527_v21 }
 0x171   : > { %v19516_v44 = vpop.f32.mrf.mxu0  ;;  %25239 = vst [vmem:[#allocation34_spill] sm:$0xff] %v19545_v25  ;;  %v19591_v28 = vadd.f32 %v19326_v11, %v19185_v18  ;;  %v19615_v11 = vsel %vm1420_vm6, %v19413_v6, %v1520_v37  ;;  %vm1440_vm0 = vcmp.gt.f32.partialorder %v19505_v55, 0.0  ;;  %v19633_v37 = vsel %vm25244_vm1, %v19423_v14, %v19443_v26 }
 0x172   : > { %25238 = vst [vmem:[#allocation33_spill] sm:$0xff] %v19516_v44  ;;  %v19539_v44 = vsel %vm1407_vm15, %v19353_v60, %v19375_v58  ;;  %v19562_v58 = vmul.f32 0.01, %v19505_v55  ;;  %v19581_v60 = vadd.f32 %v19185_v18, %v19318_v24  ;;  %v19600_v24 = vsel %vm1415_vm3, %v19400_v33, %v1515_v16  ;;  %25243 = vst [vmem:[#allocation38_spill] sm:$0xff] %v19615_v11 }
 0x173   : > { %v19553_v17 = vpop.f32.mrf.mxu0  ;;  %vm1441_vm15 = vcmp.gt.f32.partialorder %v19484_v48, 0.0  ;;  %v1544_v10 = vmul.f32 0.01, %v19566_v38  ;;  %25245 = vst [vmem:[#allocation39_spill] sm:$0xff] %v19633_v37  ;;  %v19636_v6 = vmul.f32 0.01, %v19573_v5  ;;  %v19655_v26 = vadd.f32 %v19185_v18, %v19355_v15 }
 0x174   : > { %v19639_v8 = vmul.f32 0.01, %v19577_v59  ;;  %v19642_v16 = vmul.f32 0.01, %v19581_v60  ;;  %v19648_v34 = vmul.f32 0.01, %v19591_v28  ;;  %v19661_v14 = vsel %vm1424_vm9, %v19434_v19, %v19456_v39 }
 0x175   : > { %v19583_v2 = vpop.f32.mrf.mxu0  ;;  %v19666_v33 = vsel %vm1429_vm10, %v19447_v45, %v1529_v32  ;;  %v19671_v37 = vsel %vm1428_vm8, %v19460_v50, %v1528_v40  ;;  %v19676_v18 = vsel %vm1433_vm11, %v19464_v30, %v1533_v23  ;;  %v19683_v39 = vsel %vm1432_vm12, %v19468_v49, %v1532_v52  ;;  %v19692_v50 = vld [vmem:[%s25157_s3] ss:$0 sm:$0xff] }
 0x176   : > { %25246 = vst [vmem:[#allocation40_spill] sm:$0xff] %v19676_v18  ;;  %vm1444_vm3 = vcmp.gt.f32.partialorder %v19566_v38, 0.0  ;;  %v19687_v32 = vmul.f32 0.01, %v19627_v29  ;;  %v19696_v45 = vadd.f32 %v19692_v50, %v19362_v47  ;;  %v19701_v19 = vsel %vm1437_vm13, %v19472_v3, %v1537_v62 }
 0x177   : > { %v19618_v13 = vpop.f32.mrf.mxu0  ;;  %25247 = vst [vmem:[#allocation41_spill] sm:$0xff] %v19701_v19  ;;  %v19705_v49 = vadd.f32 %v19692_v50, %v19377_v54  ;;  %v19709_v30 = vadd.f32 %v19692_v50, %v19392_v51  ;;  %v19713_v40 = vadd.f32 %v19692_v50, %v19415_v57  ;;  %v19719_v47 = vmul.f32 0.01, %v19655_v26 }
 0x178   : > { %v19723_v3 = vadd.f32 %v19692_v50, %v19425_v56  ;;  %v19727_v54 = vadd.f32 %v19692_v50, %v19439_v36  ;;  %vm1448_vm6 = vcmp.gt.f32.partialorder %v19581_v60, 0.0  ;;  %vm1453_vm7 = vcmp.gt.f32.partialorder %v19591_v28, 0.0 }
 0x179   : > { %v19644_v20 = vpop.f32.mrf.mxu0  ;;  %v19745_v36 = vmul.f32 0.01, %v19696_v45  ;;  %v19749_v57 = vadd.f32 %v19692_v50, %v19449_v27  ;;  %vm1451_vm8 = vcmp.gt.f32.partialorder %v19595_v43, 0.0  ;;  %v19755_v56 = vmul.f32 0.01, %v19705_v49 }
 0x17a   : > { %v19758_v52 = vmul.f32 0.01, %v19709_v30  ;;  %v19761_v51 = vmul.f32 0.01, %v19713_v40  ;;  %v19769_v27 = vsel %vm1436_vm14, %v19480_v42, %v19520_v41  ;;  %vm1454_vm9 = vcmp.gt.f32.partialorder %v19627_v29, 0.0 }
 0x17b   : > { %v19678_v15 = vpop.f32.mrf.mxu0  ;;  %vm1452_vm10 = vcmp.gt.f32.partialorder %v19655_v26, 0.0  ;;  %vm1457_vm11 = vcmp.gt.f32.partialorder %v19696_v45, 0.0  ;;  %v19775_v62 = vmul.f32 0.01, %v19723_v3  ;;  %v19778_v19 = vmul.f32 0.01, %v19727_v54 }
 0x17c   : > { %v19784_v4 = vsel %vm1441_vm15, %v19484_v48, %v19523_v35  ;;  %v19790_v41 = vsel %vm1440_vm0, %v19505_v55, %v19562_v58  ;;  %v19796_v42 = vsel %vm1445_vm2, %v19527_v21, %v19587_v53  ;;  %vm1455_vm12 = vcmp.gt.f32.partialorder %v19705_v49, 0.0  ;;  %v25255_v58 = vld [vmem:[#allocation32_spill] sm:$0xff]  ;;  %v25256_v53 = vld [vmem:[#allocation33_spill] sm:$0xff] }
 0x17d   : > { %v19715_v23 = vpop.f32.mrf.mxu0  ;;  %25251 = vst [vmem:[#allocation45_spill] sm:$0xff] %v19784_v4  ;;  %25252 = vst [vmem:[#allocation46_spill] sm:$0xff] %v19796_v42  ;;  %vm1458_vm13 = vcmp.gt.f32.partialorder %v19709_v30, 0.0  ;;  %v19806_v48 = vmul.f32 0.01, %v19749_v57  ;;  %v19810_v55 = vadd.f32 %v19692_v50, %v19474_v1  ;;  %v19825_v25 = vadd.f32 %v19692_v50, %v19553_v17 }
 0x17e   : > { %25248 = vst [vmem:[#allocation42_spill] sm:$0xff] %v19715_v23  ;;  %v1649_v1 = vsel %vm1449_vm4, %v19573_v5, %v19636_v6  ;;  %vm1456_vm15 = vcmp.gt.f32.partialorder %v19713_v40, 0.0  ;;  %vm1461_vm0 = vcmp.gt.f32.partialorder %v19723_v3, 0.0  ;;  %vm1459_vm4 = vcmp.gt.f32.partialorder %v19727_v54, 0.0 }
 0x17f   : > { %v19737_v23 = vpop.f32.mrf.mxu0  ;;  %25254 = vst [vmem:[#allocation48_spill] sm:$0xff] %v19806_v48  ;;  %v19858_v42 = vmul.f32 0.01, %v19825_v25 }
 0x180   : > { %25249 = vst [vmem:[#allocation43_spill] sm:$0xff] %v19737_v23 }
 0x181   : > { %v19763_v23 = vpop.f32.mrf.mxu0 }
 0x182   : > { %25250 = vst [vmem:[#allocation44_spill] sm:$0xff] %v19763_v23  ;;  %v19801_v23 = vsel %vm1444_vm3, %v19566_v38, %v1544_v10  ;;  %v19817_v38 = vadd.f32 %v19692_v50, %v25255_v58  ;;  %v19821_v10 = vadd.f32 %v19692_v50, %v25256_v53 }
 0x183   : > { %25253 = vst [vmem:[#allocation47_spill] sm:$0xff] %v19801_v23  ;;  %v17344_v18 = vpop.f32.mrf.mxu0  ;;  %v19872_v23 = vsel %vm1448_vm6, %v19581_v60, %v19642_v16  ;;  %v19890_v16 = vsel %vm1454_vm9, %v19627_v29, %v19687_v32  ;;  %v19907_v29 = vsel %vm1455_vm12, %v19705_v49, %v19755_v56  ;;  %v19919_v32 = vsel %vm1456_vm15, %v19713_v40, %v19761_v51 }
 0x184   : > { %v1300_v35 = vadd.f32 %v19692_v50, %v17344_v18  ;;  %v19833_v18 = vadd.f32 %v19692_v50, %v19583_v2  ;;  %v19847_v2 = vmul.f32 0.01, %v19810_v55  ;;  %v19852_v53 = vmul.f32 0.01, %v19817_v38 }
 0x185   : > { %v19827_v48 = vpop.f32.mrf.mxu0  ;;  %v19855_v17 = vmul.f32 0.01, %v19821_v10  ;;  %vm1463_vm12 = vcmp.gt.f32.partialorder %v19821_v10, 0.0 }
 0x186   : > { %vm1474_vm14 = vcmp.gt.f32.partialorder %v1300_v35, 0.0  ;;  %v1574_v58 = vmul.f32 0.01, %v1300_v35  ;;  %v19861_v11 = vmul.f32 0.01, %v19833_v18 }
 0x187   : > { %v17347_v4 = vpop.f32.mrf.mxu0 }
 0x188   : > { %v1674_v61 = vsel %vm1474_vm14, %v1300_v35, %v1574_v58  ;;  %v1313_v21 = vadd.f32 %v19692_v50, %v17347_v4  ;;  %v1650_v58 = vsel %vm1450_vm5, %v19577_v59, %v19639_v8  ;;  %v1651_v59 = vsel %vm1451_vm8, %v19595_v43, %v19651_v22 }
 0x189   : > { %v1724_v5 = vmax.f32 %v1649_v1, %v1674_v61  ;;  %v1304_v6 = vpop.f32.mrf.mxu0  ;;  %v1653_v61 = vsel %vm1453_vm7, %v19591_v28, %v19648_v34  ;;  %v25257_v1 = vmax.f32 %v19490_v63, %v19661_v14  ;;  %v1652_v63 = vsel %vm1452_vm10, %v19655_v26, %v19719_v47 }
 0x18a   : > { %vm1477_vm1 = vcmp.gt.f32.partialorder %v1313_v21, 0.0  ;;  %v1577_v35 = vmul.f32 0.01, %v1313_v21  ;;  %v1305_v4 = vadd.f32 %v19692_v50, %v1304_v6  ;;  %v19900_v28 = vsel %vm1457_vm11, %v19696_v45, %v19745_v36 }
 0x18b   : > { %v1749_v6 = vmax.f32 %v25257_v1, %v1724_v5  ;;  %v17348_v12 = vpop.f32.mrf.mxu0  ;;  %v19913_v26 = vsel %vm1458_vm13, %v19709_v30, %v19758_v52  ;;  %v25258_v52 = vmax.f32 %v19497_v31, %v19569_v46  ;;  %v19933_v1 = vadd.f32 %v19692_v50, %v19644_v20 }
 0x18c   : > { %vm1475_vm2 = vcmp.gt.f32.partialorder %v1305_v4, 0.0  ;;  %v1575_v8 = vmul.f32 0.01, %v1305_v4  ;;  %v1316_v60 = vadd.f32 %v19692_v50, %v17348_v12  ;;  %v1677_v43 = vsel %vm1477_vm1, %v1313_v21, %v1577_v35 }
 0x18d   : > { %v1307_v34 = vpop.f32.mrf.mxu0  ;;  %v19925_v21 = vadd.f32 %v19692_v50, %v19618_v13  ;;  %v1727_v30 = vmax.f32 %v1652_v63, %v1677_v43  ;;  %v25259_v13 = vmax.f32 %v19511_v7, %v19671_v37  ;;  %v19944_v46 = vsel %vm1461_vm0, %v19723_v3, %v19775_v62  ;;  %v25260_v7 = vld [vmem:[#allocation10_spill] sm:$0xff]  ;;  %v25261_v37 = vld [vmem:[#allocation11_spill] sm:$0xff] }
 0x18e   : > { %v1675_v12 = vsel %vm1475_vm2, %v1305_v4, %v1575_v8  ;;  %vm1478_vm3 = vcmp.gt.f32.partialorder %v1316_v60, 0.0  ;;  %v1578_v22 = vmul.f32 0.01, %v1316_v60  ;;  %v1308_v14 = vadd.f32 %v19692_v50, %v1307_v34  ;;  %v25263_v34 = vld [vmem:[#allocation8_spill] sm:$0xff] }
 0x18f   : > { %v1725_v45 = vmax.f32 %v1650_v58, %v1675_v12  ;;  %v17351_v47 = vpop.f32.mrf.mxu0  ;;  %vm1462_vm7 = vcmp.gt.f32.partialorder %v19749_v57, 0.0  ;;  %vm1460_vm8 = vcmp.gt.f32.partialorder %v19810_v55, 0.0  ;;  %v25264_v12 = vld [vmem:[#allocation9_spill] sm:$0xff]  ;;  %vm1465_vm10 = vcmp.gt.f32.partialorder %v19817_v38, 0.0 }
 0x190   : > { %v1678_v36 = vsel %vm1478_vm3, %v1316_v60, %v1578_v22  ;;  %vm1476_vm5 = vcmp.gt.f32.partialorder %v1308_v14, 0.0  ;;  %v1576_v49 = vmul.f32 0.01, %v1308_v14  ;;  %v1329_v56 = vadd.f32 %v19692_v50, %v17351_v47 }
 0x191   : > { %v1750_v5 = vmax.f32 %v25258_v52, %v1725_v45  ;;  %v1728_v40 = vmax.f32 %v1653_v61, %v1678_v36  ;;  %v1320_v51 = vpop.f32.mrf.mxu0  ;;  %v25265_v22 = vmax.f32 %v25263_v34, %v25264_v12  ;;  %vm1466_vm14 = vcmp.gt.f32.partialorder %v19825_v25, 0.0 }
 0x192   : > { %v1676_v35 = vsel %vm1476_vm5, %v1308_v14, %v1576_v49  ;;  %vm1481_vm6 = vcmp.gt.f32.partialorder %v1329_v56, 0.0  ;;  %v1581_v4 = vmul.f32 0.01, %v1329_v56  ;;  %v1321_v58 = vadd.f32 %v19692_v50, %v1320_v51 }
 0x193   : > { %v19935_v8 = vpack.c.bf16 %v1750_v5, %v1749_v6  ;;  %v1753_v60 = vmax.f32 %v25259_v13, %v1728_v40  ;;  %v1726_v63 = vmax.f32 %v1651_v59, %v1676_v35  ;;  %v17352_v31 = vpop.f32.mrf.mxu0  ;;  %v19950_v6 = vmul.f32 0.01, %v19925_v21 }
 0x194   : > { %vm1479_vm9 = vcmp.gt.f32.partialorder %v1321_v58, 0.0  ;;  %v1579_v20 = vmul.f32 0.01, %v1321_v58  ;;  %v1332_v61 = vadd.f32 %v19692_v50, %v17352_v31  ;;  %v25262_v59 = vmax.f32 %v25260_v7, %v25261_v37 }
 0x195   : > { %v1751_v3 = vmax.f32 %v25265_v22, %v1726_v63  ;;  %v1681_v62 = vsel %vm1481_vm6, %v1329_v56, %v1581_v4  ;;  %v1323_v14 = vpop.f32.mrf.mxu0  ;;  %v19962_v49 = vmul.f32 0.01, %v19933_v1  ;;  %v25266_v4 = vld [vmem:[#allocation42_spill] sm:$0xff]  ;;  %v25267_v13 = vmax.f32 %v19533_v0, %v19666_v33 }
 0x196   : > { %v1752_v43 = vmax.f32 %v25262_v59, %v1727_v30  ;;  %v1679_v45 = vsel %vm1479_vm9, %v1321_v58, %v1579_v20  ;;  %vm1482_vm11 = vcmp.gt.f32.partialorder %v1332_v61, 0.0  ;;  %v1582_v47 = vmul.f32 0.01, %v1332_v61 }
 0x197   : > { %v1324_v36 = vadd.f32 %v19692_v50, %v1323_v14  ;;  %v19966_v30 = vadd.f32 %v19692_v50, %v19678_v15  ;;  %v1729_v5 = vmax.f32 %v19890_v16, %v1679_v45  ;;  %v17355_v56 = vpop.f32.mrf.mxu0  ;;  %v19976_v58 = vadd.f32 %v19692_v50, %v25266_v4 }
 0x198   : > { %v19968_v52 = vpack.c.bf16 %v1752_v43, %v1751_v3  ;;  %v1682_v40 = vsel %vm1482_vm11, %v1332_v61, %v1582_v47  ;;  %v1345_v35 = vadd.f32 %v19692_v50, %v17355_v56  ;;  %v1731_v15 = vmax.f32 %v19919_v32, %v1681_v62  ;;  %v25273_v3 = vld [vmem:[#allocation13_spill] sm:$0xff]  ;;  %v25275_v56 = vld [vmem:[#allocation48_spill] sm:$0xff] }
 0x199   : > { %vm1480_vm13 = vcmp.gt.f32.partialorder %v1324_v36, 0.0  ;;  %v1580_v51 = vmul.f32 0.01, %v1324_v36  ;;  %v1754_v16 = vmax.f32 %v25267_v13, %v1729_v5  ;;  %v1732_v63 = vmax.f32 %v19900_v28, %v1682_v40  ;;  %v1336_v31 = vpop.f32.mrf.mxu0 }
 0x19a   : > { %vm1485_vm15 = vcmp.gt.f32.partialorder %v1345_v35, 0.0  ;;  %v1585_v61 = vmul.f32 0.01, %v1345_v35  ;;  %v1337_v7 = vadd.f32 %v19692_v50, %v1336_v31  ;;  %v1659_v37 = vsel %vm1459_vm4, %v19727_v54, %v19778_v19  ;;  %v25269_v54 = vld [vmem:[#allocation14_spill] sm:$0xff] }
 0x19b   : > { %v1680_v20 = vsel %vm1480_vm13, %v1324_v36, %v1580_v51  ;;  %v19988_v59 = vpack.c.bf16 %v1754_v16, %v1753_v60  ;;  %v25268_v32 = vmax.f32 %v19539_v44, %v19683_v39  ;;  %v17356_v28 = vpop.f32.mrf.mxu0  ;;  %vm1464_vm0 = vcmp.gt.f32.partialorder %v19833_v18, 0.0  ;;  %v25270_v60 = vld [vmem:[#allocation15_spill] sm:$0xff]  ;;  %v25272_v39 = vld [vmem:[#allocation12_spill] sm:$0xff] }
 0x19c   : > { %v1730_v33 = vmax.f32 %v19907_v29, %v1680_v20  ;;  %v19996_v43 = vmul.f32 0.01, %v19966_v30  ;;  %vm1483_vm1 = vcmp.gt.f32.partialorder %v1337_v7, 0.0  ;;  %v1583_v34 = vmul.f32 0.01, %v1337_v7  ;;  %v25276_v20 = vld [vmem:[#allocation34_spill] sm:$0xff] }
 0x19d   : > { %v1757_v0 = vmax.f32 %v25268_v32, %v1732_v63  ;;  %v1348_v12 = vadd.f32 %v19692_v50, %v17356_v28  ;;  %v20000_v19 = vmul.f32 0.01, %v19976_v58  ;;  %v25271_v22 = vmax.f32 %v25269_v54, %v25270_v60  ;;  %v1339_v45 = vpop.f32.mrf.mxu0 }
 0x19e   : > { %v25274_v29 = vmax.f32 %v25272_v39, %v25273_v3  ;;  %v1685_v14 = vsel %vm1485_vm15, %v1345_v35, %v1585_v61  ;;  %v1683_v47 = vsel %vm1483_vm1, %v1337_v7, %v1583_v34  ;;  %v1340_v5 = vadd.f32 %v19692_v50, %v1339_v45  ;;  %v25284_v39 = vld [vmem:[#allocation16_spill] sm:$0xff]  ;;  %v25285_v3 = vld [vmem:[#allocation17_spill] sm:$0xff] }
 0x19f   : > { %v1756_v44 = vmax.f32 %v25271_v22, %v1731_v15  ;;  %vm1486_vm2 = vcmp.gt.f32.partialorder %v1348_v12, 0.0  ;;  %v1586_v36 = vmul.f32 0.01, %v1348_v12  ;;  %v1662_v40 = vsel %vm1462_vm7, %v19749_v57, %v25275_v56  ;;  %v17359_v15 = vpop.f32.mrf.mxu0 }
 0x1a0   : > { %v1755_v62 = vmax.f32 %v25274_v29, %v1730_v33  ;;  %v1660_v51 = vsel %vm1460_vm8, %v19810_v55, %v19847_v2  ;;  %v1733_v35 = vmax.f32 %v19913_v26, %v1683_v47  ;;  %vm1484_vm3 = vcmp.gt.f32.partialorder %v1340_v5, 0.0  ;;  %v25277_v55 = vld [vmem:[#allocation40_spill] sm:$0xff] }
 0x1a1   : > { %v1686_v13 = vsel %vm1486_vm2, %v1348_v12, %v1586_v36  ;;  %v1584_v16 = vmul.f32 0.01, %v1340_v5  ;;  %v1361_v63 = vadd.f32 %v19692_v50, %v17359_v15  ;;  %v1665_v57 = vsel %vm1465_vm10, %v19817_v38, %v19852_v53  ;;  %v1352_v7 = vpop.f32.mrf.mxu0 }
 0x1a2   : > { %v20018_v4 = vpack.c.bf16 %v1756_v44, %v1755_v62  ;;  %vm1469_vm4 = vcmp.gt.f32.partialorder %v19925_v21, 0.0  ;;  %v1735_v31 = vmax.f32 %v1660_v51, %v1685_v14  ;;  %v25278_v2 = vmax.f32 %v25276_v20, %v25277_v55 }
 0x1a3   : > { %v1736_v26 = vmax.f32 %v19944_v46, %v1686_v13  ;;  %v1684_v32 = vsel %vm1484_vm3, %v1340_v5, %v1584_v16  ;;  %vm1489_vm5 = vcmp.gt.f32.partialorder %v1361_v63, 0.0  ;;  %v1589_v33 = vmul.f32 0.01, %v1361_v63  ;;  %v17360_v60 = vpop.f32.mrf.mxu0  ;;  %v25287_v5 = vld [vmem:[#allocation44_spill] sm:$0xff] }
 0x1a4   : > { %v1758_v61 = vmax.f32 %v25278_v2, %v1733_v35  ;;  %v1353_v28 = vadd.f32 %v19692_v50, %v1352_v7  ;;  %v1663_v38 = vsel %vm1463_vm12, %v19821_v10, %v19855_v17  ;;  %v25279_v34 = vmax.f32 %v19551_v9, %v19769_v27  ;;  %v25281_v27 = vld [vmem:[#allocation18_spill] sm:$0xff] }
 0x1a5   : > { %v1734_v54 = vmax.f32 %v1659_v37, %v1684_v32  ;;  %v20045_v46 = vsel %vm1466_vm14, %v19825_v25, %v19858_v42  ;;  %vm1467_vm6 = vcmp.gt.f32.partialorder %v19933_v1, 0.0  ;;  %vm1468_vm7 = vcmp.gt.f32.partialorder %v19976_v58, 0.0  ;;  %v25282_v37 = vld [vmem:[#allocation19_spill] sm:$0xff]  ;;  %v1355_v62 = vpop.f32.mrf.mxu0 }
 0x1a6   : > { %v20036_v53 = vpack.c.bf16 %v1758_v61, %v1757_v0  ;;  %v1761_v12 = vmax.f32 %v25279_v34, %v1736_v26  ;;  %vm1487_vm8 = vcmp.gt.f32.partialorder %v1353_v28, 0.0  ;;  %v1587_v10 = vmul.f32 0.01, %v1353_v28  ;;  %v25280_v0 = vld [vmem:[#allocation43_spill] sm:$0xff] }
 0x1a7   : > { %v1364_v17 = vadd.f32 %v19692_v50, %v17360_v60  ;;  %v20052_v9 = vadd.f32 %v19692_v50, %v25280_v0  ;;  %v25283_v22 = vmax.f32 %v25281_v27, %v25282_v37  ;;  %v25286_v25 = vmax.f32 %v25284_v39, %v25285_v3  ;;  %v17363_v15 = vpop.f32.mrf.mxu0  ;;  %v25292_v27 = vld [vmem:[#allocation22_spill] sm:$0xff]  ;;  %v25293_v37 = vld [vmem:[#allocation23_spill] sm:$0xff] }
 0x1a8   : > { %v1689_v29 = vsel %vm1489_vm5, %v1361_v63, %v1589_v33  ;;  %v1687_v14 = vsel %vm1487_vm8, %v1353_v28, %v1587_v10  ;;  %v1356_v47 = vadd.f32 %v19692_v50, %v1355_v62  ;;  %v1664_v36 = vsel %vm1464_vm0, %v19833_v18, %v19861_v11  ;;  %v25288_v11 = vld [vmem:[#allocation35_spill] sm:$0xff]  ;;  %v25289_v18 = vld [vmem:[#allocation41_spill] sm:$0xff] }
 0x1a9   : > { %v1760_v44 = vmax.f32 %v25283_v22, %v1735_v31  ;;  %v1759_v42 = vmax.f32 %v25286_v25, %v1734_v54  ;;  %vm1490_vm9 = vcmp.gt.f32.partialorder %v1364_v17, 0.0  ;;  %v1590_v45 = vmul.f32 0.01, %v1364_v17  ;;  %v1368_v26 = vpop.f32.mrf.mxu0  ;;  %v25296_v22 = vld [vmem:[#allocation21_spill] sm:$0xff] }
 0x1aa   : > { %v20068_v56 = vadd.f32 %v19692_v50, %v25287_v5  ;;  %v1737_v35 = vmax.f32 %v1662_v40, %v1687_v14  ;;  %vm1488_vm10 = vcmp.gt.f32.partialorder %v1356_v47, 0.0  ;;  %v1588_v16 = vmul.f32 0.01, %v1356_v47 }
 0x1ab   : > { %v20070_v51 = vpack.c.bf16 %v1760_v44, %v1759_v42  ;;  %v1690_v13 = vsel %vm1490_vm9, %v1364_v17, %v1590_v45  ;;  %v1377_v63 = vadd.f32 %v19692_v50, %v17363_v15  ;;  %vm1470_vm11 = vcmp.gt.f32.partialorder %v19966_v30, 0.0  ;;  %v17364_v10 = vpop.f32.mrf.mxu0 }
 0x1ac   : > { %v20075_v31 = vmul.f32 0.01, %v20052_v9  ;;  %v1739_v20 = vmax.f32 %v1664_v36, %v1689_v29  ;;  %v25290_v55 = vmax.f32 %v25288_v11, %v25289_v18  ;;  %v1740_v61 = vmax.f32 %v1665_v57, %v1690_v13 }
 0x1ad   : > { %v1688_v7 = vsel %vm1488_vm10, %v1356_v47, %v1588_v16  ;;  %vm1493_vm12 = vcmp.gt.f32.partialorder %v1377_v63, 0.0  ;;  %v1593_v40 = vmul.f32 0.01, %v1377_v63  ;;  %v1369_v32 = vadd.f32 %v19692_v50, %v1368_v26 }
 0x1ae   : > { %v1762_v2 = vmax.f32 %v25290_v55, %v1737_v35  ;;  %v20082_v33 = vmul.f32 0.01, %v20068_v56  ;;  %v25291_v34 = vmax.f32 %v19600_v24, %v19790_v41  ;;  %v1738_v60 = vmax.f32 %v1663_v38, %v1688_v7  ;;  %v25295_v38 = vld [vmem:[#allocation20_spill] sm:$0xff]  ;;  %v25302_v55 = vld [vmem:[#allocation37_spill] sm:$0xff] }
 0x1af   : > { %v1669_v57 = vsel %vm1469_vm4, %v19925_v21, %v19950_v6  ;;  %vm1473_vm13 = vcmp.gt.f32.partialorder %v20052_v9, 0.0  ;;  %vm1491_vm14 = vcmp.gt.f32.partialorder %v1369_v32, 0.0  ;;  %v1591_v17 = vmul.f32 0.01, %v1369_v32  ;;  %v1371_v21 = vpop.f32.mrf.mxu0 }
 0x1b0   : > { %v20084_v28 = vpack.c.bf16 %v1762_v2, %v1761_v12  ;;  %v1765_v54 = vmax.f32 %v25291_v34, %v1740_v61  ;;  %v1380_v0 = vadd.f32 %v19692_v50, %v17364_v10  ;;  %v1292_v12 = vadd.f32 %v19692_v50, %v19827_v48  ;;  %v25303_v2 = vld [vmem:[#allocation47_spill] sm:$0xff]  ;;  %v25305_v10 = vld [vmem:[#allocation26_spill] sm:$0xff] }
 0x1b1   : > { %v25294_v24 = vmax.f32 %v25292_v27, %v25293_v37  ;;  %v25297_v44 = vmax.f32 %v25295_v38, %v25296_v22  ;;  %v1693_v3 = vsel %vm1493_vm12, %v1377_v63, %v1593_v40  ;;  %v1691_v6 = vsel %vm1491_vm14, %v1369_v32, %v1591_v17  ;;  %v17367_v45 = vpop.f32.mrf.mxu0  ;;  %v25309_v27 = vld [vmem:[#allocation25_spill] sm:$0xff] }
 0x1b2   : > { %vm1494_vm15 = vcmp.gt.f32.partialorder %v1380_v0, 0.0  ;;  %v1594_v25 = vmul.f32 0.01, %v1380_v0  ;;  %v1372_v42 = vadd.f32 %v19692_v50, %v1371_v21  ;;  %v1667_v48 = vsel %vm1467_vm6, %v19933_v1, %v19962_v49  ;;  %v25298_v1 = vld [vmem:[#allocation36_spill] sm:$0xff]  ;;  %v25299_v49 = vld [vmem:[#allocation45_spill] sm:$0xff] }
 0x1b3   : > { %v1764_v41 = vmax.f32 %v25294_v24, %v1739_v20  ;;  %v1763_v39 = vmax.f32 %v25297_v44, %v1738_v60  ;;  %v1668_v29 = vsel %vm1468_vm7, %v19976_v58, %v20000_v19  ;;  %vm1471_vm0 = vcmp.gt.f32.partialorder %v20068_v56, 0.0  ;;  %v1384_v58 = vpop.f32.mrf.mxu0  ;;  %v25311_v44 = vld [vmem:[#allocation39_spill] sm:$0xff] }
 0x1b4   : > { %v1741_v14 = vmax.f32 %v20045_v46, %v1691_v6  ;;  %v1694_v47 = vsel %vm1494_vm15, %v1380_v0, %v1594_v25  ;;  %vm1492_vm1 = vcmp.gt.f32.partialorder %v1372_v42, 0.0  ;;  %v1592_v36 = vmul.f32 0.01, %v1372_v42  ;;  %v25308_v0 = vld [vmem:[#allocation24_spill] sm:$0xff] }
 0x1b5   : > { %v20114_v62 = vpack.c.bf16 %v1764_v41, %v1763_v39  ;;  %v1393_v5 = vadd.f32 %v19692_v50, %v17367_v45  ;;  %vm1472_vm2 = vcmp.gt.f32.partialorder %v1292_v12, 0.0  ;;  %v1743_v35 = vmax.f32 %v1668_v29, %v1693_v3  ;;  %v17368_v40 = vpop.f32.mrf.mxu0  ;;  %v25312_v29 = vld [vmem:[#allocation38_spill] sm:$0xff] }
 0x1b6   : > { %v25300_v15 = vmax.f32 %v25298_v1, %v25299_v49  ;;  %v1744_v16 = vmax.f32 %v1669_v57, %v1694_v47  ;;  %v1692_v19 = vsel %vm1492_vm1, %v1372_v42, %v1592_v36  ;;  %v1385_v63 = vadd.f32 %v19692_v50, %v1384_v58  ;;  %v25306_v57 = vld [vmem:[#allocation27_spill] sm:$0xff] }
 0x1b7   : > { %1885 = vmatpush1.bf16.msra.mxu1 %v20114_v62  ;;  %2738 = vmatpush1.bf16.msra.mxu0 %v20114_v62  ;;  %vm1497_vm3 = vcmp.gt.f32.partialorder %v1393_v5, 0.0  ;;  %v1597_v46 = vmul.f32 0.01, %v1393_v5  ;;  %v25301_v20 = vmov 0   ;;  %v1572_v11 = vmul.f32 0.01, %v1292_v12  ;;  %v1387_v38 = vpop.f32.mrf.mxu0 }
 0x1b8   : > { %v1766_v13 = vmax.f32 %v25300_v15, %v1741_v14  ;;  %1886 = vmatprep.subr.bf16.mxu1 %v25301_v20  ;;  %2739 = vmatprep.subr.bf16.mxu0 %v25301_v20  ;;  %v25304_v61 = vmax.f32 %v25302_v55, %v25303_v2  ;;  %v1742_v7 = vmax.f32 %v1667_v48, %v1692_v19  ;;  %vm1495_vm4 = vcmp.gt.f32.partialorder %v1385_v63, 0.0  ;;  %v25313_v14 = vld [vmem:[#allocation46_spill] sm:$0xff]  ;;  %v25316_v1 = vld [vmem:[#allocation31_spill] sm:$0xff] }
 0x1b9   : > { %v1670_v32 = vsel %vm1470_vm11, %v19966_v30, %v19996_v43  ;;  %v1595_v34 = vmul.f32 0.01, %v1385_v63  ;;  %v1396_v60 = vadd.f32 %v19692_v50, %v17368_v40  ;;  %v25307_v17 = vmax.f32 %v25305_v10, %v25306_v57  ;;  %v17512_v55 = vld [vmem:[%s25155_s1 + $0x14] ss:$8 sps:$4 sm:$0xff]   ;;  %v17520_v40 = vld [vmem:[%s25155_s1 + $0x1a4] ss:$8 sps:$4 sm:$0xff]  }
 0x1ba   : > { %v20126_v18 = vpack.c.bf16 %v1766_v13, %v1765_v54  ;;  %v1769_v26 = vmax.f32 %v25304_v61, %v1744_v16  ;;  %v25310_v37 = vmax.f32 %v25308_v0, %v25309_v27  ;;  %v1697_v41 = vsel %vm1497_vm3, %v1393_v5, %v1597_v46  ;;  %v25318_v13 = vld [vmem:[#allocation28_spill] sm:$0xff]  ;;  %v25319_v16 = vld [vmem:[#allocation29_spill] sm:$0xff]  ;;  %v17532_v27 = vld [vmem:[%s25155_s1 + $0x1c0] ss:$8 sps:$4 sm:$0xff]  }
 0x1bb   : > { %v1768_v54 = vmax.f32 %v25307_v17, %v1743_v35  ;;  %1887 = vmatpush1.bf16.msra.mxu1 %v20084_v28  ;;  %2740 = vmatpush1.bf16.msra.mxu0 %v20084_v28  ;;  %v1695_v30 = vsel %vm1495_vm4, %v1385_v63, %v1595_v34  ;;  %vm1498_vm5 = vcmp.gt.f32.partialorder %v1396_v60, 0.0  ;;  %v1598_v43 = vmul.f32 0.01, %v1396_v60  ;;  %v25315_v35 = vld [vmem:[#allocation30_spill] sm:$0xff]  ;;  %v17516_v61 = vld [vmem:[%s25155_s1 + $0x10] ss:$8 sps:$4 sm:$0xff]  }
 0x1bc   : > { %v1767_v24 = vmax.f32 %v25310_v37, %v1742_v7  ;;  %v1388_v22 = vadd.f32 %v19692_v50, %v1387_v38  ;;  %1888 = vmatprep.subr.bf16.mxu1 %v25301_v20  ;;  %2741 = vmatprep.subr.bf16.mxu0 %v25301_v20  ;;  %v1723_v39 = vmax.f32 %v25311_v44, %v19872_v23  ;;  %v17506_v63 = vld [vmem:[%s25155_s1] ss:$8 sps:$4 sm:$0xff]   ;;  %v17514_v2 = vld [vmem:[%s25155_s1 + $0x194] ss:$8 sps:$4 sm:$0xff]   ;;  %v17518_v7 = vld [vmem:[%s25155_s1 + $0x24] ss:$8 sps:$4 sm:$0xff]  }
 0x1bd   : > { %v1673_v3 = vsel %vm1473_vm13, %v20052_v9, %v20075_v31  ;;  %v1745_v6 = vmax.f32 %v1670_v32, %v1695_v30  ;;  %v1672_v25 = vsel %vm1472_vm2, %v1292_v12, %v1572_v11  ;;  %v1698_v42 = vsel %vm1498_vm5, %v1396_v60, %v1598_v43  ;;  %v17509_v11 = vld [vmem:[%s25155_s1 + $0x180] ss:$8 sps:$4 sm:$0xff]   ;;  %v17524_v60 = vld [vmem:[%s25155_s1 + $0x34] ss:$8 sps:$4 sm:$0xff]   ;;  %v17526_v57 = vld [vmem:[%s25155_s1 + $0x1b0] ss:$8 sps:$4 sm:$0xff]  }
 0x1be   : > { %v20154_v21 = vpack.c.bf16 %v1768_v54, %v1767_v24  ;;  %vm1496_vm6 = vcmp.gt.f32.partialorder %v1388_v22, 0.0  ;;  %v1596_v50 = vmul.f32 0.01, %v1388_v22  ;;  %v1747_v48 = vmax.f32 %v1672_v25, %v1697_v41  ;;  %v17522_v32 = vld [vmem:[%s25155_s1 + $0x20] ss:$8 sps:$4 sm:$0xff]  }
 0x1bf   : > { %v25314_v45 = vmax.f32 %v25312_v29, %v25313_v14  ;;  %v1748_v36 = vmax.f32 %v1673_v3, %v1698_v42  ;;  %1889 = vmatpush1.bf16.msra.mxu1 %v20070_v51  ;;  %2742 = vmatpush1.bf16.msra.mxu0 %v20070_v51  ;;  %v1671_v23 = vsel %vm1471_vm0, %v20068_v56, %v20082_v33  ;;  %v25205_v33 = vmov 0.0   ;;  %v17523_v34 = vld [vmem:[%s25155_s1 + $0x1a0] ss:$8 sps:$4 sm:$0xff]   ;;  %v17528_v10 = vld [vmem:[%s25155_s1 + $0x1b4] ss:$8 sps:$4 sm:$0xff]  }
 0x1c0   : > { %v1696_v9 = vsel %vm1496_vm6, %v1388_v22, %v1596_v50  ;;  %1890 = vmatprep.subr.bf16.mxu1 %v25301_v20  ;;  %2743 = vmatprep.subr.bf16.mxu0 %v25301_v20  ;;  %v25317_v49 = vmax.f32 %v25315_v35, %v25316_v1  ;;  %v25320_v58 = vmax.f32 %v25318_v13, %v25319_v16  ;;  %v17529_v17 = vld [vmem:[%s25155_s1 + $0x30] ss:$8 sps:$4 sm:$0xff]   ;;  %v17530_v54 = vld [vmem:[%s25155_s1 + $0x44] ss:$8 sps:$4 sm:$0xff]   ;;  %v17535_v37 = vld [vmem:[%s25155_s1 + $0x40] ss:$8 sps:$4 sm:$0xff]  }
 0x1c1   : > { %v1770_v47 = vmax.f32 %v25314_v45, %v1745_v6  ;;  %v1773_v12 = vmax.f32 %v1723_v39, %v1748_v36  ;;  %v1746_v5 = vmax.f32 %v1671_v23, %v1696_v9  ;;  %v17534_v0 = vld [vmem:[%s25155_s1 + $0x1c4] ss:$8 sps:$4 sm:$0xff]   ;;  %v17536_v24 = vld [vmem:[%s25155_s1 + $0x54] ss:$8 sps:$4 sm:$0xff]   ;;  %v17538_v38 = vld [vmem:[%s25155_s1 + $0x1d0] ss:$8 sps:$4 sm:$0xff]  }
 0x1c2   : > { %v1772_v15 = vmax.f32 %v25317_v49, %v1747_v48  ;;  %v17540_v41 = vld [vmem:[%s25155_s1 + $0x1d4] ss:$8 sps:$4 sm:$0xff]   ;;  %v17541_v30 = vld [vmem:[%s25155_s1 + $0x50] ss:$8 sps:$4 sm:$0xff]   ;;  %v17542_v43 = vld [vmem:[%s25155_s1 + $0x64] ss:$8 sps:$4 sm:$0xff]  }
 0x1c3   : > { %v20168_v31 = vpack.c.bf16 %v1770_v47, %v1769_v26  ;;  %v1771_v19 = vmax.f32 %v25320_v58, %v1746_v5  ;;  %1891 = vmatpush1.bf16.msra.mxu1 %v20036_v53  ;;  %2744 = vmatpush1.bf16.msra.mxu0 %v20036_v53  ;;  %v20199_v46 = vpack.c.bf16 %v25205_v33, %v1773_v12  ;;  %v17517_v26 = vld [vmem:[%s25155_s1 + $0x190] ss:$8 sps:$4 sm:$0xff]   ;;  %v17546_v22 = vld [vmem:[%s25155_s1 + $0x1e4] ss:$8 sps:$4 sm:$0xff]   ;;  %v17544_v44 = vld [vmem:[%s25155_s1 + $0x1e0] ss:$8 sps:$4 sm:$0xff]  }
 0x1c4   : > { %1892 = vmatprep.subr.bf16.mxu1 %v25301_v20  ;;  %2745 = vmatprep.subr.bf16.mxu0 %v25301_v20  ;;  %v17547_v39 = vld [vmem:[%s25155_s1 + $0x60] ss:$8 sps:$4 sm:$0xff]   ;;  %v17548_v3 = vld [vmem:[%s25155_s1 + $0x74] ss:$8 sps:$4 sm:$0xff]   ;;  %v17550_v25 = vld [vmem:[%s25155_s1 + $0x1f0] ss:$8 sps:$4 sm:$0xff]  }
 0x1c5   : > { %v20180_v56 = vpack.c.bf16 %v1772_v15, %v1771_v19  ;;  %v17552_v6 = vld [vmem:[%s25155_s1 + $0x1f4] ss:$8 sps:$4 sm:$0xff]   ;;  %v17553_v42 = vld [vmem:[%s25155_s1 + $0x70] ss:$8 sps:$4 sm:$0xff]   ;;  %v17556_v50 = vld [vmem:[%s25155_s1 + $0x84] ss:$8 sps:$4 sm:$0xff]  }
 0x1c6   : > { %v17559_v48 = vld [vmem:[%s25155_s1 + $0x284] ss:$8 sps:$4 sm:$0xff]   ;;  %v17554_v29 = vld [vmem:[%s25155_s1 + $0x80] ss:$8 sps:$4 sm:$0xff]   ;;  %v17560_v45 = vld [vmem:[%s25155_s1 + $0x94] ss:$8 sps:$4 sm:$0xff]  }
 0x1c7   : > { %1893 = vmatpush1.bf16.msra.mxu1 %v20018_v4  ;;  %2746 = vmatpush1.bf16.msra.mxu0 %v20018_v4  ;;  %v17557_v14 = vld [vmem:[%s25155_s1 + $0x280] ss:$8 sps:$4 sm:$0xff]   ;;  %v17564_v47 = vld [vmem:[%s25155_s1 + $0x294] ss:$8 sps:$4 sm:$0xff]   ;;  %v17562_v36 = vld [vmem:[%s25155_s1 + $0x290] ss:$8 sps:$4 sm:$0xff]  }
 0x1c8   : > { %1894 = vmatprep.subr.bf16.mxu1 %v25301_v20  ;;  %2747 = vmatprep.subr.bf16.mxu0 %v25301_v20  ;;  %v17565_v23 = vld [vmem:[%s25155_s1 + $0x90] ss:$8 sps:$4 sm:$0xff]   ;;  %v17566_v9 = vld [vmem:[%s25155_s1 + $0xa4] ss:$8 sps:$4 sm:$0xff]   ;;  %v17568_v5 = vld [vmem:[%s25155_s1 + $0x2a0] ss:$8 sps:$4 sm:$0xff]  }
 0x1c9   : > { %v17570_v12 = vld [vmem:[%s25155_s1 + $0x2a4] ss:$8 sps:$4 sm:$0xff]   ;;  %v17571_v35 = vld [vmem:[%s25155_s1 + $0xa0] ss:$8 sps:$4 sm:$0xff]   ;;  %v17572_v1 = vld [vmem:[%s25155_s1 + $0xb4] ss:$8 sps:$4 sm:$0xff]  }
 0x1ca   : > { %v17576_v49 = vld [vmem:[%s25155_s1 + $0x2b4] ss:$8 sps:$4 sm:$0xff]   ;;  %v17574_v15 = vld [vmem:[%s25155_s1 + $0x2b0] ss:$8 sps:$4 sm:$0xff]   ;;  %v17578_v16 = vld [vmem:[%s25155_s1 + $0xc4] ss:$8 sps:$4 sm:$0xff]  }
 0x1cb   : > { %1895 = vmatpush1.bf16.msra.mxu1 %v19988_v59  ;;  %2748 = vmatpush1.bf16.msra.mxu0 %v19988_v59  ;;  %v17577_v13 = vld [vmem:[%s25155_s1 + $0xb0] ss:$8 sps:$4 sm:$0xff]   ;;  %v17582_v58 = vld [vmem:[%s25155_s1 + $0x2c4] ss:$8 sps:$4 sm:$0xff]   ;;  %v17580_v19 = vld [vmem:[%s25155_s1 + $0x2c0] ss:$8 sps:$4 sm:$0xff]  }
 0x1cc   : > { %1896 = vmatprep.subr.bf16.mxu1 %v25301_v20  ;;  %2749 = vmatprep.subr.bf16.mxu0 %v25301_v20  ;;  %vm2045_vm7 = vcmask 519168   ;;  %vm2351_vm8 = vcmask 1043968   ;;  %vm10438_vm9 = vcmask 523264   ;;  %vm11203_vm2 = vcmask 516096  }
 0x1cd   : > { %vm11204_vm6 = vsmask.f32 256 }
 0x1cf   : > { %1897 = vmatpush1.bf16.msra.mxu1 %v19968_v52  ;;  %2750 = vmatpush1.bf16.msra.mxu0 %v19968_v52 }
 0x1d0   : > { %1898 = vmatprep.subr.bf16.mxu1 %v25301_v20  ;;  %2751 = vmatprep.subr.bf16.mxu0 %v25301_v20 }
 0x1d3   : > { %1899 = vmatpush1.bf16.msra.mxu1 %v19935_v8  ;;  %2752 = vmatpush1.bf16.msra.mxu0 %v19935_v8 }
 0x1d4   : > { %1906 = vmatprep.subr.bf16.mxu1 %v25301_v20  ;;  %2759 = vmatprep.subr.bf16.mxu0 %v25301_v20 }
 0x1d7   : > { %1907 = vmatpush2.bf16.msra.mxu1 %v20199_v46  ;;  %2760 = vmatpush2.bf16.msra.mxu0 %v20199_v46 }
 0x1d8   : > { %1908 = vmatprep.subr.bf16.mxu1 %v25301_v20  ;;  %2761 = vmatprep.subr.bf16.mxu0 %v25301_v20 }
 0x1db   : > { %1909 = vmatpush2.bf16.msra.mxu1 %v20180_v56  ;;  %2762 = vmatpush2.bf16.msra.mxu0 %v20180_v56 }
 0x1dc   : > { %1910 = vmatprep.subr.bf16.mxu1 %v25301_v20  ;;  %2763 = vmatprep.subr.bf16.mxu0 %v25301_v20 }
 0x1df   : > { %1911 = vmatpush2.bf16.msra.mxu1 %v20168_v31  ;;  %2764 = vmatpush2.bf16.msra.mxu0 %v20168_v31 }
 0x1e0   : > { %1912 = vmatprep.subr.bf16.mxu1 %v25301_v20  ;;  %2765 = vmatprep.subr.bf16.mxu0 %v25301_v20 }
 0x1e3   : > { %1913 = vmatpush2.bf16.msra.mxu1 %v20154_v21  ;;  %2766 = vmatpush2.bf16.msra.mxu0 %v20154_v21 }
 0x1e4   : > { %1914 = vmatprep.subr.bf16.mxu1 %v25301_v20  ;;  %2767 = vmatprep.subr.bf16.mxu0 %v25301_v20 }
 0x1e7   : > { %1915 = vmatpush2.bf16.msra.mxu1 %v20126_v18  ;;  %2768 = vmatpush2.bf16.msra.mxu0 %v20126_v18 }
 0x1e8   : > { %2158 = vmatprep.subr.bf16.mxu1 %v25301_v20  ;;  %3315 = vmatprep.subr.bf16.mxu0 %v25301_v20 }
 0x1ea   : > { %1917 = vmatmul.mubr.bf16.vlgmr.msra.gmra.mxu1 %v17506_v63  ;;  %2770 = vmatmul.mubr.bf16.vlgmr.msra.gmra.mxu0 %v17509_v11  ;;  %v17583_v63 = vld [vmem:[%s25155_s1 + $0xc0] ss:$8 sps:$4 sm:$0xff]   ;;  %v17584_v11 = vld [vmem:[%s25155_s1 + $0xd4] ss:$8 sps:$4 sm:$0xff]  }
 0x1eb   : > { %2159 = vmatpush1.bf16.msra.mxu1 %v20114_v62  ;;  %3316 = vmatpush1.bf16.msra.mxu0 %v20114_v62 }
 0x1ec   : > { %2160 = vmatprep.subr.bf16.mxu1 %v25301_v20  ;;  %3317 = vmatprep.subr.bf16.mxu0 %v25301_v20 }
 0x1ed   : > { %1924 = vmatprep.mubr.bf16.mxu1 %v17512_v55  ;;  %2777 = vmatprep.mubr.bf16.mxu0 %v17514_v2  ;;  %v17588_v55 = vld [vmem:[%s25155_s1 + $0x2d4] ss:$8 sps:$4 sm:$0xff]   ;;  %v17586_v2 = vld [vmem:[%s25155_s1 + $0x2d0] ss:$8 sps:$4 sm:$0xff]  }
 0x1ef   : > { %2161 = vmatpush1.bf16.msra.mxu1 %v20084_v28  ;;  %3318 = vmatpush1.bf16.msra.mxu0 %v20084_v28 }
 0x1f0   : > { %2162 = vmatprep.subr.bf16.mxu1 %v25301_v20  ;;  %3319 = vmatprep.subr.bf16.mxu0 %v25301_v20 }
 0x1f2   : > { %1925 = vmatmul.mubr.bf16.gmra.mxu1 %v17516_v61  ;;  %2778 = vmatmul.mubr.bf16.gmra.mxu0 %v17517_v26  ;;  %v17589_v61 = vld [vmem:[%s25155_s1 + $0xd0] ss:$8 sps:$4 sm:$0xff]   ;;  %v17590_v26 = vld [vmem:[%s25155_s1 + $0xe4] ss:$8 sps:$4 sm:$0xff]  }
 0x1f3   : > { %2163 = vmatpush1.bf16.msra.mxu1 %v20070_v51  ;;  %3320 = vmatpush1.bf16.msra.mxu0 %v20070_v51 }
 0x1f4   : > { %2164 = vmatprep.subr.bf16.mxu1 %v25301_v20  ;;  %3321 = vmatprep.subr.bf16.mxu0 %v25301_v20 }
 0x1f5   : > { %1932 = vmatprep.mubr.bf16.mxu1 %v17518_v7  ;;  %2785 = vmatprep.mubr.bf16.mxu0 %v17520_v40  ;;  %v17594_v7 = vld [vmem:[%s25155_s1 + $0x2e4] ss:$8 sps:$4 sm:$0xff]   ;;  %v17592_v40 = vld [vmem:[%s25155_s1 + $0x2e0] ss:$8 sps:$4 sm:$0xff]  }
 0x1f7   : > { %2165 = vmatpush1.bf16.msra.mxu1 %v20036_v53  ;;  %3322 = vmatpush1.bf16.msra.mxu0 %v20036_v53 }
 0x1f8   : > { %2166 = vmatprep.subr.bf16.mxu1 %v25301_v20  ;;  %3323 = vmatprep.subr.bf16.mxu0 %v25301_v20 }
 0x1fa   : > { %1933 = vmatmul.mubr.bf16.gmra.mxu1 %v17522_v32  ;;  %2786 = vmatmul.mubr.bf16.gmra.mxu0 %v17523_v34  ;;  %v17595_v32 = vld [vmem:[%s25155_s1 + $0xe0] ss:$8 sps:$4 sm:$0xff]   ;;  %v17596_v34 = vld [vmem:[%s25155_s1 + $0xf4] ss:$8 sps:$4 sm:$0xff]  }
 0x1fb   : > { %2167 = vmatpush1.bf16.msra.mxu1 %v20018_v4  ;;  %3324 = vmatpush1.bf16.msra.mxu0 %v20018_v4 }
 0x1fc   : > { %2168 = vmatprep.subr.bf16.mxu1 %v25301_v20  ;;  %3325 = vmatprep.subr.bf16.mxu0 %v25301_v20 }
 0x1fd   : > { %1940 = vmatprep.mubr.bf16.mxu1 %v17524_v60  ;;  %2793 = vmatprep.mubr.bf16.mxu0 %v17528_v10  ;;  %v17600_v60 = vld [vmem:[%s25155_s1 + $0x2f4] ss:$8 sps:$4 sm:$0xff]   ;;  %v17598_v10 = vld [vmem:[%s25155_s1 + $0x2f0] ss:$8 sps:$4 sm:$0xff]  }
 0x1ff   : > { %2169 = vmatpush1.bf16.msra.mxu1 %v19988_v59  ;;  %3326 = vmatpush1.bf16.msra.mxu0 %v19988_v59 }
 0x200   : > { %2170 = vmatprep.subr.bf16.mxu1 %v25301_v20  ;;  %3327 = vmatprep.subr.bf16.mxu0 %v25301_v20 }
 0x202   : > { %1941 = vmatmul.mubr.bf16.gmra.mxu1 %v17529_v17  ;;  %2794 = vmatmul.mubr.bf16.gmra.mxu0 %v17526_v57  ;;  %v17601_v57 = vld [vmem:[%s25155_s1 + $0xf0] ss:$8 sps:$4 sm:$0xff]   ;;  %v17604_v17 = vld [vmem:[%s25155_s1 + $0x104] ss:$8 sps:$4 sm:$0xff]  }
 0x203   : > { %2171 = vmatpush1.bf16.msra.mxu1 %v19968_v52  ;;  %3328 = vmatpush1.bf16.msra.mxu0 %v19968_v52 }
 0x204   : > { %2172 = vmatprep.subr.bf16.mxu1 %v25301_v20  ;;  %3329 = vmatprep.subr.bf16.mxu0 %v25301_v20 }
 0x205   : > { %1948 = vmatprep.mubr.bf16.mxu1 %v17530_v54  ;;  %2801 = vmatprep.mubr.bf16.mxu0 %v17534_v0  ;;  %v17607_v54 = vld [vmem:[%s25155_s1 + $0x384] ss:$8 sps:$4 sm:$0xff]   ;;  %v17602_v0 = vld [vmem:[%s25155_s1 + $0x100] ss:$8 sps:$4 sm:$0xff]  }
 0x207   : > { %2173 = vmatpush1.bf16.msra.mxu1 %v19935_v8  ;;  %3330 = vmatpush1.bf16.msra.mxu0 %v19935_v8 }
 0x208   : > { %2180 = vmatprep.subr.bf16.mxu1 %v25301_v20  ;;  %3337 = vmatprep.subr.bf16.mxu0 %v25301_v20 }
 0x20a   : > { %1949 = vmatmul.mubr.bf16.gmra.mxu1 %v17535_v37  ;;  %2802 = vmatmul.mubr.bf16.gmra.mxu0 %v17532_v27  ;;  %v17605_v27 = vld [vmem:[%s25155_s1 + $0x380] ss:$8 sps:$4 sm:$0xff]   ;;  %v17608_v37 = vld [vmem:[%s25155_s1 + $0x114] ss:$8 sps:$4 sm:$0xff]  }
 0x20b   : > { %2181 = vmatpush2.bf16.msra.mxu1 %v20199_v46  ;;  %3338 = vmatpush2.bf16.msra.mxu0 %v20199_v46 }
 0x20c   : > { %2182 = vmatprep.subr.bf16.mxu1 %v25301_v20  ;;  %3339 = vmatprep.subr.bf16.mxu0 %v25301_v20 }
 0x20d   : > { %1956 = vmatprep.mubr.bf16.mxu1 %v17536_v24  ;;  %2809 = vmatprep.mubr.bf16.mxu0 %v17540_v41  ;;  %v17612_v24 = vld [vmem:[%s25155_s1 + $0x394] ss:$8 sps:$4 sm:$0xff]   ;;  %v17610_v41 = vld [vmem:[%s25155_s1 + $0x390] ss:$8 sps:$4 sm:$0xff]  }
 0x20f   : > { %2183 = vmatpush2.bf16.msra.mxu1 %v20180_v56  ;;  %3340 = vmatpush2.bf16.msra.mxu0 %v20180_v56 }
 0x210   : > { %2184 = vmatprep.subr.bf16.mxu1 %v25301_v20  ;;  %3341 = vmatprep.subr.bf16.mxu0 %v25301_v20 }
 0x212   : > { %1957 = vmatmul.mubr.bf16.gmra.mxu1 %v17541_v30  ;;  %2810 = vmatmul.mubr.bf16.gmra.mxu0 %v17538_v38  ;;  %v17613_v38 = vld [vmem:[%s25155_s1 + $0x110] ss:$8 sps:$4 sm:$0xff]   ;;  %v17614_v30 = vld [vmem:[%s25155_s1 + $0x124] ss:$8 sps:$4 sm:$0xff]  }
 0x213   : > { %2185 = vmatpush2.bf16.msra.mxu1 %v20168_v31  ;;  %3342 = vmatpush2.bf16.msra.mxu0 %v20168_v31 }
 0x214   : > { %2186 = vmatprep.subr.bf16.mxu1 %v25301_v20  ;;  %3343 = vmatprep.subr.bf16.mxu0 %v25301_v20 }
 0x215   : > { %1964 = vmatprep.mubr.bf16.mxu1 %v17542_v43  ;;  %2817 = vmatprep.mubr.bf16.mxu0 %v17546_v22  ;;  %v17618_v43 = vld [vmem:[%s25155_s1 + $0x3a4] ss:$8 sps:$4 sm:$0xff]   ;;  %v17616_v22 = vld [vmem:[%s25155_s1 + $0x3a0] ss:$8 sps:$4 sm:$0xff]  }
 0x217   : > { %2187 = vmatpush2.bf16.msra.mxu1 %v20154_v21  ;;  %3344 = vmatpush2.bf16.msra.mxu0 %v20154_v21 }
 0x218   : > { %2188 = vmatprep.subr.bf16.mxu1 %v25301_v20  ;;  %3345 = vmatprep.subr.bf16.mxu0 %v25301_v20 }
 0x21a   : > { %1965 = vmatmul.mubr.bf16.gmra.mxu1 %v17547_v39  ;;  %2818 = vmatmul.mubr.bf16.gmra.mxu0 %v17544_v44  ;;  %v17619_v44 = vld [vmem:[%s25155_s1 + $0x120] ss:$8 sps:$4 sm:$0xff]   ;;  %v17620_v39 = vld [vmem:[%s25155_s1 + $0x134] ss:$8 sps:$4 sm:$0xff]  }
 0x21b   : > { %2189 = vmatpush2.bf16.msra.mxu1 %v20126_v18  ;;  %3346 = vmatpush2.bf16.msra.mxu0 %v20126_v18 }
 0x21c   : > { %1972 = vmatprep.mubr.bf16.mxu1 %v17548_v3  ;;  %2825 = vmatprep.mubr.bf16.mxu0 %v17552_v6  ;;  %v17624_v3 = vld [vmem:[%s25155_s1 + $0x3b4] ss:$8 sps:$4 sm:$0xff]   ;;  %v17622_v6 = vld [vmem:[%s25155_s1 + $0x3b0] ss:$8 sps:$4 sm:$0xff]  }
 0x21d   : > { %2464 = vmatprep.subr.bf16.mxu1 %v25301_v20  ;;  %3893 = vmatprep.subr.bf16.mxu0 %v25301_v20 }
 0x222   : > { %1973 = vmatmul.mubr.bf16.gmra.mxu1 %v17553_v42  ;;  %2826 = vmatmul.mubr.bf16.gmra.mxu0 %v17550_v25  ;;  %v17625_v25 = vld [vmem:[%s25155_s1 + $0x130] ss:$8 sps:$4 sm:$0xff]   ;;  %v17626_v42 = vld [vmem:[%s25155_s1 + $0x144] ss:$8 sps:$4 sm:$0xff]  }
 0x223   : > { %2190 = vmatprep.mubr.bf16.mxu1 %v17556_v50  ;;  %3347 = vmatprep.mubr.bf16.mxu0 %v17559_v48  ;;  %v17630_v50 = vld [vmem:[%s25155_s1 + $0x3c4] ss:$8 sps:$4 sm:$0xff]   ;;  %v17628_v48 = vld [vmem:[%s25155_s1 + $0x3c0] ss:$8 sps:$4 sm:$0xff]  }
 0x22a   : > { %2191 = vmatmul.mubr.bf16.vlgmr.msra.gmra.mxu1 %v17554_v29  ;;  %3348 = vmatmul.mubr.bf16.vlgmr.msra.gmra.mxu0 %v17557_v14  ;;  %v17631_v29 = vld [vmem:[%s25155_s1 + $0x140] ss:$8 sps:$4 sm:$0xff]   ;;  %v17632_v14 = vld [vmem:[%s25155_s1 + $0x154] ss:$8 sps:$4 sm:$0xff]  }
 0x22b   : > { %2465 = vmatpush1.bf16.msra.mxu1 %v20114_v62  ;;  %3894 = vmatpush1.bf16.msra.mxu0 %v20114_v62 }
 0x22c   : > { %2466 = vmatprep.subr.bf16.mxu1 %v25301_v20  ;;  %3895 = vmatprep.subr.bf16.mxu0 %v25301_v20 }
 0x22d   : > { %2198 = vmatprep.mubr.bf16.mxu1 %v17560_v45  ;;  %3355 = vmatprep.mubr.bf16.mxu0 %v17564_v47  ;;  %v17636_v45 = vld [vmem:[%s25155_s1 + $0x3d4] ss:$8 sps:$4 sm:$0xff]   ;;  %v17634_v47 = vld [vmem:[%s25155_s1 + $0x3d0] ss:$8 sps:$4 sm:$0xff]  }
 0x22f   : > { %2467 = vmatpush1.bf16.msra.mxu1 %v20084_v28  ;;  %3896 = vmatpush1.bf16.msra.mxu0 %v20084_v28 }
 0x230   : > { %2468 = vmatprep.subr.bf16.mxu1 %v25301_v20  ;;  %3897 = vmatprep.subr.bf16.mxu0 %v25301_v20 }
 0x232   : > { %2199 = vmatmul.mubr.bf16.gmra.mxu1 %v17565_v23  ;;  %3356 = vmatmul.mubr.bf16.gmra.mxu0 %v17562_v36  ;;  %v17637_v36 = vld [vmem:[%s25155_s1 + $0x150] ss:$8 sps:$4 sm:$0xff]   ;;  %v17638_v23 = vld [vmem:[%s25155_s1 + $0x164] ss:$8 sps:$4 sm:$0xff]  }
 0x233   : > { %2469 = vmatpush1.bf16.msra.mxu1 %v20070_v51  ;;  %3898 = vmatpush1.bf16.msra.mxu0 %v20070_v51 }
 0x234   : > { %2470 = vmatprep.subr.bf16.mxu1 %v25301_v20  ;;  %3899 = vmatprep.subr.bf16.mxu0 %v25301_v20 }
 0x235   : > { %2206 = vmatprep.mubr.bf16.mxu1 %v17566_v9  ;;  %3363 = vmatprep.mubr.bf16.mxu0 %v17570_v12  ;;  %v17642_v9 = vld [vmem:[%s25155_s1 + $0x3e4] ss:$8 sps:$4 sm:$0xff]   ;;  %v17640_v12 = vld [vmem:[%s25155_s1 + $0x3e0] ss:$8 sps:$4 sm:$0xff]  }
 0x237   : > { %2471 = vmatpush1.bf16.msra.mxu1 %v20036_v53  ;;  %3900 = vmatpush1.bf16.msra.mxu0 %v20036_v53 }
 0x238   : > { %2472 = vmatprep.subr.bf16.mxu1 %v25301_v20  ;;  %3901 = vmatprep.subr.bf16.mxu0 %v25301_v20 }
 0x23a   : > { %2207 = vmatmul.mubr.bf16.gmra.mxu1 %v17571_v35  ;;  %3364 = vmatmul.mubr.bf16.gmra.mxu0 %v17568_v5  ;;  %v17643_v5 = vld [vmem:[%s25155_s1 + $0x160] ss:$8 sps:$4 sm:$0xff]   ;;  %v17644_v35 = vld [vmem:[%s25155_s1 + $0x174] ss:$8 sps:$4 sm:$0xff]  }
 0x23b   : > { %2473 = vmatpush1.bf16.msra.mxu1 %v20018_v4  ;;  %3902 = vmatpush1.bf16.msra.mxu0 %v20018_v4 }
 0x23c   : > { %2474 = vmatprep.subr.bf16.mxu1 %v25301_v20  ;;  %3903 = vmatprep.subr.bf16.mxu0 %v25301_v20 }
 0x23d   : > { %2214 = vmatprep.mubr.bf16.mxu1 %v17572_v1  ;;  %3371 = vmatprep.mubr.bf16.mxu0 %v17576_v49  ;;  %v17648_v1 = vld [vmem:[%s25155_s1 + $0x3f4] ss:$8 sps:$4 sm:$0xff]   ;;  %v17646_v49 = vld [vmem:[%s25155_s1 + $0x3f0] ss:$8 sps:$4 sm:$0xff]  }
 0x23f   : > { %2475 = vmatpush1.bf16.msra.mxu1 %v19988_v59  ;;  %3904 = vmatpush1.bf16.msra.mxu0 %v19988_v59 }
 0x240   : > { %2476 = vmatprep.subr.bf16.mxu1 %v25301_v20  ;;  %3905 = vmatprep.subr.bf16.mxu0 %v25301_v20 }
 0x242   : > { %2215 = vmatmul.mubr.bf16.gmra.mxu1 %v17577_v13  ;;  %3372 = vmatmul.mubr.bf16.gmra.mxu0 %v17574_v15  ;;  %v17649_v15 = vld [vmem:[%s25155_s1 + $0x170] ss:$8 sps:$4 sm:$0xff]   ;;  %v17652_v13 = vld [vmem:[%s25155_s1 + $0x204] ss:$8 sps:$4 sm:$0xff]  }
 0x243   : > { %2477 = vmatpush1.bf16.msra.mxu1 %v19968_v52  ;;  %3906 = vmatpush1.bf16.msra.mxu0 %v19968_v52 }
 0x244   : > { %2478 = vmatprep.subr.bf16.mxu1 %v25301_v20  ;;  %3907 = vmatprep.subr.bf16.mxu0 %v25301_v20 }
 0x245   : > { %2222 = vmatprep.mubr.bf16.mxu1 %v17578_v16  ;;  %3379 = vmatprep.mubr.bf16.mxu0 %v17582_v58  ;;  %v17655_v16 = vld [vmem:[%s25155_s1 + $0x484] ss:$8 sps:$4 sm:$0xff]   ;;  %v17650_v58 = vld [vmem:[%s25155_s1 + $0x200] ss:$8 sps:$4 sm:$0xff]  }
 0x247   : > { %2479 = vmatpush1.bf16.msra.mxu1 %v19935_v8  ;;  %3908 = vmatpush1.bf16.msra.mxu0 %v19935_v8 }
 0x248   : > { %2486 = vmatprep.subr.bf16.mxu1 %v25301_v20  ;;  %3915 = vmatprep.subr.bf16.mxu0 %v25301_v20 }
 0x24a   : > { %2223 = vmatmul.mubr.bf16.gmra.mxu1 %v17583_v63  ;;  %3380 = vmatmul.mubr.bf16.gmra.mxu0 %v17580_v19  ;;  %v17653_v19 = vld [vmem:[%s25155_s1 + $0x480] ss:$8 sps:$4 sm:$0xff]   ;;  %v17656_v63 = vld [vmem:[%s25155_s1 + $0x214] ss:$8 sps:$4 sm:$0xff]  }
 0x24b   : > { %2487 = vmatpush2.bf16.msra.mxu1 %v20199_v46  ;;  %3916 = vmatpush2.bf16.msra.mxu0 %v20199_v46 }
 0x24c   : > { %2488 = vmatprep.subr.bf16.mxu1 %v25301_v20  ;;  %3917 = vmatprep.subr.bf16.mxu0 %v25301_v20 }
 0x24d   : > { %2230 = vmatprep.mubr.bf16.mxu1 %v17584_v11  ;;  %3387 = vmatprep.mubr.bf16.mxu0 %v17588_v55  ;;  %v17660_v11 = vld [vmem:[%s25155_s1 + $0x494] ss:$8 sps:$4 sm:$0xff]  }
 0x24f   : > { %2489 = vmatpush2.bf16.msra.mxu1 %v20180_v56  ;;  %3918 = vmatpush2.bf16.msra.mxu0 %v20180_v56 }
 0x250   : > { %2490 = vmatprep.subr.bf16.mxu1 %v25301_v20  ;;  %3919 = vmatprep.subr.bf16.mxu0 %v25301_v20 }
 0x252   : > { %2231 = vmatmul.mubr.bf16.gmra.mxu1 %v17589_v61  ;;  %3388 = vmatmul.mubr.bf16.gmra.mxu0 %v17586_v2 }
 0x253   : > { %2491 = vmatpush2.bf16.msra.mxu1 %v20168_v31  ;;  %3920 = vmatpush2.bf16.msra.mxu0 %v20168_v31 }
 0x254   : > { %2492 = vmatprep.subr.bf16.mxu1 %v25301_v20  ;;  %3921 = vmatprep.subr.bf16.mxu0 %v25301_v20 }
 0x255   : > { %2238 = vmatprep.mubr.bf16.mxu1 %v17590_v26  ;;  %3395 = vmatprep.mubr.bf16.mxu0 %v17594_v7  ;;  %v2948_v7 = vld [vmem:[%s25155_s1 + $0x210] sm:$0xff] }
 0x257   : > { %2493 = vmatpush2.bf16.msra.mxu1 %v20154_v21  ;;  %3922 = vmatpush2.bf16.msra.mxu0 %v20154_v21 }
 0x258   : > { %2494 = vmatprep.subr.bf16.mxu1 %v25301_v20  ;;  %3923 = vmatprep.subr.bf16.mxu0 %v25301_v20 }
 0x25a   : > { %2239 = vmatmul.mubr.bf16.gmra.mxu1 %v17595_v32  ;;  %3396 = vmatmul.mubr.bf16.gmra.mxu0 %v17592_v40  ;;  %v2949_v40 = vld [vmem:[%s25155_s1 + $0x218] sm:$0xff] }
 0x25b   : > { %2495 = vmatpush2.bf16.msra.mxu1 %v20126_v18  ;;  %3924 = vmatpush2.bf16.msra.mxu0 %v20126_v18 }
 0x25c   : > { %2246 = vmatprep.mubr.bf16.mxu1 %v17596_v34  ;;  %3403 = vmatprep.mubr.bf16.mxu0 %v17600_v60 }
 0x25d   : > { %3042 = vmatprep.subr.bf16.mxu1 %v25301_v20  ;;  %4471 = vmatprep.subr.bf16.mxu0 %v25301_v20 }
 0x262   : > { %2247 = vmatmul.mubr.bf16.gmra.mxu1 %v17601_v57  ;;  %3404 = vmatmul.mubr.bf16.gmra.mxu0 %v17598_v10  ;;  %v17658_v57 = vld [vmem:[%s25155_s1 + $0x490] ss:$8 sps:$4 sm:$0xff]  }
 0x263   : > { %2496 = vmatprep.mubr.bf16.mxu1 %v17604_v17  ;;  %3925 = vmatprep.mubr.bf16.mxu0 %v17607_v54  ;;  %v15010_v17 = vcombine.low %v2948_v7, %v2949_v40 }
 0x26a   : > { %2497 = vmatmul.mubr.bf16.vlgmr.msra.gmra.mxu1 %v17602_v0  ;;  %3926 = vmatmul.mubr.bf16.vlgmr.msra.gmra.mxu0 %v17605_v27 }
 0x26b   : > { %3043 = vmatpush1.bf16.msra.mxu1 %v20114_v62  ;;  %4472 = vmatpush1.bf16.msra.mxu0 %v20114_v62 }
 0x26c   : > { %3044 = vmatprep.subr.bf16.mxu1 %v25301_v20  ;;  %4473 = vmatprep.subr.bf16.mxu0 %v25301_v20 }
 0x26d   : > { %2504 = vmatprep.mubr.bf16.mxu1 %v17608_v37  ;;  %3933 = vmatprep.mubr.bf16.mxu0 %v17612_v24  ;;  %v17661_v37 = vld [vmem:[%s25155_s1 + $0x224] ss:$8 sps:$4 sm:$0xff]  }
 0x26e   : > { %v17665_v24 = vld [vmem:[%s25155_s1 + $0x4a4] ss:$8 sps:$4 sm:$0xff]  }
 0x26f   : > { %3045 = vmatpush1.bf16.msra.mxu1 %v20084_v28  ;;  %4474 = vmatpush1.bf16.msra.mxu0 %v20084_v28 }
 0x270   : > { %3046 = vmatprep.subr.bf16.mxu1 %v25301_v20  ;;  %4475 = vmatprep.subr.bf16.mxu0 %v25301_v20 }
 0x272   : > { %2505 = vmatmul.mubr.bf16.gmra.mxu1 %v17613_v38  ;;  %3934 = vmatmul.mubr.bf16.gmra.mxu0 %v17610_v41 }
 0x273   : > { %3047 = vmatpush1.bf16.msra.mxu1 %v20070_v51  ;;  %4476 = vmatpush1.bf16.msra.mxu0 %v20070_v51 }
 0x274   : > { %3048 = vmatprep.subr.bf16.mxu1 %v25301_v20  ;;  %4477 = vmatprep.subr.bf16.mxu0 %v25301_v20 }
 0x275   : > { %2512 = vmatprep.mubr.bf16.mxu1 %v17614_v30  ;;  %3941 = vmatprep.mubr.bf16.mxu0 %v17618_v43 }
 0x277   : > { %3049 = vmatpush1.bf16.msra.mxu1 %v20036_v53  ;;  %4478 = vmatpush1.bf16.msra.mxu0 %v20036_v53 }
 0x278   : > { %3050 = vmatprep.subr.bf16.mxu1 %v25301_v20  ;;  %4479 = vmatprep.subr.bf16.mxu0 %v25301_v20 }
 0x27a   : > { %2513 = vmatmul.mubr.bf16.gmra.mxu1 %v17619_v44  ;;  %3942 = vmatmul.mubr.bf16.gmra.mxu0 %v17616_v22  ;;  %v2950_v44 = vld [vmem:[%s25155_s1 + $0x220] sm:$0xff] }
 0x27b   : > { %3051 = vmatpush1.bf16.msra.mxu1 %v20018_v4  ;;  %4480 = vmatpush1.bf16.msra.mxu0 %v20018_v4 }
 0x27c   : > { %3052 = vmatprep.subr.bf16.mxu1 %v25301_v20  ;;  %4481 = vmatprep.subr.bf16.mxu0 %v25301_v20 }
 0x27d   : > { %2520 = vmatprep.mubr.bf16.mxu1 %v17620_v39  ;;  %3949 = vmatprep.mubr.bf16.mxu0 %v17624_v3  ;;  %v2951_v39 = vld [vmem:[%s25155_s1 + $0x228] sm:$0xff] }
 0x27f   : > { %3053 = vmatpush1.bf16.msra.mxu1 %v19988_v59  ;;  %4482 = vmatpush1.bf16.msra.mxu0 %v19988_v59 }
 0x280   : > { %3054 = vmatprep.subr.bf16.mxu1 %v25301_v20  ;;  %4483 = vmatprep.subr.bf16.mxu0 %v25301_v20 }
 0x282   : > { %2521 = vmatmul.mubr.bf16.gmra.mxu1 %v17625_v25  ;;  %3950 = vmatmul.mubr.bf16.gmra.mxu0 %v17622_v6 }
 0x283   : > { %3055 = vmatpush1.bf16.msra.mxu1 %v19968_v52  ;;  %4484 = vmatpush1.bf16.msra.mxu0 %v19968_v52 }
 0x284   : > { %3056 = vmatprep.subr.bf16.mxu1 %v25301_v20  ;;  %4485 = vmatprep.subr.bf16.mxu0 %v25301_v20 }
 0x285   : > { %2528 = vmatprep.mubr.bf16.mxu1 %v17626_v42  ;;  %3957 = vmatprep.mubr.bf16.mxu0 %v17630_v50  ;;  %v17663_v50 = vld [vmem:[%s25155_s1 + $0x4a0] ss:$8 sps:$4 sm:$0xff]  }
 0x287   : > { %3057 = vmatpush1.bf16.msra.mxu1 %v19935_v8  ;;  %4486 = vmatpush1.bf16.msra.mxu0 %v19935_v8 }
 0x288   : > { %3064 = vmatprep.subr.bf16.mxu1 %v25301_v20  ;;  %4493 = vmatprep.subr.bf16.mxu0 %v25301_v20 }
 0x28a   : > { %2529 = vmatmul.mubr.bf16.gmra.mxu1 %v17631_v29  ;;  %3958 = vmatmul.mubr.bf16.gmra.mxu0 %v17628_v48  ;;  %v15012_v48 = vcombine.low %v2950_v44, %v2951_v39 }
 0x28b   : > { %3065 = vmatpush2.bf16.msra.mxu1 %v20199_v46  ;;  %4494 = vmatpush2.bf16.msra.mxu0 %v20199_v46 }
 0x28c   : > { %3066 = vmatprep.subr.bf16.mxu1 %v25301_v20  ;;  %4495 = vmatprep.subr.bf16.mxu0 %v25301_v20 }
 0x28d   : > { %2536 = vmatprep.mubr.bf16.mxu1 %v17632_v14  ;;  %3965 = vmatprep.mubr.bf16.mxu0 %v17636_v45 }
 0x28f   : > { %3067 = vmatpush2.bf16.msra.mxu1 %v20180_v56  ;;  %4496 = vmatpush2.bf16.msra.mxu0 %v20180_v56 }
 0x290   : > { %3068 = vmatprep.subr.bf16.mxu1 %v25301_v20  ;;  %4497 = vmatprep.subr.bf16.mxu0 %v25301_v20 }
 0x292   : > { %2537 = vmatmul.mubr.bf16.gmra.mxu1 %v17637_v36  ;;  %3966 = vmatmul.mubr.bf16.gmra.mxu0 %v17634_v47  ;;  %v17666_v47 = vld [vmem:[%s25155_s1 + $0x234] ss:$8 sps:$4 sm:$0xff]  }
 0x293   : > { %3069 = vmatpush2.bf16.msra.mxu1 %v20168_v31  ;;  %4498 = vmatpush2.bf16.msra.mxu0 %v20168_v31  ;;  %v17670_v36 = vld [vmem:[%s25155_s1 + $0x4b4] ss:$8 sps:$4 sm:$0xff]  }
 0x294   : > { %3070 = vmatprep.subr.bf16.mxu1 %v25301_v20  ;;  %4499 = vmatprep.subr.bf16.mxu0 %v25301_v20 }
 0x295   : > { %2544 = vmatprep.mubr.bf16.mxu1 %v17638_v23  ;;  %3973 = vmatprep.mubr.bf16.mxu0 %v17642_v9 }
 0x297   : > { %3071 = vmatpush2.bf16.msra.mxu1 %v20154_v21  ;;  %4500 = vmatpush2.bf16.msra.mxu0 %v20154_v21 }
 0x298   : > { %3072 = vmatprep.subr.bf16.mxu1 %v25301_v20  ;;  %4501 = vmatprep.subr.bf16.mxu0 %v25301_v20 }
 0x29a   : > { %2545 = vmatmul.mubr.bf16.gmra.mxu1 %v17643_v5  ;;  %3974 = vmatmul.mubr.bf16.gmra.mxu0 %v17640_v12 }
 0x29b   : > { %3073 = vmatpush2.bf16.msra.mxu1 %v20126_v18  ;;  %4502 = vmatpush2.bf16.msra.mxu0 %v20126_v18 }
 0x29c   : > { %2552 = vmatprep.mubr.bf16.mxu1 %v17644_v35  ;;  %3981 = vmatprep.mubr.bf16.mxu0 %v17648_v1  ;;  %v2952_v1 = vld [vmem:[%s25155_s1 + $0x230] sm:$0xff] }
 0x29d   : > { %3620 = vmatprep.subr.bf16.mxu1 %v25301_v20  ;;  %5049 = vmatprep.subr.bf16.mxu0 %v25301_v20 }
 0x2a2   : > { %2553 = vmatmul.mubr.bf16.gmra.mxu1 %v17649_v15  ;;  %3982 = vmatmul.mubr.bf16.gmra.mxu0 %v17646_v49  ;;  %v2953_v49 = vld [vmem:[%s25155_s1 + $0x238] sm:$0xff] }
 0x2a3   : > { %3074 = vmatprep.mubr.bf16.mxu1 %v17652_v13  ;;  %4503 = vmatprep.mubr.bf16.mxu0 %v17655_v16 }
 0x2aa   : > { %v1918_v55 = vpop.f32.mrf.mxu1  ;;  %v2771_v2 = vpop.f32.mrf.mxu0  ;;  %3075 = vmatmul.mubr.bf16.vlgmr.msra.gmra.mxu1 %v17650_v58  ;;  %4504 = vmatmul.mubr.bf16.vlgmr.msra.gmra.mxu0 %v17653_v19  ;;  %v17668_v19 = vld [vmem:[%s25155_s1 + $0x4b0] ss:$8 sps:$4 sm:$0xff]  }
 0x2ab   : > { %v16271_v61 = vpack.c.bf16 %v1918_v55, %v1918_v55  ;;  %v16319_v26 = vpack.c.bf16 %v2771_v2, %v2771_v2  ;;  %3621 = vmatpush1.bf16.msra.mxu1 %v20114_v62  ;;  %5050 = vmatpush1.bf16.msra.mxu0 %v20114_v62 }
 0x2ac   : > { %v1920_v32 = vpop.f32.mrf.mxu1  ;;  %v2773_v34 = vpop.f32.mrf.mxu0  ;;  %3622 = vmatprep.subr.bf16.mxu1 %v25301_v20  ;;  %5051 = vmatprep.subr.bf16.mxu0 %v25301_v20 }
 0x2ad   : > { %2046 = vst.msk [vmem:[#allocation2] sm:$0xf] %vm2045_vm7, %v16271_v61  ;;  %3082 = vmatprep.mubr.bf16.mxu1 %v17656_v63  ;;  %4511 = vmatprep.mubr.bf16.mxu0 %v17660_v11  ;;  %v15014_v63 = vcombine.low %v2952_v1, %v2953_v49  ;;  %v17673_v61 = vld [vmem:[%s25155_s1 + $0x244] ss:$8 sps:$4 sm:$0xff]  }
 0x2ae   : > { %v1921_v60 = vpop.f32.mrf.mxu1  ;;  %v2774_v10 = vpop.f32.mrf.mxu0  ;;  %2882 = vrot.lane.b32.xlu1 %v16319_v26, %s25203_s29  ;;  %v17676_v26 = vld [vmem:[%s25155_s1 + $0x4c4] ss:$8 sps:$4 sm:$0xff]  }
 0x2af   : > { %v16272_v54 = vpack.c.bf16 %v1921_v60, %v1921_v60  ;;  %3623 = vmatpush1.bf16.msra.mxu1 %v20084_v28  ;;  %5052 = vmatpush1.bf16.msra.mxu0 %v20084_v28  ;;  %v16320_v41 = vpack.c.bf16 %v2774_v10, %v2774_v10 }
 0x2b0   : > { %v1923_v0 = vpop.f32.mrf.mxu1  ;;  %v2776_v27 = vpop.f32.mrf.mxu0  ;;  %3624 = vmatprep.subr.bf16.mxu1 %v25301_v20  ;;  %5053 = vmatprep.subr.bf16.mxu0 %v25301_v20 }
 0x2b1   : > { %2047 = vst.msk [vmem:[#allocation2 + $0x34] sm:$0xf] %vm2045_vm7, %v16272_v54  ;;  %v17671_v0 = vld [vmem:[%s25155_s1 + $0x240] ss:$8 sps:$4 sm:$0xff]  }
 0x2b2   : > { %v1926_v38 = vpop.f32.mrf.mxu1  ;;  %v2779_v30 = vpop.f32.mrf.mxu0  ;;  %3083 = vmatmul.mubr.bf16.gmra.mxu1 %v15010_v17  ;;  %4512 = vmatmul.mubr.bf16.gmra.mxu0 %v17658_v57  ;;  %v17674_v27 = vld [vmem:[%s25155_s1 + $0x4c0] ss:$8 sps:$4 sm:$0xff]  }
 0x2b3   : > { %v16273_v43 = vpack.c.bf16 %v1926_v38, %v1926_v38  ;;  %v16321_v22 = vpack.c.bf16 %v2779_v30, %v2779_v30  ;;  %3625 = vmatpush1.bf16.msra.mxu1 %v20070_v51  ;;  %5054 = vmatpush1.bf16.msra.mxu0 %v20070_v51  ;;  %v17679_v38 = vld [vmem:[%s25155_s1 + $0x254] ss:$8 sps:$4 sm:$0xff]  }
 0x2b4   : > { %v1928_v3 = vpop.f32.mrf.mxu1  ;;  %v2781_v6 = vpop.f32.mrf.mxu0  ;;  %3626 = vmatprep.subr.bf16.mxu1 %v25301_v20  ;;  %5055 = vmatprep.subr.bf16.mxu0 %v25301_v20  ;;  %v17682_v30 = vld [vmem:[%s25155_s1 + $0x4d4] ss:$8 sps:$4 sm:$0xff]  }
 0x2b5   : > { %2048 = vst.msk [vmem:[#allocation2 + $0x68] sm:$0xf] %vm2045_vm7, %v16273_v43  ;;  %3090 = vmatprep.mubr.bf16.mxu1 %v17661_v37  ;;  %4519 = vmatprep.mubr.bf16.mxu0 %v17665_v24 }
 0x2b6   : > { %v1929_v25 = vpop.f32.mrf.mxu1  ;;  %v2782_v42 = vpop.f32.mrf.mxu0  ;;  %2886 = vrot.lane.b32.xlu0 %v16321_v22, %s25203_s29  ;;  %2884 = vrot.lane.b32.xlu1 %v16320_v41, %s25203_s29 }
 0x2b7   : > { %v16274_v29 = vpack.c.bf16 %v1929_v25, %v1929_v25  ;;  %3627 = vmatpush1.bf16.msra.mxu1 %v20036_v53  ;;  %5056 = vmatpush1.bf16.msra.mxu0 %v20036_v53  ;;  %v16322_v23 = vpack.c.bf16 %v2782_v42, %v2782_v42 }
 0x2b8   : > { %v1931_v14 = vpop.f32.mrf.mxu1  ;;  %v2784_v45 = vpop.f32.mrf.mxu0  ;;  %3628 = vmatprep.subr.bf16.mxu1 %v25301_v20  ;;  %5057 = vmatprep.subr.bf16.mxu0 %v25301_v20 }
 0x2b9   : > { %2049 = vst.msk [vmem:[#allocation2 + $0x9c] sm:$0xf] %vm2045_vm7, %v16274_v29  ;;  %v17680_v29 = vld [vmem:[%s25155_s1 + $0x4d0] ss:$8 sps:$4 sm:$0xff]  }
 0x2ba   : > { %v1934_v9 = vpop.f32.mrf.mxu1  ;;  %v2787_v12 = vpop.f32.mrf.mxu0  ;;  %3091 = vmatmul.mubr.bf16.gmra.mxu1 %v15012_v48  ;;  %4520 = vmatmul.mubr.bf16.gmra.mxu0 %v17663_v50  ;;  %v17677_v48 = vld [vmem:[%s25155_s1 + $0x250] ss:$8 sps:$4 sm:$0xff]  }
 0x2bb   : > { %v16275_v5 = vpack.c.bf16 %v1934_v9, %v1934_v9  ;;  %v16323_v35 = vpack.c.bf16 %v2787_v12, %v2787_v12  ;;  %3629 = vmatpush1.bf16.msra.mxu1 %v20018_v4  ;;  %5058 = vmatpush1.bf16.msra.mxu0 %v20018_v4 }
 0x2bc   : > { %v1936_v15 = vpop.f32.mrf.mxu1  ;;  %v2789_v13 = vpop.f32.mrf.mxu0  ;;  %3630 = vmatprep.subr.bf16.mxu1 %v25301_v20  ;;  %5059 = vmatprep.subr.bf16.mxu0 %v25301_v20 }
 0x2bd   : > { %2050 = vst.msk [vmem:[#allocation2 + $0xd0] sm:$0xf] %vm2045_vm7, %v16275_v5  ;;  %3098 = vmatprep.mubr.bf16.mxu1 %v17666_v47  ;;  %4527 = vmatprep.mubr.bf16.mxu0 %v17670_v36  ;;  %v17685_v36 = vld [vmem:[%s25155_s1 + $0x264] ss:$8 sps:$4 sm:$0xff]  }
 0x2be   : > { %v1937_v16 = vpop.f32.mrf.mxu1  ;;  %v2790_v58 = vpop.f32.mrf.mxu0  ;;  %2890 = vrot.lane.b32.xlu0 %v16323_v35, %s25203_s29  ;;  %2888 = vrot.lane.b32.xlu1 %v16322_v23, %s25203_s29  ;;  %v17688_v23 = vld [vmem:[%s25155_s1 + $0x4e4] ss:$8 sps:$4 sm:$0xff]  }
 0x2bf   : > { %v16276_v11 = vpack.c.bf16 %v1937_v16, %v1937_v16  ;;  %3631 = vmatpush1.bf16.msra.mxu1 %v19988_v59  ;;  %5060 = vmatpush1.bf16.msra.mxu0 %v19988_v59  ;;  %v16324_v7 = vpack.c.bf16 %v2790_v58, %v2790_v58  ;;  %v17683_v58 = vld [vmem:[%s25155_s1 + $0x260] ss:$8 sps:$4 sm:$0xff]  }
 0x2c0   : > { %v1939_v55 = vpop.f32.mrf.mxu1  ;;  %v2792_v2 = vpop.f32.mrf.mxu0  ;;  %3632 = vmatprep.subr.bf16.mxu1 %v25301_v20  ;;  %5061 = vmatprep.subr.bf16.mxu0 %v25301_v20 }
 0x2c1   : > { %2051 = vst.msk [vmem:[#allocation2 + $0x104] sm:$0xf] %vm2045_vm7, %v16276_v11  ;;  %v17691_v2 = vld [vmem:[%s25155_s1 + $0x274] ss:$8 sps:$4 sm:$0xff]  }
 0x2c2   : > { %v1942_v40 = vpop.f32.mrf.mxu1  ;;  %v2795_v32 = vpop.f32.mrf.mxu0  ;;  %3099 = vmatmul.mubr.bf16.gmra.mxu1 %v15014_v63  ;;  %4528 = vmatmul.mubr.bf16.gmra.mxu0 %v17668_v19  ;;  %v17686_v19 = vld [vmem:[%s25155_s1 + $0x4e0] ss:$8 sps:$4 sm:$0xff]  }
 0x2c3   : > { %v16277_v34 = vpack.c.bf16 %v1942_v40, %v1942_v40  ;;  %v16325_v60 = vpack.c.bf16 %v2795_v32, %v2795_v32  ;;  %3633 = vmatpush1.bf16.msra.mxu1 %v19968_v52  ;;  %5062 = vmatpush1.bf16.msra.mxu0 %v19968_v52 }
 0x2c4   : > { %v1944_v10 = vpop.f32.mrf.mxu1  ;;  %v2797_v57 = vpop.f32.mrf.mxu0  ;;  %3634 = vmatprep.subr.bf16.mxu1 %v25301_v20  ;;  %5063 = vmatprep.subr.bf16.mxu0 %v25301_v20 }
 0x2c5   : > { %2052 = vst.msk [vmem:[#allocation2 + $0x138] sm:$0xf] %vm2045_vm7, %v16277_v34  ;;  %3106 = vmatprep.mubr.bf16.mxu1 %v17673_v61  ;;  %4535 = vmatprep.mubr.bf16.mxu0 %v17676_v26  ;;  %v17694_v61 = vld [vmem:[%s25155_s1 + $0x4f4] ss:$8 sps:$4 sm:$0xff]  }
 0x2c6   : > { %v1945_v17 = vpop.f32.mrf.mxu1  ;;  %v2798_v54 = vpop.f32.mrf.mxu0  ;;  %2894 = vrot.lane.b32.xlu0 %v16325_v60, %s25203_s29  ;;  %2892 = vrot.lane.b32.xlu1 %v16324_v7, %s25203_s29 }
 0x2c7   : > { %v16278_v37 = vpack.c.bf16 %v1945_v17, %v1945_v17  ;;  %3635 = vmatpush1.bf16.msra.mxu1 %v19935_v8  ;;  %5064 = vmatpush1.bf16.msra.mxu0 %v19935_v8  ;;  %v16326_v43 = vpack.c.bf16 %v2798_v54, %v2798_v54  ;;  %v17689_v54 = vld [vmem:[%s25155_s1 + $0x270] ss:$8 sps:$4 sm:$0xff]  }
 0x2c8   : > { %v1947_v24 = vpop.f32.mrf.mxu1  ;;  %v2800_v41 = vpop.f32.mrf.mxu0  ;;  %3642 = vmatprep.subr.bf16.mxu1 %v25301_v20  ;;  %5071 = vmatprep.subr.bf16.mxu0 %v25301_v20 }
 0x2c9   : > { %2053 = vst.msk [vmem:[#allocation2 + $0x16c] sm:$0xf] %vm2045_vm7, %v16278_v37  ;;  %v17697_v37 = vld [vmem:[%s25155_s1 + $0x304] ss:$8 sps:$4 sm:$0xff]  }
 0x2ca   : > { %v1950_v22 = vpop.f32.mrf.mxu1  ;;  %v2803_v44 = vpop.f32.mrf.mxu0  ;;  %3107 = vmatmul.mubr.bf16.gmra.mxu1 %v17671_v0  ;;  %4536 = vmatmul.mubr.bf16.gmra.mxu0 %v17674_v27  ;;  %v17692_v0 = vld [vmem:[%s25155_s1 + $0x4f0] ss:$8 sps:$4 sm:$0xff]   ;;  %v17700_v24 = vld [vmem:[%s25155_s1 + $0x584] ss:$8 sps:$4 sm:$0xff]  }
 0x2cb   : > { %v16279_v39 = vpack.c.bf16 %v1950_v22, %v1950_v22  ;;  %v16327_v3 = vpack.c.bf16 %v2803_v44, %v2803_v44  ;;  %3643 = vmatpush2.bf16.msra.mxu1 %v20199_v46  ;;  %5072 = vmatpush2.bf16.msra.mxu0 %v20199_v46 }
 0x2cc   : > { %v1952_v6 = vpop.f32.mrf.mxu1  ;;  %v2805_v25 = vpop.f32.mrf.mxu0  ;;  %3644 = vmatprep.subr.bf16.mxu1 %v25301_v20  ;;  %5073 = vmatprep.subr.bf16.mxu0 %v25301_v20 }
 0x2cd   : > { %2054 = vst.msk [vmem:[#allocation2 + $0x1a0] sm:$0xf] %vm2045_vm7, %v16279_v39  ;;  %3114 = vmatprep.mubr.bf16.mxu1 %v17679_v38  ;;  %4543 = vmatprep.mubr.bf16.mxu0 %v17682_v30 }
 0x2ce   : > { %v1953_v42 = vpop.f32.mrf.mxu1  ;;  %v2806_v50 = vpop.f32.mrf.mxu0  ;;  %2898 = vrot.lane.b32.xlu0 %v16327_v3, %s25203_s29  ;;  %2896 = vrot.lane.b32.xlu1 %v16326_v43, %s25203_s29 }
 0x2cf   : > { %v16280_v14 = vpack.c.bf16 %v1953_v42, %v1953_v42  ;;  %3645 = vmatpush2.bf16.msra.mxu1 %v20180_v56  ;;  %5074 = vmatpush2.bf16.msra.mxu0 %v20180_v56  ;;  %v16328_v9 = vpack.c.bf16 %v2806_v50, %v2806_v50  ;;  %v17695_v50 = vld [vmem:[%s25155_s1 + $0x300] ss:$8 sps:$4 sm:$0xff]  }
 0x2d0   : > { %v1955_v45 = vpop.f32.mrf.mxu1  ;;  %v2808_v47 = vpop.f32.mrf.mxu0  ;;  %3646 = vmatprep.subr.bf16.mxu1 %v25301_v20  ;;  %5075 = vmatprep.subr.bf16.mxu0 %v25301_v20 }
 0x2d1   : > { %2055 = vst.msk [vmem:[#allocation2 + $0x1d4] sm:$0xf] %vm2045_vm7, %v16280_v14 }
 0x2d2   : > { %v1958_v12 = vpop.f32.mrf.mxu1  ;;  %v2811_v5 = vpop.f32.mrf.mxu0  ;;  %3115 = vmatmul.mubr.bf16.gmra.mxu1 %v17677_v48  ;;  %4544 = vmatmul.mubr.bf16.gmra.mxu0 %v17680_v29  ;;  %v17698_v48 = vld [vmem:[%s25155_s1 + $0x580] ss:$8 sps:$4 sm:$0xff]  }
 0x2d3   : > { %v16281_v35 = vpack.c.bf16 %v1958_v12, %v1958_v12  ;;  %v16329_v1 = vpack.c.bf16 %v2811_v5, %v2811_v5  ;;  %3647 = vmatpush2.bf16.msra.mxu1 %v20168_v31  ;;  %5076 = vmatpush2.bf16.msra.mxu0 %v20168_v31 }
 0x2d4   : > { %v1960_v49 = vpop.f32.mrf.mxu1  ;;  %v2813_v15 = vpop.f32.mrf.mxu0  ;;  %3648 = vmatprep.subr.bf16.mxu1 %v25301_v20  ;;  %5077 = vmatprep.subr.bf16.mxu0 %v25301_v20 }
 0x2d5   : > { %2056 = vst.msk [vmem:[#allocation2 + $0x208] sm:$0xf] %vm2045_vm7, %v16281_v35  ;;  %3122 = vmatprep.mubr.bf16.mxu1 %v17685_v36  ;;  %4551 = vmatprep.mubr.bf16.mxu0 %v17688_v23  ;;  %v17703_v36 = vld [vmem:[%s25155_s1 + $0x314] ss:$8 sps:$4 sm:$0xff]  }
 0x2d6   : > { %v1961_v13 = vpop.f32.mrf.mxu1  ;;  %v2814_v16 = vpop.f32.mrf.mxu0  ;;  %2902 = vrot.lane.b32.xlu0 %v16329_v1, %s25203_s29  ;;  %2900 = vrot.lane.b32.xlu1 %v16328_v9, %s25203_s29  ;;  %v17706_v23 = vld [vmem:[%s25155_s1 + $0x594] ss:$8 sps:$4 sm:$0xff]  }
 0x2d7   : > { %v16282_v63 = vpack.c.bf16 %v1961_v13, %v1961_v13  ;;  %3649 = vmatpush2.bf16.msra.mxu1 %v20154_v21  ;;  %5078 = vmatpush2.bf16.msra.mxu0 %v20154_v21  ;;  %v16330_v26 = vpack.c.bf16 %v2814_v16, %v2814_v16  ;;  %v17701_v13 = vld [vmem:[%s25155_s1 + $0x310] ss:$8 sps:$4 sm:$0xff]  }
 0x2d8   : > { %v1963_v11 = vpop.f32.mrf.mxu1  ;;  %v2816_v55 = vpop.f32.mrf.mxu0  ;;  %3650 = vmatprep.subr.bf16.mxu1 %v25301_v20  ;;  %5079 = vmatprep.subr.bf16.mxu0 %v25301_v20  ;;  %v17704_v16 = vld [vmem:[%s25155_s1 + $0x590] ss:$8 sps:$4 sm:$0xff]  }
 0x2d9   : > { %2057 = vst.msk [vmem:[#allocation2 + $0x23c] sm:$0xf] %vm2045_vm7, %v16282_v63  ;;  %v17709_v11 = vld [vmem:[%s25155_s1 + $0x324] ss:$8 sps:$4 sm:$0xff]  }
 0x2da   : > { %v1966_v7 = vpop.f32.mrf.mxu1  ;;  %v2819_v40 = vpop.f32.mrf.mxu0  ;;  %3123 = vmatmul.mubr.bf16.gmra.mxu1 %v17683_v58  ;;  %4552 = vmatmul.mubr.bf16.gmra.mxu0 %v17686_v19  ;;  %v17712_v55 = vld [vmem:[%s25155_s1 + $0x5a4] ss:$8 sps:$4 sm:$0xff]  }
 0x2db   : > { %v16283_v32 = vpack.c.bf16 %v1966_v7, %v1966_v7  ;;  %v16331_v34 = vpack.c.bf16 %v2819_v40, %v2819_v40  ;;  %3651 = vmatpush2.bf16.msra.mxu1 %v20126_v18  ;;  %5080 = vmatpush2.bf16.msra.mxu0 %v20126_v18 }
 0x2dc   : > { %v1968_v60 = vpop.f32.mrf.mxu1  ;;  %v2821_v10 = vpop.f32.mrf.mxu0  ;;  %3130 = vmatprep.mubr.bf16.mxu1 %v17691_v2  ;;  %4559 = vmatprep.mubr.bf16.mxu0 %v17694_v61 }
 0x2dd   : > { %2058 = vst.msk [vmem:[#allocation2 + $0x270] sm:$0xf] %vm2045_vm7, %v16283_v32  ;;  %4198 = vmatprep.subr.bf16.mxu1 %v25301_v20  ;;  %5627 = vmatprep.subr.bf16.mxu0 %v25301_v20  ;;  %v17707_v60 = vld [vmem:[%s25155_s1 + $0x320] ss:$8 sps:$4 sm:$0xff]  }
 0x2de   : > { %v1969_v57 = vpop.f32.mrf.mxu1  ;;  %v2822_v17 = vpop.f32.mrf.mxu0  ;;  %2906 = vrot.lane.b32.xlu0 %v16331_v34, %s25203_s29  ;;  %2904 = vrot.lane.b32.xlu1 %v16330_v26, %s25203_s29  ;;  %v17710_v10 = vld [vmem:[%s25155_s1 + $0x5a0] ss:$8 sps:$4 sm:$0xff]  }
 0x2df   : > { %v16284_v27 = vpack.c.bf16 %v1969_v57, %v1969_v57  ;;  %v16332_v41 = vpack.c.bf16 %v2822_v17, %v2822_v17 }
 0x2e0   : > { %v1971_v38 = vpop.f32.mrf.mxu1  ;;  %v2824_v30 = vpop.f32.mrf.mxu0 }
 0x2e1   : > { %2059 = vst.msk [vmem:[#allocation2 + $0x2a4] sm:$0xf] %vm2045_vm7, %v16284_v27  ;;  %v17718_v27 = vld [vmem:[%s25155_s1 + $0x5b4] ss:$8 sps:$4 sm:$0xff]  }
 0x2e2   : > { %v1974_v43 = vpop.f32.mrf.mxu1  ;;  %v2827_v22 = vpop.f32.mrf.mxu0  ;;  %3131 = vmatmul.mubr.bf16.gmra.mxu1 %v17689_v54  ;;  %4560 = vmatmul.mubr.bf16.gmra.mxu0 %v17692_v0  ;;  %v17715_v0 = vld [vmem:[%s25155_s1 + $0x334] ss:$8 sps:$4 sm:$0xff]  }
 0x2e3   : > { %v16285_v44 = vpack.c.bf16 %v1974_v43, %v1974_v43  ;;  %v16333_v39 = vpack.c.bf16 %v2827_v22, %v2827_v22  ;;  %3652 = vmatprep.mubr.bf16.mxu1 %v17697_v37  ;;  %5081 = vmatprep.mubr.bf16.mxu0 %v17700_v24 }
 0x2e4   : > { %v1976_v3 = vpop.f32.mrf.mxu1  ;;  %v2829_v6 = vpop.f32.mrf.mxu0  ;;  %2908 = vrot.lane.b32.xlu1 %v16332_v41, %s25203_s29 }
 0x2e5   : > { %2060 = vst.msk [vmem:[#allocation2 + $0x2d8] sm:$0xf] %vm2045_vm7, %v16285_v44  ;;  %2910 = vrot.lane.b32.xlu0 %v16333_v39, %s25203_s29  ;;  %v17713_v39 = vld [vmem:[%s25155_s1 + $0x330] ss:$8 sps:$4 sm:$0xff]  }
 0x2e6   : > { %v1977_v25 = vpop.f32.mrf.mxu1  ;;  %v2830_v42 = vpop.f32.mrf.mxu0  ;;  %v17716_v3 = vld [vmem:[%s25155_s1 + $0x5b0] ss:$8 sps:$4 sm:$0xff]  }
 0x2e7   : > { %v16286_v29 = vpack.c.bf16 %v1977_v25, %v1977_v25  ;;  %v16334_v14 = vpack.c.bf16 %v2830_v42, %v2830_v42  ;;  %v17721_v42 = vld [vmem:[%s25155_s1 + $0x344] ss:$8 sps:$4 sm:$0xff]  }
 0x2e8   : > { %v1979_v45 = vpop.f32.mrf.mxu1  ;;  %v2832_v47 = vpop.f32.mrf.mxu0 }
 0x2e9   : > { %2061 = vst.msk [vmem:[#allocation2 + $0x30c] sm:$0xf] %vm2045_vm7, %v16286_v29  ;;  %2912 = vrot.lane.b32.xlu1 %v16334_v14, %s25203_s29 }
 0x2ea   : > { %v2192_v9 = vpop.f32.mrf.mxu1  ;;  %v3349_v12 = vpop.f32.mrf.mxu0  ;;  %3653 = vmatmul.mubr.bf16.vlgmr.msra.gmra.mxu1 %v17695_v50  ;;  %5082 = vmatmul.mubr.bf16.vlgmr.msra.gmra.mxu0 %v17698_v48  ;;  %v17724_v50 = vld [vmem:[%s25155_s1 + $0x5c4] ss:$8 sps:$4 sm:$0xff]  }
 0x2eb   : > { %v16287_v5 = vpack.c.bf16 %v2192_v9, %v2192_v9  ;;  %4199 = vmatpush1.bf16.msra.mxu1 %v20114_v62  ;;  %5628 = vmatpush1.bf16.msra.mxu0 %v20114_v62  ;;  %v16351_v2 = vpack.c.bf16 %v3349_v12, %v3349_v12  ;;  %v17719_v12 = vld [vmem:[%s25155_s1 + $0x340] ss:$8 sps:$4 sm:$0xff]  }
 0x2ec   : > { %v2194_v35 = vpop.f32.mrf.mxu1  ;;  %v3351_v1 = vpop.f32.mrf.mxu0  ;;  %4200 = vmatprep.subr.bf16.mxu1 %v25301_v20  ;;  %5629 = vmatprep.subr.bf16.mxu0 %v25301_v20 }
 0x2ed   : > { %3660 = vmatprep.mubr.bf16.mxu1 %v17703_v36  ;;  %5089 = vmatprep.mubr.bf16.mxu0 %v17706_v23 }
 0x2ee   : > { %v2195_v49 = vpop.f32.mrf.mxu1  ;;  %v3352_v15 = vpop.f32.mrf.mxu0  ;;  %2303 = vrot.lane.b32.xlu0 %v16287_v5, %s25203_s29  ;;  %v17722_v5 = vld [vmem:[%s25155_s1 + $0x5c0] ss:$8 sps:$4 sm:$0xff]  }
 0x2ef   : > { %v16352_v58 = vpack.c.bf16 %v3352_v15, %v3352_v15  ;;  %4201 = vmatpush1.bf16.msra.mxu1 %v20084_v28  ;;  %5630 = vmatpush1.bf16.msra.mxu0 %v20084_v28  ;;  %v16288_v38 = vpack.c.bf16 %v2195_v49, %v2195_v49  ;;  %v17727_v49 = vld [vmem:[%s25155_s1 + $0x354] ss:$8 sps:$4 sm:$0xff]  }
 0x2f0   : > { %v2197_v19 = vpop.f32.mrf.mxu1  ;;  %v3354_v63 = vpop.f32.mrf.mxu0  ;;  %4202 = vmatprep.subr.bf16.mxu1 %v25301_v20  ;;  %5631 = vmatprep.subr.bf16.mxu0 %v25301_v20  ;;  %v17730_v15 = vld [vmem:[%s25155_s1 + $0x5d4] ss:$8 sps:$4 sm:$0xff]  }
 0x2f1   : > { %3462 = vrot.lane.b32.xlu1 %v16352_v58, %s25203_s29 }
 0x2f2   : > { %v20888_v61 = vpop.f32.mrf.mxu1  ;;  %v20890_v26 = vpop.f32.mrf.mxu0  ;;  %3661 = vmatmul.mubr.bf16.gmra.mxu1 %v17701_v13  ;;  %5090 = vmatmul.mubr.bf16.gmra.mxu0 %v17704_v16 }
 0x2f3   : > { %4203 = vmatpush1.bf16.msra.mxu1 %v20070_v51  ;;  %5632 = vmatpush1.bf16.msra.mxu0 %v20070_v51  ;;  %v16289_v45 = vpack.c.bf16 %v20888_v61, %v20888_v61  ;;  %v16353_v13 = vpack.c.bf16 %v20890_v26, %v20890_v26  ;;  %v17725_v61 = vld [vmem:[%s25155_s1 + $0x350] ss:$8 sps:$4 sm:$0xff]  }
 0x2f4   : > { %v2202_v7 = vpop.f32.mrf.mxu1  ;;  %v3359_v40 = vpop.f32.mrf.mxu0  ;;  %4204 = vmatprep.subr.bf16.mxu1 %v25301_v20  ;;  %5633 = vmatprep.subr.bf16.mxu0 %v25301_v20  ;;  %v17728_v26 = vld [vmem:[%s25155_s1 + $0x5d0] ss:$8 sps:$4 sm:$0xff]  }
 0x2f5   : > { %3668 = vmatprep.mubr.bf16.mxu1 %v17709_v11  ;;  %5097 = vmatprep.mubr.bf16.mxu0 %v17712_v55 }
 0x2f6   : > { %v2203_v32 = vpop.f32.mrf.mxu1  ;;  %v3360_v34 = vpop.f32.mrf.mxu0  ;;  %3460 = vrot.lane.b32.xlu0 %v16351_v2, %s25203_s29 }
 0x2f7   : > { %v16290_v57 = vpack.c.bf16 %v2203_v32, %v2203_v32  ;;  %4205 = vmatpush1.bf16.msra.mxu1 %v20036_v53  ;;  %5634 = vmatpush1.bf16.msra.mxu0 %v20036_v53  ;;  %v16354_v37 = vpack.c.bf16 %v3360_v34, %v3360_v34  ;;  %v17733_v32 = vld [vmem:[%s25155_s1 + $0x364] ss:$8 sps:$4 sm:$0xff]  }
 0x2f8   : > { %v2205_v17 = vpop.f32.mrf.mxu1  ;;  %v3362_v54 = vpop.f32.mrf.mxu0  ;;  %4206 = vmatprep.subr.bf16.mxu1 %v25301_v20  ;;  %5635 = vmatprep.subr.bf16.mxu0 %v25301_v20  ;;  %v17736_v34 = vld [vmem:[%s25155_s1 + $0x5e4] ss:$8 sps:$4 sm:$0xff]  }
 0x2f9   : > { %2309 = vrot.lane.b32.xlu1 %v16290_v57, %s25203_s29 }
 0x2fa   : > { %v20914_v24 = vpop.f32.mrf.mxu1  ;;  %v20916_v41 = vpop.f32.mrf.mxu0  ;;  %3669 = vmatmul.mubr.bf16.gmra.mxu1 %v17707_v60  ;;  %5098 = vmatmul.mubr.bf16.gmra.mxu0 %v17710_v10 }
 0x2fb   : > { %4207 = vmatpush1.bf16.msra.mxu1 %v20018_v4  ;;  %5636 = vmatpush1.bf16.msra.mxu0 %v20018_v4  ;;  %v16291_v17 = vpack.c.bf16 %v20914_v24, %v20914_v24  ;;  %v17734_v24 = vld [vmem:[%s25155_s1 + $0x5e0] ss:$8 sps:$4 sm:$0xff]  }
 0x2fc   : > { %v2210_v30 = vpop.f32.mrf.mxu1  ;;  %v3367_v43 = vpop.f32.mrf.mxu0  ;;  %4208 = vmatprep.subr.bf16.mxu1 %v25301_v20  ;;  %5637 = vmatprep.subr.bf16.mxu0 %v25301_v20 }
 0x2fd   : > { %3676 = vmatprep.mubr.bf16.mxu1 %v17715_v0  ;;  %5105 = vmatprep.mubr.bf16.mxu0 %v17718_v27 }
 0x2fe   : > { %v2211_v22 = vpop.f32.mrf.mxu1  ;;  %v3368_v44 = vpop.f32.mrf.mxu0  ;;  %2305 = vrot.lane.b32.xlu0 %v16288_v38, %s25203_s29  ;;  %3466 = vrot.lane.b32.xlu1 %v16354_v37, %s25203_s29  ;;  %v17731_v38 = vld [vmem:[%s25155_s1 + $0x360] ss:$8 sps:$4 sm:$0xff]  }
 0x2ff   : > { %4209 = vmatpush1.bf16.msra.mxu1 %v19988_v59  ;;  %5638 = vmatpush1.bf16.msra.mxu0 %v19988_v59  ;;  %v16292_v48 = vpack.c.bf16 %v2211_v22, %v2211_v22  ;;  %v16356_v16 = vpack.c.bf16 %v3368_v44, %v3368_v44  ;;  %v17739_v22 = vld [vmem:[%s25155_s1 + $0x374] ss:$8 sps:$4 sm:$0xff]  }
 0x300   : > { %v2213_v6 = vpop.f32.mrf.mxu1  ;;  %v3370_v25 = vpop.f32.mrf.mxu0  ;;  %4210 = vmatprep.subr.bf16.mxu1 %v25301_v20  ;;  %5639 = vmatprep.subr.bf16.mxu0 %v25301_v20  ;;  %v17742_v44 = vld [vmem:[%s25155_s1 + $0x5f4] ss:$8 sps:$4 sm:$0xff]  }
 0x302   : > { %v20940_v29 = vpop.f32.mrf.mxu1  ;;  %v20942_v14 = vpop.f32.mrf.mxu0  ;;  %3677 = vmatmul.mubr.bf16.gmra.mxu1 %v17713_v39  ;;  %5106 = vmatmul.mubr.bf16.gmra.mxu0 %v17716_v3  ;;  %v16355_v39 = vpack.c.bf16 %v20916_v41, %v20916_v41 }
 0x303   : > { %4211 = vmatpush1.bf16.msra.mxu1 %v19968_v52  ;;  %5640 = vmatpush1.bf16.msra.mxu0 %v19968_v52 }
 0x304   : > { %v2218_v47 = vpop.f32.mrf.mxu1  ;;  %v3375_v36 = vpop.f32.mrf.mxu0  ;;  %4212 = vmatprep.subr.bf16.mxu1 %v25301_v20  ;;  %5641 = vmatprep.subr.bf16.mxu0 %v25301_v20 }
 0x305   : > { %3684 = vmatprep.mubr.bf16.mxu1 %v17721_v42  ;;  %5113 = vmatprep.mubr.bf16.mxu0 %v17724_v50  ;;  %v17740_v47 = vld [vmem:[%s25155_s1 + $0x5f0] ss:$8 sps:$4 sm:$0xff]   ;;  %v17745_v36 = vld [vmem:[%s25155_s1 + $0x404] ss:$8 sps:$4 sm:$0xff]  }
 0x306   : > { %v2219_v23 = vpop.f32.mrf.mxu1  ;;  %v20950_v9 = vpop.f32.mrf.mxu0  ;;  %2307 = vrot.lane.b32.xlu0 %v16289_v45, %s25203_s29  ;;  %2313 = vrot.lane.b32.xlu1 %v16292_v48, %s25203_s29  ;;  %v17737_v45 = vld [vmem:[%s25155_s1 + $0x370] ss:$8 sps:$4 sm:$0xff]  }
 0x307   : > { %4213 = vmatpush1.bf16.msra.mxu1 %v19935_v8  ;;  %5642 = vmatpush1.bf16.msra.mxu0 %v19935_v8  ;;  %v16294_v60 = vpack.c.bf16 %v2219_v23, %v2219_v23  ;;  %v16358_v3 = vpack.c.bf16 %v20950_v9, %v20950_v9  ;;  %v17748_v23 = vld [vmem:[%s25155_s1 + $0x684] ss:$8 sps:$4 sm:$0xff]  }
 0x308   : > { %v2221_v35 = vpop.f32.mrf.mxu1  ;;  %v3378_v1 = vpop.f32.mrf.mxu0  ;;  %4220 = vmatprep.subr.bf16.mxu1 %v25301_v20  ;;  %5649 = vmatprep.subr.bf16.mxu0 %v25301_v20 }
 0x309   : > { %v16293_v35 = vpack.c.bf16 %v20940_v29, %v20940_v29 }
 0x30a   : > { %v20972_v58 = vpop.f32.mrf.mxu1  ;;  %v20974_v19 = vpop.f32.mrf.mxu0  ;;  %3685 = vmatmul.mubr.bf16.gmra.mxu1 %v17719_v12  ;;  %5114 = vmatmul.mubr.bf16.gmra.mxu0 %v17722_v5 }
 0x30b   : > { %4221 = vmatpush2.bf16.msra.mxu1 %v20199_v46  ;;  %5650 = vmatpush2.bf16.msra.mxu0 %v20199_v46 }
 0x30c   : > { %v2226_v63 = vpop.f32.mrf.mxu1  ;;  %v3383_v11 = vpop.f32.mrf.mxu0  ;;  %4222 = vmatprep.subr.bf16.mxu1 %v25301_v20  ;;  %5651 = vmatprep.subr.bf16.mxu0 %v25301_v20 }
 0x30d   : > { %3692 = vmatprep.mubr.bf16.mxu1 %v17727_v49  ;;  %5121 = vmatprep.mubr.bf16.mxu0 %v17730_v15  ;;  %v16357_v15 = vpack.c.bf16 %v20942_v14, %v20942_v14  ;;  %v17746_v14 = vld [vmem:[%s25155_s1 + $0x680] ss:$8 sps:$4 sm:$0xff]  }
 0x30e   : > { %v20980_v55 = vpop.f32.mrf.mxu1  ;;  %v20982_v2 = vpop.f32.mrf.mxu0  ;;  %3464 = vrot.lane.b32.xlu0 %v16353_v13, %s25203_s29  ;;  %3470 = vrot.lane.b32.xlu1 %v16356_v16, %s25203_s29 }
 0x30f   : > { %4223 = vmatpush2.bf16.msra.mxu1 %v20180_v56  ;;  %5652 = vmatpush2.bf16.msra.mxu0 %v20180_v56  ;;  %v16296_v9 = vpack.c.bf16 %v20980_v55, %v20980_v55  ;;  %v16360_v13 = vpack.c.bf16 %v20982_v2, %v20982_v2  ;;  %v17743_v55 = vld [vmem:[%s25155_s1 + $0x400] ss:$8 sps:$4 sm:$0xff]  }
 0x310   : > { %v2229_v7 = vpop.f32.mrf.mxu1  ;;  %v3386_v40 = vpop.f32.mrf.mxu0  ;;  %4224 = vmatprep.subr.bf16.mxu1 %v25301_v20  ;;  %5653 = vmatprep.subr.bf16.mxu0 %v25301_v20 }
 0x311   : > { %v17754_v7 = vld [vmem:[%s25155_s1 + $0x694] ss:$8 sps:$4 sm:$0xff]  }
 0x312   : > { %v21002_v10 = vpop.f32.mrf.mxu1  ;;  %v21004_v57 = vpop.f32.mrf.mxu0  ;;  %3693 = vmatmul.mubr.bf16.gmra.mxu1 %v17725_v61  ;;  %5122 = vmatmul.mubr.bf16.gmra.mxu0 %v17728_v26  ;;  %v17751_v26 = vld [vmem:[%s25155_s1 + $0x414] ss:$8 sps:$4 sm:$0xff]  }
 0x313   : > { %4225 = vmatpush2.bf16.msra.mxu1 %v20168_v31  ;;  %5654 = vmatpush2.bf16.msra.mxu0 %v20168_v31 }
 0x314   : > { %v2234_v54 = vpop.f32.mrf.mxu1  ;;  %v3391_v0 = vpop.f32.mrf.mxu0  ;;  %4226 = vmatprep.subr.bf16.mxu1 %v25301_v20  ;;  %5655 = vmatprep.subr.bf16.mxu0 %v25301_v20 }
 0x315   : > { %3700 = vmatprep.mubr.bf16.mxu1 %v17733_v32  ;;  %5129 = vmatprep.mubr.bf16.mxu0 %v17736_v34  ;;  %v16295_v54 = vpack.c.bf16 %v20972_v58, %v20972_v58  ;;  %v17752_v58 = vld [vmem:[%s25155_s1 + $0x690] ss:$8 sps:$4 sm:$0xff]  }
 0x316   : > { %v21012_v27 = vpop.f32.mrf.mxu1  ;;  %v21014_v37 = vpop.f32.mrf.mxu0  ;;  %2311 = vrot.lane.b32.xlu0 %v16291_v17, %s25203_s29  ;;  %2317 = vrot.lane.b32.xlu1 %v16294_v60, %s25203_s29 }
 0x317   : > { %4227 = vmatpush2.bf16.msra.mxu1 %v20154_v21  ;;  %5656 = vmatpush2.bf16.msra.mxu0 %v20154_v21  ;;  %v16298_v40 = vpack.c.bf16 %v21012_v27, %v21012_v27 }
 0x318   : > { %v2237_v30 = vpop.f32.mrf.mxu1  ;;  %v3394_v43 = vpop.f32.mrf.mxu0  ;;  %4228 = vmatprep.subr.bf16.mxu1 %v25301_v20  ;;  %5657 = vmatprep.subr.bf16.mxu0 %v25301_v20 }
 0x319   : > { %v17749_v30 = vld [vmem:[%s25155_s1 + $0x410] ss:$8 sps:$4 sm:$0xff]  }
 0x31a   : > { %v21038_v6 = vpop.f32.mrf.mxu1  ;;  %v21040_v25 = vpop.f32.mrf.mxu0  ;;  %3701 = vmatmul.mubr.bf16.gmra.mxu1 %v17731_v38  ;;  %5130 = vmatmul.mubr.bf16.gmra.mxu0 %v17734_v24 }
 0x31b   : > { %4229 = vmatpush2.bf16.msra.mxu1 %v20126_v18  ;;  %5658 = vmatpush2.bf16.msra.mxu0 %v20126_v18 }
 0x31c   : > { %v2242_v42 = vpop.f32.mrf.mxu1  ;;  %v3399_v50 = vpop.f32.mrf.mxu0  ;;  %3708 = vmatprep.mubr.bf16.mxu1 %v17739_v22  ;;  %5137 = vmatprep.mubr.bf16.mxu0 %v17742_v44 }
 0x31d   : > { %4776 = vmatprep.subr.bf16.mxu1 %v25301_v20  ;;  %6205 = vmatprep.subr.bf16.mxu0 %v25301_v20  ;;  %v16359_v50 = vpack.c.bf16 %v20974_v19, %v20974_v19 }
 0x31e   : > { %v21046_v41 = vpop.f32.mrf.mxu1  ;;  %v21048_v48 = vpop.f32.mrf.mxu0  ;;  %3468 = vrot.lane.b32.xlu0 %v16355_v39, %s25203_s29  ;;  %3474 = vrot.lane.b32.xlu1 %v16358_v3, %s25203_s29  ;;  %v17757_v39 = vld [vmem:[%s25155_s1 + $0x424] ss:$8 sps:$4 sm:$0xff]  }
 0x31f   : > { %v17760_v3 = vld [vmem:[%s25155_s1 + $0x6a4] ss:$8 sps:$4 sm:$0xff]  }
 0x320   : > { %v2245_v12 = vpop.f32.mrf.mxu1  ;;  %v3402_v5 = vpop.f32.mrf.mxu0 }
 0x321   : > { %v2883_v17 = vpop.permute.xlu1 %2882 }
 0x322   : > { %v21068_v1 = vpop.f32.mrf.mxu1  ;;  %v21070_v49 = vpop.f32.mrf.mxu0  ;;  %3709 = vmatmul.mubr.bf16.gmra.mxu1 %v17737_v45  ;;  %5138 = vmatmul.mubr.bf16.gmra.mxu0 %v17740_v47  ;;  %v16362_v45 = vpack.c.bf16 %v21014_v37, %v21014_v37 }
 0x323   : > { %4230 = vmatprep.mubr.bf16.mxu1 %v17745_v36  ;;  %5659 = vmatprep.mubr.bf16.mxu0 %v17748_v23 }
 0x324   : > { %v2250_v16 = vpop.f32.mrf.mxu1  ;;  %v3407_v63 = vpop.f32.mrf.mxu0  ;;  %2315 = vrot.lane.b32.xlu0 %v16293_v35, %s25203_s29  ;;  %2321 = vrot.lane.b32.xlu1 %v16296_v9, %s25203_s29  ;;  %v17755_v35 = vld [vmem:[%s25155_s1 + $0x420] ss:$8 sps:$4 sm:$0xff]  }
 0x326   : > { %v21078_v29 = vpop.f32.mrf.mxu1  ;;  %v21080_v11 = vpop.f32.mrf.mxu0 }
 0x328   : > { %v2253_v61 = vpop.f32.mrf.mxu1  ;;  %v3410_v2 = vpop.f32.mrf.mxu0  ;;  %3472 = vrot.lane.b32.xlu0 %v16357_v15, %s25203_s29  ;;  %3478 = vrot.lane.b32.xlu1 %v16360_v13, %s25203_s29  ;;  %v17758_v15 = vld [vmem:[%s25155_s1 + $0x6a0] ss:$8 sps:$4 sm:$0xff]  }
 0x329   : > { %v2885_v42 = vpop.permute.xlu1 %2884  ;;  %v2887_v19 = vpop.permute.xlu0 %2886  ;;  %v16300_v2 = vpack.c.bf16 %v21046_v41, %v21046_v41 }
 0x32a   : > { %v21098_v32 = vpop.f32.mrf.mxu0  ;;  %5660 = vmatmul.mubr.bf16.vlgmr.msra.gmra.mxu0 %v17746_v14  ;;  %v2498_v34 = vpop.f32.mrf.mxu1  ;;  %4231 = vmatmul.mubr.bf16.vlgmr.msra.gmra.mxu1 %v17743_v55  ;;  %v17763_v55 = vld [vmem:[%s25155_s1 + $0x434] ss:$8 sps:$4 sm:$0xff]  }
 0x32b   : > { %6206 = vmatpush1.bf16.msra.mxu0 %v20114_v62  ;;  %v16303_v60 = vpack.c.bf16 %v2498_v34, %v2498_v34  ;;  %4777 = vmatpush1.bf16.msra.mxu1 %v20114_v62  ;;  %v17766_v14 = vld [vmem:[%s25155_s1 + $0x6b4] ss:$8 sps:$4 sm:$0xff]   ;;  %v16297_v34 = vpack.c.bf16 %v21002_v10, %v21002_v10  ;;  %v17764_v10 = vld [vmem:[%s25155_s1 + $0x6b0] ss:$8 sps:$4 sm:$0xff]  }
 0x32c   : > { %v2500_v0 = vpop.f32.mrf.mxu1  ;;  %v3929_v38 = vpop.f32.mrf.mxu0  ;;  %4778 = vmatprep.subr.bf16.mxu1 %v25301_v20  ;;  %6207 = vmatprep.subr.bf16.mxu0 %v25301_v20 }
 0x32d   : > { %2625 = vst.msk [vmem:[#allocation2 + $0x4] sm:$0xf] %vm2045_vm7, %v16303_v60  ;;  %4238 = vmatprep.mubr.bf16.mxu1 %v17751_v26  ;;  %5667 = vmatprep.mubr.bf16.mxu0 %v17754_v7  ;;  %v17761_v38 = vld [vmem:[%s25155_s1 + $0x430] ss:$8 sps:$4 sm:$0xff]  }
 0x32e   : > { %v21107_v27 = vpop.f32.mrf.mxu0  ;;  %v2501_v24 = vpop.f32.mrf.mxu1  ;;  %2319 = vrot.lane.b32.xlu0 %v16295_v54, %s25203_s29  ;;  %2325 = vrot.lane.b32.xlu1 %v16298_v40, %s25203_s29  ;;  %2930 = vst.msk [vmem:[#allocation2 + $0x4] sm:$0xf] %vm2351_vm8, %v2883_v17 }
 0x32f   : > { %6208 = vmatpush1.bf16.msra.mxu0 %v20084_v28  ;;  %v16304_v43 = vpack.c.bf16 %v2501_v24, %v2501_v24  ;;  %4779 = vmatpush1.bf16.msra.mxu1 %v20084_v28 }
 0x330   : > { %v2503_v22 = vpop.f32.mrf.mxu1  ;;  %v3932_v44 = vpop.f32.mrf.mxu0  ;;  %4780 = vmatprep.subr.bf16.mxu1 %v25301_v20  ;;  %6209 = vmatprep.subr.bf16.mxu0 %v25301_v20 }
 0x331   : > { %2626 = vst.msk [vmem:[#allocation2 + $0x38] sm:$0xf] %vm2045_vm7, %v16304_v43  ;;  %v2889_v61 = vpop.permute.xlu1 %2888  ;;  %v2891_v41 = vpop.permute.xlu0 %2890  ;;  %v17769_v43 = vld [vmem:[%s25155_s1 + $0x444] ss:$8 sps:$4 sm:$0xff]  }
 0x332   : > { %v21133_v47 = vpop.f32.mrf.mxu0  ;;  %5668 = vmatmul.mubr.bf16.gmra.mxu0 %v17752_v58  ;;  %v2506_v36 = vpop.f32.mrf.mxu1  ;;  %4239 = vmatmul.mubr.bf16.gmra.mxu1 %v17749_v30  ;;  %2931 = vst.msk [vmem:[#allocation2 + $0x38] sm:$0xf] %vm2351_vm8, %v2885_v42  ;;  %v17772_v22 = vld [vmem:[%s25155_s1 + $0x6c4] ss:$8 sps:$4 sm:$0xff]  }
 0x333   : > { %6210 = vmatpush1.bf16.msra.mxu0 %v20070_v51  ;;  %v16305_v23 = vpack.c.bf16 %v2506_v36, %v2506_v36  ;;  %4781 = vmatpush1.bf16.msra.mxu1 %v20070_v51 }
 0x334   : > { %v2508_v9 = vpop.f32.mrf.mxu1  ;;  %v3937_v12 = vpop.f32.mrf.mxu0  ;;  %4782 = vmatprep.subr.bf16.mxu1 %v25301_v20  ;;  %6211 = vmatprep.subr.bf16.mxu0 %v25301_v20 }
 0x335   : > { %2627 = vst.msk [vmem:[#allocation2 + $0x6c] sm:$0xf] %vm2045_vm7, %v16305_v23  ;;  %4246 = vmatprep.mubr.bf16.mxu1 %v17757_v39  ;;  %5675 = vmatprep.mubr.bf16.mxu0 %v17760_v3  ;;  %v16361_v39 = vpack.c.bf16 %v21004_v57, %v21004_v57  ;;  %v16364_v3 = vpack.c.bf16 %v21048_v48, %v21048_v48  ;;  %v17767_v12 = vld [vmem:[%s25155_s1 + $0x440] ss:$8 sps:$4 sm:$0xff]  }
 0x336   : > { %v2509_v37 = vpop.f32.mrf.mxu1  ;;  %v21141_v5 = vpop.f32.mrf.mxu0  ;;  %3476 = vrot.lane.b32.xlu0 %v16359_v50, %s25203_s29  ;;  %3482 = vrot.lane.b32.xlu1 %v16362_v45, %s25203_s29  ;;  %2932 = vst.msk [vmem:[#allocation2 + $0x6c] sm:$0xf] %vm2351_vm8, %v2887_v19  ;;  %v17770_v19 = vld [vmem:[%s25155_s1 + $0x6c0] ss:$8 sps:$4 sm:$0xff]  }
 0x337   : > { %v16306_v13 = vpack.c.bf16 %v2509_v37, %v2509_v37  ;;  %4783 = vmatpush1.bf16.msra.mxu1 %v20036_v53  ;;  %6212 = vmatpush1.bf16.msra.mxu0 %v20036_v53 }
 0x338   : > { %v2511_v16 = vpop.f32.mrf.mxu1  ;;  %v3940_v63 = vpop.f32.mrf.mxu0  ;;  %4784 = vmatprep.subr.bf16.mxu1 %v25301_v20  ;;  %6213 = vmatprep.subr.bf16.mxu0 %v25301_v20 }
 0x339   : > { %2628 = vst.msk [vmem:[#allocation2 + $0xa0] sm:$0xf] %vm2045_vm7, %v16306_v13  ;;  %v2893_v44 = vpop.permute.xlu1 %2892  ;;  %v2895_v36 = vpop.permute.xlu0 %2894  ;;  %v17775_v16 = vld [vmem:[%s25155_s1 + $0x454] ss:$8 sps:$4 sm:$0xff]  }
 0x33a   : > { %v21165_v26 = vpop.f32.mrf.mxu0  ;;  %5676 = vmatmul.mubr.bf16.gmra.mxu0 %v17758_v15  ;;  %v2514_v7 = vpop.f32.mrf.mxu1  ;;  %4247 = vmatmul.mubr.bf16.gmra.mxu1 %v17755_v35  ;;  %2933 = vst.msk [vmem:[#allocation2 + $0xa0] sm:$0xf] %vm2351_vm8, %v2889_v61  ;;  %v17778_v63 = vld [vmem:[%s25155_s1 + $0x6d4] ss:$8 sps:$4 sm:$0xff]  }
 0x33b   : > { %6214 = vmatpush1.bf16.msra.mxu0 %v20018_v4  ;;  %v16307_v40 = vpack.c.bf16 %v2514_v7, %v2514_v7  ;;  %4785 = vmatpush1.bf16.msra.mxu1 %v20018_v4 }
 0x33c   : > { %v2516_v60 = vpop.f32.mrf.mxu1  ;;  %v3945_v17 = vpop.f32.mrf.mxu0  ;;  %4786 = vmatprep.subr.bf16.mxu1 %v25301_v20  ;;  %6215 = vmatprep.subr.bf16.mxu0 %v25301_v20 }
 0x33d   : > { %2629 = vst.msk [vmem:[#allocation2 + $0xd4] sm:$0xf] %vm2045_vm7, %v16307_v40  ;;  %4254 = vmatprep.mubr.bf16.mxu1 %v17763_v55  ;;  %5683 = vmatprep.mubr.bf16.mxu0 %v17766_v14  ;;  %v16302_v14 = vpack.c.bf16 %v21078_v29, %v21078_v29  ;;  %v16299_v40 = vpack.c.bf16 %v21038_v6, %v21038_v6  ;;  %v17776_v6 = vld [vmem:[%s25155_s1 + $0x6d0] ss:$8 sps:$4 sm:$0xff]  }
 0x33e   : > { %v21175_v54 = vpop.f32.mrf.mxu0  ;;  %v2517_v0 = vpop.f32.mrf.mxu1  ;;  %2323 = vrot.lane.b32.xlu0 %v16297_v34, %s25203_s29  ;;  %2329 = vrot.lane.b32.xlu1 %v16300_v2, %s25203_s29  ;;  %2934 = vst.msk [vmem:[#allocation2 + $0xd4] sm:$0xf] %vm2351_vm8, %v2891_v41 }
 0x33f   : > { %6216 = vmatpush1.bf16.msra.mxu0 %v19988_v59  ;;  %v16308_v24 = vpack.c.bf16 %v2517_v0, %v2517_v0  ;;  %4787 = vmatpush1.bf16.msra.mxu1 %v19988_v59  ;;  %v17773_v0 = vld [vmem:[%s25155_s1 + $0x450] ss:$8 sps:$4 sm:$0xff]  }
 0x340   : > { %v2519_v30 = vpop.f32.mrf.mxu1  ;;  %v3948_v58 = vpop.f32.mrf.mxu0  ;;  %4788 = vmatprep.subr.bf16.mxu1 %v25301_v20  ;;  %6217 = vmatprep.subr.bf16.mxu0 %v25301_v20 }
 0x341   : > { %2630 = vst.msk [vmem:[#allocation2 + $0x108] sm:$0xf] %vm2045_vm7, %v16308_v24  ;;  %v2897_v35 = vpop.permute.xlu1 %2896  ;;  %v2899_v55 = vpop.permute.xlu0 %2898  ;;  %v17781_v58 = vld [vmem:[%s25155_s1 + $0x464] ss:$8 sps:$4 sm:$0xff]  }
 0x342   : > { %v21201_v42 = vpop.f32.mrf.mxu0  ;;  %5684 = vmatmul.mubr.bf16.gmra.mxu0 %v17764_v10  ;;  %v2522_v50 = vpop.f32.mrf.mxu1  ;;  %4255 = vmatmul.mubr.bf16.gmra.mxu1 %v17761_v38  ;;  %2935 = vst.msk [vmem:[#allocation2 + $0x108] sm:$0xf] %vm2351_vm8, %v2893_v44  ;;  %v16366_v44 = vpack.c.bf16 %v21080_v11, %v21080_v11 }
 0x343   : > { %6218 = vmatpush1.bf16.msra.mxu0 %v19968_v52  ;;  %v16309_v45 = vpack.c.bf16 %v2522_v50, %v2522_v50  ;;  %4789 = vmatpush1.bf16.msra.mxu1 %v19968_v52 }
 0x344   : > { %v2524_v23 = vpop.f32.mrf.mxu1  ;;  %v3953_v9 = vpop.f32.mrf.mxu0  ;;  %4790 = vmatprep.subr.bf16.mxu1 %v25301_v20  ;;  %6219 = vmatprep.subr.bf16.mxu0 %v25301_v20 }
 0x345   : > { %2631 = vst.msk [vmem:[#allocation2 + $0x13c] sm:$0xf] %vm2045_vm7, %v16309_v45  ;;  %4262 = vmatprep.mubr.bf16.mxu1 %v17769_v43  ;;  %5691 = vmatprep.mubr.bf16.mxu0 %v17772_v22  ;;  %v17784_v43 = vld [vmem:[%s25155_s1 + $0x6e4] ss:$8 sps:$4 sm:$0xff]   ;;  %v16363_v22 = vpack.c.bf16 %v21040_v25, %v21040_v25 }
 0x346   : > { %v21209_v57 = vpop.f32.mrf.mxu0  ;;  %v2525_v48 = vpop.f32.mrf.mxu1  ;;  %3480 = vrot.lane.b32.xlu0 %v16361_v39, %s25203_s29  ;;  %3486 = vrot.lane.b32.xlu1 %v16364_v3, %s25203_s29  ;;  %2936 = vst.msk [vmem:[#allocation2 + $0x13c] sm:$0xf] %vm2351_vm8, %v2895_v36 }
 0x347   : > { %6220 = vmatpush1.bf16.msra.mxu0 %v19935_v8  ;;  %v16310_v37 = vpack.c.bf16 %v2525_v48, %v2525_v48  ;;  %4791 = vmatpush1.bf16.msra.mxu1 %v19935_v8  ;;  %v17779_v48 = vld [vmem:[%s25155_s1 + $0x460] ss:$8 sps:$4 sm:$0xff]  }
 0x348   : > { %v2527_v15 = vpop.f32.mrf.mxu1  ;;  %v3956_v13 = vpop.f32.mrf.mxu0  ;;  %4798 = vmatprep.subr.bf16.mxu1 %v25301_v20  ;;  %6227 = vmatprep.subr.bf16.mxu0 %v25301_v20 }
 0x349   : > { %2632 = vst.msk [vmem:[#allocation2 + $0x170] sm:$0xf] %vm2045_vm7, %v16310_v37  ;;  %v2901_v29 = vpop.permute.xlu1 %2900  ;;  %v2903_v10 = vpop.permute.xlu0 %2902  ;;  %v17787_v15 = vld [vmem:[%s25155_s1 + $0x474] ss:$8 sps:$4 sm:$0xff]  }
 0x34a   : > { %v21233_v61 = vpop.f32.mrf.mxu0  ;;  %5692 = vmatmul.mubr.bf16.gmra.mxu0 %v17770_v19  ;;  %v2530_v2 = vpop.f32.mrf.mxu1  ;;  %4263 = vmatmul.mubr.bf16.gmra.mxu1 %v17767_v12  ;;  %2937 = vst.msk [vmem:[#allocation2 + $0x170] sm:$0xf] %vm2351_vm8, %v2897_v35  ;;  %v17782_v12 = vld [vmem:[%s25155_s1 + $0x6e0] ss:$8 sps:$4 sm:$0xff]   ;;  %v17790_v13 = vld [vmem:[%s25155_s1 + $0x6f4] ss:$8 sps:$4 sm:$0xff]  }
 0x34b   : > { %6228 = vmatpush2.bf16.msra.mxu0 %v20199_v46  ;;  %v16311_v7 = vpack.c.bf16 %v2530_v2, %v2530_v2  ;;  %4799 = vmatpush2.bf16.msra.mxu1 %v20199_v46 }
 0x34c   : > { %v2532_v34 = vpop.f32.mrf.mxu1  ;;  %v3961_v60 = vpop.f32.mrf.mxu0  ;;  %4800 = vmatprep.subr.bf16.mxu1 %v25301_v20  ;;  %6229 = vmatprep.subr.bf16.mxu0 %v25301_v20 }
 0x34d   : > { %2633 = vst.msk [vmem:[#allocation2 + $0x1a4] sm:$0xf] %vm2045_vm7, %v16311_v7  ;;  %4270 = vmatprep.mubr.bf16.mxu1 %v17775_v16  ;;  %5699 = vmatprep.mubr.bf16.mxu0 %v17778_v63  ;;  %v16384_v63 = vpack.c.bf16 %v21107_v27, %v21107_v27 }
 0x34e   : > { %v21243_v17 = vpop.f32.mrf.mxu0  ;;  %v2533_v41 = vpop.f32.mrf.mxu1  ;;  %2327 = vrot.lane.b32.xlu0 %v16299_v40, %s25203_s29  ;;  %2333 = vrot.lane.b32.xlu1 %v16302_v14, %s25203_s29  ;;  %2938 = vst.msk [vmem:[#allocation2 + $0x1a4] sm:$0xf] %vm2351_vm8, %v2899_v55  ;;  %v16301_v40 = vpack.c.bf16 %v21068_v1, %v21068_v1  ;;  %v17788_v1 = vld [vmem:[%s25155_s1 + $0x6f0] ss:$8 sps:$4 sm:$0xff]  }
 0x34f   : > { %6230 = vmatpush2.bf16.msra.mxu0 %v20180_v56  ;;  %v16312_v38 = vpack.c.bf16 %v2533_v41, %v2533_v41  ;;  %4801 = vmatpush2.bf16.msra.mxu1 %v20180_v56  ;;  %v17785_v41 = vld [vmem:[%s25155_s1 + $0x470] ss:$8 sps:$4 sm:$0xff]  }
 0x350   : > { %v2535_v24 = vpop.f32.mrf.mxu1  ;;  %v3964_v30 = vpop.f32.mrf.mxu0  ;;  %4802 = vmatprep.subr.bf16.mxu1 %v25301_v20  ;;  %6231 = vmatprep.subr.bf16.mxu0 %v25301_v20 }
 0x351   : > { %2634 = vst.msk [vmem:[#allocation2 + $0x1d8] sm:$0xf] %vm2045_vm7, %v16312_v38  ;;  %v2905_v45 = vpop.permute.xlu1 %2904  ;;  %v2907_v25 = vpop.permute.xlu0 %2906  ;;  %v17796_v38 = vld [vmem:[%s25155_s1 + $0x784] ss:$8 sps:$4 sm:$0xff]   ;;  %v16365_v24 = vpack.c.bf16 %v21070_v49, %v21070_v49  ;;  %v16386_v30 = vpack.c.bf16 %v21141_v5, %v21141_v5  ;;  %v16383_v49 = vpack.c.bf16 %v21098_v32, %v21098_v32  ;;  %v16388_v5 = vpack.c.bf16 %v21175_v54, %v21175_v54  ;;  %v17794_v32 = vld [vmem:[%s25155_s1 + $0x780] ss:$8 sps:$4 sm:$0xff]  }
 0x352   : > { %v21269_v39 = vpop.f32.mrf.mxu0  ;;  %5700 = vmatmul.mubr.bf16.gmra.mxu0 %v17776_v6  ;;  %v2538_v3 = vpop.f32.mrf.mxu1  ;;  %4271 = vmatmul.mubr.bf16.gmra.mxu1 %v17773_v0  ;;  %2939 = vst.msk [vmem:[#allocation2 + $0x1d8] sm:$0xf] %vm2351_vm8, %v2901_v29  ;;  %v17793_v6 = vld [vmem:[%s25155_s1 + $0x504] ss:$8 sps:$4 sm:$0xff]  }
 0x353   : > { %6232 = vmatpush2.bf16.msra.mxu0 %v20168_v31  ;;  %v16313_v50 = vpack.c.bf16 %v2538_v3, %v2538_v3  ;;  %4803 = vmatpush2.bf16.msra.mxu1 %v20168_v31 }
 0x354   : > { %v2540_v36 = vpop.f32.mrf.mxu1  ;;  %v3969_v23 = vpop.f32.mrf.mxu0  ;;  %4804 = vmatprep.subr.bf16.mxu1 %v25301_v20  ;;  %6233 = vmatprep.subr.bf16.mxu0 %v25301_v20 }
 0x355   : > { %2635 = vst.msk [vmem:[#allocation2 + $0x20c] sm:$0xf] %vm2045_vm7, %v16313_v50  ;;  %4278 = vmatprep.mubr.bf16.mxu1 %v17781_v58  ;;  %5707 = vmatprep.mubr.bf16.mxu0 %v17784_v43 }
 0x356   : > { %v21277_v11 = vpop.f32.mrf.mxu0  ;;  %v2541_v9 = vpop.f32.mrf.mxu1  ;;  %3484 = vrot.lane.b32.xlu0 %v16363_v22, %s25203_s29  ;;  %3490 = vrot.lane.b32.xlu1 %v16366_v44, %s25203_s29  ;;  %2940 = vst.msk [vmem:[#allocation2 + $0x20c] sm:$0xf] %vm2351_vm8, %v2903_v10 }
 0x357   : > { %6234 = vmatpush2.bf16.msra.mxu0 %v20154_v21  ;;  %v16314_v19 = vpack.c.bf16 %v2541_v9, %v2541_v9  ;;  %4805 = vmatpush2.bf16.msra.mxu1 %v20154_v21  ;;  %v2909_v16 = vpop.permute.xlu1 %2908  ;;  %v2911_v7 = vpop.permute.xlu0 %2910 }
 0x358   : > { %v2543_v37 = vpop.f32.mrf.mxu1  ;;  %v3972_v35 = vpop.f32.mrf.mxu0  ;;  %4806 = vmatprep.subr.bf16.mxu1 %v25301_v20  ;;  %6235 = vmatprep.subr.bf16.mxu0 %v25301_v20 }
 0x359   : > { %2636 = vst.msk [vmem:[#allocation2 + $0x240] sm:$0xf] %vm2045_vm7, %v16314_v19  ;;  %v17799_v37 = vld [vmem:[%s25155_s1 + $0x514] ss:$8 sps:$4 sm:$0xff]  }
 0x35a   : > { %v21301_v55 = vpop.f32.mrf.mxu0  ;;  %5708 = vmatmul.mubr.bf16.gmra.mxu0 %v17782_v12  ;;  %v2546_v14 = vpop.f32.mrf.mxu1  ;;  %4279 = vmatmul.mubr.bf16.gmra.mxu1 %v17779_v48  ;;  %2941 = vst.msk [vmem:[#allocation2 + $0x240] sm:$0xf] %vm2351_vm8, %v2905_v45  ;;  %v17791_v48 = vld [vmem:[%s25155_s1 + $0x500] ss:$8 sps:$4 sm:$0xff]   ;;  %v17802_v35 = vld [vmem:[%s25155_s1 + $0x794] ss:$8 sps:$4 sm:$0xff]  }
 0x35b   : > { %4807 = vmatpush2.bf16.msra.mxu1 %v20126_v18  ;;  %6236 = vmatpush2.bf16.msra.mxu0 %v20126_v18  ;;  %v16315_v2 = vpack.c.bf16 %v2546_v14, %v2546_v14  ;;  %v2913_v10 = vpop.permute.xlu1 %2912 }
 0x35c   : > { %v2548_v34 = vpop.f32.mrf.mxu1  ;;  %v3977_v60 = vpop.f32.mrf.mxu0  ;;  %4286 = vmatprep.mubr.bf16.mxu1 %v17787_v15  ;;  %5715 = vmatprep.mubr.bf16.mxu0 %v17790_v13  ;;  %v16385_v15 = vpack.c.bf16 %v21133_v47, %v21133_v47  ;;  %v16390_v13 = vpack.c.bf16 %v21209_v57, %v21209_v57 }
 0x35d   : > { %2637 = vst.msk [vmem:[#allocation2 + $0x274] sm:$0xf] %vm2045_vm7, %v16315_v2  ;;  %5354 = vmatprep.subr.bf16.mxu1 %v25301_v20  ;;  %6783 = vmatprep.subr.bf16.mxu0 %v25301_v20  ;;  %v17797_v60 = vld [vmem:[%s25155_s1 + $0x510] ss:$8 sps:$4 sm:$0xff]  }
 0x35e   : > { %v21311_v27 = vpop.f32.mrf.mxu0  ;;  %v2549_v29 = vpop.f32.mrf.mxu1  ;;  %2331 = vrot.lane.b32.xlu0 %v16301_v40, %s25203_s29  ;;  %4040 = vrot.lane.b32.xlu1 %v16384_v63, %s25203_s29  ;;  %2942 = vst.msk [vmem:[#allocation2 + $0x274] sm:$0xf] %vm2351_vm8, %v2907_v25 }
 0x35f   : > { %v16316_v0 = vpack.c.bf16 %v2549_v29, %v2549_v29  ;;  %v17800_v29 = vld [vmem:[%s25155_s1 + $0x790] ss:$8 sps:$4 sm:$0xff]  }
 0x360   : > { %v2551_v58 = vpop.f32.mrf.mxu1  ;;  %v3980_v43 = vpop.f32.mrf.mxu0 }
 0x361   : > { %2638 = vst.msk [vmem:[#allocation2 + $0x2a8] sm:$0xf] %vm2045_vm7, %v16316_v0  ;;  %v2304_v22 = vpop.permute.xlu0 %2303 }
 0x362   : > { %v21333_v44 = vpop.f32.mrf.mxu0  ;;  %5716 = vmatmul.mubr.bf16.gmra.mxu0 %v17788_v1  ;;  %v2554_v3 = vpop.f32.mrf.mxu1  ;;  %4287 = vmatmul.mubr.bf16.gmra.mxu1 %v17785_v41  ;;  %2352 = vst.msk [vmem:[#allocation2] sm:$0xf] %vm2351_vm8, %v2304_v22  ;;  %2943 = vst.msk [vmem:[#allocation2 + $0x2a8] sm:$0xf] %vm2351_vm8, %v2909_v16 }
 0x363   : > { %v16317_v50 = vpack.c.bf16 %v2554_v3, %v2554_v3  ;;  %4808 = vmatprep.mubr.bf16.mxu1 %v17793_v6  ;;  %6237 = vmatprep.mubr.bf16.mxu0 %v17796_v38  ;;  %v3463_v23 = vpop.permute.xlu1 %3462  ;;  %v17805_v6 = vld [vmem:[%s25155_s1 + $0x524] ss:$8 sps:$4 sm:$0xff]  }
 0x364   : > { %v2556_v45 = vpop.f32.mrf.mxu1  ;;  %v3985_v36 = vpop.f32.mrf.mxu0  ;;  %3488 = vrot.lane.b32.xlu0 %v16365_v24, %s25203_s29  ;;  %4044 = vrot.lane.b32.xlu1 %v16386_v30, %s25203_s29  ;;  %v17808_v38 = vld [vmem:[%s25155_s1 + $0x7a4] ss:$8 sps:$4 sm:$0xff]   ;;  %v16387_v24 = vpack.c.bf16 %v21165_v26, %v21165_v26  ;;  %v16392_v30 = vpack.c.bf16 %v21243_v17, %v21243_v17 }
 0x365   : > { %2639 = vst.msk [vmem:[#allocation2 + $0x2dc] sm:$0xf] %vm2045_vm7, %v16317_v50  ;;  %v17806_v45 = vld [vmem:[%s25155_s1 + $0x7a0] ss:$8 sps:$4 sm:$0xff]  }
 0x366   : > { %v21344_v25 = vpop.f32.mrf.mxu0  ;;  %v2557_v9 = vpop.f32.mrf.mxu1  ;;  %2944 = vst.msk [vmem:[#allocation2 + $0x2dc] sm:$0xf] %vm2351_vm8, %v2911_v7 }
 0x367   : > { %v16318_v54 = vpack.c.bf16 %v2557_v9, %v2557_v9 }
 0x368   : > { %v2559_v12 = vpop.f32.mrf.mxu1  ;;  %v3988_v19 = vpop.f32.mrf.mxu0  ;;  %4038 = vrot.lane.b32.xlu0 %v16383_v49, %s25203_s29  ;;  %4048 = vrot.lane.b32.xlu1 %v16388_v5, %s25203_s29  ;;  %v17803_v5 = vld [vmem:[%s25155_s1 + $0x520] ss:$8 sps:$4 sm:$0xff]  }
 0x369   : > { %2640 = vst.msk [vmem:[#allocation2 + $0x310] sm:$0xf] %vm2045_vm7, %v16318_v54  ;;  %v3461_v2 = vpop.permute.xlu0 %3460  ;;  %v16389_v19 = vpack.c.bf16 %v21201_v42, %v21201_v42 }
 0x36a   : > { %v21366_v16 = vpop.f32.mrf.mxu0  ;;  %6238 = vmatmul.mubr.bf16.vlgmr.msra.gmra.mxu0 %v17794_v32  ;;  %v3076_v63 = vpop.f32.mrf.mxu1  ;;  %4809 = vmatmul.mubr.bf16.vlgmr.msra.gmra.mxu1 %v17791_v48  ;;  %2945 = vst.msk [vmem:[#allocation2 + $0x310] sm:$0xf] %vm2351_vm8, %v2913_v10  ;;  %v17811_v48 = vld [vmem:[%s25155_s1 + $0x534] ss:$8 sps:$4 sm:$0xff]  }
 0x36b   : > { %6784 = vmatpush1.bf16.msra.mxu0 %v20114_v62  ;;  %v16335_v14 = vpack.c.bf16 %v3076_v63, %v3076_v63  ;;  %5355 = vmatpush1.bf16.msra.mxu1 %v20114_v62  ;;  %v2310_v7 = vpop.permute.xlu1 %2309  ;;  %v17814_v32 = vld [vmem:[%s25155_s1 + $0x7b4] ss:$8 sps:$4 sm:$0xff]  }
 0x36c   : > { %v3078_v40 = vpop.f32.mrf.mxu1  ;;  %v4507_v34 = vpop.f32.mrf.mxu0  ;;  %5356 = vmatprep.subr.bf16.mxu1 %v25301_v20  ;;  %6785 = vmatprep.subr.bf16.mxu0 %v25301_v20  ;;  %2355 = vst.msk [vmem:[#allocation2 + $0x9c] sm:$0xf] %vm2351_vm8, %v2310_v7  ;;  %v17812_v7 = vld [vmem:[%s25155_s1 + $0x7b0] ss:$8 sps:$4 sm:$0xff]  }
 0x36d   : > { %3203 = vst.msk [vmem:[#allocation2 + $0x8] sm:$0xf] %vm2045_vm7, %v16335_v14  ;;  %4816 = vmatprep.mubr.bf16.mxu1 %v17799_v37  ;;  %6245 = vmatprep.mubr.bf16.mxu0 %v17802_v35  ;;  %v16394_v37 = vpack.c.bf16 %v21277_v11, %v21277_v11 }
 0x36e   : > { %v3079_v47 = vpop.f32.mrf.mxu1  ;;  %v21375_v57 = vpop.f32.mrf.mxu0  ;;  %4042 = vrot.lane.b32.xlu0 %v16385_v15, %s25203_s29  ;;  %4052 = vrot.lane.b32.xlu1 %v16390_v13, %s25203_s29  ;;  %3508 = vst.msk [vmem:[#allocation2 + $0x8] sm:$0xf] %vm2351_vm8, %v3461_v2  ;;  %v17809_v2 = vld [vmem:[%s25155_s1 + $0x530] ss:$8 sps:$4 sm:$0xff]  }
 0x36f   : > { %v16336_v41 = vpack.c.bf16 %v3079_v47, %v3079_v47  ;;  %5357 = vmatpush1.bf16.msra.mxu1 %v20084_v28  ;;  %6786 = vmatpush1.bf16.msra.mxu0 %v20084_v28 }
 0x370   : > { %v3081_v1 = vpop.f32.mrf.mxu1  ;;  %v4510_v0 = vpop.f32.mrf.mxu0  ;;  %5358 = vmatprep.subr.bf16.mxu1 %v25301_v20  ;;  %6787 = vmatprep.subr.bf16.mxu0 %v25301_v20 }
 0x371   : > { %3204 = vst.msk [vmem:[#allocation2 + $0x3c] sm:$0xf] %vm2045_vm7, %v16336_v41  ;;  %v2306_v10 = vpop.permute.xlu0 %2305  ;;  %v3467_v3 = vpop.permute.xlu1 %3466  ;;  %v16391_v0 = vpack.c.bf16 %v21233_v61, %v21233_v61 }
 0x372   : > { %v3084_v58 = vpop.f32.mrf.mxu1  ;;  %v21401_v43 = vpop.f32.mrf.mxu0  ;;  %4817 = vmatmul.mubr.bf16.gmra.mxu1 %v17797_v60  ;;  %6246 = vmatmul.mubr.bf16.gmra.mxu0 %v17800_v29  ;;  %2353 = vst.msk [vmem:[#allocation2 + $0x34] sm:$0xf] %vm2351_vm8, %v2306_v10  ;;  %3509 = vst.msk [vmem:[#allocation2 + $0x3c] sm:$0xf] %vm2351_vm8, %v3463_v23  ;;  %v17817_v60 = vld [vmem:[%s25155_s1 + $0x544] ss:$8 sps:$4 sm:$0xff]  }
 0x373   : > { %v16337_v22 = vpack.c.bf16 %v3084_v58, %v3084_v58  ;;  %5359 = vmatpush1.bf16.msra.mxu1 %v20070_v51  ;;  %6788 = vmatpush1.bf16.msra.mxu0 %v20070_v51  ;;  %v17820_v29 = vld [vmem:[%s25155_s1 + $0x7c4] ss:$8 sps:$4 sm:$0xff]  }
 0x374   : > { %v3086_v50 = vpop.f32.mrf.mxu1  ;;  %v4515_v26 = vpop.f32.mrf.mxu0  ;;  %5360 = vmatprep.subr.bf16.mxu1 %v25301_v20  ;;  %6789 = vmatprep.subr.bf16.mxu0 %v25301_v20 }
 0x375   : > { %3205 = vst.msk [vmem:[#allocation2 + $0x70] sm:$0xf] %vm2045_vm7, %v16337_v22  ;;  %4824 = vmatprep.mubr.bf16.mxu1 %v17805_v6  ;;  %6253 = vmatprep.mubr.bf16.mxu0 %v17808_v38  ;;  %v16396_v6 = vpack.c.bf16 %v21311_v27, %v21311_v27  ;;  %v17815_v22 = vld [vmem:[%s25155_s1 + $0x540] ss:$8 sps:$4 sm:$0xff]  }
 0x376   : > { %v3087_v17 = vpop.f32.mrf.mxu1  ;;  %v21410_v49 = vpop.f32.mrf.mxu0  ;;  %4046 = vrot.lane.b32.xlu0 %v16387_v24, %s25203_s29  ;;  %4056 = vrot.lane.b32.xlu1 %v16392_v30, %s25203_s29 }
 0x377   : > { %v16338_v36 = vpack.c.bf16 %v3087_v17, %v3087_v17  ;;  %5361 = vmatpush1.bf16.msra.mxu1 %v20036_v53  ;;  %6790 = vmatpush1.bf16.msra.mxu0 %v20036_v53 }
 0x378   : > { %v3089_v23 = vpop.f32.mrf.mxu1  ;;  %v4518_v9 = vpop.f32.mrf.mxu0  ;;  %5362 = vmatprep.subr.bf16.mxu1 %v25301_v20  ;;  %6791 = vmatprep.subr.bf16.mxu0 %v25301_v20 }
 0x379   : > { %3206 = vst.msk [vmem:[#allocation2 + $0xa4] sm:$0xf] %vm2045_vm7, %v16338_v36  ;;  %v2308_v54 = vpop.permute.xlu0 %2307  ;;  %v2314_v12 = vpop.permute.xlu1 %2313  ;;  %v16393_v9 = vpack.c.bf16 %v21269_v39, %v21269_v39 }
 0x37a   : > { %v3092_v35 = vpop.f32.mrf.mxu1  ;;  %v21435_v15 = vpop.f32.mrf.mxu0  ;;  %4825 = vmatmul.mubr.bf16.gmra.mxu1 %v17803_v5  ;;  %6254 = vmatmul.mubr.bf16.gmra.mxu0 %v17806_v45  ;;  %2354 = vst.msk [vmem:[#allocation2 + $0x68] sm:$0xf] %vm2351_vm8, %v2308_v54  ;;  %3511 = vst.msk [vmem:[#allocation2 + $0xa4] sm:$0xf] %vm2351_vm8, %v3467_v3  ;;  %v17818_v3 = vld [vmem:[%s25155_s1 + $0x7c0] ss:$8 sps:$4 sm:$0xff]  }
 0x37b   : > { %2357 = vst.msk [vmem:[#allocation2 + $0x104] sm:$0xf] %vm2351_vm8, %v2314_v12  ;;  %v16339_v13 = vpack.c.bf16 %v3092_v35, %v3092_v35  ;;  %5363 = vmatpush1.bf16.msra.mxu1 %v20018_v4  ;;  %6792 = vmatpush1.bf16.msra.mxu0 %v20018_v4  ;;  %v17823_v5 = vld [vmem:[%s25155_s1 + $0x554] ss:$8 sps:$4 sm:$0xff]   ;;  %v17821_v35 = vld [vmem:[%s25155_s1 + $0x550] ss:$8 sps:$4 sm:$0xff]  }
 0x37c   : > { %v3094_v42 = vpop.f32.mrf.mxu1  ;;  %v4523_v63 = vpop.f32.mrf.mxu0  ;;  %5364 = vmatprep.subr.bf16.mxu1 %v25301_v20  ;;  %6793 = vmatprep.subr.bf16.mxu0 %v25301_v20  ;;  %v17826_v45 = vld [vmem:[%s25155_s1 + $0x7d4] ss:$8 sps:$4 sm:$0xff]  }
 0x37d   : > { %3207 = vst.msk [vmem:[#allocation2 + $0xd8] sm:$0xf] %vm2045_vm7, %v16339_v13  ;;  %4832 = vmatprep.mubr.bf16.mxu1 %v17811_v48  ;;  %6261 = vmatprep.mubr.bf16.mxu0 %v17814_v32  ;;  %v16398_v48 = vpack.c.bf16 %v21344_v25, %v21344_v25  ;;  %v17824_v13 = vld [vmem:[%s25155_s1 + $0x7d0] ss:$8 sps:$4 sm:$0xff]  }
 0x37e   : > { %v21445_v11 = vpop.f32.mrf.mxu0  ;;  %v3095_v14 = vpop.f32.mrf.mxu1  ;;  %4050 = vrot.lane.b32.xlu0 %v16389_v19, %s25203_s29  ;;  %4060 = vrot.lane.b32.xlu1 %v16394_v37, %s25203_s29 }
 0x37f   : > { %6794 = vmatpush1.bf16.msra.mxu0 %v19988_v59  ;;  %v16340_v40 = vpack.c.bf16 %v3095_v14, %v3095_v14  ;;  %5365 = vmatpush1.bf16.msra.mxu1 %v19988_v59 }
 0x380   : > { %v3097_v34 = vpop.f32.mrf.mxu1  ;;  %v4526_v47 = vpop.f32.mrf.mxu0  ;;  %5366 = vmatprep.subr.bf16.mxu1 %v25301_v20  ;;  %6795 = vmatprep.subr.bf16.mxu0 %v25301_v20 }
 0x381   : > { %3208 = vst.msk [vmem:[#allocation2 + $0x10c] sm:$0xf] %vm2045_vm7, %v16340_v40  ;;  %v3465_v41 = vpop.permute.xlu0 %3464  ;;  %v3471_v1 = vpop.permute.xlu1 %3470  ;;  %v16395_v47 = vpack.c.bf16 %v21301_v55, %v21301_v55 }
 0x382   : > { %v21470_v38 = vpop.f32.mrf.mxu0  ;;  %6262 = vmatmul.mubr.bf16.gmra.mxu0 %v17812_v7  ;;  %v3100_v10 = vpop.f32.mrf.mxu1  ;;  %4833 = vmatmul.mubr.bf16.gmra.mxu1 %v17809_v2  ;;  %3510 = vst.msk [vmem:[#allocation2 + $0x70] sm:$0xf] %vm2351_vm8, %v3465_v41  ;;  %3513 = vst.msk [vmem:[#allocation2 + $0x10c] sm:$0xf] %vm2351_vm8, %v3471_v1  ;;  %v17829_v2 = vld [vmem:[%s25155_s1 + $0x564] ss:$8 sps:$4 sm:$0xff]  }
 0x383   : > { %6796 = vmatpush1.bf16.msra.mxu0 %v19968_v52  ;;  %v16341_v24 = vpack.c.bf16 %v3100_v10, %v3100_v10  ;;  %5367 = vmatpush1.bf16.msra.mxu1 %v19968_v52  ;;  %v17832_v7 = vld [vmem:[%s25155_s1 + $0x7e4] ss:$8 sps:$4 sm:$0xff]   ;;  %v17827_v10 = vld [vmem:[%s25155_s1 + $0x560] ss:$8 sps:$4 sm:$0xff]  }
 0x384   : > { %v3102_v30 = vpop.f32.mrf.mxu1  ;;  %v4531_v58 = vpop.f32.mrf.mxu0  ;;  %5368 = vmatprep.subr.bf16.mxu1 %v25301_v20  ;;  %6797 = vmatprep.subr.bf16.mxu0 %v25301_v20 }
 0x385   : > { %3209 = vst.msk [vmem:[#allocation2 + $0x140] sm:$0xf] %vm2045_vm7, %v16341_v24  ;;  %4840 = vmatprep.mubr.bf16.mxu1 %v17817_v60  ;;  %6269 = vmatprep.mubr.bf16.mxu0 %v17820_v29  ;;  %v16416_v60 = vpack.c.bf16 %v21375_v57, %v21375_v57  ;;  %v17830_v24 = vld [vmem:[%s25155_s1 + $0x7e0] ss:$8 sps:$4 sm:$0xff]  }
 0x386   : > { %v3103_v61 = vpop.f32.mrf.mxu1  ;;  %v21479_v27 = vpop.f32.mrf.mxu0  ;;  %4054 = vrot.lane.b32.xlu0 %v16391_v0, %s25203_s29  ;;  %4064 = vrot.lane.b32.xlu1 %v16396_v6, %s25203_s29 }
 0x387   : > { %v16342_v50 = vpack.c.bf16 %v3103_v61, %v3103_v61  ;;  %5369 = vmatpush1.bf16.msra.mxu1 %v19935_v8  ;;  %6798 = vmatpush1.bf16.msra.mxu0 %v19935_v8 }
 0x388   : > { %v3105_v26 = vpop.f32.mrf.mxu1  ;;  %v4534_v17 = vpop.f32.mrf.mxu0  ;;  %5376 = vmatprep.subr.bf16.mxu1 %v25301_v20  ;;  %6805 = vmatprep.subr.bf16.mxu0 %v25301_v20 }
 0x389   : > { %3210 = vst.msk [vmem:[#allocation2 + $0x174] sm:$0xf] %vm2045_vm7, %v16342_v50  ;;  %v2312_v36 = vpop.permute.xlu0 %2311  ;;  %v2318_v23 = vpop.permute.xlu1 %2317  ;;  %v17835_v50 = vld [vmem:[%s25155_s1 + $0x574] ss:$8 sps:$4 sm:$0xff]   ;;  %v16397_v17 = vpack.c.bf16 %v21333_v44, %v21333_v44 }
 0x38a   : > { %v21504_v32 = vpop.f32.mrf.mxu0  ;;  %6270 = vmatmul.mubr.bf16.gmra.mxu0 %v17818_v3  ;;  %v3108_v54 = vpop.f32.mrf.mxu1  ;;  %4841 = vmatmul.mubr.bf16.gmra.mxu1 %v17815_v22  ;;  %2356 = vst.msk [vmem:[#allocation2 + $0xd0] sm:$0xf] %vm2351_vm8, %v2312_v36  ;;  %2359 = vst.msk [vmem:[#allocation2 + $0x16c] sm:$0xf] %vm2351_vm8, %v2318_v23  ;;  %v17838_v26 = vld [vmem:[%s25155_s1 + $0x7f4] ss:$8 sps:$4 sm:$0xff]  }
 0x38b   : > { %6806 = vmatpush2.bf16.msra.mxu0 %v20199_v46  ;;  %v16343_v12 = vpack.c.bf16 %v3108_v54, %v3108_v54  ;;  %5377 = vmatpush2.bf16.msra.mxu1 %v20199_v46 }
 0x38c   : > { %v3110_v19 = vpop.f32.mrf.mxu1  ;;  %v4539_v37 = vpop.f32.mrf.mxu0  ;;  %5378 = vmatprep.subr.bf16.mxu1 %v25301_v20  ;;  %6807 = vmatprep.subr.bf16.mxu0 %v25301_v20 }
 0x38d   : > { %3211 = vst.msk [vmem:[#allocation2 + $0x1a8] sm:$0xf] %vm2045_vm7, %v16343_v12  ;;  %4848 = vmatprep.mubr.bf16.mxu1 %v17823_v5  ;;  %6277 = vmatprep.mubr.bf16.mxu0 %v17826_v45  ;;  %v16418_v5 = vpack.c.bf16 %v21410_v49, %v21410_v49  ;;  %v17833_v19 = vld [vmem:[%s25155_s1 + $0x570] ss:$8 sps:$4 sm:$0xff]  }
 0x38e   : > { %v3111_v39 = vpop.f32.mrf.mxu1  ;;  %v21513_v25 = vpop.f32.mrf.mxu0  ;;  %4058 = vrot.lane.b32.xlu0 %v16393_v9, %s25203_s29  ;;  %4068 = vrot.lane.b32.xlu1 %v16398_v48, %s25203_s29  ;;  %v17836_v37 = vld [vmem:[%s25155_s1 + $0x7f0] ss:$8 sps:$4 sm:$0xff]  }
 0x38f   : > { %v16344_v42 = vpack.c.bf16 %v3111_v39, %v3111_v39  ;;  %5379 = vmatpush2.bf16.msra.mxu1 %v20180_v56  ;;  %6808 = vmatpush2.bf16.msra.mxu0 %v20180_v56 }
 0x390   : > { %v3113_v63 = vpop.f32.mrf.mxu1  ;;  %v4542_v14 = vpop.f32.mrf.mxu0  ;;  %5380 = vmatprep.subr.bf16.mxu1 %v25301_v20  ;;  %6809 = vmatprep.subr.bf16.mxu0 %v25301_v20 }
 0x391   : > { %3212 = vst.msk [vmem:[#allocation2 + $0x1dc] sm:$0xf] %vm2045_vm7, %v16344_v42  ;;  %v3469_v40 = vpop.permute.xlu0 %3468  ;;  %v3475_v34 = vpop.permute.xlu1 %3474  ;;  %v16415_v42 = vpack.c.bf16 %v21366_v16, %v21366_v16  ;;  %v16420_v63 = vpack.c.bf16 %v21445_v11, %v21445_v11  ;;  %v16417_v16 = vpack.c.bf16 %v21401_v43, %v21401_v43  ;;  %v16422_v11 = vpack.c.bf16 %v21479_v27, %v21479_v27  ;;  %v17842_v43 = vld [vmem:[%s25155_s1 + $0x880] ss:$8 sps:$4 sm:$0xff]  }
 0x392   : > { %v21538_v29 = vpop.f32.mrf.mxu0  ;;  %6278 = vmatmul.mubr.bf16.gmra.mxu0 %v17824_v13  ;;  %v3116_v41 = vpop.f32.mrf.mxu1  ;;  %4849 = vmatmul.mubr.bf16.gmra.mxu1 %v17821_v35  ;;  %3512 = vst.msk [vmem:[#allocation2 + $0xd8] sm:$0xf] %vm2351_vm8, %v3469_v40  ;;  %3515 = vst.msk [vmem:[#allocation2 + $0x174] sm:$0xf] %vm2351_vm8, %v3475_v34  ;;  %v17841_v35 = vld [vmem:[%s25155_s1 + $0x604] ss:$8 sps:$4 sm:$0xff]  }
 0x393   : > { %6810 = vmatpush2.bf16.msra.mxu0 %v20168_v31  ;;  %v16345_v1 = vpack.c.bf16 %v3116_v41, %v3116_v41  ;;  %5381 = vmatpush2.bf16.msra.mxu1 %v20168_v31  ;;  %v17844_v13 = vld [vmem:[%s25155_s1 + $0x884] ss:$8 sps:$4 sm:$0xff]  }
 0x394   : > { %v3118_v0 = vpop.f32.mrf.mxu1  ;;  %v4547_v6 = vpop.f32.mrf.mxu0  ;;  %5382 = vmatprep.subr.bf16.mxu1 %v25301_v20  ;;  %6811 = vmatprep.subr.bf16.mxu0 %v25301_v20 }
 0x395   : > { %3213 = vst.msk [vmem:[#allocation2 + $0x210] sm:$0xf] %vm2045_vm7, %v16345_v1  ;;  %4856 = vmatprep.mubr.bf16.mxu1 %v17829_v2  ;;  %6285 = vmatprep.mubr.bf16.mxu0 %v17832_v7 }
 0x396   : > { %v3119_v55 = vpop.f32.mrf.mxu1  ;;  %v21547_v57 = vpop.f32.mrf.mxu0  ;;  %4062 = vrot.lane.b32.xlu0 %v16395_v47, %s25203_s29  ;;  %4618 = vrot.lane.b32.xlu1 %v16416_v60, %s25203_s29 }
 0x397   : > { %v16346_v30 = vpack.c.bf16 %v3119_v55, %v3119_v55  ;;  %5383 = vmatpush2.bf16.msra.mxu1 %v20154_v21  ;;  %6812 = vmatpush2.bf16.msra.mxu0 %v20154_v21  ;;  %v2316_v58 = vpop.permute.xlu0 %2315  ;;  %v2322_v61 = vpop.permute.xlu1 %2321  ;;  %v17839_v55 = vld [vmem:[%s25155_s1 + $0x600] ss:$8 sps:$4 sm:$0xff]  }
 0x398   : > { %v3121_v22 = vpop.f32.mrf.mxu1  ;;  %v4550_v3 = vpop.f32.mrf.mxu0  ;;  %5384 = vmatprep.subr.bf16.mxu1 %v25301_v20  ;;  %6813 = vmatprep.subr.bf16.mxu0 %v25301_v20  ;;  %2358 = vst.msk [vmem:[#allocation2 + $0x138] sm:$0xf] %vm2351_vm8, %v2316_v58  ;;  %2361 = vst.msk [vmem:[#allocation2 + $0x1d4] sm:$0xf] %vm2351_vm8, %v2322_v61  ;;  %v17850_v58 = vld [vmem:[%s25155_s1 + $0x894] ss:$8 sps:$4 sm:$0xff]  }
 0x399   : > { %3214 = vst.msk [vmem:[#allocation2 + $0x244] sm:$0xf] %vm2045_vm7, %v16346_v30  ;;  %v17847_v30 = vld [vmem:[%s25155_s1 + $0x614] ss:$8 sps:$4 sm:$0xff]   ;;  %v16419_v3 = vpack.c.bf16 %v21435_v15, %v21435_v15 }
 0x39a   : > { %v21574_v45 = vpop.f32.mrf.mxu0  ;;  %6286 = vmatmul.mubr.bf16.gmra.mxu0 %v17830_v24  ;;  %v3124_v36 = vpop.f32.mrf.mxu1  ;;  %4857 = vmatmul.mubr.bf16.gmra.mxu1 %v17827_v10 }
 0x39b   : > { %6814 = vmatpush2.bf16.msra.mxu0 %v20126_v18  ;;  %v16347_v23 = vpack.c.bf16 %v3124_v36, %v3124_v36  ;;  %5385 = vmatpush2.bf16.msra.mxu1 %v20126_v18  ;;  %v3473_v9 = vpop.permute.xlu0 %3472  ;;  %v3479_v48 = vpop.permute.xlu1 %3478 }
 0x39c   : > { %v4555_v54 = vpop.f32.mrf.mxu0  ;;  %v3126_v12 = vpop.f32.mrf.mxu1  ;;  %4864 = vmatprep.mubr.bf16.mxu1 %v17835_v50  ;;  %6293 = vmatprep.mubr.bf16.mxu0 %v17838_v26  ;;  %3514 = vst.msk [vmem:[#allocation2 + $0x140] sm:$0xf] %vm2351_vm8, %v3473_v9  ;;  %3517 = vst.msk [vmem:[#allocation2 + $0x1dc] sm:$0xf] %vm2351_vm8, %v3479_v48  ;;  %v16424_v50 = vpack.c.bf16 %v21513_v25, %v21513_v25  ;;  %v17845_v9 = vld [vmem:[%s25155_s1 + $0x610] ss:$8 sps:$4 sm:$0xff]  }
 0x39d   : > { %3215 = vst.msk [vmem:[#allocation2 + $0x278] sm:$0xf] %vm2045_vm7, %v16347_v23  ;;  %5932 = vmatprep.subr.bf16.mxu1 %v25301_v20  ;;  %7361 = vmatprep.subr.bf16.mxu0 %v25301_v20  ;;  %v17848_v48 = vld [vmem:[%s25155_s1 + $0x890] ss:$8 sps:$4 sm:$0xff]  }
 0x39e   : > { %v3127_v44 = vpop.f32.mrf.mxu1  ;;  %v21583_v49 = vpop.f32.mrf.mxu0  ;;  %4066 = vrot.lane.b32.xlu0 %v16397_v17, %s25203_s29  ;;  %4622 = vrot.lane.b32.xlu1 %v16418_v5, %s25203_s29 }
 0x39f   : > { %v16348_v39 = vpack.c.bf16 %v3127_v44, %v3127_v44 }
 0x3a0   : > { %v4558_v14 = vpop.f32.mrf.mxu0  ;;  %v3129_v2 = vpop.f32.mrf.mxu1 }
 0x3a1   : > { %3216 = vst.msk [vmem:[#allocation2 + $0x2ac] sm:$0xf] %vm2045_vm7, %v16348_v39  ;;  %v2320_v7 = vpop.permute.xlu0 %2319  ;;  %v2326_v40 = vpop.permute.xlu1 %2325 }
 0x3a2   : > { %v21604_v34 = vpop.f32.mrf.mxu0  ;;  %6294 = vmatmul.mubr.bf16.gmra.mxu0 %v17836_v37  ;;  %v3132_v47 = vpop.f32.mrf.mxu1  ;;  %4865 = vmatmul.mubr.bf16.gmra.mxu1 %v17833_v19  ;;  %2360 = vst.msk [vmem:[#allocation2 + $0x1a0] sm:$0xf] %vm2351_vm8, %v2320_v7  ;;  %2363 = vst.msk [vmem:[#allocation2 + $0x23c] sm:$0xf] %vm2351_vm8, %v2326_v40  ;;  %v17853_v19 = vld [vmem:[%s25155_s1 + $0x624] ss:$8 sps:$4 sm:$0xff]  }
 0x3a3   : > { %v16349_v60 = vpack.c.bf16 %v3132_v47, %v3132_v47  ;;  %5386 = vmatprep.mubr.bf16.mxu1 %v17841_v35  ;;  %6815 = vmatprep.mubr.bf16.mxu0 %v17844_v13  ;;  %v17856_v37 = vld [vmem:[%s25155_s1 + $0x8a4] ss:$8 sps:$4 sm:$0xff]   ;;  %v16421_v13 = vpack.c.bf16 %v21470_v38, %v21470_v38  ;;  %v17851_v47 = vld [vmem:[%s25155_s1 + $0x620] ss:$8 sps:$4 sm:$0xff]  }
 0x3a4   : > { %v4563_v41 = vpop.f32.mrf.mxu0  ;;  %v3134_v1 = vpop.f32.mrf.mxu1  ;;  %4616 = vrot.lane.b32.xlu0 %v16415_v42, %s25203_s29  ;;  %4626 = vrot.lane.b32.xlu1 %v16420_v63, %s25203_s29  ;;  %v16426_v42 = vpack.c.bf16 %v21547_v57, %v21547_v57 }
 0x3a5   : > { %3217 = vst.msk [vmem:[#allocation2 + $0x2e0] sm:$0xf] %vm2045_vm7, %v16349_v60  ;;  %v17854_v60 = vld [vmem:[%s25155_s1 + $0x8a0] ss:$8 sps:$4 sm:$0xff]   ;;  %v17859_v1 = vld [vmem:[%s25155_s1 + $0x634] ss:$8 sps:$4 sm:$0xff]  }
 0x3a6   : > { %v3135_v0 = vpop.f32.mrf.mxu1  ;;  %v21615_v6 = vpop.f32.mrf.mxu0 }
 0x3a7   : > { %v16350_v27 = vpack.c.bf16 %v3135_v0, %v3135_v0  ;;  %v17862_v0 = vld [vmem:[%s25155_s1 + $0x8b4] ss:$8 sps:$4 sm:$0xff]  }
 0x3a8   : > { %v3137_v10 = vpop.f32.mrf.mxu1  ;;  %v4566_v24 = vpop.f32.mrf.mxu0  ;;  %4620 = vrot.lane.b32.xlu0 %v16417_v16, %s25203_s29  ;;  %4630 = vrot.lane.b32.xlu1 %v16422_v11, %s25203_s29 }
 0x3a9   : > { %3218 = vst.msk [vmem:[#allocation2 + $0x314] sm:$0xf] %vm2045_vm7, %v16350_v27  ;;  %v3477_v61 = vpop.permute.xlu0 %3476  ;;  %v3483_v22 = vpop.permute.xlu1 %3482  ;;  %v16423_v27 = vpack.c.bf16 %v21504_v32, %v21504_v32  ;;  %v16428_v10 = vpack.c.bf16 %v21583_v49, %v21583_v49 }
 0x3aa   : > { %v21636_v26 = vpop.f32.mrf.mxu0  ;;  %6816 = vmatmul.mubr.bf16.vlgmr.msra.gmra.mxu0 %v17842_v43  ;;  %v3654_v17 = vpop.f32.mrf.mxu1  ;;  %5387 = vmatmul.mubr.bf16.vlgmr.msra.gmra.mxu1 %v17839_v55  ;;  %3516 = vst.msk [vmem:[#allocation2 + $0x1a8] sm:$0xf] %vm2351_vm8, %v3477_v61  ;;  %3519 = vst.msk [vmem:[#allocation2 + $0x244] sm:$0xf] %vm2351_vm8, %v3483_v22 }
 0x3ab   : > { %7362 = vmatpush1.bf16.msra.mxu0 %v20114_v62  ;;  %v16367_v5 = vpack.c.bf16 %v3654_v17, %v3654_v17  ;;  %5933 = vmatpush1.bf16.msra.mxu1 %v20114_v62 }
 0x3ac   : > { %v5085_v36 = vpop.f32.mrf.mxu0  ;;  %v3656_v23 = vpop.f32.mrf.mxu1  ;;  %5934 = vmatprep.subr.bf16.mxu1 %v25301_v20  ;;  %7363 = vmatprep.subr.bf16.mxu0 %v25301_v20 }
 0x3ad   : > { %3781 = vst.msk [vmem:[#allocation2 + $0xc] sm:$0xf] %vm2045_vm7, %v16367_v5  ;;  %5394 = vmatprep.mubr.bf16.mxu1 %v17847_v30  ;;  %6823 = vmatprep.mubr.bf16.mxu0 %v17850_v58  ;;  %v17865_v23 = vld [vmem:[%s25155_s1 + $0x644] ss:$8 sps:$4 sm:$0xff]  }
 0x3ae   : > { %v3657_v15 = vpop.f32.mrf.mxu1  ;;  %v21645_v25 = vpop.f32.mrf.mxu0  ;;  %4624 = vrot.lane.b32.xlu0 %v16419_v3, %s25203_s29  ;;  %4634 = vrot.lane.b32.xlu1 %v16424_v50, %s25203_s29  ;;  %v17857_v3 = vld [vmem:[%s25155_s1 + $0x630] ss:$8 sps:$4 sm:$0xff]  }
 0x3af   : > { %v16368_v54 = vpack.c.bf16 %v3657_v15, %v3657_v15  ;;  %5935 = vmatpush1.bf16.msra.mxu1 %v20084_v28  ;;  %7364 = vmatpush1.bf16.msra.mxu0 %v20084_v28  ;;  %v17860_v50 = vld [vmem:[%s25155_s1 + $0x8b0] ss:$8 sps:$4 sm:$0xff]   ;;  %v17868_v15 = vld [vmem:[%s25155_s1 + $0x8c4] ss:$8 sps:$4 sm:$0xff]  }
 0x3b0   : > { %v5088_v12 = vpop.f32.mrf.mxu0  ;;  %v3659_v44 = vpop.f32.mrf.mxu1  ;;  %5936 = vmatprep.subr.bf16.mxu1 %v25301_v20  ;;  %7365 = vmatprep.subr.bf16.mxu0 %v25301_v20 }
 0x3b1   : > { %3782 = vst.msk [vmem:[#allocation2 + $0x40] sm:$0xf] %vm2045_vm7, %v16368_v54  ;;  %v2324_v39 = vpop.permute.xlu0 %2323  ;;  %v2330_v35 = vpop.permute.xlu1 %2329  ;;  %v16425_v54 = vpack.c.bf16 %v21538_v29, %v21538_v29  ;;  %v16430_v12 = vpack.c.bf16 %v21615_v6, %v21615_v6 }
 0x3b2   : > { %v21670_v63 = vpop.f32.mrf.mxu0  ;;  %6824 = vmatmul.mubr.bf16.gmra.mxu0 %v17848_v48  ;;  %v3662_v14 = vpop.f32.mrf.mxu1  ;;  %5395 = vmatmul.mubr.bf16.gmra.mxu1 %v17845_v9  ;;  %2362 = vst.msk [vmem:[#allocation2 + $0x208] sm:$0xf] %vm2351_vm8, %v2324_v39  ;;  %2365 = vst.msk [vmem:[#allocation2 + $0x2a4] sm:$0xf] %vm2351_vm8, %v2330_v35 }
 0x3b3   : > { %7366 = vmatpush1.bf16.msra.mxu0 %v20070_v51  ;;  %v16369_v2 = vpack.c.bf16 %v3662_v14, %v3662_v14  ;;  %5937 = vmatpush1.bf16.msra.mxu1 %v20070_v51 }
 0x3b4   : > { %v5093_v7 = vpop.f32.mrf.mxu0  ;;  %v3664_v40 = vpop.f32.mrf.mxu1  ;;  %5938 = vmatprep.subr.bf16.mxu1 %v25301_v20  ;;  %7367 = vmatprep.subr.bf16.mxu0 %v25301_v20 }
 0x3b5   : > { %3783 = vst.msk [vmem:[#allocation2 + $0x74] sm:$0xf] %vm2045_vm7, %v16369_v2  ;;  %5402 = vmatprep.mubr.bf16.mxu1 %v17853_v19  ;;  %6831 = vmatprep.mubr.bf16.mxu0 %v17856_v37  ;;  %v17871_v40 = vld [vmem:[%s25155_s1 + $0x654] ss:$8 sps:$4 sm:$0xff]  }
 0x3b6   : > { %v3665_v38 = vpop.f32.mrf.mxu1  ;;  %v21679_v57 = vpop.f32.mrf.mxu0  ;;  %4628 = vrot.lane.b32.xlu0 %v16421_v13, %s25203_s29  ;;  %4638 = vrot.lane.b32.xlu1 %v16426_v42, %s25203_s29  ;;  %v17863_v13 = vld [vmem:[%s25155_s1 + $0x640] ss:$8 sps:$4 sm:$0xff]  }
 0x3b7   : > { %v16370_v16 = vpack.c.bf16 %v3665_v38, %v3665_v38  ;;  %5939 = vmatpush1.bf16.msra.mxu1 %v20036_v53  ;;  %7368 = vmatpush1.bf16.msra.mxu0 %v20036_v53  ;;  %v17866_v42 = vld [vmem:[%s25155_s1 + $0x8c0] ss:$8 sps:$4 sm:$0xff]   ;;  %v17874_v38 = vld [vmem:[%s25155_s1 + $0x8d4] ss:$8 sps:$4 sm:$0xff]  }
 0x3b8   : > { %v5096_v11 = vpop.f32.mrf.mxu0  ;;  %v3667_v41 = vpop.f32.mrf.mxu1  ;;  %5940 = vmatprep.subr.bf16.mxu1 %v25301_v20  ;;  %7369 = vmatprep.subr.bf16.mxu0 %v25301_v20 }
 0x3b9   : > { %3784 = vst.msk [vmem:[#allocation2 + $0xa8] sm:$0xf] %vm2045_vm7, %v16370_v16  ;;  %v3481_v55 = vpop.permute.xlu0 %3480  ;;  %v3487_v43 = vpop.permute.xlu1 %3486  ;;  %v16427_v16 = vpack.c.bf16 %v21574_v45, %v21574_v45  ;;  %v16448_v11 = vpack.c.bf16 %v21645_v25, %v21645_v25 }
 0x3ba   : > { %v21704_v24 = vpop.f32.mrf.mxu0  ;;  %6832 = vmatmul.mubr.bf16.gmra.mxu0 %v17854_v60  ;;  %v3670_v30 = vpop.f32.mrf.mxu1  ;;  %5403 = vmatmul.mubr.bf16.gmra.mxu1 %v17851_v47  ;;  %3518 = vst.msk [vmem:[#allocation2 + $0x210] sm:$0xf] %vm2351_vm8, %v3481_v55  ;;  %3521 = vst.msk [vmem:[#allocation2 + $0x2ac] sm:$0xf] %vm2351_vm8, %v3487_v43 }
 0x3bb   : > { %7370 = vmatpush1.bf16.msra.mxu0 %v20018_v4  ;;  %v16371_v58 = vpack.c.bf16 %v3670_v30, %v3670_v30  ;;  %5941 = vmatpush1.bf16.msra.mxu1 %v20018_v4 }
 0x3bc   : > { %v5101_v61 = vpop.f32.mrf.mxu0  ;;  %v3672_v22 = vpop.f32.mrf.mxu1  ;;  %5942 = vmatprep.subr.bf16.mxu1 %v25301_v20  ;;  %7371 = vmatprep.subr.bf16.mxu0 %v25301_v20 }
 0x3bd   : > { %3785 = vst.msk [vmem:[#allocation2 + $0xdc] sm:$0xf] %vm2045_vm7, %v16371_v58  ;;  %5410 = vmatprep.mubr.bf16.mxu1 %v17859_v1  ;;  %6839 = vmatprep.mubr.bf16.mxu0 %v17862_v0  ;;  %v17877_v22 = vld [vmem:[%s25155_s1 + $0x664] ss:$8 sps:$4 sm:$0xff]  }
 0x3be   : > { %v3673_v32 = vpop.f32.mrf.mxu1  ;;  %v21713_v49 = vpop.f32.mrf.mxu0  ;;  %4632 = vrot.lane.b32.xlu0 %v16423_v27, %s25203_s29  ;;  %4642 = vrot.lane.b32.xlu1 %v16428_v10, %s25203_s29  ;;  %v17869_v27 = vld [vmem:[%s25155_s1 + $0x650] ss:$8 sps:$4 sm:$0xff]  }
 0x3bf   : > { %v16372_v17 = vpack.c.bf16 %v3673_v32, %v3673_v32  ;;  %5943 = vmatpush1.bf16.msra.mxu1 %v19988_v59  ;;  %7372 = vmatpush1.bf16.msra.mxu0 %v19988_v59  ;;  %v17872_v10 = vld [vmem:[%s25155_s1 + $0x8d0] ss:$8 sps:$4 sm:$0xff]   ;;  %v17880_v32 = vld [vmem:[%s25155_s1 + $0x8e4] ss:$8 sps:$4 sm:$0xff]  }
 0x3c0   : > { %v5104_v5 = vpop.f32.mrf.mxu0  ;;  %v3675_v36 = vpop.f32.mrf.mxu1  ;;  %5944 = vmatprep.subr.bf16.mxu1 %v25301_v20  ;;  %7373 = vmatprep.subr.bf16.mxu0 %v25301_v20 }
 0x3c1   : > { %3786 = vst.msk [vmem:[#allocation2 + $0x110] sm:$0xf] %vm2045_vm7, %v16372_v17  ;;  %v2328_v9 = vpop.permute.xlu0 %2327  ;;  %v2334_v48 = vpop.permute.xlu1 %2333  ;;  %v16429_v17 = vpack.c.bf16 %v21604_v34, %v21604_v34  ;;  %v16450_v5 = vpack.c.bf16 %v21679_v57, %v21679_v57 }
 0x3c2   : > { %v3678_v44 = vpop.f32.mrf.mxu1  ;;  %v21738_v19 = vpop.f32.mrf.mxu0  ;;  %5411 = vmatmul.mubr.bf16.gmra.mxu1 %v17857_v3  ;;  %6840 = vmatmul.mubr.bf16.gmra.mxu0 %v17860_v50  ;;  %2364 = vst.msk [vmem:[#allocation2 + $0x270] sm:$0xf] %vm2351_vm8, %v2328_v9  ;;  %2367 = vst.msk [vmem:[#allocation2 + $0x30c] sm:$0xf] %vm2351_vm8, %v2334_v48 }
 0x3c3   : > { %v16373_v37 = vpack.c.bf16 %v3678_v44, %v3678_v44  ;;  %5945 = vmatpush1.bf16.msra.mxu1 %v19968_v52  ;;  %7374 = vmatpush1.bf16.msra.mxu0 %v19968_v52 }
 0x3c4   : > { %v5109_v39 = vpop.f32.mrf.mxu0  ;;  %v3680_v35 = vpop.f32.mrf.mxu1  ;;  %5946 = vmatprep.subr.bf16.mxu1 %v25301_v20  ;;  %7375 = vmatprep.subr.bf16.mxu0 %v25301_v20 }
 0x3c5   : > { %3787 = vst.msk [vmem:[#allocation2 + $0x144] sm:$0xf] %vm2045_vm7, %v16373_v37  ;;  %5418 = vmatprep.mubr.bf16.mxu1 %v17865_v23  ;;  %6847 = vmatprep.mubr.bf16.mxu0 %v17868_v15 }
 0x3c6   : > { %v3681_v29 = vpop.f32.mrf.mxu1  ;;  %v21747_v6 = vpop.f32.mrf.mxu0  ;;  %4636 = vrot.lane.b32.xlu0 %v16425_v54, %s25203_s29  ;;  %4646 = vrot.lane.b32.xlu1 %v16430_v12, %s25203_s29  ;;  %v17875_v54 = vld [vmem:[%s25155_s1 + $0x660] ss:$8 sps:$4 sm:$0xff]  }
 0x3c7   : > { %v16374_v14 = vpack.c.bf16 %v3681_v29, %v3681_v29  ;;  %5947 = vmatpush1.bf16.msra.mxu1 %v19935_v8  ;;  %7376 = vmatpush1.bf16.msra.mxu0 %v19935_v8  ;;  %v17878_v12 = vld [vmem:[%s25155_s1 + $0x8e0] ss:$8 sps:$4 sm:$0xff]  }
 0x3c8   : > { %v5112_v2 = vpop.f32.mrf.mxu0  ;;  %v3683_v7 = vpop.f32.mrf.mxu1  ;;  %5954 = vmatprep.subr.bf16.mxu1 %v25301_v20  ;;  %7383 = vmatprep.subr.bf16.mxu0 %v25301_v20 }
 0x3c9   : > { %3788 = vst.msk [vmem:[#allocation2 + $0x178] sm:$0xf] %vm2045_vm7, %v16374_v14  ;;  %v3485_v47 = vpop.permute.xlu0 %3484  ;;  %v3491_v60 = vpop.permute.xlu1 %3490  ;;  %v16447_v14 = vpack.c.bf16 %v21636_v26, %v21636_v26  ;;  %v16452_v2 = vpack.c.bf16 %v21713_v49, %v21713_v49 }
 0x3ca   : > { %v3686_v41 = vpop.f32.mrf.mxu1  ;;  %v21772_v1 = vpop.f32.mrf.mxu0  ;;  %5419 = vmatmul.mubr.bf16.gmra.mxu1 %v17863_v13  ;;  %6848 = vmatmul.mubr.bf16.gmra.mxu0 %v17866_v42  ;;  %3520 = vst.msk [vmem:[#allocation2 + $0x278] sm:$0xf] %vm2351_vm8, %v3485_v47  ;;  %3523 = vst.msk [vmem:[#allocation2 + $0x314] sm:$0xf] %vm2351_vm8, %v3491_v60  ;;  %v17883_v13 = vld [vmem:[%s25155_s1 + $0x674] ss:$8 sps:$4 sm:$0xff]  }
 0x3cb   : > { %v16375_v0 = vpack.c.bf16 %v3686_v41, %v3686_v41  ;;  %5955 = vmatpush2.bf16.msra.mxu1 %v20199_v46  ;;  %7384 = vmatpush2.bf16.msra.mxu0 %v20199_v46  ;;  %v17886_v42 = vld [vmem:[%s25155_s1 + $0x8f4] ss:$8 sps:$4 sm:$0xff]   ;;  %v17881_v41 = vld [vmem:[%s25155_s1 + $0x670] ss:$8 sps:$4 sm:$0xff]  }
 0x3cc   : > { %v5117_v55 = vpop.f32.mrf.mxu0  ;;  %v3688_v43 = vpop.f32.mrf.mxu1  ;;  %5956 = vmatprep.subr.bf16.mxu1 %v25301_v20  ;;  %7385 = vmatprep.subr.bf16.mxu0 %v25301_v20 }
 0x3cd   : > { %3789 = vst.msk [vmem:[#allocation2 + $0x1ac] sm:$0xf] %vm2045_vm7, %v16375_v0  ;;  %5426 = vmatprep.mubr.bf16.mxu1 %v17871_v40  ;;  %6855 = vmatprep.mubr.bf16.mxu0 %v17874_v38  ;;  %v17884_v0 = vld [vmem:[%s25155_s1 + $0x8f0] ss:$8 sps:$4 sm:$0xff]   ;;  %v17889_v43 = vld [vmem:[%s25155_s1 + $0x704] ss:$8 sps:$4 sm:$0xff]  }
 0x3ce   : > { %v3689_v45 = vpop.f32.mrf.mxu1  ;;  %v21781_v25 = vpop.f32.mrf.mxu0  ;;  %4640 = vrot.lane.b32.xlu0 %v16427_v16, %s25203_s29  ;;  %5196 = vrot.lane.b32.xlu1 %v16448_v11, %s25203_s29 }
 0x3cf   : > { %v16376_v30 = vpack.c.bf16 %v3689_v45, %v3689_v45  ;;  %5957 = vmatpush2.bf16.msra.mxu1 %v20180_v56  ;;  %7386 = vmatpush2.bf16.msra.mxu0 %v20180_v56  ;;  %v17892_v45 = vld [vmem:[%s25155_s1 + $0x984] ss:$8 sps:$4 sm:$0xff]  }
 0x3d0   : > { %v5120_v58 = vpop.f32.mrf.mxu0  ;;  %v3691_v61 = vpop.f32.mrf.mxu1  ;;  %5958 = vmatprep.subr.bf16.mxu1 %v25301_v20  ;;  %7387 = vmatprep.subr.bf16.mxu0 %v25301_v20 }
 0x3d1   : > { %3790 = vst.msk [vmem:[#allocation2 + $0x1e0] sm:$0xf] %vm2045_vm7, %v16376_v30  ;;  %v2332_v3 = vpop.permute.xlu0 %2331  ;;  %v4041_v50 = vpop.permute.xlu1 %4040 }
 0x3d2   : > { %v3694_v36 = vpop.f32.mrf.mxu1  ;;  %v21806_v23 = vpop.f32.mrf.mxu0  ;;  %5427 = vmatmul.mubr.bf16.gmra.mxu1 %v17869_v27  ;;  %6856 = vmatmul.mubr.bf16.gmra.mxu0 %v17872_v10  ;;  %2366 = vst.msk [vmem:[#allocation2 + $0x2d8] sm:$0xf] %vm2351_vm8, %v2332_v3  ;;  %4087 = vst.msk [vmem:[#allocation2 + $0x40] sm:$0xf] %vm2351_vm8, %v4041_v50  ;;  %v16449_v27 = vpack.c.bf16 %v21670_v63, %v21670_v63  ;;  %v16454_v10 = vpack.c.bf16 %v21747_v6, %v21747_v6 }
 0x3d3   : > { %v16377_v15 = vpack.c.bf16 %v3694_v36, %v3694_v36  ;;  %5959 = vmatpush2.bf16.msra.mxu1 %v20168_v31  ;;  %7388 = vmatpush2.bf16.msra.mxu0 %v20168_v31  ;;  %v16451_v63 = vpack.c.bf16 %v21704_v24, %v21704_v24  ;;  %v16456_v6 = vpack.c.bf16 %v21781_v25, %v21781_v25  ;;  %v17890_v24 = vld [vmem:[%s25155_s1 + $0x980] ss:$8 sps:$4 sm:$0xff]  }
 0x3d4   : > { %v5125_v9 = vpop.f32.mrf.mxu0  ;;  %v3696_v48 = vpop.f32.mrf.mxu1  ;;  %5960 = vmatprep.subr.bf16.mxu1 %v25301_v20  ;;  %7389 = vmatprep.subr.bf16.mxu0 %v25301_v20 }
 0x3d5   : > { %3791 = vst.msk [vmem:[#allocation2 + $0x214] sm:$0xf] %vm2045_vm7, %v16377_v15  ;;  %5434 = vmatprep.mubr.bf16.mxu1 %v17877_v22  ;;  %6863 = vmatprep.mubr.bf16.mxu0 %v17880_v32  ;;  %v17887_v9 = vld [vmem:[%s25155_s1 + $0x700] ss:$8 sps:$4 sm:$0xff]  }
 0x3d6   : > { %v3697_v34 = vpop.f32.mrf.mxu1  ;;  %v21815_v57 = vpop.f32.mrf.mxu0  ;;  %4644 = vrot.lane.b32.xlu0 %v16429_v17, %s25203_s29  ;;  %5200 = vrot.lane.b32.xlu1 %v16450_v5, %s25203_s29 }
 0x3d7   : > { %v16378_v44 = vpack.c.bf16 %v3697_v34, %v3697_v34  ;;  %5961 = vmatpush2.bf16.msra.mxu1 %v20154_v21  ;;  %7390 = vmatpush2.bf16.msra.mxu0 %v20154_v21  ;;  %v3489_v37 = vpop.permute.xlu0 %3488  ;;  %v4045_v39 = vpop.permute.xlu1 %4044 }
 0x3d8   : > { %v5128_v35 = vpop.f32.mrf.mxu0  ;;  %v3699_v29 = vpop.f32.mrf.mxu1  ;;  %5962 = vmatprep.subr.bf16.mxu1 %v25301_v20  ;;  %7391 = vmatprep.subr.bf16.mxu0 %v25301_v20  ;;  %3522 = vst.msk [vmem:[#allocation2 + $0x2e0] sm:$0xf] %vm2351_vm8, %v3489_v37  ;;  %4089 = vst.msk [vmem:[#allocation2 + $0xa8] sm:$0xf] %vm2351_vm8, %v4045_v39  ;;  %v16453_v39 = vpack.c.bf16 %v21738_v19, %v21738_v19 }
 0x3d9   : > { %3792 = vst.msk [vmem:[#allocation2 + $0x248] sm:$0xf] %vm2045_vm7, %v16378_v44  ;;  %v16458_v35 = vpack.c.bf16 %v21815_v57, %v21815_v57 }
 0x3da   : > { %v3702_v7 = vpop.f32.mrf.mxu1  ;;  %v21842_v40 = vpop.f32.mrf.mxu0  ;;  %5435 = vmatmul.mubr.bf16.gmra.mxu1 %v17875_v54  ;;  %6864 = vmatmul.mubr.bf16.gmra.mxu0 %v17878_v12  ;;  %v17895_v54 = vld [vmem:[%s25155_s1 + $0x714] ss:$8 sps:$4 sm:$0xff]  }
 0x3db   : > { %v16379_v38 = vpack.c.bf16 %v3702_v7, %v3702_v7  ;;  %5963 = vmatpush2.bf16.msra.mxu1 %v20126_v18  ;;  %7392 = vmatpush2.bf16.msra.mxu0 %v20126_v18  ;;  %v4039_v47 = vpop.permute.xlu0 %4038  ;;  %v4049_v60 = vpop.permute.xlu1 %4048  ;;  %v17898_v12 = vld [vmem:[%s25155_s1 + $0x994] ss:$8 sps:$4 sm:$0xff]   ;;  %v17893_v7 = vld [vmem:[%s25155_s1 + $0x710] ss:$8 sps:$4 sm:$0xff]  }
 0x3dc   : > { %v5133_v16 = vpop.f32.mrf.mxu0  ;;  %v3704_v11 = vpop.f32.mrf.mxu1  ;;  %5442 = vmatprep.mubr.bf16.mxu1 %v17883_v13  ;;  %6871 = vmatprep.mubr.bf16.mxu0 %v17886_v42  ;;  %4086 = vst.msk [vmem:[#allocation2 + $0xc] sm:$0xf] %vm2351_vm8, %v4039_v47  ;;  %4091 = vst.msk [vmem:[#allocation2 + $0x110] sm:$0xf] %vm2351_vm8, %v4049_v60 }
 0x3dd   : > { %3793 = vst.msk [vmem:[#allocation2 + $0x27c] sm:$0xf] %vm2045_vm7, %v16379_v38  ;;  %6510 = vmatprep.subr.bf16.mxu1 %v25301_v20  ;;  %7939 = vmatprep.subr.bf16.mxu0 %v25301_v20  ;;  %v17896_v38 = vld [vmem:[%s25155_s1 + $0x990] ss:$8 sps:$4 sm:$0xff]   ;;  %v17901_v11 = vld [vmem:[%s25155_s1 + $0x724] ss:$8 sps:$4 sm:$0xff]  }
 0x3de   : > { %v3705_v26 = vpop.f32.mrf.mxu1  ;;  %v21851_v49 = vpop.f32.mrf.mxu0  ;;  %5194 = vrot.lane.b32.xlu0 %v16447_v14, %s25203_s29  ;;  %5204 = vrot.lane.b32.xlu1 %v16452_v2, %s25203_s29 }
 0x3df   : > { %v16380_v55 = vpack.c.bf16 %v3705_v26, %v3705_v26  ;;  %v17904_v26 = vld [vmem:[%s25155_s1 + $0x9a4] ss:$8 sps:$4 sm:$0xff]  }
 0x3e0   : > { %v3707_v30 = vpop.f32.mrf.mxu1  ;;  %v5136_v58 = vpop.f32.mrf.mxu0 }
 0x3e1   : > { %3794 = vst.msk [vmem:[#allocation2 + $0x2b0] sm:$0xf] %vm2045_vm7, %v16380_v55  ;;  %v4043_v61 = vpop.permute.xlu0 %4042  ;;  %v4053_v22 = vpop.permute.xlu1 %4052  ;;  %v16455_v55 = vpack.c.bf16 %v21772_v1, %v21772_v1 }
 0x3e2   : > { %v21872_v32 = vpop.f32.mrf.mxu0  ;;  %6872 = vmatmul.mubr.bf16.gmra.mxu0 %v17884_v0  ;;  %v3710_v3 = vpop.f32.mrf.mxu1  ;;  %5443 = vmatmul.mubr.bf16.gmra.mxu1 %v17881_v41  ;;  %4088 = vst.msk [vmem:[#allocation2 + $0x74] sm:$0xf] %vm2351_vm8, %v4043_v61  ;;  %4093 = vst.msk [vmem:[#allocation2 + $0x178] sm:$0xf] %vm2351_vm8, %v4053_v22  ;;  %v17899_v61 = vld [vmem:[%s25155_s1 + $0x720] ss:$8 sps:$4 sm:$0xff]  }
 0x3e3   : > { %v16381_v50 = vpack.c.bf16 %v3710_v3, %v3710_v3  ;;  %5964 = vmatprep.mubr.bf16.mxu1 %v17889_v43  ;;  %7393 = vmatprep.mubr.bf16.mxu0 %v17892_v45  ;;  %v16460_v43 = vpack.c.bf16 %v21851_v49, %v21851_v49  ;;  %v17902_v22 = vld [vmem:[%s25155_s1 + $0x9a0] ss:$8 sps:$4 sm:$0xff]  }
 0x3e4   : > { %v3712_v17 = vpop.f32.mrf.mxu1  ;;  %v5141_v5 = vpop.f32.mrf.mxu0  ;;  %5198 = vrot.lane.b32.xlu0 %v16449_v27, %s25203_s29  ;;  %5208 = vrot.lane.b32.xlu1 %v16454_v10, %s25203_s29 }
 0x3e5   : > { %3795 = vst.msk [vmem:[#allocation2 + $0x2e4] sm:$0xf] %vm2045_vm7, %v16381_v50  ;;  %v17910_v17 = vld [vmem:[%s25155_s1 + $0x9b4] ss:$8 sps:$4 sm:$0xff]  }
 0x3e6   : > { %v21883_v36 = vpop.f32.mrf.mxu0  ;;  %v3713_v15 = vpop.f32.mrf.mxu1 }
 0x3e7   : > { %v16382_v25 = vpack.c.bf16 %v3713_v15, %v3713_v15 }
 0x3e8   : > { %v3715_v48 = vpop.f32.mrf.mxu1  ;;  %v5144_v34 = vpop.f32.mrf.mxu0  ;;  %5202 = vrot.lane.b32.xlu0 %v16451_v63, %s25203_s29  ;;  %5212 = vrot.lane.b32.xlu1 %v16456_v6, %s25203_s29  ;;  %v17907_v6 = vld [vmem:[%s25155_s1 + $0x734] ss:$8 sps:$4 sm:$0xff]  }
 0x3e9   : > { %3796 = vst.msk [vmem:[#allocation2 + $0x318] sm:$0xf] %vm2045_vm7, %v16382_v25  ;;  %v4047_v44 = vpop.permute.xlu0 %4046  ;;  %v4057_v37 = vpop.permute.xlu1 %4056 }
 0x3ea   : > { %v21904_v29 = vpop.f32.mrf.mxu0  ;;  %7394 = vmatmul.mubr.bf16.vlgmr.msra.gmra.mxu0 %v17890_v24  ;;  %v4232_v13 = vpop.f32.mrf.mxu1  ;;  %5965 = vmatmul.mubr.bf16.vlgmr.msra.gmra.mxu1 %v17887_v9  ;;  %4090 = vst.msk [vmem:[#allocation2 + $0xdc] sm:$0xf] %vm2351_vm8, %v4047_v44  ;;  %4095 = vst.msk [vmem:[#allocation2 + $0x1e0] sm:$0xf] %vm2351_vm8, %v4057_v37  ;;  %v16457_v9 = vpack.c.bf16 %v21806_v23, %v21806_v23  ;;  %v16462_v24 = vpack.c.bf16 %v21883_v36, %v21883_v36  ;;  %v17905_v44 = vld [vmem:[%s25155_s1 + $0x730] ss:$8 sps:$4 sm:$0xff]  }
 0x3eb   : > { %7940 = vmatpush1.bf16.msra.mxu0 %v20114_v62  ;;  %v16399_v42 = vpack.c.bf16 %v4232_v13, %v4232_v13  ;;  %6511 = vmatpush1.bf16.msra.mxu1 %v20114_v62  ;;  %v17908_v37 = vld [vmem:[%s25155_s1 + $0x9b0] ss:$8 sps:$4 sm:$0xff]  }
 0x3ec   : > { %v4234_v14 = vpop.f32.mrf.mxu1  ;;  %v5663_v2 = vpop.f32.mrf.mxu0  ;;  %6512 = vmatprep.subr.bf16.mxu1 %v25301_v20  ;;  %7941 = vmatprep.subr.bf16.mxu0 %v25301_v20 }
 0x3ed   : > { %4359 = vst.msk [vmem:[#allocation2 + $0x10] sm:$0xf] %vm2045_vm7, %v16399_v42  ;;  %5972 = vmatprep.mubr.bf16.mxu1 %v17895_v54  ;;  %7401 = vmatprep.mubr.bf16.mxu0 %v17898_v12  ;;  %v17913_v42 = vld [vmem:[%s25155_s1 + $0x744] ss:$8 sps:$4 sm:$0xff]  }
 0x3ee   : > { %v21913_v19 = vpop.f32.mrf.mxu0  ;;  %v4235_v57 = vpop.f32.mrf.mxu1  ;;  %5206 = vrot.lane.b32.xlu0 %v16453_v39, %s25203_s29  ;;  %5216 = vrot.lane.b32.xlu1 %v16458_v35, %s25203_s29  ;;  %v17916_v14 = vld [vmem:[%s25155_s1 + $0x9c4] ss:$8 sps:$4 sm:$0xff]  }
 0x3ef   : > { %7942 = vmatpush1.bf16.msra.mxu0 %v20084_v28  ;;  %v16400_v47 = vpack.c.bf16 %v4235_v57, %v4235_v57  ;;  %6513 = vmatpush1.bf16.msra.mxu1 %v20084_v28 }
 0x3f0   : > { %v5666_v60 = vpop.f32.mrf.mxu0  ;;  %v4237_v16 = vpop.f32.mrf.mxu1  ;;  %6514 = vmatprep.subr.bf16.mxu1 %v25301_v20  ;;  %7943 = vmatprep.subr.bf16.mxu0 %v25301_v20 }
 0x3f1   : > { %4360 = vst.msk [vmem:[#allocation2 + $0x44] sm:$0xf] %vm2045_vm7, %v16400_v47  ;;  %v4051_v41 = vpop.permute.xlu0 %4050  ;;  %v4061_v0 = vpop.permute.xlu1 %4060 }
 0x3f2   : > { %v21938_v45 = vpop.f32.mrf.mxu0  ;;  %7402 = vmatmul.mubr.bf16.gmra.mxu0 %v17896_v38  ;;  %v4240_v27 = vpop.f32.mrf.mxu1  ;;  %5973 = vmatmul.mubr.bf16.gmra.mxu1 %v17893_v7  ;;  %4092 = vst.msk [vmem:[#allocation2 + $0x144] sm:$0xf] %vm2351_vm8, %v4051_v41  ;;  %4097 = vst.msk [vmem:[#allocation2 + $0x248] sm:$0xf] %vm2351_vm8, %v4061_v0  ;;  %v16459_v7 = vpack.c.bf16 %v21842_v40, %v21842_v40  ;;  %v16480_v38 = vpack.c.bf16 %v21913_v19, %v21913_v19  ;;  %v17911_v41 = vld [vmem:[%s25155_s1 + $0x740] ss:$8 sps:$4 sm:$0xff]  }
 0x3f3   : > { %7944 = vmatpush1.bf16.msra.mxu0 %v20070_v51  ;;  %v16401_v10 = vpack.c.bf16 %v4240_v27, %v4240_v27  ;;  %6515 = vmatpush1.bf16.msra.mxu1 %v20070_v51  ;;  %v17914_v0 = vld [vmem:[%s25155_s1 + $0x9c0] ss:$8 sps:$4 sm:$0xff]  }
 0x3f4   : > { %v5671_v30 = vpop.f32.mrf.mxu0  ;;  %v4242_v58 = vpop.f32.mrf.mxu1  ;;  %6516 = vmatprep.subr.bf16.mxu1 %v25301_v20  ;;  %7945 = vmatprep.subr.bf16.mxu0 %v25301_v20 }
 0x3f5   : > { %4361 = vst.msk [vmem:[#allocation2 + $0x78] sm:$0xf] %vm2045_vm7, %v16401_v10  ;;  %5980 = vmatprep.mubr.bf16.mxu1 %v17901_v11  ;;  %7409 = vmatprep.mubr.bf16.mxu0 %v17904_v26  ;;  %v17919_v10 = vld [vmem:[%s25155_s1 + $0x754] ss:$8 sps:$4 sm:$0xff]  }
 0x3f6   : > { %v21947_v1 = vpop.f32.mrf.mxu0  ;;  %v4243_v49 = vpop.f32.mrf.mxu1  ;;  %5210 = vrot.lane.b32.xlu0 %v16455_v55, %s25203_s29  ;;  %5220 = vrot.lane.b32.xlu1 %v16460_v43, %s25203_s29  ;;  %v17922_v30 = vld [vmem:[%s25155_s1 + $0x9d4] ss:$8 sps:$4 sm:$0xff]  }
 0x3f7   : > { %7946 = vmatpush1.bf16.msra.mxu0 %v20036_v53  ;;  %v16402_v3 = vpack.c.bf16 %v4243_v49, %v4243_v49  ;;  %6517 = vmatpush1.bf16.msra.mxu1 %v20036_v53 }
 0x3f8   : > { %v4245_v50 = vpop.f32.mrf.mxu1  ;;  %v5674_v63 = vpop.f32.mrf.mxu0  ;;  %6518 = vmatprep.subr.bf16.mxu1 %v25301_v20  ;;  %7947 = vmatprep.subr.bf16.mxu0 %v25301_v20 }
 0x3f9   : > { %4362 = vst.msk [vmem:[#allocation2 + $0xac] sm:$0xf] %vm2045_vm7, %v16402_v3  ;;  %v4055_v5 = vpop.permute.xlu0 %4054  ;;  %v4065_v15 = vpop.permute.xlu1 %4064 }
 0x3fa   : > { %v21972_v25 = vpop.f32.mrf.mxu0  ;;  %7410 = vmatmul.mubr.bf16.gmra.mxu0 %v17902_v22  ;;  %v4248_v48 = vpop.f32.mrf.mxu1  ;;  %5981 = vmatmul.mubr.bf16.gmra.mxu1 %v17899_v61  ;;  %4094 = vst.msk [vmem:[#allocation2 + $0x1ac] sm:$0xf] %vm2351_vm8, %v4055_v5  ;;  %4099 = vst.msk [vmem:[#allocation2 + $0x2b0] sm:$0xf] %vm2351_vm8, %v4065_v15  ;;  %v16461_v61 = vpack.c.bf16 %v21872_v32, %v21872_v32  ;;  %v16482_v22 = vpack.c.bf16 %v21947_v1, %v21947_v1  ;;  %v17917_v5 = vld [vmem:[%s25155_s1 + $0x750] ss:$8 sps:$4 sm:$0xff]  }
 0x3fb   : > { %7948 = vmatpush1.bf16.msra.mxu0 %v20018_v4  ;;  %v16403_v34 = vpack.c.bf16 %v4248_v48, %v4248_v48  ;;  %6519 = vmatpush1.bf16.msra.mxu1 %v20018_v4  ;;  %v17920_v15 = vld [vmem:[%s25155_s1 + $0x9d0] ss:$8 sps:$4 sm:$0xff]  }
 0x3fc   : > { %v5679_v54 = vpop.f32.mrf.mxu0  ;;  %v4250_v12 = vpop.f32.mrf.mxu1  ;;  %6520 = vmatprep.subr.bf16.mxu1 %v25301_v20  ;;  %7949 = vmatprep.subr.bf16.mxu0 %v25301_v20 }
 0x3fd   : > { %4363 = vst.msk [vmem:[#allocation2 + $0xe0] sm:$0xf] %vm2045_vm7, %v16403_v34  ;;  %5988 = vmatprep.mubr.bf16.mxu1 %v17907_v6  ;;  %7417 = vmatprep.mubr.bf16.mxu0 %v17910_v17  ;;  %v17925_v34 = vld [vmem:[%s25155_s1 + $0x764] ss:$8 sps:$4 sm:$0xff]  }
 0x3fe   : > { %v21981_v23 = vpop.f32.mrf.mxu0  ;;  %v4251_v36 = vpop.f32.mrf.mxu1  ;;  %5214 = vrot.lane.b32.xlu0 %v16457_v9, %s25203_s29  ;;  %5224 = vrot.lane.b32.xlu1 %v16462_v24, %s25203_s29  ;;  %v17928_v54 = vld [vmem:[%s25155_s1 + $0x9e4] ss:$8 sps:$4 sm:$0xff]  }
 0x3ff   : > { %7950 = vmatpush1.bf16.msra.mxu0 %v19988_v59  ;;  %v16404_v39 = vpack.c.bf16 %v4251_v36, %v4251_v36  ;;  %6521 = vmatpush1.bf16.msra.mxu1 %v19988_v59 }
 0x400   : > { %v4253_v35 = vpop.f32.mrf.mxu1  ;;  %v5682_v13 = vpop.f32.mrf.mxu0  ;;  %6522 = vmatprep.subr.bf16.mxu1 %v25301_v20  ;;  %7951 = vmatprep.subr.bf16.mxu0 %v25301_v20 }
 0x401   : > { %4364 = vst.msk [vmem:[#allocation2 + $0x114] sm:$0xf] %vm2045_vm7, %v16404_v39  ;;  %v4059_v2 = vpop.permute.xlu0 %4058  ;;  %v4069_v57 = vpop.permute.xlu1 %4068 }
 0x402   : > { %v22006_v47 = vpop.f32.mrf.mxu0  ;;  %7418 = vmatmul.mubr.bf16.gmra.mxu0 %v17908_v37  ;;  %v4256_v60 = vpop.f32.mrf.mxu1  ;;  %5989 = vmatmul.mubr.bf16.gmra.mxu1 %v17905_v44  ;;  %4096 = vst.msk [vmem:[#allocation2 + $0x214] sm:$0xf] %vm2351_vm8, %v4059_v2  ;;  %4101 = vst.msk [vmem:[#allocation2 + $0x318] sm:$0xf] %vm2351_vm8, %v4069_v57  ;;  %v16479_v44 = vpack.c.bf16 %v21904_v29, %v21904_v29  ;;  %v16484_v37 = vpack.c.bf16 %v21981_v23, %v21981_v23  ;;  %v17923_v2 = vld [vmem:[%s25155_s1 + $0x760] ss:$8 sps:$4 sm:$0xff]  }
 0x403   : > { %7952 = vmatpush1.bf16.msra.mxu0 %v19968_v52  ;;  %v16405_v16 = vpack.c.bf16 %v4256_v60, %v4256_v60  ;;  %6523 = vmatpush1.bf16.msra.mxu1 %v19968_v52  ;;  %v17926_v57 = vld [vmem:[%s25155_s1 + $0x9e0] ss:$8 sps:$4 sm:$0xff]  }
 0x404   : > { %v5687_v11 = vpop.f32.mrf.mxu0  ;;  %v4258_v26 = vpop.f32.mrf.mxu1  ;;  %6524 = vmatprep.subr.bf16.mxu1 %v25301_v20  ;;  %7953 = vmatprep.subr.bf16.mxu0 %v25301_v20 }
 0x405   : > { %4365 = vst.msk [vmem:[#allocation2 + $0x148] sm:$0xf] %vm2045_vm7, %v16405_v16  ;;  %5996 = vmatprep.mubr.bf16.mxu1 %v17913_v42  ;;  %7425 = vmatprep.mubr.bf16.mxu0 %v17916_v14  ;;  %v17931_v26 = vld [vmem:[%s25155_s1 + $0x774] ss:$8 sps:$4 sm:$0xff]  }
 0x406   : > { %v4259_v40 = vpop.f32.mrf.mxu1  ;;  %v22015_v19 = vpop.f32.mrf.mxu0  ;;  %5218 = vrot.lane.b32.xlu0 %v16459_v7, %s25203_s29  ;;  %5774 = vrot.lane.b32.xlu1 %v16480_v38, %s25203_s29 }
 0x407   : > { %v16406_v55 = vpack.c.bf16 %v4259_v40, %v4259_v40  ;;  %6525 = vmatpush1.bf16.msra.mxu1 %v19935_v8  ;;  %7954 = vmatpush1.bf16.msra.mxu0 %v19935_v8  ;;  %v17934_v40 = vld [vmem:[%s25155_s1 + $0x9f4] ss:$8 sps:$4 sm:$0xff]  }
 0x408   : > { %v4261_v43 = vpop.f32.mrf.mxu1  ;;  %v5690_v27 = vpop.f32.mrf.mxu0  ;;  %6532 = vmatprep.subr.bf16.mxu1 %v25301_v20  ;;  %7961 = vmatprep.subr.bf16.mxu0 %v25301_v20 }
 0x409   : > { %4366 = vst.msk [vmem:[#allocation2 + $0x17c] sm:$0xf] %vm2045_vm7, %v16406_v55  ;;  %v4063_v58 = vpop.permute.xlu0 %4062  ;;  %v4619_v49 = vpop.permute.xlu1 %4618 }
 0x40a   : > { %v22040_v3 = vpop.f32.mrf.mxu0  ;;  %7426 = vmatmul.mubr.bf16.gmra.mxu0 %v17914_v0  ;;  %v4264_v50 = vpop.f32.mrf.mxu1  ;;  %5997 = vmatmul.mubr.bf16.gmra.mxu1 %v17911_v41  ;;  %4098 = vst.msk [vmem:[#allocation2 + $0x27c] sm:$0xf] %vm2351_vm8, %v4063_v58  ;;  %4665 = vst.msk [vmem:[#allocation2 + $0x44] sm:$0xf] %vm2351_vm8, %v4619_v49  ;;  %v16481_v41 = vpack.c.bf16 %v21938_v45, %v21938_v45  ;;  %v16486_v0 = vpack.c.bf16 %v22015_v19, %v22015_v19 }
 0x40b   : > { %7962 = vmatpush2.bf16.msra.mxu0 %v20199_v46  ;;  %v16407_v63 = vpack.c.bf16 %v4264_v50, %v4264_v50  ;;  %6533 = vmatpush2.bf16.msra.mxu1 %v20199_v46 }
 0x40c   : > { %v5695_v6 = vpop.f32.mrf.mxu0  ;;  %v4266_v17 = vpop.f32.mrf.mxu1  ;;  %6534 = vmatprep.subr.bf16.mxu1 %v25301_v20  ;;  %7963 = vmatprep.subr.bf16.mxu0 %v25301_v20 }
 0x40d   : > { %4367 = vst.msk [vmem:[#allocation2 + $0x1b0] sm:$0xf] %vm2045_vm7, %v16407_v63  ;;  %6004 = vmatprep.mubr.bf16.mxu1 %v17919_v10  ;;  %7433 = vmatprep.mubr.bf16.mxu0 %v17922_v30  ;;  %v17937_v63 = vld [vmem:[%s25155_s1 + $0x804] ss:$8 sps:$4 sm:$0xff]   ;;  %v16483_v17 = vpack.c.bf16 %v21972_v25, %v21972_v25  ;;  %v16485_v25 = vpack.c.bf16 %v22006_v47, %v22006_v47  ;;  %v17938_v47 = vld [vmem:[%s25155_s1 + $0xa80] ss:$8 sps:$4 sm:$0xff]  }
 0x40e   : > { %v4267_v32 = vpop.f32.mrf.mxu1  ;;  %v22049_v1 = vpop.f32.mrf.mxu0  ;;  %5222 = vrot.lane.b32.xlu0 %v16461_v61, %s25203_s29  ;;  %5778 = vrot.lane.b32.xlu1 %v16482_v22, %s25203_s29  ;;  %v17929_v61 = vld [vmem:[%s25155_s1 + $0x770] ss:$8 sps:$4 sm:$0xff]   ;;  %v17940_v6 = vld [vmem:[%s25155_s1 + $0xa84] ss:$8 sps:$4 sm:$0xff]  }
 0x40f   : > { %v16408_v9 = vpack.c.bf16 %v4267_v32, %v4267_v32  ;;  %6535 = vmatpush2.bf16.msra.mxu1 %v20180_v56  ;;  %7964 = vmatpush2.bf16.msra.mxu0 %v20180_v56  ;;  %v17932_v22 = vld [vmem:[%s25155_s1 + $0x9f0] ss:$8 sps:$4 sm:$0xff]   ;;  %v16488_v32 = vpack.c.bf16 %v22049_v1, %v22049_v1 }
 0x410   : > { %v4269_v24 = vpop.f32.mrf.mxu1  ;;  %v5698_v48 = vpop.f32.mrf.mxu0  ;;  %6536 = vmatprep.subr.bf16.mxu1 %v25301_v20  ;;  %7965 = vmatprep.subr.bf16.mxu0 %v25301_v20 }
 0x411   : > { %4368 = vst.msk [vmem:[#allocation2 + $0x1e4] sm:$0xf] %vm2045_vm7, %v16408_v9  ;;  %v4067_v12 = vpop.permute.xlu0 %4066  ;;  %v4623_v36 = vpop.permute.xlu1 %4622 }
 0x412   : > { %v22074_v39 = vpop.f32.mrf.mxu0  ;;  %7434 = vmatmul.mubr.bf16.gmra.mxu0 %v17920_v15  ;;  %v4272_v35 = vpop.f32.mrf.mxu1  ;;  %6005 = vmatmul.mubr.bf16.gmra.mxu1 %v17917_v5  ;;  %4100 = vst.msk [vmem:[#allocation2 + $0x2e4] sm:$0xf] %vm2351_vm8, %v4067_v12  ;;  %4667 = vst.msk [vmem:[#allocation2 + $0xac] sm:$0xf] %vm2351_vm8, %v4623_v36 }
 0x413   : > { %7966 = vmatpush2.bf16.msra.mxu0 %v20168_v31  ;;  %v16409_v13 = vpack.c.bf16 %v4272_v35, %v4272_v35  ;;  %6537 = vmatpush2.bf16.msra.mxu1 %v20168_v31  ;;  %v17935_v35 = vld [vmem:[%s25155_s1 + $0x800] ss:$8 sps:$4 sm:$0xff]  }
 0x414   : > { %v5703_v42 = vpop.f32.mrf.mxu0  ;;  %v4274_v14 = vpop.f32.mrf.mxu1  ;;  %6538 = vmatprep.subr.bf16.mxu1 %v25301_v20  ;;  %7967 = vmatprep.subr.bf16.mxu0 %v25301_v20 }
 0x415   : > { %4369 = vst.msk [vmem:[#allocation2 + $0x218] sm:$0xf] %vm2045_vm7, %v16409_v13  ;;  %6012 = vmatprep.mubr.bf16.mxu1 %v17925_v34  ;;  %7441 = vmatprep.mubr.bf16.mxu0 %v17928_v54 }
 0x416   : > { %v4275_v29 = vpop.f32.mrf.mxu1  ;;  %v22083_v23 = vpop.f32.mrf.mxu0  ;;  %5772 = vrot.lane.b32.xlu0 %v16479_v44, %s25203_s29  ;;  %5782 = vrot.lane.b32.xlu1 %v16484_v37, %s25203_s29 }
 0x417   : > { %v16410_v7 = vpack.c.bf16 %v4275_v29, %v4275_v29  ;;  %6539 = vmatpush2.bf16.msra.mxu1 %v20154_v21  ;;  %7968 = vmatpush2.bf16.msra.mxu0 %v20154_v21  ;;  %v4617_v38 = vpop.permute.xlu0 %4616  ;;  %v4627_v60 = vpop.permute.xlu1 %4626  ;;  %v16490_v1 = vpack.c.bf16 %v22083_v23, %v22083_v23  ;;  %v17943_v29 = vld [vmem:[%s25155_s1 + $0x814] ss:$8 sps:$4 sm:$0xff]  }
 0x418   : > { %v4277_v16 = vpop.f32.mrf.mxu1  ;;  %v5706_v11 = vpop.f32.mrf.mxu0  ;;  %6540 = vmatprep.subr.bf16.mxu1 %v25301_v20  ;;  %7969 = vmatprep.subr.bf16.mxu0 %v25301_v20  ;;  %4664 = vst.msk [vmem:[#allocation2 + $0x10] sm:$0xf] %vm2351_vm8, %v4617_v38  ;;  %4669 = vst.msk [vmem:[#allocation2 + $0x114] sm:$0xf] %vm2351_vm8, %v4627_v60  ;;  %v17946_v23 = vld [vmem:[%s25155_s1 + $0xa94] ss:$8 sps:$4 sm:$0xff]  }
 0x419   : > { %4370 = vst.msk [vmem:[#allocation2 + $0x24c] sm:$0xf] %vm2045_vm7, %v16410_v7  ;;  %v16487_v7 = vpack.c.bf16 %v22040_v3, %v22040_v3 }
 0x41a   : > { %v22110_v55 = vpop.f32.mrf.mxu0  ;;  %7442 = vmatmul.mubr.bf16.gmra.mxu0 %v17926_v57  ;;  %v4280_v43 = vpop.f32.mrf.mxu1  ;;  %6013 = vmatmul.mubr.bf16.gmra.mxu1 %v17923_v2 }
 0x41b   : > { %7970 = vmatpush2.bf16.msra.mxu0 %v20126_v18  ;;  %v16411_v27 = vpack.c.bf16 %v4280_v43, %v4280_v43  ;;  %6541 = vmatpush2.bf16.msra.mxu1 %v20126_v18  ;;  %v4621_v10 = vpop.permute.xlu0 %4620  ;;  %v4631_v30 = vpop.permute.xlu1 %4630  ;;  %v17944_v43 = vld [vmem:[%s25155_s1 + $0xa90] ss:$8 sps:$4 sm:$0xff]  }
 0x41c   : > { %v5711_v58 = vpop.f32.mrf.mxu0  ;;  %v4282_v49 = vpop.f32.mrf.mxu1  ;;  %6020 = vmatprep.mubr.bf16.mxu1 %v17931_v26  ;;  %7449 = vmatprep.mubr.bf16.mxu0 %v17934_v40  ;;  %4666 = vst.msk [vmem:[#allocation2 + $0x78] sm:$0xf] %vm2351_vm8, %v4621_v10  ;;  %4671 = vst.msk [vmem:[#allocation2 + $0x17c] sm:$0xf] %vm2351_vm8, %v4631_v30 }
 0x41d   : > { %4371 = vst.msk [vmem:[#allocation2 + $0x280] sm:$0xf] %vm2045_vm7, %v16411_v27  ;;  %7088 = vmatprep.subr.bf16.mxu1 %v25301_v20  ;;  %8517 = vmatprep.subr.bf16.mxu0 %v25301_v20  ;;  %v17949_v58 = vld [vmem:[%s25155_s1 + $0x824] ss:$8 sps:$4 sm:$0xff]  }
 0x41e   : > { %v4283_v45 = vpop.f32.mrf.mxu1  ;;  %v22119_v19 = vpop.f32.mrf.mxu0  ;;  %5776 = vrot.lane.b32.xlu0 %v16481_v41, %s25203_s29  ;;  %5786 = vrot.lane.b32.xlu1 %v16486_v0, %s25203_s29  ;;  %v17941_v0 = vld [vmem:[%s25155_s1 + $0x810] ss:$8 sps:$4 sm:$0xff]   ;;  %v17952_v49 = vld [vmem:[%s25155_s1 + $0xaa4] ss:$8 sps:$4 sm:$0xff]  }
 0x41f   : > { %v16412_v50 = vpack.c.bf16 %v4283_v45, %v4283_v45  ;;  %v16492_v38 = vpack.c.bf16 %v22119_v19, %v22119_v19 }
 0x420   : > { %v4285_v5 = vpop.f32.mrf.mxu1  ;;  %v5714_v15 = vpop.f32.mrf.mxu0 }
 0x421   : > { %4372 = vst.msk [vmem:[#allocation2 + $0x2b4] sm:$0xf] %vm2045_vm7, %v16412_v50  ;;  %v4625_v9 = vpop.permute.xlu0 %4624  ;;  %v4635_v24 = vpop.permute.xlu1 %4634  ;;  %v17947_v15 = vld [vmem:[%s25155_s1 + $0x820] ss:$8 sps:$4 sm:$0xff]  }
 0x422   : > { %v22140_v48 = vpop.f32.mrf.mxu0  ;;  %7450 = vmatmul.mubr.bf16.gmra.mxu0 %v17932_v22  ;;  %v4288_v34 = vpop.f32.mrf.mxu1  ;;  %6021 = vmatmul.mubr.bf16.gmra.mxu1 %v17929_v61  ;;  %4668 = vst.msk [vmem:[#allocation2 + $0xe0] sm:$0xf] %vm2351_vm8, %v4625_v9  ;;  %4673 = vst.msk [vmem:[#allocation2 + $0x1e4] sm:$0xf] %vm2351_vm8, %v4635_v24  ;;  %v16489_v61 = vpack.c.bf16 %v22074_v39, %v22074_v39  ;;  %v17950_v9 = vld [vmem:[%s25155_s1 + $0xaa0] ss:$8 sps:$4 sm:$0xff]  }
 0x423   : > { %v16413_v54 = vpack.c.bf16 %v4288_v34, %v4288_v34  ;;  %6542 = vmatprep.mubr.bf16.mxu1 %v17937_v63  ;;  %7971 = vmatprep.mubr.bf16.mxu0 %v17940_v6 }
 0x424   : > { %v5719_v12 = vpop.f32.mrf.mxu0  ;;  %v4290_v36 = vpop.f32.mrf.mxu1  ;;  %5780 = vrot.lane.b32.xlu0 %v16483_v17, %s25203_s29  ;;  %5790 = vrot.lane.b32.xlu1 %v16488_v32, %s25203_s29 }
 0x425   : > { %4373 = vst.msk [vmem:[#allocation2 + $0x2e8] sm:$0xf] %vm2045_vm7, %v16413_v54 }
 0x426   : > { %v4291_v44 = vpop.f32.mrf.mxu1  ;;  %v22151_v37 = vpop.f32.mrf.mxu0 }
 0x427   : > { %v16414_v13 = vpack.c.bf16 %v4291_v44, %v4291_v44  ;;  %v16494_v22 = vpack.c.bf16 %v22151_v37, %v22151_v37  ;;  %v16491_v44 = vpack.c.bf16 %v22110_v55, %v22110_v55 }
 0x428   : > { %v4293_v42 = vpop.f32.mrf.mxu1  ;;  %v5722_v14 = vpop.f32.mrf.mxu0  ;;  %5784 = vrot.lane.b32.xlu0 %v16485_v25, %s25203_s29  ;;  %5794 = vrot.lane.b32.xlu1 %v16490_v1, %s25203_s29  ;;  %v17955_v25 = vld [vmem:[%s25155_s1 + $0x834] ss:$8 sps:$4 sm:$0xff]  }
 0x429   : > { %4374 = vst.msk [vmem:[#allocation2 + $0x31c] sm:$0xf] %vm2045_vm7, %v16414_v13  ;;  %v4629_v2 = vpop.permute.xlu0 %4628  ;;  %v4639_v57 = vpop.permute.xlu1 %4638  ;;  %v17958_v1 = vld [vmem:[%s25155_s1 + $0xab4] ss:$8 sps:$4 sm:$0xff]  }
 0x42a   : > { %v22172_v60 = vpop.f32.mrf.mxu0  ;;  %7972 = vmatmul.mubr.bf16.vlgmr.msra.gmra.mxu0 %v17938_v47  ;;  %v4810_v16 = vpop.f32.mrf.mxu1  ;;  %6543 = vmatmul.mubr.bf16.vlgmr.msra.gmra.mxu1 %v17935_v35  ;;  %4670 = vst.msk [vmem:[#allocation2 + $0x148] sm:$0xf] %vm2351_vm8, %v4629_v2  ;;  %4675 = vst.msk [vmem:[#allocation2 + $0x24c] sm:$0xf] %vm2351_vm8, %v4639_v57  ;;  %v17956_v2 = vld [vmem:[%s25155_s1 + $0xab0] ss:$8 sps:$4 sm:$0xff]  }
 0x42b   : > { %8518 = vmatpush1.bf16.msra.mxu0 %v20114_v62  ;;  %v16431_v11 = vpack.c.bf16 %v4810_v16, %v4810_v16  ;;  %7089 = vmatpush1.bf16.msra.mxu1 %v20114_v62  ;;  %v17961_v16 = vld [vmem:[%s25155_s1 + $0x844] ss:$8 sps:$4 sm:$0xff]  }
 0x42c   : > { %v6241_v26 = vpop.f32.mrf.mxu0  ;;  %v4812_v40 = vpop.f32.mrf.mxu1  ;;  %7090 = vmatprep.subr.bf16.mxu1 %v25301_v20  ;;  %8519 = vmatprep.subr.bf16.mxu0 %v25301_v20 }
 0x42d   : > { %4937 = vst.msk [vmem:[#allocation2 + $0x14] sm:$0xf] %vm2045_vm7, %v16431_v11  ;;  %6550 = vmatprep.mubr.bf16.mxu1 %v17943_v29  ;;  %7979 = vmatprep.mubr.bf16.mxu0 %v17946_v23  ;;  %v17953_v23 = vld [vmem:[%s25155_s1 + $0x830] ss:$8 sps:$4 sm:$0xff]   ;;  %v17964_v11 = vld [vmem:[%s25155_s1 + $0xac4] ss:$8 sps:$4 sm:$0xff]  }
 0x42e   : > { %v4813_v3 = vpop.f32.mrf.mxu1  ;;  %v22181_v41 = vpop.f32.mrf.mxu0  ;;  %5788 = vrot.lane.b32.xlu0 %v16487_v7, %s25203_s29  ;;  %5798 = vrot.lane.b32.xlu1 %v16492_v38, %s25203_s29 }
 0x42f   : > { %v16432_v27 = vpack.c.bf16 %v4813_v3, %v4813_v3  ;;  %7091 = vmatpush1.bf16.msra.mxu1 %v20084_v28  ;;  %8520 = vmatpush1.bf16.msra.mxu0 %v20084_v28  ;;  %v16512_v37 = vpack.c.bf16 %v22181_v41, %v22181_v41  ;;  %v16493_v3 = vpack.c.bf16 %v22140_v48, %v22140_v48 }
 0x430   : > { %v4815_v10 = vpop.f32.mrf.mxu1  ;;  %v6244_v30 = vpop.f32.mrf.mxu0  ;;  %7092 = vmatprep.subr.bf16.mxu1 %v25301_v20  ;;  %8521 = vmatprep.subr.bf16.mxu0 %v25301_v20 }
 0x431   : > { %4938 = vst.msk [vmem:[#allocation2 + $0x48] sm:$0xf] %vm2045_vm7, %v16432_v27  ;;  %v4633_v45 = vpop.permute.xlu0 %4632  ;;  %v4643_v19 = vpop.permute.xlu1 %4642 }
 0x432   : > { %v22206_v50 = vpop.f32.mrf.mxu0  ;;  %7980 = vmatmul.mubr.bf16.gmra.mxu0 %v17944_v43  ;;  %v4818_v63 = vpop.f32.mrf.mxu1  ;;  %6551 = vmatmul.mubr.bf16.gmra.mxu1 %v17941_v0  ;;  %4672 = vst.msk [vmem:[#allocation2 + $0x1b0] sm:$0xf] %vm2351_vm8, %v4633_v45  ;;  %4677 = vst.msk [vmem:[#allocation2 + $0x2b4] sm:$0xf] %vm2351_vm8, %v4643_v19  ;;  %v17962_v45 = vld [vmem:[%s25155_s1 + $0xac0] ss:$8 sps:$4 sm:$0xff]  }
 0x433   : > { %8522 = vmatpush1.bf16.msra.mxu0 %v20070_v51  ;;  %v16433_v6 = vpack.c.bf16 %v4818_v63, %v4818_v63  ;;  %7093 = vmatpush1.bf16.msra.mxu1 %v20070_v51  ;;  %v17967_v63 = vld [vmem:[%s25155_s1 + $0x854] ss:$8 sps:$4 sm:$0xff]  }
 0x434   : > { %v4820_v17 = vpop.f32.mrf.mxu1  ;;  %v6249_v32 = vpop.f32.mrf.mxu0  ;;  %7094 = vmatprep.subr.bf16.mxu1 %v25301_v20  ;;  %8523 = vmatprep.subr.bf16.mxu0 %v25301_v20 }
 0x435   : > { %4939 = vst.msk [vmem:[#allocation2 + $0x7c] sm:$0xf] %vm2045_vm7, %v16433_v6  ;;  %6558 = vmatprep.mubr.bf16.mxu1 %v17949_v58  ;;  %7987 = vmatprep.mubr.bf16.mxu0 %v17952_v49  ;;  %v17959_v49 = vld [vmem:[%s25155_s1 + $0x840] ss:$8 sps:$4 sm:$0xff]   ;;  %v17970_v6 = vld [vmem:[%s25155_s1 + $0xad4] ss:$8 sps:$4 sm:$0xff]  }
 0x436   : > { %v4821_v39 = vpop.f32.mrf.mxu1  ;;  %v22215_v5 = vpop.f32.mrf.mxu0  ;;  %5792 = vrot.lane.b32.xlu0 %v16489_v61, %s25203_s29  ;;  %5802 = vrot.lane.b32.xlu1 %v16494_v22, %s25203_s29 }
 0x437   : > { %v16434_v24 = vpack.c.bf16 %v4821_v39, %v4821_v39  ;;  %7095 = vmatpush1.bf16.msra.mxu1 %v20036_v53  ;;  %8524 = vmatpush1.bf16.msra.mxu0 %v20036_v53  ;;  %v16514_v41 = vpack.c.bf16 %v22215_v5, %v22215_v5  ;;  %v16511_v39 = vpack.c.bf16 %v22172_v60, %v22172_v60 }
 0x438   : > { %v4823_v34 = vpop.f32.mrf.mxu1  ;;  %v6252_v54 = vpop.f32.mrf.mxu0  ;;  %7096 = vmatprep.subr.bf16.mxu1 %v25301_v20  ;;  %8525 = vmatprep.subr.bf16.mxu0 %v25301_v20 }
 0x439   : > { %4940 = vst.msk [vmem:[#allocation2 + $0xb0] sm:$0xf] %vm2045_vm7, %v16434_v24  ;;  %v4637_v12 = vpop.permute.xlu0 %4636  ;;  %v4647_v36 = vpop.permute.xlu1 %4646 }
 0x43a   : > { %v22240_v35 = vpop.f32.mrf.mxu0  ;;  %7988 = vmatmul.mubr.bf16.gmra.mxu0 %v17950_v9  ;;  %v4826_v47 = vpop.f32.mrf.mxu1  ;;  %6559 = vmatmul.mubr.bf16.gmra.mxu1 %v17947_v15  ;;  %4674 = vst.msk [vmem:[#allocation2 + $0x218] sm:$0xf] %vm2351_vm8, %v4637_v12  ;;  %4679 = vst.msk [vmem:[#allocation2 + $0x31c] sm:$0xf] %vm2351_vm8, %v4647_v36  ;;  %v17968_v12 = vld [vmem:[%s25155_s1 + $0xad0] ss:$8 sps:$4 sm:$0xff]  }
 0x43b   : > { %8526 = vmatpush1.bf16.msra.mxu0 %v20018_v4  ;;  %v16435_v13 = vpack.c.bf16 %v4826_v47, %v4826_v47  ;;  %7097 = vmatpush1.bf16.msra.mxu1 %v20018_v4  ;;  %v17973_v47 = vld [vmem:[%s25155_s1 + $0x864] ss:$8 sps:$4 sm:$0xff]  }
 0x43c   : > { %v4828_v42 = vpop.f32.mrf.mxu1  ;;  %v6257_v14 = vpop.f32.mrf.mxu0  ;;  %7098 = vmatprep.subr.bf16.mxu1 %v25301_v20  ;;  %8527 = vmatprep.subr.bf16.mxu0 %v25301_v20 }
 0x43d   : > { %4941 = vst.msk [vmem:[#allocation2 + $0xe4] sm:$0xf] %vm2045_vm7, %v16435_v13  ;;  %6566 = vmatprep.mubr.bf16.mxu1 %v17955_v25  ;;  %7995 = vmatprep.mubr.bf16.mxu0 %v17958_v1  ;;  %v17965_v1 = vld [vmem:[%s25155_s1 + $0x850] ss:$8 sps:$4 sm:$0xff]   ;;  %v17976_v13 = vld [vmem:[%s25155_s1 + $0xae4] ss:$8 sps:$4 sm:$0xff]  }
 0x43e   : > { %v4829_v55 = vpop.f32.mrf.mxu1  ;;  %v22249_v29 = vpop.f32.mrf.mxu0  ;;  %5796 = vrot.lane.b32.xlu0 %v16491_v44, %s25203_s29  ;;  %6352 = vrot.lane.b32.xlu1 %v16512_v37, %s25203_s29 }
 0x43f   : > { %v16436_v57 = vpack.c.bf16 %v4829_v55, %v4829_v55  ;;  %7099 = vmatpush1.bf16.msra.mxu1 %v19988_v59  ;;  %8528 = vmatpush1.bf16.msra.mxu0 %v19988_v59  ;;  %v16516_v5 = vpack.c.bf16 %v22249_v29, %v22249_v29  ;;  %v16513_v55 = vpack.c.bf16 %v22206_v50, %v22206_v50 }
 0x440   : > { %v4831_v7 = vpop.f32.mrf.mxu1  ;;  %v6260_v38 = vpop.f32.mrf.mxu0  ;;  %7100 = vmatprep.subr.bf16.mxu1 %v25301_v20  ;;  %8529 = vmatprep.subr.bf16.mxu0 %v25301_v20 }
 0x441   : > { %4942 = vst.msk [vmem:[#allocation2 + $0x118] sm:$0xf] %vm2045_vm7, %v16436_v57  ;;  %v4641_v26 = vpop.permute.xlu0 %4640  ;;  %v5197_v40 = vpop.permute.xlu1 %5196 }
 0x442   : > { %v4834_v0 = vpop.f32.mrf.mxu1  ;;  %v22274_v43 = vpop.f32.mrf.mxu0  ;;  %6567 = vmatmul.mubr.bf16.gmra.mxu1 %v17953_v23  ;;  %7996 = vmatmul.mubr.bf16.gmra.mxu0 %v17956_v2  ;;  %4676 = vst.msk [vmem:[#allocation2 + $0x280] sm:$0xf] %vm2351_vm8, %v4641_v26  ;;  %5243 = vst.msk [vmem:[#allocation2 + $0x48] sm:$0xf] %vm2351_vm8, %v5197_v40  ;;  %v17974_v26 = vld [vmem:[%s25155_s1 + $0xae0] ss:$8 sps:$4 sm:$0xff]  }
 0x443   : > { %v16437_v27 = vpack.c.bf16 %v4834_v0, %v4834_v0  ;;  %7101 = vmatpush1.bf16.msra.mxu1 %v19968_v52  ;;  %8530 = vmatpush1.bf16.msra.mxu0 %v19968_v52 }
 0x444   : > { %v4836_v10 = vpop.f32.mrf.mxu1  ;;  %v6265_v30 = vpop.f32.mrf.mxu0  ;;  %7102 = vmatprep.subr.bf16.mxu1 %v25301_v20  ;;  %8531 = vmatprep.subr.bf16.mxu0 %v25301_v20 }
 0x445   : > { %4943 = vst.msk [vmem:[#allocation2 + $0x14c] sm:$0xf] %vm2045_vm7, %v16437_v27  ;;  %6574 = vmatprep.mubr.bf16.mxu1 %v17961_v16  ;;  %8003 = vmatprep.mubr.bf16.mxu0 %v17964_v11  ;;  %v17971_v11 = vld [vmem:[%s25155_s1 + $0x860] ss:$8 sps:$4 sm:$0xff]   ;;  %v17979_v10 = vld [vmem:[%s25155_s1 + $0x874] ss:$8 sps:$4 sm:$0xff]  }
 0x446   : > { %v4837_v48 = vpop.f32.mrf.mxu1  ;;  %v22283_v58 = vpop.f32.mrf.mxu0  ;;  %5800 = vrot.lane.b32.xlu0 %v16493_v3, %s25203_s29  ;;  %6356 = vrot.lane.b32.xlu1 %v16514_v41, %s25203_s29  ;;  %v17982_v30 = vld [vmem:[%s25155_s1 + $0xaf4] ss:$8 sps:$4 sm:$0xff]  }
 0x447   : > { %v16438_v19 = vpack.c.bf16 %v4837_v48, %v4837_v48  ;;  %7103 = vmatpush1.bf16.msra.mxu1 %v19935_v8  ;;  %8532 = vmatpush1.bf16.msra.mxu0 %v19935_v8  ;;  %v16518_v29 = vpack.c.bf16 %v22283_v58, %v22283_v58  ;;  %v18013_v48 = vld [vmem:[%s25158_s4 + $0x78] sm:$0xff]   ;;  %v16515_v58 = vpack.c.bf16 %v22240_v35, %v22240_v35 }
 0x448   : > { %v4839_v61 = vpop.f32.mrf.mxu1  ;;  %v6268_v22 = vpop.f32.mrf.mxu0  ;;  %7110 = vmatprep.subr.bf16.mxu1 %v25301_v20  ;;  %8539 = vmatprep.subr.bf16.mxu0 %v25301_v20 }
 0x449   : > { %4944 = vst.msk [vmem:[#allocation2 + $0x180] sm:$0xf] %vm2045_vm7, %v16438_v19  ;;  %v4645_v17 = vpop.permute.xlu0 %4644  ;;  %v5201_v32 = vpop.permute.xlu1 %5200 }
 0x44a   : > { %v4842_v15 = vpop.f32.mrf.mxu1  ;;  %v22308_v9 = vpop.f32.mrf.mxu0  ;;  %6575 = vmatmul.mubr.bf16.gmra.mxu1 %v17959_v49  ;;  %8004 = vmatmul.mubr.bf16.gmra.mxu0 %v17962_v45  ;;  %4678 = vst.msk [vmem:[#allocation2 + $0x2e8] sm:$0xf] %vm2351_vm8, %v4645_v17  ;;  %5245 = vst.msk [vmem:[#allocation2 + $0xb0] sm:$0xf] %vm2351_vm8, %v5201_v32 }
 0x44b   : > { %v16439_v24 = vpack.c.bf16 %v4842_v15, %v4842_v15  ;;  %7111 = vmatpush2.bf16.msra.mxu1 %v20199_v46  ;;  %8540 = vmatpush2.bf16.msra.mxu0 %v20199_v46 }
 0x44c   : > { %v4844_v34 = vpop.f32.mrf.mxu1  ;;  %v6273_v54 = vpop.f32.mrf.mxu0  ;;  %7112 = vmatprep.subr.bf16.mxu1 %v25301_v20  ;;  %8541 = vmatprep.subr.bf16.mxu0 %v25301_v20 }
 0x44d   : > { %4945 = vst.msk [vmem:[#allocation2 + $0x1b4] sm:$0xf] %vm2045_vm7, %v16439_v24  ;;  %6582 = vmatprep.mubr.bf16.mxu1 %v17967_v63  ;;  %8011 = vmatprep.mubr.bf16.mxu0 %v17970_v6  ;;  %v17985_v24 = vld [vmem:[%s25155_s1 + $0x904] ss:$8 sps:$4 sm:$0xff]   ;;  %v16517_v54 = vpack.c.bf16 %v22274_v43, %v22274_v43  ;;  %v16519_v43 = vpack.c.bf16 %v22308_v9, %v22308_v9 }
 0x44e   : > { %v4845_v60 = vpop.f32.mrf.mxu1  ;;  %v22317_v25 = vpop.f32.mrf.mxu0  ;;  %6350 = vrot.lane.b32.xlu0 %v16511_v39, %s25203_s29  ;;  %6360 = vrot.lane.b32.xlu1 %v16516_v5, %s25203_s29  ;;  %v17977_v39 = vld [vmem:[%s25155_s1 + $0x870] ss:$8 sps:$4 sm:$0xff]   ;;  %v17988_v34 = vld [vmem:[%s25155_s1 + $0xb84] ss:$8 sps:$4 sm:$0xff]  }
 0x44f   : > { %v16440_v36 = vpack.c.bf16 %v4845_v60, %v4845_v60  ;;  %7113 = vmatpush2.bf16.msra.mxu1 %v20180_v56  ;;  %8542 = vmatpush2.bf16.msra.mxu0 %v20180_v56  ;;  %v16520_v49 = vpack.c.bf16 %v22317_v25, %v22317_v25  ;;  %v17980_v5 = vld [vmem:[%s25155_s1 + $0xaf0] ss:$8 sps:$4 sm:$0xff]  }
 0x450   : > { %v4847_v44 = vpop.f32.mrf.mxu1  ;;  %v6276_v37 = vpop.f32.mrf.mxu0  ;;  %7114 = vmatprep.subr.bf16.mxu1 %v25301_v20  ;;  %8543 = vmatprep.subr.bf16.mxu0 %v25301_v20 }
 0x451   : > { %4946 = vst.msk [vmem:[#allocation2 + $0x1e8] sm:$0xf] %vm2045_vm7, %v16440_v36  ;;  %v5195_v42 = vpop.permute.xlu0 %5194  ;;  %v5205_v14 = vpop.permute.xlu1 %5204 }
 0x452   : > { %v4850_v23 = vpop.f32.mrf.mxu1  ;;  %v22342_v2 = vpop.f32.mrf.mxu0  ;;  %6583 = vmatmul.mubr.bf16.gmra.mxu1 %v17965_v1  ;;  %8012 = vmatmul.mubr.bf16.gmra.mxu0 %v17968_v12  ;;  %5242 = vst.msk [vmem:[#allocation2 + $0x14] sm:$0xf] %vm2351_vm8, %v5195_v42  ;;  %5247 = vst.msk [vmem:[#allocation2 + $0x118] sm:$0xf] %vm2351_vm8, %v5205_v14 }
 0x453   : > { %v16441_v57 = vpack.c.bf16 %v4850_v23, %v4850_v23  ;;  %7115 = vmatpush2.bf16.msra.mxu1 %v20168_v31  ;;  %8544 = vmatpush2.bf16.msra.mxu0 %v20168_v31  ;;  %v17983_v23 = vld [vmem:[%s25155_s1 + $0x900] ss:$8 sps:$4 sm:$0xff]  }
 0x454   : > { %v6281_v7 = vpop.f32.mrf.mxu0  ;;  %v4852_v38 = vpop.f32.mrf.mxu1  ;;  %7116 = vmatprep.subr.bf16.mxu1 %v25301_v20  ;;  %8545 = vmatprep.subr.bf16.mxu0 %v25301_v20 }
 0x455   : > { %4947 = vst.msk [vmem:[#allocation2 + $0x21c] sm:$0xf] %vm2045_vm7, %v16441_v57  ;;  %6590 = vmatprep.mubr.bf16.mxu1 %v17973_v47  ;;  %8019 = vmatprep.mubr.bf16.mxu0 %v17976_v13  ;;  %v17986_v57 = vld [vmem:[%s25155_s1 + $0xb80] ss:$8 sps:$4 sm:$0xff]   ;;  %v17991_v7 = vld [vmem:[%s25155_s1 + $0x914] ss:$8 sps:$4 sm:$0xff]  }
 0x456   : > { %v4853_v50 = vpop.f32.mrf.mxu1  ;;  %v22351_v16 = vpop.f32.mrf.mxu0  ;;  %6354 = vrot.lane.b32.xlu0 %v16513_v55, %s25203_s29  ;;  %6364 = vrot.lane.b32.xlu1 %v16518_v29, %s25203_s29 }
 0x457   : > { %v16442_v40 = vpack.c.bf16 %v4853_v50, %v4853_v50  ;;  %7117 = vmatpush2.bf16.msra.mxu1 %v20154_v21  ;;  %8546 = vmatpush2.bf16.msra.mxu0 %v20154_v21  ;;  %v5199_v3 = vpop.permute.xlu0 %5198  ;;  %v5209_v41 = vpop.permute.xlu1 %5208  ;;  %v16522_v60 = vpack.c.bf16 %v22351_v16, %v22351_v16  ;;  %v17994_v16 = vld [vmem:[%s25155_s1 + $0xb94] ss:$8 sps:$4 sm:$0xff]  }
 0x458   : > { %v6284_v0 = vpop.f32.mrf.mxu0  ;;  %v4855_v27 = vpop.f32.mrf.mxu1  ;;  %7118 = vmatprep.subr.bf16.mxu1 %v25301_v20  ;;  %8547 = vmatprep.subr.bf16.mxu0 %v25301_v20  ;;  %5244 = vst.msk [vmem:[#allocation2 + $0x7c] sm:$0xf] %vm2351_vm8, %v5199_v3  ;;  %5249 = vst.msk [vmem:[#allocation2 + $0x180] sm:$0xf] %vm2351_vm8, %v5209_v41 }
 0x459   : > { %4948 = vst.msk [vmem:[#allocation2 + $0x250] sm:$0xf] %vm2045_vm7, %v16442_v40 }
 0x45a   : > { %v4858_v45 = vpop.f32.mrf.mxu1  ;;  %v22381_v19 = vpop.f32.mrf.mxu0  ;;  %6591 = vmatmul.mubr.bf16.gmra.mxu1 %v17971_v11  ;;  %8020 = vmatmul.mubr.bf16.gmra.mxu0 %v17974_v26  ;;  %v16521_v11 = vpack.c.bf16 %v22342_v2, %v22342_v2  ;;  %v18014_v26 = vld [vmem:[%s25158_s4 + $0x38] sm:$0xff]  }
 0x45b   : > { %v16443_v61 = vpack.c.bf16 %v4858_v45, %v4858_v45  ;;  %7119 = vmatpush2.bf16.msra.mxu1 %v20126_v18  ;;  %8548 = vmatpush2.bf16.msra.mxu0 %v20126_v18  ;;  %v5203_v22 = vpop.permute.xlu0 %5202  ;;  %v5213_v63 = vpop.permute.xlu1 %5212 }
 0x45c   : > { %v6289_v6 = vpop.f32.mrf.mxu0  ;;  %v4860_v17 = vpop.f32.mrf.mxu1  ;;  %6598 = vmatprep.mubr.bf16.mxu1 %v17979_v10  ;;  %8027 = vmatprep.mubr.bf16.mxu0 %v17982_v30  ;;  %5246 = vst.msk [vmem:[#allocation2 + $0xe4] sm:$0xf] %vm2351_vm8, %v5203_v22  ;;  %5251 = vst.msk [vmem:[#allocation2 + $0x1e8] sm:$0xf] %vm2351_vm8, %v5213_v63  ;;  %v18015_v10 = vld [vmem:[%s25158_s4 + $0x70] sm:$0xff]  }
 0x45d   : > { %4949 = vst.msk [vmem:[#allocation2 + $0x284] sm:$0xf] %vm2045_vm7, %v16443_v61  ;;  %7666 = vmatprep.subr.bf16.mxu1 %v25301_v20  ;;  %16726 = vmatprep.subr.bf16.mxu0 %v18013_v48  ;;  %v17989_v22 = vld [vmem:[%s25155_s1 + $0x910] ss:$8 sps:$4 sm:$0xff]   ;;  %v17997_v6 = vld [vmem:[%s25155_s1 + $0x924] ss:$8 sps:$4 sm:$0xff]  }
 0x45e   : > { %v4861_v35 = vpop.f32.mrf.mxu1  ;;  %v6290_v32 = vpop.f32.mrf.mxu0  ;;  %6358 = vrot.lane.b32.xlu0 %v16515_v58, %s25203_s29  ;;  %6368 = vrot.lane.b32.xlu1 %v16520_v49, %s25203_s29  ;;  %v16523_v58 = vpack.c.bf16 %v22381_v19, %v22381_v19  ;;  %v18016_v49 = vld [vmem:[%s25158_s4 + $0x30] sm:$0xff]  }
 0x45f   : > { %v16444_v15 = vpack.c.bf16 %v4861_v35, %v4861_v35  ;;  %v16524_v13 = vpack.c.bf16 %v6290_v32, %v6290_v32  ;;  %v17992_v63 = vld [vmem:[%s25155_s1 + $0xb90] ss:$8 sps:$4 sm:$0xff]   ;;  %v18000_v32 = vld [vmem:[%s25155_s1 + $0xba4] ss:$8 sps:$4 sm:$0xff]  }
 0x460   : > { %v6292_v25 = vpop.f32.mrf.mxu0  ;;  %v4863_v1 = vpop.f32.mrf.mxu1 }
 0x461   : > { %4950 = vst.msk [vmem:[#allocation2 + $0x2b8] sm:$0xf] %vm2045_vm7, %v16444_v15  ;;  %v5207_v12 = vpop.permute.xlu0 %5206  ;;  %v5217_v36 = vpop.permute.xlu1 %5216  ;;  %v18024_v25 = vld [vmem:[%s25158_s4 + $0x28] sm:$0xff]  }
 0x462   : > { %v22408_v44 = vpop.f32.mrf.mxu0  ;;  %8028 = vmatmul.mubr.bf16.gmra.mxu0 %v17980_v5  ;;  %v4866_v37 = vpop.f32.mrf.mxu1  ;;  %6599 = vmatmul.mubr.bf16.gmra.mxu1 %v17977_v39  ;;  %5248 = vst.msk [vmem:[#allocation2 + $0x14c] sm:$0xf] %vm2351_vm8, %v5207_v12  ;;  %5253 = vst.msk [vmem:[#allocation2 + $0x250] sm:$0xf] %vm2351_vm8, %v5217_v36  ;;  %v18023_v5 = vld [vmem:[%s25158_s4 + $0x68] sm:$0xff]   ;;  %v18025_v12 = vld [vmem:[%s25158_s4 + $0x60] sm:$0xff]  }
 0x463   : > { %v16445_v47 = vpack.c.bf16 %v4866_v37, %v4866_v37  ;;  %7120 = vmatprep.mubr.bf16.mxu1 %v17985_v24  ;;  %8549 = vmatprep.mubr.bf16.mxu0 %v17988_v34  ;;  %v16525_v39 = vpack.c.bf16 %v22408_v44, %v22408_v44 }
 0x464   : > { %v6297_v42 = vpop.f32.mrf.mxu0  ;;  %v4868_v14 = vpop.f32.mrf.mxu1  ;;  %6362 = vrot.lane.b32.xlu0 %v16517_v54, %s25203_s29  ;;  %6372 = vrot.lane.b32.xlu1 %v16522_v60, %s25203_s29 }
 0x465   : > { %4951 = vst.msk [vmem:[#allocation2 + $0x2ec] sm:$0xf] %vm2045_vm7, %v16445_v47  ;;  %v17998_v42 = vld [vmem:[%s25155_s1 + $0xba0] ss:$8 sps:$4 sm:$0xff]  }
 0x466   : > { %v6298_v55 = vpop.f32.mrf.mxu0  ;;  %v4869_v29 = vpop.f32.mrf.mxu1 }
 0x467   : > { %v16446_v9 = vpack.c.bf16 %v4869_v29, %v4869_v29  ;;  %v16526_v41 = vpack.c.bf16 %v6298_v55, %v6298_v55  ;;  %v18003_v55 = vld [vmem:[%s25155_s1 + $0x934] ss:$8 sps:$4 sm:$0xff]  }
 0x468   : > { %v6300_v38 = vpop.f32.mrf.mxu0  ;;  %v4871_v50 = vpop.f32.mrf.mxu1  ;;  %6366 = vrot.lane.b32.xlu0 %v16519_v43, %s25203_s29  ;;  %6376 = vrot.lane.b32.xlu1 %v16524_v13, %s25203_s29  ;;  %v17995_v13 = vld [vmem:[%s25155_s1 + $0x920] ss:$8 sps:$4 sm:$0xff]  }
 0x469   : > { %4952 = vst.msk [vmem:[#allocation2 + $0x320] sm:$0xf] %vm2045_vm7, %v16446_v9  ;;  %v5211_v40 = vpop.permute.xlu0 %5210  ;;  %v5221_v3 = vpop.permute.xlu1 %5220 }
 0x46a   : > { %v22437_v0 = vpop.f32.mrf.mxu0  ;;  %8550 = vmatmul.mubr.bf16.vlgmr.msra.gmra.mxu0 %v17986_v57  ;;  %v5388_v27 = vpop.f32.mrf.mxu1  ;;  %7121 = vmatmul.mubr.bf16.vlgmr.msra.gmra.mxu1 %v17983_v23  ;;  %5250 = vst.msk [vmem:[#allocation2 + $0x1b4] sm:$0xf] %vm2351_vm8, %v5211_v40  ;;  %5255 = vst.msk [vmem:[#allocation2 + $0x2b8] sm:$0xf] %vm2351_vm8, %v5221_v3  ;;  %v18006_v57 = vld [vmem:[%s25155_s1 + $0xbb4] ss:$8 sps:$4 sm:$0xff]  }
 0x46b   : > { %v16463_v2 = vpack.c.bf16 %v5388_v27, %v5388_v27  ;;  %7667 = vmatpush1.bf16.msra.mxu1 %v20114_v62  ;;  %7128 = vmatprep.mubr.bf16.mxu1 %v17991_v7  ;;  %v16543_v37 = vpack.c.bf16 %v22437_v0, %v22437_v0  ;;  %v18026_v7 = vld [vmem:[%s25158_s4 + $0x20] sm:$0xff]   ;;  %v18033_v40 = vld [vmem:[%s25158_s4 + $0x58] sm:$0xff]  }
 0x46c   : > { %v6819_v30 = vpop.f32.mrf.mxu0  ;;  %v5390_v48 = vpop.f32.mrf.mxu1  ;;  %7668 = vmatprep.subr.bf16.mxu1 %v25301_v20  ;;  %8557 = vmatprep.mubr.bf16.mxu0 %v17994_v16 }
 0x46d   : > { %5515 = vst.msk [vmem:[#allocation2 + $0x18] sm:$0xf] %vm2045_vm7, %v16463_v2  ;;  %16727 = vmatpush3.bf16.msra.mxu0 %v18014_v26  ;;  %6370 = vrot.lane.b32.xlu0 %v16521_v11, %s25203_s29  ;;  %v18001_v48 = vld [vmem:[%s25155_s1 + $0x930] ss:$8 sps:$4 sm:$0xff]  }
 0x46e   : > { %v6820_v45 = vpop.f32.mrf.mxu0  ;;  %v5391_v61 = vpop.f32.mrf.mxu1  ;;  %16728 = vmatprep.subr.bf16.mxu0 %v18015_v10  ;;  %6380 = vrot.lane.b32.xlu1 %v16526_v41, %s25203_s29  ;;  %v18034_v10 = vld [vmem:[%s25158_s4 + $0x18] sm:$0xff]  }
 0x46f   : > { %v16464_v19 = vpack.c.bf16 %v5391_v61, %v5391_v61  ;;  %7669 = vmatpush1.bf16.msra.mxu1 %v20084_v28  ;;  %v16544_v34 = vpack.c.bf16 %v6820_v45, %v6820_v45  ;;  %v18009_v45 = vld [vmem:[%s25155_s1 + $0x944] ss:$8 sps:$4 sm:$0xff]  }
 0x470   : > { %v6822_v17 = vpop.f32.mrf.mxu0  ;;  %v5393_v35 = vpop.f32.mrf.mxu1  ;;  %7670 = vmatprep.subr.bf16.mxu1 %v25301_v20 }
 0x471   : > { %5516 = vst.msk [vmem:[#allocation2 + $0x4c] sm:$0xf] %vm2045_vm7, %v16464_v19  ;;  %16729 = vmatpush3.bf16.msra.mxu0 %v18016_v49  ;;  %v5215_v15 = vpop.permute.xlu0 %5214  ;;  %v5225_v24 = vpop.permute.xlu1 %5224  ;;  %6374 = vrot.lane.b32.xlu0 %v16523_v58, %s25203_s29  ;;  %v18004_v58 = vld [vmem:[%s25155_s1 + $0xbb0] ss:$8 sps:$4 sm:$0xff]  }
 0x472   : > { %v6825_v54 = vpop.f32.mrf.mxu0  ;;  %8558 = vmatmul.mubr.bf16.gmra.mxu0 %v17992_v63  ;;  %v5396_v60 = vpop.f32.mrf.mxu1  ;;  %7129 = vmatmul.mubr.bf16.gmra.mxu1 %v17989_v22  ;;  %5252 = vst.msk [vmem:[#allocation2 + $0x21c] sm:$0xf] %vm2351_vm8, %v5215_v15  ;;  %5257 = vst.msk [vmem:[#allocation2 + $0x320] sm:$0xf] %vm2351_vm8, %v5225_v24  ;;  %v18012_v63 = vld [vmem:[%s25155_s1 + $0xbc4] ss:$8 sps:$4 sm:$0xff]  }
 0x473   : > { %v16465_v1 = vpack.c.bf16 %v5396_v60, %v5396_v60  ;;  %7671 = vmatpush1.bf16.msra.mxu1 %v20070_v51  ;;  %7136 = vmatprep.mubr.bf16.mxu1 %v17997_v6  ;;  %v16545_v9 = vpack.c.bf16 %v6825_v54, %v6825_v54  ;;  %v18035_v6 = vld [vmem:[%s25158_s4 + $0x50] sm:$0xff]  }
 0x474   : > { %v6827_v36 = vpop.f32.mrf.mxu0  ;;  %v5398_v44 = vpop.f32.mrf.mxu1  ;;  %7672 = vmatprep.subr.bf16.mxu1 %v25301_v20  ;;  %8565 = vmatprep.mubr.bf16.mxu0 %v18000_v32 }
 0x475   : > { %5517 = vst.msk [vmem:[#allocation2 + $0x80] sm:$0xf] %vm2045_vm7, %v16465_v1  ;;  %16730 = vmatprep.subr.bf16.mxu0 %v18023_v5  ;;  %6378 = vrot.lane.b32.xlu0 %v16525_v39, %s25203_s29  ;;  %v18036_v5 = vld [vmem:[%s25158_s4 + $0x10] sm:$0xff]   ;;  %v18010_v36 = vld [vmem:[%s25155_s1 + $0xbc0] ss:$8 sps:$4 sm:$0xff]  }
 0x476   : > { %v6828_v47 = vpop.f32.mrf.mxu0  ;;  %v5399_v43 = vpop.f32.mrf.mxu1  ;;  %16731 = vmatpush3.bf16.msra.mxu0 %v18024_v25  ;;  %6930 = vrot.lane.b32.xlu1 %v16544_v34, %s25203_s29  ;;  %v18043_v34 = vld [vmem:[%s25158_s4 + $0x48] sm:$0xff]  }
 0x477   : > { %v16466_v14 = vpack.c.bf16 %v5399_v43, %v5399_v43  ;;  %7673 = vmatpush1.bf16.msra.mxu1 %v20036_v53  ;;  %16732 = vmatprep.subr.bf16.mxu0 %v18025_v12  ;;  %v16546_v16 = vpack.c.bf16 %v6828_v47, %v6828_v47  ;;  %v18007_v12 = vld [vmem:[%s25155_s1 + $0x940] ss:$8 sps:$4 sm:$0xff]   ;;  %v18019_v47 = vld [vmem:[%s25155_s1 + $0x954] ss:$8 sps:$4 sm:$0xff]  }
 0x478   : > { %v5401_v29 = vpop.f32.mrf.mxu1  ;;  %v6830_v23 = vpop.f32.mrf.mxu0  ;;  %7674 = vmatprep.subr.bf16.mxu1 %v25301_v20 }
 0x479   : > { %5518 = vst.msk [vmem:[#allocation2 + $0xb4] sm:$0xf] %vm2045_vm7, %v16466_v14  ;;  %v5219_v38 = vpop.permute.xlu0 %5218  ;;  %v5775_v50 = vpop.permute.xlu1 %5774  ;;  %6928 = vrot.lane.b32.xlu0 %v16543_v37, %s25203_s29  ;;  %v18044_v14 = vld [vmem:[%s25158_s4 + $0x8] sm:$0xff]  }
 0x47a   : > { %v6833_v11 = vpop.f32.mrf.mxu0  ;;  %8566 = vmatmul.mubr.bf16.gmra.mxu0 %v17998_v42  ;;  %v5404_v26 = vpop.f32.mrf.mxu1  ;;  %7137 = vmatmul.mubr.bf16.gmra.mxu1 %v17995_v13  ;;  %5254 = vst.msk [vmem:[#allocation2 + $0x284] sm:$0xf] %vm2351_vm8, %v5219_v38  ;;  %5821 = vst.msk [vmem:[#allocation2 + $0x4c] sm:$0xf] %vm2351_vm8, %v5775_v50  ;;  %v18022_v42 = vld [vmem:[%s25155_s1 + $0xbd4] ss:$8 sps:$4 sm:$0xff]  }
 0x47b   : > { %v16467_v3 = vpack.c.bf16 %v5404_v26, %v5404_v26  ;;  %7675 = vmatpush1.bf16.msra.mxu1 %v20018_v4  ;;  %7144 = vmatprep.mubr.bf16.mxu1 %v18003_v55  ;;  %v16547_v27 = vpack.c.bf16 %v6833_v11, %v6833_v11  ;;  %v18049_v11 = vld [vmem:[%s25158_s4] sm:$0xff]  }
 0x47c   : > { %v6835_v41 = vpop.f32.mrf.mxu0  ;;  %v5406_v0 = vpop.f32.mrf.mxu1  ;;  %7676 = vmatprep.subr.bf16.mxu1 %v25301_v20  ;;  %8573 = vmatprep.mubr.bf16.mxu0 %v18006_v57 }
 0x47d   : > { %5519 = vst.msk [vmem:[#allocation2 + $0xe8] sm:$0xf] %vm2045_vm7, %v16467_v3  ;;  %16733 = vmatpush3.bf16.msra.mxu0 %v18026_v7  ;;  %6932 = vrot.lane.b32.xlu0 %v16545_v9, %s25203_s29  ;;  %v18048_v9 = vld [vmem:[%s25158_s4 + $0x40] sm:$0xff]   ;;  %v18017_v3 = vld [vmem:[%s25155_s1 + $0x950] ss:$8 sps:$4 sm:$0xff]  }
 0x47e   : > { %v6836_v2 = vpop.f32.mrf.mxu0  ;;  %v5407_v30 = vpop.f32.mrf.mxu1  ;;  %16734 = vmatprep.subr.bf16.mxu0 %v18033_v40  ;;  %6934 = vrot.lane.b32.xlu1 %v16546_v16, %s25203_s29  ;;  %v18020_v41 = vld [vmem:[%s25155_s1 + $0xbd0] ss:$8 sps:$4 sm:$0xff]  }
 0x47f   : > { %v16468_v49 = vpack.c.bf16 %v5407_v30, %v5407_v30  ;;  %7677 = vmatpush1.bf16.msra.mxu1 %v19988_v59  ;;  %v16548_v19 = vpack.c.bf16 %v6836_v2, %v6836_v2 }
 0x480   : > { %v5409_v61 = vpop.f32.mrf.mxu1  ;;  %v6838_v22 = vpop.f32.mrf.mxu0  ;;  %7678 = vmatprep.subr.bf16.mxu1 %v25301_v20 }
 0x481   : > { %5520 = vst.msk [vmem:[#allocation2 + $0x11c] sm:$0xf] %vm2045_vm7, %v16468_v49  ;;  %16735 = vmatpush3.bf16.msra.mxu0 %v18034_v10  ;;  %v5223_v17 = vpop.permute.xlu0 %5222  ;;  %v5779_v35 = vpop.permute.xlu1 %5778  ;;  %6936 = vrot.lane.b32.xlu0 %v16547_v27, %s25203_s29  ;;  %v18029_v10 = vld [vmem:[%s25155_s1 + $0x964] ss:$8 sps:$4 sm:$0xff]  }
 0x482   : > { %v6841_v32 = vpop.f32.mrf.mxu0  ;;  %8574 = vmatmul.mubr.bf16.gmra.mxu0 %v18004_v58  ;;  %v5412_v39 = vpop.f32.mrf.mxu1  ;;  %7145 = vmatmul.mubr.bf16.gmra.mxu1 %v18001_v48  ;;  %5256 = vst.msk [vmem:[#allocation2 + $0x2ec] sm:$0xf] %vm2351_vm8, %v5223_v17  ;;  %5823 = vst.msk [vmem:[#allocation2 + $0xb4] sm:$0xf] %vm2351_vm8, %v5779_v35  ;;  %v18032_v48 = vld [vmem:[%s25155_s1 + $0xbe4] ss:$8 sps:$4 sm:$0xff]  }
 0x483   : > { %v16549_v15 = vpack.c.bf16 %v6841_v32, %v6841_v32  ;;  %v16469_v24 = vpack.c.bf16 %v5412_v39, %v5412_v39  ;;  %7679 = vmatpush1.bf16.msra.mxu1 %v19968_v52  ;;  %7152 = vmatprep.mubr.bf16.mxu1 %v18009_v45  ;;  %v18077_v58 = vld [vmem:[%s25158_s4 + $0x178] sm:$0xff]   ;;  %v18027_v39 = vld [vmem:[%s25155_s1 + $0x960] ss:$8 sps:$4 sm:$0xff]  }
 0x484   : > { %v6843_v54 = vpop.f32.mrf.mxu0  ;;  %v5414_v60 = vpop.f32.mrf.mxu1  ;;  %7680 = vmatprep.subr.bf16.mxu1 %v25301_v20  ;;  %8581 = vmatprep.mubr.bf16.mxu0 %v18012_v63 }
 0x485   : > { %5521 = vst.msk [vmem:[#allocation2 + $0x150] sm:$0xf] %vm2045_vm7, %v16469_v24  ;;  %16736 = vmatprep.subr.bf16.mxu0 %v18035_v6  ;;  %6938 = vrot.lane.b32.xlu1 %v16548_v19, %s25203_s29 }
 0x486   : > { %v5415_v25 = vpop.f32.mrf.mxu1  ;;  %v6844_v1 = vpop.f32.mrf.mxu0  ;;  %16737 = vmatpush3.bf16.msra.mxu0 %v18036_v5  ;;  %6940 = vrot.lane.b32.xlu0 %v16549_v15, %s25203_s29  ;;  %v18030_v5 = vld [vmem:[%s25155_s1 + $0xbe0] ss:$8 sps:$4 sm:$0xff]  }
 0x487   : > { %v16470_v44 = vpack.c.bf16 %v5415_v25, %v5415_v25  ;;  %v16550_v37 = vpack.c.bf16 %v6844_v1, %v6844_v1  ;;  %7681 = vmatpush1.bf16.msra.mxu1 %v19935_v8  ;;  %16738 = vmatprep.subr.bf16.mxu0 %v18043_v34  ;;  %v18039_v34 = vld [vmem:[%s25155_s1 + $0x974] ss:$8 sps:$4 sm:$0xff]  }
 0x488   : > { %v5417_v43 = vpop.f32.mrf.mxu1  ;;  %v6846_v13 = vpop.f32.mrf.mxu0  ;;  %7688 = vmatprep.subr.bf16.mxu1 %v25301_v20 }
 0x489   : > { %5522 = vst.msk [vmem:[#allocation2 + $0x184] sm:$0xf] %vm2045_vm7, %v16470_v44  ;;  %v5773_v55 = vpop.permute.xlu0 %5772  ;;  %v5783_v29 = vpop.permute.xlu1 %5782  ;;  %6942 = vrot.lane.b32.xlu1 %v16550_v37, %s25203_s29 }
 0x48a   : > { %v6849_v23 = vpop.f32.mrf.mxu0  ;;  %8582 = vmatmul.mubr.bf16.gmra.mxu0 %v18010_v36  ;;  %v5420_v57 = vpop.f32.mrf.mxu1  ;;  %7153 = vmatmul.mubr.bf16.gmra.mxu1 %v18007_v12  ;;  %5820 = vst.msk [vmem:[#allocation2 + $0x18] sm:$0xf] %vm2351_vm8, %v5773_v55  ;;  %5825 = vst.msk [vmem:[#allocation2 + $0x11c] sm:$0xf] %vm2351_vm8, %v5783_v29  ;;  %v18042_v12 = vld [vmem:[%s25155_s1 + $0xbf4] ss:$8 sps:$4 sm:$0xff]  }
 0x48b   : > { %v16551_v7 = vpack.c.bf16 %v6849_v23, %v6849_v23  ;;  %v16471_v38 = vpack.c.bf16 %v5420_v57, %v5420_v57  ;;  %7689 = vmatpush2.bf16.msra.mxu1 %v20199_v46  ;;  %7160 = vmatprep.mubr.bf16.mxu1 %v18019_v47  ;;  %v18037_v23 = vld [vmem:[%s25155_s1 + $0x970] ss:$8 sps:$4 sm:$0xff]  }
 0x48c   : > { %v6851_v50 = vpop.f32.mrf.mxu0  ;;  %v5422_v16 = vpop.f32.mrf.mxu1  ;;  %7690 = vmatprep.subr.bf16.mxu1 %v25301_v20  ;;  %8589 = vmatprep.mubr.bf16.mxu0 %v18022_v42  ;;  %v18040_v57 = vld [vmem:[%s25155_s1 + $0xbf0] ss:$8 sps:$4 sm:$0xff]  }
 0x48d   : > { %5523 = vst.msk [vmem:[#allocation2 + $0x1b8] sm:$0xf] %vm2045_vm7, %v16471_v38  ;;  %16739 = vmatpush3.bf16.msra.mxu0 %v18044_v14  ;;  %6944 = vrot.lane.b32.xlu0 %v16551_v7, %s25203_s29  ;;  %v18052_v38 = vld [vmem:[%s25155_s1 + $0xa04] ss:$8 sps:$4 sm:$0xff]  }
 0x48e   : > { %v5423_v26 = vpop.f32.mrf.mxu1  ;;  %v6852_v40 = vpop.f32.mrf.mxu0  ;;  %16740 = vmatprep.subr.bf16.mxu0 %v18048_v9 }
 0x48f   : > { %v16472_v0 = vpack.c.bf16 %v5423_v26, %v5423_v26  ;;  %v16552_v27 = vpack.c.bf16 %v6852_v40, %v6852_v40  ;;  %7691 = vmatpush2.bf16.msra.mxu1 %v20180_v56 }
 0x490   : > { %v5425_v2 = vpop.f32.mrf.mxu1  ;;  %v6854_v30 = vpop.f32.mrf.mxu0  ;;  %7692 = vmatprep.subr.bf16.mxu1 %v25301_v20 }
 0x491   : > { %5524 = vst.msk [vmem:[#allocation2 + $0x1ec] sm:$0xf] %vm2045_vm7, %v16472_v0  ;;  %16741 = vmatpush3.bf16.msra.mxu0 %v18049_v11  ;;  %v5777_v49 = vpop.permute.xlu0 %5776  ;;  %v5787_v45 = vpop.permute.xlu1 %5786  ;;  %6946 = vrot.lane.b32.xlu1 %v16552_v27, %s25203_s29  ;;  %v18047_v11 = vld [vmem:[#allocation2 + $0x4] ss:$52 sps:$4 sm:$0xff]  }
 0x492   : > { %v6857_v61 = vpop.f32.mrf.mxu0  ;;  %8590 = vmatmul.mubr.bf16.gmra.mxu0 %v18020_v41  ;;  %v5428_v22 = vpop.f32.mrf.mxu1  ;;  %7161 = vmatmul.mubr.bf16.gmra.mxu1 %v18017_v3  ;;  %5822 = vst.msk [vmem:[#allocation2 + $0x80] sm:$0xf] %vm2351_vm8, %v5777_v49  ;;  %5827 = vst.msk [vmem:[#allocation2 + $0x184] sm:$0xf] %vm2351_vm8, %v5787_v45  ;;  %v18045_v49 = vld [vmem:[#allocation2] ss:$52 sps:$4 sm:$0xff]  }
 0x493   : > { %v16553_v63 = vpack.c.bf16 %v6857_v61, %v6857_v61  ;;  %v16473_v19 = vpack.c.bf16 %v5428_v22, %v5428_v22  ;;  %7693 = vmatpush2.bf16.msra.mxu1 %v20168_v31  ;;  %7168 = vmatprep.mubr.bf16.mxu1 %v18029_v10  ;;  %v18058_v22 = vld [vmem:[%s25155_s1 + $0xa14] ss:$8 sps:$4 sm:$0xff]  }
 0x494   : > { %v6859_v6 = vpop.f32.mrf.mxu0  ;;  %v5430_v17 = vpop.f32.mrf.mxu1  ;;  %7694 = vmatprep.subr.bf16.mxu1 %v25301_v20  ;;  %8597 = vmatprep.mubr.bf16.mxu0 %v18032_v48  ;;  %v18050_v48 = vld [vmem:[%s25155_s1 + $0xa00] ss:$8 sps:$4 sm:$0xff]  }
 0x495   : > { %5525 = vst.msk [vmem:[#allocation2 + $0x220] sm:$0xf] %vm2045_vm7, %v16473_v19  ;;  %16854 = vmatprep.subr.bf16.mxu0 %v18077_v58  ;;  %6948 = vrot.lane.b32.xlu0 %v16553_v63, %s25203_s29  ;;  %v18055_v63 = vld [vmem:[#allocation2 + $0x6c] ss:$52 sps:$4 sm:$0xff]   ;;  %v18081_v19 = vld [vmem:[%s25158_s4 + $0x138] sm:$0xff]  }
 0x496   : > { %v5431_v35 = vpop.f32.mrf.mxu1  ;;  %v6860_v32 = vpop.f32.mrf.mxu0 }
 0x497   : > { %v16474_v15 = vpack.c.bf16 %v5431_v35, %v5431_v35  ;;  %v16554_v24 = vpack.c.bf16 %v6860_v32, %v6860_v32  ;;  %7695 = vmatpush2.bf16.msra.mxu1 %v20154_v21  ;;  %v5781_v54 = vpop.permute.xlu0 %5780  ;;  %v5791_v60 = vpop.permute.xlu1 %5790 }
 0x498   : > { %v5433_v25 = vpop.f32.mrf.mxu1  ;;  %v6862_v1 = vpop.f32.mrf.mxu0  ;;  %7696 = vmatprep.subr.bf16.mxu1 %v25301_v20  ;;  %5824 = vst.msk [vmem:[#allocation2 + $0xe8] sm:$0xf] %vm2351_vm8, %v5781_v54  ;;  %5829 = vst.msk [vmem:[#allocation2 + $0x1ec] sm:$0xf] %vm2351_vm8, %v5791_v60  ;;  %v18083_v54 = vld [vmem:[%s25158_s4 + $0x130] sm:$0xff]  }
 0x499   : > { %5526 = vst.msk [vmem:[#allocation2 + $0x254] sm:$0xf] %vm2045_vm7, %v16474_v15  ;;  %6950 = vrot.lane.b32.xlu1 %v16554_v24, %s25203_s29  ;;  %v18056_v1 = vld [vmem:[%s25155_s1 + $0xa10] ss:$8 sps:$4 sm:$0xff]  }
 0x49a   : > { %v6865_v36 = vpop.f32.mrf.mxu0  ;;  %8598 = vmatmul.mubr.bf16.gmra.mxu0 %v18030_v5  ;;  %v5436_v44 = vpop.f32.mrf.mxu1  ;;  %7169 = vmatmul.mubr.bf16.gmra.mxu1 %v18027_v39  ;;  %v18082_v39 = vld [vmem:[%s25158_s4 + $0x170] sm:$0xff]  }
 0x49b   : > { %v16555_v37 = vpack.c.bf16 %v6865_v36, %v6865_v36  ;;  %v16475_v47 = vpack.c.bf16 %v5436_v44, %v5436_v44  ;;  %7697 = vmatpush2.bf16.msra.mxu1 %v20126_v18  ;;  %7176 = vmatprep.mubr.bf16.mxu1 %v18039_v34  ;;  %v5785_v43 = vpop.permute.xlu0 %5784  ;;  %v5795_v13 = vpop.permute.xlu1 %5794  ;;  %v18053_v44 = vld [vmem:[#allocation2 + $0x68] ss:$52 sps:$4 sm:$0xff]  }
 0x49c   : > { %v6867_v42 = vpop.f32.mrf.mxu0  ;;  %v5438_v14 = vpop.f32.mrf.mxu1  ;;  %8605 = vmatprep.mubr.bf16.mxu0 %v18042_v12  ;;  %8244 = vmatprep.subr.bf16.mxu1 %v25301_v20  ;;  %5826 = vst.msk [vmem:[#allocation2 + $0x150] sm:$0xf] %vm2351_vm8, %v5785_v43  ;;  %5831 = vst.msk [vmem:[#allocation2 + $0x254] sm:$0xf] %vm2351_vm8, %v5795_v13  ;;  %v18064_v43 = vld [vmem:[%s25155_s1 + $0xa24] ss:$8 sps:$4 sm:$0xff]  }
 0x49d   : > { %5527 = vst.msk [vmem:[#allocation2 + $0x288] sm:$0xf] %vm2045_vm7, %v16475_v47  ;;  %6952 = vrot.lane.b32.xlu0 %v16555_v37, %s25203_s29  ;;  %v18061_v13 = vld [vmem:[#allocation2 + $0xd4] ss:$52 sps:$4 sm:$0xff]  }
 0x49e   : > { %v5439_v55 = vpop.f32.mrf.mxu1  ;;  %v6868_v29 = vpop.f32.mrf.mxu0  ;;  %v18087_v42 = vld [vmem:[%s25158_s4 + $0x168] sm:$0xff]  }
 0x49f   : > { %v16476_v9 = vpack.c.bf16 %v5439_v55, %v5439_v55  ;;  %v16556_v7 = vpack.c.bf16 %v6868_v29, %v6868_v29 }
 0x4a0   : > { %v5441_v50 = vpop.f32.mrf.mxu1  ;;  %v6870_v16 = vpop.f32.mrf.mxu0 }
 0x4a1   : > { %5528 = vst.msk [vmem:[#allocation2 + $0x2bc] sm:$0xf] %vm2045_vm7, %v16476_v9  ;;  %v5789_v26 = vpop.permute.xlu0 %5788  ;;  %v5799_v40 = vpop.permute.xlu1 %5798  ;;  %6954 = vrot.lane.b32.xlu1 %v16556_v7, %s25203_s29 }
 0x4a2   : > { %v22645_v3 = vpop.f32.mrf.mxu0  ;;  %8606 = vmatmul.mubr.bf16.gmra.mxu0 %v18040_v57  ;;  %v5444_v41 = vpop.f32.mrf.mxu1  ;;  %7177 = vmatmul.mubr.bf16.gmra.mxu1 %v18037_v23  ;;  %5828 = vst.msk [vmem:[#allocation2 + $0x1b8] sm:$0xf] %vm2351_vm8, %v5789_v26  ;;  %5833 = vst.msk [vmem:[#allocation2 + $0x2bc] sm:$0xf] %vm2351_vm8, %v5799_v40  ;;  %v18091_v57 = vld [vmem:[%s25158_s4 + $0x128] sm:$0xff]  }
 0x4a3   : > { %v16477_v0 = vpack.c.bf16 %v5444_v41, %v5444_v41  ;;  %10495 = vmatprep.mubr.bf16.mxu0 %v18047_v11  ;;  %7698 = vmatprep.mubr.bf16.mxu1 %v18052_v38  ;;  %v18092_v38 = vld [vmem:[%s25158_s4 + $0x160] sm:$0xff]  }
 0x4a4   : > { %v6875_v27 = vpop.f32.mrf.mxu0  ;;  %v5446_v10 = vpop.f32.mrf.mxu1  ;;  %v18062_v40 = vld [vmem:[%s25155_s1 + $0xa20] ss:$8 sps:$4 sm:$0xff]  }
 0x4a5   : > { %5529 = vst.msk [vmem:[#allocation2 + $0x2f0] sm:$0xf] %vm2045_vm7, %v16477_v0  ;;  %v18059_v27 = vld [vmem:[#allocation2 + $0xd0] ss:$52 sps:$4 sm:$0xff]  }
 0x4a6   : > { %v5447_v2 = vpop.f32.mrf.mxu1  ;;  %v22650_v30 = vpop.f32.mrf.mxu0 }
 0x4a7   : > { %v16478_v58 = vpack.c.bf16 %v5447_v2, %v5447_v2 }
 0x4a8   : > { %v5449_v45 = vpop.f32.mrf.mxu1  ;;  %v6878_v61 = vpop.f32.mrf.mxu0 }
 0x4a9   : > { %5530 = vst.msk [vmem:[#allocation2 + $0x324] sm:$0xf] %vm2045_vm7, %v16478_v58  ;;  %v5793_v6 = vpop.permute.xlu0 %5792  ;;  %v5803_v17 = vpop.permute.xlu1 %5802  ;;  %v18067_v58 = vld [vmem:[#allocation2 + $0x13c] ss:$52 sps:$4 sm:$0xff]  }
 0x4aa   : > { %v7395_v35 = vpop.f32.mrf.mxu0  ;;  %v5966_v32 = vpop.f32.mrf.mxu1  ;;  %7699 = vmatmul.mubr.bf16.vlgmr.msra.gmra.mxu1 %v18050_v48  ;;  %10496 = vmatmul.mubr.bf16.vlgmr.msra.gmra.mxu0 %v18045_v49  ;;  %5830 = vst.msk [vmem:[#allocation2 + $0x220] sm:$0xf] %vm2351_vm8, %v5793_v6  ;;  %5835 = vst.msk [vmem:[#allocation2 + $0x324] sm:$0xf] %vm2351_vm8, %v5803_v17  ;;  %v18070_v48 = vld [vmem:[%s25155_s1 + $0xa34] ss:$8 sps:$4 sm:$0xff]  }
 0x4ab   : > { %v16575_v5 = vpack.c.bf16 %v7395_v35, %v7395_v35  ;;  %v16495_v15 = vpack.c.bf16 %v5966_v32, %v5966_v32  ;;  %8245 = vmatpush1.bf16.msra.mxu1 %v20114_v62  ;;  %10503 = vmatprep.mubr.bf16.mxu0 %v18055_v63  ;;  %v18093_v49 = vld [vmem:[%s25158_s4 + $0x120] sm:$0xff]  }
 0x4ac   : > { %v7397_v24 = vpop.f32.mrf.mxu0  ;;  %v5968_v34 = vpop.f32.mrf.mxu1  ;;  %8246 = vmatprep.subr.bf16.mxu1 %v25301_v20  ;;  %7706 = vmatprep.mubr.bf16.mxu1 %v18058_v22 }
 0x4ad   : > { %6093 = vst.msk [vmem:[#allocation2 + $0x1c] sm:$0xf] %vm2045_vm7, %v16495_v15  ;;  %16855 = vmatpush3.bf16.msra.mxu0 %v18081_v19  ;;  %7506 = vrot.lane.b32.xlu0 %v16575_v5, %s25203_s29  ;;  %v18097_v19 = vld [vmem:[%s25158_s4 + $0x158] sm:$0xff]  }
 0x4ae   : > { %v5969_v60 = vpop.f32.mrf.mxu1  ;;  %v7398_v25 = vpop.f32.mrf.mxu0  ;;  %16856 = vmatprep.subr.bf16.mxu0 %v18082_v39  ;;  %v18101_v39 = vld [vmem:[%s25158_s4 + $0x118] sm:$0xff]  }
 0x4af   : > { %v16496_v12 = vpack.c.bf16 %v5969_v60, %v5969_v60  ;;  %v16576_v36 = vpack.c.bf16 %v7398_v25, %v7398_v25  ;;  %8247 = vmatpush1.bf16.msra.mxu1 %v20084_v28  ;;  %v18068_v24 = vld [vmem:[%s25155_s1 + $0xa30] ss:$8 sps:$4 sm:$0xff]  }
 0x4b0   : > { %v5971_v37 = vpop.f32.mrf.mxu1  ;;  %v7400_v47 = vpop.f32.mrf.mxu0  ;;  %8248 = vmatprep.subr.bf16.mxu1 %v25301_v20  ;;  %v18065_v60 = vld [vmem:[#allocation2 + $0x138] ss:$52 sps:$4 sm:$0xff]  }
 0x4b1   : > { %6094 = vst.msk [vmem:[#allocation2 + $0x50] sm:$0xf] %vm2045_vm7, %v16496_v12  ;;  %16857 = vmatpush3.bf16.msra.mxu0 %v18083_v54  ;;  %v5797_v14 = vpop.permute.xlu0 %5796  ;;  %v6353_v55 = vpop.permute.xlu1 %6352  ;;  %7508 = vrot.lane.b32.xlu1 %v16576_v36, %s25203_s29  ;;  %v18076_v12 = vld [vmem:[%s25155_s1 + $0xa44] ss:$8 sps:$4 sm:$0xff]  }
 0x4b2   : > { %v7403_v29 = vpop.f32.mrf.mxu0  ;;  %v5974_v23 = vpop.f32.mrf.mxu1  ;;  %7707 = vmatmul.mubr.bf16.gmra.mxu1 %v18056_v1  ;;  %10504 = vmatmul.mubr.bf16.gmra.mxu0 %v18053_v44  ;;  %5832 = vst.msk [vmem:[#allocation2 + $0x288] sm:$0xf] %vm2351_vm8, %v5797_v14  ;;  %6399 = vst.msk [vmem:[#allocation2 + $0x50] sm:$0xf] %vm2351_vm8, %v6353_v55  ;;  %v18073_v36 = vld [vmem:[#allocation2 + $0x1a4] ss:$52 sps:$4 sm:$0xff]  }
 0x4b3   : > { %v16577_v9 = vpack.c.bf16 %v7403_v29, %v7403_v29  ;;  %v16497_v7 = vpack.c.bf16 %v5974_v23, %v5974_v23  ;;  %8249 = vmatpush1.bf16.msra.mxu1 %v20070_v51  ;;  %10511 = vmatprep.mubr.bf16.mxu0 %v18061_v13  ;;  %v18102_v44 = vld [vmem:[%s25158_s4 + $0x150] sm:$0xff]   ;;  %v18107_v29 = vld [vmem:[%s25158_s4 + $0x148] sm:$0xff]  }
 0x4b4   : > { %v5976_v50 = vpop.f32.mrf.mxu1  ;;  %v7405_v16 = vpop.f32.mrf.mxu0  ;;  %8250 = vmatprep.subr.bf16.mxu1 %v25301_v20  ;;  %7714 = vmatprep.mubr.bf16.mxu1 %v18064_v43 }
 0x4b5   : > { %6095 = vst.msk [vmem:[#allocation2 + $0x84] sm:$0xf] %vm2045_vm7, %v16497_v7  ;;  %16858 = vmatprep.subr.bf16.mxu0 %v18087_v42  ;;  %7510 = vrot.lane.b32.xlu0 %v16577_v9, %s25203_s29  ;;  %v18103_v42 = vld [vmem:[%s25158_s4 + $0x110] sm:$0xff]  }
 0x4b6   : > { %v5977_v11 = vpop.f32.mrf.mxu1  ;;  %v7406_v26 = vpop.f32.mrf.mxu0  ;;  %16859 = vmatpush3.bf16.msra.mxu0 %v18091_v57 }
 0x4b7   : > { %v16498_v41 = vpack.c.bf16 %v5977_v11, %v5977_v11  ;;  %v16578_v0 = vpack.c.bf16 %v7406_v26, %v7406_v26  ;;  %8251 = vmatpush1.bf16.msra.mxu1 %v20036_v53  ;;  %16860 = vmatprep.subr.bf16.mxu0 %v18092_v38  ;;  %v18074_v38 = vld [vmem:[%s25155_s1 + $0xa40] ss:$8 sps:$4 sm:$0xff]  }
 0x4b8   : > { %v5979_v10 = vpop.f32.mrf.mxu1  ;;  %v7408_v2 = vpop.f32.mrf.mxu0  ;;  %8252 = vmatprep.subr.bf16.mxu1 %v25301_v20  ;;  %v18071_v11 = vld [vmem:[#allocation2 + $0x1a0] ss:$52 sps:$4 sm:$0xff]  }
 0x4b9   : > { %6096 = vst.msk [vmem:[#allocation2 + $0xb8] sm:$0xf] %vm2045_vm7, %v16498_v41  ;;  %v5801_v45 = vpop.permute.xlu0 %5800  ;;  %v6357_v61 = vpop.permute.xlu1 %6356  ;;  %7512 = vrot.lane.b32.xlu1 %v16578_v0, %s25203_s29  ;;  %v18086_v41 = vld [vmem:[%s25155_s1 + $0xa54] ss:$8 sps:$4 sm:$0xff]   ;;  %v18080_v0 = vld [vmem:[#allocation2 + $0x20c] ss:$52 sps:$4 sm:$0xff]  }
 0x4ba   : > { %v7411_v22 = vpop.f32.mrf.mxu0  ;;  %v5982_v63 = vpop.f32.mrf.mxu1  ;;  %7715 = vmatmul.mubr.bf16.gmra.mxu1 %v18062_v40  ;;  %10512 = vmatmul.mubr.bf16.gmra.mxu0 %v18059_v27  ;;  %5834 = vst.msk [vmem:[#allocation2 + $0x2f0] sm:$0xf] %vm2351_vm8, %v5801_v45  ;;  %6401 = vst.msk [vmem:[#allocation2 + $0xb8] sm:$0xf] %vm2351_vm8, %v6357_v61  ;;  %v18108_v27 = vld [vmem:[%s25158_s4 + $0x108] sm:$0xff]  }
 0x4bb   : > { %v16579_v6 = vpack.c.bf16 %v7411_v22, %v7411_v22  ;;  %v16499_v17 = vpack.c.bf16 %v5982_v63, %v5982_v63  ;;  %8253 = vmatpush1.bf16.msra.mxu1 %v20018_v4  ;;  %10519 = vmatprep.mubr.bf16.mxu0 %v18067_v58 }
 0x4bc   : > { %v5984_v35 = vpop.f32.mrf.mxu1  ;;  %v7413_v32 = vpop.f32.mrf.mxu0  ;;  %8254 = vmatprep.subr.bf16.mxu1 %v25301_v20  ;;  %7722 = vmatprep.mubr.bf16.mxu1 %v18070_v48 }
 0x4bd   : > { %6097 = vst.msk [vmem:[#allocation2 + $0xec] sm:$0xf] %vm2045_vm7, %v16499_v17  ;;  %16861 = vmatpush3.bf16.msra.mxu0 %v18093_v49  ;;  %7514 = vrot.lane.b32.xlu0 %v16579_v6, %s25203_s29  ;;  %v18112_v49 = vld [vmem:[%s25158_s4 + $0x140] sm:$0xff]   ;;  %v18084_v35 = vld [vmem:[%s25155_s1 + $0xa50] ss:$8 sps:$4 sm:$0xff]  }
 0x4be   : > { %v5985_v5 = vpop.f32.mrf.mxu1  ;;  %v7414_v15 = vpop.f32.mrf.mxu0  ;;  %16862 = vmatprep.subr.bf16.mxu0 %v18097_v19  ;;  %v18113_v19 = vld [vmem:[%s25158_s4 + $0x100] sm:$0xff]  }
 0x4bf   : > { %v16500_v34 = vpack.c.bf16 %v5985_v5, %v5985_v5  ;;  %v16580_v54 = vpack.c.bf16 %v7414_v15, %v7414_v15  ;;  %8255 = vmatpush1.bf16.msra.mxu1 %v19988_v59  ;;  %v18078_v5 = vld [vmem:[#allocation2 + $0x208] ss:$52 sps:$4 sm:$0xff]  }
 0x4c0   : > { %v5987_v25 = vpop.f32.mrf.mxu1  ;;  %v7416_v1 = vpop.f32.mrf.mxu0  ;;  %8256 = vmatprep.subr.bf16.mxu1 %v25301_v20 }
 0x4c1   : > { %6098 = vst.msk [vmem:[#allocation2 + $0x120] sm:$0xf] %vm2045_vm7, %v16500_v34  ;;  %16863 = vmatpush3.bf16.msra.mxu0 %v18101_v39  ;;  %v6351_v37 = vpop.permute.xlu0 %6350  ;;  %v6361_v47 = vpop.permute.xlu1 %6360  ;;  %7516 = vrot.lane.b32.xlu1 %v16580_v54, %s25203_s29  ;;  %v18096_v34 = vld [vmem:[%s25155_s1 + $0xa64] ss:$8 sps:$4 sm:$0xff]   ;;  %v18090_v54 = vld [vmem:[#allocation2 + $0x274] ss:$52 sps:$4 sm:$0xff]  }
 0x4c2   : > { %v5990_v43 = vpop.f32.mrf.mxu1  ;;  %v7419_v13 = vpop.f32.mrf.mxu0  ;;  %7723 = vmatmul.mubr.bf16.gmra.mxu1 %v18068_v24  ;;  %10520 = vmatmul.mubr.bf16.gmra.mxu0 %v18065_v60  ;;  %6398 = vst.msk [vmem:[#allocation2 + $0x1c] sm:$0xf] %vm2351_vm8, %v6351_v37  ;;  %6403 = vst.msk [vmem:[#allocation2 + $0x120] sm:$0xf] %vm2351_vm8, %v6361_v47 }
 0x4c3   : > { %v16501_v14 = vpack.c.bf16 %v5990_v43, %v5990_v43  ;;  %v16581_v55 = vpack.c.bf16 %v7419_v13, %v7419_v13  ;;  %8257 = vmatpush1.bf16.msra.mxu1 %v19968_v52  ;;  %10527 = vmatprep.mubr.bf16.mxu0 %v18073_v36  ;;  %v18188_v36 = vld [vmem:[%s25158_s4 + $0x278] sm:$0xff]  }
 0x4c4   : > { %v5992_v23 = vpop.f32.mrf.mxu1  ;;  %v7421_v57 = vpop.f32.mrf.mxu0  ;;  %8258 = vmatprep.subr.bf16.mxu1 %v25301_v20  ;;  %7730 = vmatprep.mubr.bf16.mxu1 %v18076_v12 }
 0x4c5   : > { %6099 = vst.msk [vmem:[#allocation2 + $0x154] sm:$0xf] %vm2045_vm7, %v16501_v14  ;;  %16864 = vmatprep.subr.bf16.mxu0 %v18102_v44  ;;  %7518 = vrot.lane.b32.xlu0 %v16581_v55, %s25203_s29  ;;  %v18094_v14 = vld [vmem:[%s25155_s1 + $0xa60] ss:$8 sps:$4 sm:$0xff]  }
 0x4c6   : > { %v5993_v9 = vpop.f32.mrf.mxu1  ;;  %v7422_v7 = vpop.f32.mrf.mxu0  ;;  %16865 = vmatpush3.bf16.msra.mxu0 %v18103_v42 }
 0x4c7   : > { %v16502_v50 = vpack.c.bf16 %v5993_v9, %v5993_v9  ;;  %v16582_v16 = vpack.c.bf16 %v7422_v7, %v7422_v7  ;;  %8259 = vmatpush1.bf16.msra.mxu1 %v19935_v8  ;;  %16866 = vmatprep.subr.bf16.mxu0 %v18107_v29  ;;  %v18088_v9 = vld [vmem:[#allocation2 + $0x270] ss:$52 sps:$4 sm:$0xff]  }
 0x4c8   : > { %v5995_v26 = vpop.f32.mrf.mxu1  ;;  %v7424_v40 = vpop.f32.mrf.mxu0  ;;  %8266 = vmatprep.subr.bf16.mxu1 %v25301_v20 }
 0x4c9   : > { %6100 = vst.msk [vmem:[#allocation2 + $0x188] sm:$0xf] %vm2045_vm7, %v16502_v50  ;;  %v6355_v10 = vpop.permute.xlu0 %6354  ;;  %v6365_v2 = vpop.permute.xlu1 %6364  ;;  %7520 = vrot.lane.b32.xlu1 %v16582_v16, %s25203_s29  ;;  %v18106_v50 = vld [vmem:[%s25155_s1 + $0xa74] ss:$8 sps:$4 sm:$0xff]  }
 0x4ca   : > { %v5998_v48 = vpop.f32.mrf.mxu1  ;;  %v7427_v58 = vpop.f32.mrf.mxu0  ;;  %7731 = vmatmul.mubr.bf16.gmra.mxu1 %v18074_v38  ;;  %10528 = vmatmul.mubr.bf16.gmra.mxu0 %v18071_v11  ;;  %6400 = vst.msk [vmem:[#allocation2 + $0x84] sm:$0xf] %vm2351_vm8, %v6355_v10  ;;  %6405 = vst.msk [vmem:[#allocation2 + $0x188] sm:$0xf] %vm2351_vm8, %v6365_v2  ;;  %v18100_v16 = vld [vmem:[#allocation2 + $0x2dc] ss:$52 sps:$4 sm:$0xff]  }
 0x4cb   : > { %v16503_v45 = vpack.c.bf16 %v5998_v48, %v5998_v48  ;;  %v16583_v61 = vpack.c.bf16 %v7427_v58, %v7427_v58  ;;  %8267 = vmatpush2.bf16.msra.mxu1 %v20199_v46  ;;  %10535 = vmatprep.mubr.bf16.mxu0 %v18080_v0  ;;  %v18104_v58 = vld [vmem:[%s25155_s1 + $0xa70] ss:$8 sps:$4 sm:$0xff]  }
 0x4cc   : > { %v6000_v22 = vpop.f32.mrf.mxu1  ;;  %v7429_v63 = vpop.f32.mrf.mxu0  ;;  %8268 = vmatprep.subr.bf16.mxu1 %v25301_v20  ;;  %7738 = vmatprep.mubr.bf16.mxu1 %v18086_v41 }
 0x4cd   : > { %6101 = vst.msk [vmem:[#allocation2 + $0x1bc] sm:$0xf] %vm2045_vm7, %v16503_v45  ;;  %16867 = vmatpush3.bf16.msra.mxu0 %v18108_v27  ;;  %7522 = vrot.lane.b32.xlu0 %v16583_v61, %s25203_s29  ;;  %v18116_v61 = vld [vmem:[%s25155_s1 + $0xb04] ss:$8 sps:$4 sm:$0xff]  }
 0x4ce   : > { %v6001_v6 = vpop.f32.mrf.mxu1  ;;  %v7430_v17 = vpop.f32.mrf.mxu0  ;;  %16868 = vmatprep.subr.bf16.mxu0 %v18112_v49 }
 0x4cf   : > { %v16504_v32 = vpack.c.bf16 %v6001_v6, %v6001_v6  ;;  %v16584_v39 = vpack.c.bf16 %v7430_v17, %v7430_v17  ;;  %8269 = vmatpush2.bf16.msra.mxu1 %v20180_v56 }
 0x4d0   : > { %v6003_v15 = vpop.f32.mrf.mxu1  ;;  %v7432_v24 = vpop.f32.mrf.mxu0  ;;  %8270 = vmatprep.subr.bf16.mxu1 %v25301_v20 }
 0x4d1   : > { %6102 = vst.msk [vmem:[#allocation2 + $0x1f0] sm:$0xf] %vm2045_vm7, %v16504_v32  ;;  %16869 = vmatpush3.bf16.msra.mxu0 %v18113_v19  ;;  %v6359_v60 = vpop.permute.xlu0 %6358  ;;  %v6369_v25 = vpop.permute.xlu1 %6368  ;;  %7524 = vrot.lane.b32.xlu1 %v16584_v39, %s25203_s29  ;;  %v18098_v19 = vld [vmem:[#allocation2 + $0x2d8] ss:$52 sps:$4 sm:$0xff]  }
 0x4d2   : > { %v6006_v1 = vpop.f32.mrf.mxu1  ;;  %v7435_v12 = vpop.f32.mrf.mxu0  ;;  %7739 = vmatmul.mubr.bf16.gmra.mxu1 %v18084_v35  ;;  %10536 = vmatmul.mubr.bf16.gmra.mxu0 %v18078_v5  ;;  %6402 = vst.msk [vmem:[#allocation2 + $0xec] sm:$0xf] %vm2351_vm8, %v6359_v60  ;;  %6407 = vst.msk [vmem:[#allocation2 + $0x1f0] sm:$0xf] %vm2351_vm8, %v6369_v25  ;;  %v18111_v35 = vld [vmem:[#allocation2 + $0x14] ss:$52 sps:$4 sm:$0xff]  }
 0x4d3   : > { %v16505_v44 = vpack.c.bf16 %v6006_v1, %v6006_v1  ;;  %v16585_v37 = vpack.c.bf16 %v7435_v12, %v7435_v12  ;;  %8271 = vmatpush2.bf16.msra.mxu1 %v20168_v31  ;;  %10543 = vmatprep.mubr.bf16.mxu0 %v18090_v54  ;;  %v18114_v25 = vld [vmem:[%s25155_s1 + $0xb00] ss:$8 sps:$4 sm:$0xff]  }
 0x4d4   : > { %v7437_v47 = vpop.f32.mrf.mxu0  ;;  %v6008_v43 = vpop.f32.mrf.mxu1  ;;  %8272 = vmatprep.subr.bf16.mxu1 %v25301_v20  ;;  %7746 = vmatprep.mubr.bf16.mxu1 %v18096_v34 }
 0x4d5   : > { %6103 = vst.msk [vmem:[#allocation2 + $0x224] sm:$0xf] %vm2045_vm7, %v16505_v44  ;;  %7526 = vrot.lane.b32.xlu0 %v16585_v37, %s25203_s29  ;;  %16982 = vmatprep.subr.bf16.mxu0 %v18188_v36  ;;  %v18109_v44 = vld [vmem:[#allocation2 + $0x10] ss:$52 sps:$4 sm:$0xff]   ;;  %v18122_v43 = vld [vmem:[%s25155_s1 + $0xb14] ss:$8 sps:$4 sm:$0xff]  }
 0x4d6   : > { %v6009_v13 = vpop.f32.mrf.mxu1  ;;  %v7438_v42 = vpop.f32.mrf.mxu0 }
 0x4d7   : > { %v16506_v55 = vpack.c.bf16 %v6009_v13, %v6009_v13  ;;  %v16586_v29 = vpack.c.bf16 %v7438_v42, %v7438_v42  ;;  %8273 = vmatpush2.bf16.msra.mxu1 %v20154_v21  ;;  %v6363_v23 = vpop.permute.xlu0 %6362  ;;  %v6373_v57 = vpop.permute.xlu1 %6372  ;;  %v18119_v13 = vld [vmem:[#allocation2 + $0x7c] ss:$52 sps:$4 sm:$0xff]  }
 0x4d8   : > { %v7440_v7 = vpop.f32.mrf.mxu0  ;;  %v6011_v38 = vpop.f32.mrf.mxu1  ;;  %8274 = vmatprep.subr.bf16.mxu1 %v25301_v20  ;;  %6404 = vst.msk [vmem:[#allocation2 + $0x154] sm:$0xf] %vm2351_vm8, %v6363_v23  ;;  %v18190_v42 = vld [vmem:[%s25158_s4 + $0x238] sm:$0xff]  }
 0x4d9   : > { %6104 = vst.msk [vmem:[#allocation2 + $0x258] sm:$0xf] %vm2045_vm7, %v16506_v55  ;;  %7528 = vrot.lane.b32.xlu1 %v16586_v29, %s25203_s29  ;;  %v18192_v29 = vld [vmem:[%s25158_s4 + $0x270] sm:$0xff]  }
 0x4da   : > { %v6014_v11 = vpop.f32.mrf.mxu1  ;;  %v7443_v26 = vpop.f32.mrf.mxu0  ;;  %7747 = vmatmul.mubr.bf16.gmra.mxu1 %v18094_v14  ;;  %10544 = vmatmul.mubr.bf16.gmra.mxu0 %v18088_v9  ;;  %6409 = vst.msk [vmem:[#allocation2 + $0x258] sm:$0xf] %vm2351_vm8, %v6373_v57 }
 0x4db   : > { %v16507_v40 = vpack.c.bf16 %v6014_v11, %v6014_v11  ;;  %v16587_v41 = vpack.c.bf16 %v7443_v26, %v7443_v26  ;;  %8275 = vmatpush2.bf16.msra.mxu1 %v20126_v18  ;;  %10551 = vmatprep.mubr.bf16.mxu0 %v18100_v16  ;;  %v6367_v0 = vpop.permute.xlu0 %6366  ;;  %v6377_v63 = vpop.permute.xlu1 %6376 }
 0x4dc   : > { %v7445_v27 = vpop.f32.mrf.mxu0  ;;  %v6016_v10 = vpop.f32.mrf.mxu1  ;;  %7754 = vmatprep.mubr.bf16.mxu1 %v18106_v50  ;;  %8822 = vmatprep.subr.bf16.mxu1 %v25301_v20  ;;  %6406 = vst.msk [vmem:[#allocation2 + $0x1bc] sm:$0xf] %vm2351_vm8, %v6367_v0  ;;  %v18194_v50 = vld [vmem:[%s25158_s4 + $0x230] sm:$0xff]  }
 0x4dd   : > { %6105 = vst.msk [vmem:[#allocation2 + $0x28c] sm:$0xf] %vm2045_vm7, %v16507_v40  ;;  %7530 = vrot.lane.b32.xlu0 %v16587_v41, %s25203_s29  ;;  %v18117_v41 = vld [vmem:[#allocation2 + $0x78] ss:$52 sps:$4 sm:$0xff]  }
 0x4de   : > { %v6017_v2 = vpop.f32.mrf.mxu1  ;;  %v7446_v48 = vpop.f32.mrf.mxu0  ;;  %v18128_v10 = vld [vmem:[%s25155_s1 + $0xb24] ss:$8 sps:$4 sm:$0xff]  }
 0x4df   : > { %v16508_v49 = vpack.c.bf16 %v6017_v2, %v6017_v2  ;;  %v16588_v45 = vpack.c.bf16 %v7446_v48, %v7446_v48  ;;  %v6371_v22 = vpop.permute.xlu0 %6370  ;;  %v18125_v2 = vld [vmem:[#allocation2 + $0xe4] ss:$52 sps:$4 sm:$0xff]  }
 0x4e0   : > { %v7448_v6 = vpop.f32.mrf.mxu0  ;;  %v6019_v17 = vpop.f32.mrf.mxu1  ;;  %6408 = vst.msk [vmem:[#allocation2 + $0x224] sm:$0xf] %vm2351_vm8, %v6371_v22 }
 0x4e1   : > { %6106 = vst.msk [vmem:[#allocation2 + $0x2c0] sm:$0xf] %vm2045_vm7, %v16508_v49  ;;  %7532 = vrot.lane.b32.xlu1 %v16588_v45, %s25203_s29  ;;  %v6381_v36 = vpop.permute.xlu1 %6380  ;;  %v18201_v45 = vld [vmem:[%s25158_s4 + $0x228] sm:$0xff]  }
 0x4e2   : > { %v6022_v32 = vpop.f32.mrf.mxu1  ;;  %v22819_v39 = vpop.f32.mrf.mxu0  ;;  %7755 = vmatmul.mubr.bf16.gmra.mxu1 %v18104_v58  ;;  %10552 = vmatmul.mubr.bf16.gmra.mxu0 %v18098_v19  ;;  %6411 = vst.msk [vmem:[#allocation2 + $0x2c0] sm:$0xf] %vm2351_vm8, %v6377_v63  ;;  %v18206_v63 = vld [vmem:[%s25158_s4 + $0x260] sm:$0xff]  }
 0x4e3   : > { %v16509_v5 = vpack.c.bf16 %v6022_v32, %v6022_v32  ;;  %10689 = vmatprep.mubr.bf16.mxu0 %v18111_v35  ;;  %8276 = vmatprep.mubr.bf16.mxu1 %v18116_v61  ;;  %v6375_v15 = vpop.permute.xlu0 %6374 }
 0x4e4   : > { %v7453_v24 = vpop.f32.mrf.mxu0  ;;  %v6024_v34 = vpop.f32.mrf.mxu1  ;;  %6410 = vst.msk [vmem:[#allocation2 + $0x28c] sm:$0xf] %vm2351_vm8, %v6375_v15 }
 0x4e5   : > { %6107 = vst.msk [vmem:[#allocation2 + $0x2f4] sm:$0xf] %vm2045_vm7, %v16509_v5  ;;  %v18123_v24 = vld [vmem:[#allocation2 + $0xe0] ss:$52 sps:$4 sm:$0xff]  }
 0x4e6   : > { %v6025_v54 = vpop.f32.mrf.mxu1  ;;  %v22824_v60 = vpop.f32.mrf.mxu0 }
 0x4e7   : > { %v16510_v1 = vpack.c.bf16 %v6025_v54, %v6025_v54  ;;  %v6379_v12 = vpop.permute.xlu0 %6378 }
 0x4e8   : > { %v7456_v37 = vpop.f32.mrf.mxu0  ;;  %v6027_v47 = vpop.f32.mrf.mxu1  ;;  %6412 = vst.msk [vmem:[#allocation2 + $0x2f4] sm:$0xf] %vm2351_vm8, %v6379_v12 }
 0x4e9   : > { %6108 = vst.msk [vmem:[#allocation2 + $0x328] sm:$0xf] %vm2045_vm7, %v16510_v1  ;;  %v6931_v48 = vpop.permute.xlu1 %6930  ;;  %v18131_v1 = vld [vmem:[#allocation2 + $0x14c] ss:$52 sps:$4 sm:$0xff]   ;;  %v18210_v37 = vld [vmem:[%s25158_s4 + $0x258] sm:$0xff]  }
 0x4ea   : > { %v6544_v14 = vpop.f32.mrf.mxu1  ;;  %v7973_v55 = vpop.f32.mrf.mxu0  ;;  %8277 = vmatmul.mubr.bf16.vlgmr.msra.gmra.mxu1 %v18114_v25  ;;  %10690 = vmatmul.mubr.bf16.vlgmr.msra.gmra.mxu0 %v18109_v44  ;;  %6413 = vst.msk [vmem:[#allocation2 + $0x328] sm:$0xf] %vm2351_vm8, %v6381_v36  ;;  %v18134_v25 = vld [vmem:[%s25155_s1 + $0xb34] ss:$8 sps:$4 sm:$0xff]  }
 0x4eb   : > { %v16527_v23 = vpack.c.bf16 %v6544_v14, %v6544_v14  ;;  %v16607_v57 = vpack.c.bf16 %v7973_v55, %v7973_v55  ;;  %8823 = vmatpush1.bf16.msra.mxu1 %v20114_v62  ;;  %10697 = vmatprep.mubr.bf16.mxu0 %v18119_v13  ;;  %v6929_v38 = vpop.permute.xlu0 %6928  ;;  %v18120_v62 = vld [vmem:[%s25155_s1 + $0xb10] ss:$8 sps:$4 sm:$0xff]  }
 0x4ec   : > { %v7975_v9 = vpop.f32.mrf.mxu0  ;;  %v6546_v7 = vpop.f32.mrf.mxu1  ;;  %8824 = vmatprep.subr.bf16.mxu1 %v25301_v20  ;;  %8284 = vmatprep.mubr.bf16.mxu1 %v18122_v43  ;;  %v18211_v55 = vld [vmem:[%s25158_s4 + $0x218] sm:$0xff]  }
 0x4ed   : > { %6671 = vst.msk [vmem:[#allocation2 + $0x20] sm:$0xf] %vm2045_vm7, %v16527_v23  ;;  %8084 = vrot.lane.b32.xlu0 %v16607_v57, %s25203_s29  ;;  %16983 = vmatpush3.bf16.msra.mxu0 %v18190_v42  ;;  %v18129_v7 = vld [vmem:[#allocation2 + $0x148] ss:$52 sps:$4 sm:$0xff]  }
 0x4ee   : > { %v6547_v16 = vpop.f32.mrf.mxu1  ;;  %v7976_v11 = vpop.f32.mrf.mxu0  ;;  %6976 = vst.msk [vmem:[#allocation2 + $0x20] sm:$0xf] %vm2351_vm8, %v6929_v38  ;;  %16984 = vmatprep.subr.bf16.mxu0 %v18192_v29 }
 0x4ef   : > { %v16528_v26 = vpack.c.bf16 %v6547_v16, %v6547_v16  ;;  %v16608_v40 = vpack.c.bf16 %v7976_v11, %v7976_v11  ;;  %8825 = vmatpush1.bf16.msra.mxu1 %v20084_v28  ;;  %v18199_v28 = vld [vmem:[%s25158_s4 + $0x268] sm:$0xff]   ;;  %v6933_v17 = vpop.permute.xlu0 %6932 }
 0x4f0   : > { %v7978_v0 = vpop.f32.mrf.mxu0  ;;  %v6549_v27 = vpop.f32.mrf.mxu1  ;;  %8826 = vmatprep.subr.bf16.mxu1 %v25301_v20  ;;  %v18140_v16 = vld [vmem:[%s25155_s1 + $0xb44] ss:$8 sps:$4 sm:$0xff]   ;;  %v18137_v11 = vld [vmem:[#allocation2 + $0x1b4] ss:$52 sps:$4 sm:$0xff]  }
 0x4f1   : > { %6672 = vst.msk [vmem:[#allocation2 + $0x54] sm:$0xf] %vm2045_vm7, %v16528_v26  ;;  %8086 = vrot.lane.b32.xlu1 %v16608_v40, %s25203_s29  ;;  %16985 = vmatpush3.bf16.msra.mxu0 %v18194_v50  ;;  %v6935_v12 = vpop.permute.xlu1 %6934  ;;  %v18217_v27 = vld [vmem:[%s25158_s4 + $0x248] sm:$0xff]  }
 0x4f2   : > { %v6552_v58 = vpop.f32.mrf.mxu1  ;;  %v7981_v49 = vpop.f32.mrf.mxu0  ;;  %8285 = vmatmul.mubr.bf16.gmra.mxu1 %v18120_v62  ;;  %10698 = vmatmul.mubr.bf16.gmra.mxu0 %v18117_v41  ;;  %6977 = vst.msk [vmem:[#allocation2 + $0x54] sm:$0xf] %vm2351_vm8, %v6931_v48  ;;  %v18216_v41 = vld [vmem:[%s25158_s4 + $0x210] sm:$0xff]  }
 0x4f3   : > { %v16529_v61 = vpack.c.bf16 %v6552_v58, %v6552_v58  ;;  %v16609_v22 = vpack.c.bf16 %v7981_v49, %v7981_v49  ;;  %8827 = vmatpush1.bf16.msra.mxu1 %v20070_v51  ;;  %10705 = vmatprep.mubr.bf16.mxu0 %v18125_v2  ;;  %v18126_v51 = vld [vmem:[%s25155_s1 + $0xb20] ss:$8 sps:$4 sm:$0xff]   ;;  %v6937_v14 = vpop.permute.xlu0 %6936 }
 0x4f4   : > { %v7983_v19 = vpop.f32.mrf.mxu0  ;;  %v6554_v6 = vpop.f32.mrf.mxu1  ;;  %8828 = vmatprep.subr.bf16.mxu1 %v25301_v20  ;;  %8292 = vmatprep.mubr.bf16.mxu1 %v18128_v10 }
 0x4f5   : > { %6673 = vst.msk [vmem:[#allocation2 + $0x88] sm:$0xf] %vm2045_vm7, %v16529_v61  ;;  %8088 = vrot.lane.b32.xlu0 %v16609_v22, %s25203_s29  ;;  %16986 = vmatprep.subr.bf16.mxu0 %v18199_v28  ;;  %v18143_v19 = vld [vmem:[#allocation2 + $0x21c] ss:$52 sps:$4 sm:$0xff]  }
 0x4f6   : > { %v6555_v35 = vpop.f32.mrf.mxu1  ;;  %v7984_v32 = vpop.f32.mrf.mxu0  ;;  %6978 = vst.msk [vmem:[#allocation2 + $0x88] sm:$0xf] %vm2351_vm8, %v6933_v17  ;;  %16987 = vmatpush3.bf16.msra.mxu0 %v18201_v45  ;;  %v18135_v45 = vld [vmem:[#allocation2 + $0x1b0] ss:$52 sps:$4 sm:$0xff]   ;;  %v18218_v17 = vld [vmem:[%s25158_s4 + $0x208] sm:$0xff]  }
 0x4f7   : > { %v16530_v5 = vpack.c.bf16 %v6555_v35, %v6555_v35  ;;  %v16610_v15 = vpack.c.bf16 %v7984_v32, %v7984_v32  ;;  %8829 = vmatpush1.bf16.msra.mxu1 %v20036_v53  ;;  %16988 = vmatprep.subr.bf16.mxu0 %v18206_v63  ;;  %v18208_v53 = vld [vmem:[%s25158_s4 + $0x220] sm:$0xff]   ;;  %v6939_v62 = vpop.permute.xlu1 %6938  ;;  %v18146_v63 = vld [vmem:[%s25155_s1 + $0xb54] ss:$8 sps:$4 sm:$0xff]  }
 0x4f8   : > { %v6557_v34 = vpop.f32.mrf.mxu1  ;;  %v7986_v54 = vpop.f32.mrf.mxu0  ;;  %8830 = vmatprep.subr.bf16.mxu1 %v25301_v20  ;;  %v18222_v32 = vld [vmem:[%s25158_s4 + $0x240] sm:$0xff]  }
 0x4f9   : > { %6674 = vst.msk [vmem:[#allocation2 + $0xbc] sm:$0xf] %vm2045_vm7, %v16530_v5  ;;  %8090 = vrot.lane.b32.xlu1 %v16610_v15, %s25203_s29  ;;  %v6941_v48 = vpop.permute.xlu0 %6940  ;;  %v18223_v34 = vld [vmem:[%s25158_s4 + $0x200] sm:$0xff]  }
 0x4fa   : > { %v6560_v36 = vpop.f32.mrf.mxu1  ;;  %v7989_v44 = vpop.f32.mrf.mxu0  ;;  %8293 = vmatmul.mubr.bf16.gmra.mxu1 %v18126_v51  ;;  %10706 = vmatmul.mubr.bf16.gmra.mxu0 %v18123_v24  ;;  %6979 = vst.msk [vmem:[#allocation2 + $0xbc] sm:$0xf] %vm2351_vm8, %v6935_v12  ;;  %v18141_v12 = vld [vmem:[#allocation2 + $0x218] ss:$52 sps:$4 sm:$0xff]  }
 0x4fb   : > { %v16531_v47 = vpack.c.bf16 %v6560_v36, %v6560_v36  ;;  %v16611_v43 = vpack.c.bf16 %v7989_v44, %v7989_v44  ;;  %8831 = vmatpush1.bf16.msra.mxu1 %v20018_v4  ;;  %10713 = vmatprep.mubr.bf16.mxu0 %v18131_v1  ;;  %v18132_v4 = vld [vmem:[%s25155_s1 + $0xb30] ss:$8 sps:$4 sm:$0xff]   ;;  %v6943_v6 = vpop.permute.xlu1 %6942  ;;  %v18152_v44 = vld [vmem:[%s25155_s1 + $0xb64] ss:$8 sps:$4 sm:$0xff]  }
 0x4fc   : > { %v7991_v13 = vpop.f32.mrf.mxu0  ;;  %v6562_v42 = vpop.f32.mrf.mxu1  ;;  %8832 = vmatprep.subr.bf16.mxu1 %v25301_v20  ;;  %8300 = vmatprep.mubr.bf16.mxu1 %v18134_v25 }
 0x4fd   : > { %6675 = vst.msk [vmem:[#allocation2 + $0xf0] sm:$0xf] %vm2045_vm7, %v16531_v47  ;;  %8092 = vrot.lane.b32.xlu0 %v16611_v43, %s25203_s29  ;;  %16989 = vmatpush3.bf16.msra.mxu0 %v18208_v53 }
 0x4fe   : > { %v6563_v29 = vpop.f32.mrf.mxu1  ;;  %v7992_v23 = vpop.f32.mrf.mxu0  ;;  %6980 = vst.msk [vmem:[#allocation2 + $0xf0] sm:$0xf] %vm2351_vm8, %v6937_v14  ;;  %16990 = vmatprep.subr.bf16.mxu0 %v18210_v37  ;;  %v18149_v37 = vld [vmem:[#allocation2 + $0x284] ss:$52 sps:$4 sm:$0xff]  }
 0x4ff   : > { %v16532_v57 = vpack.c.bf16 %v6563_v29, %v6563_v29  ;;  %v16612_v9 = vpack.c.bf16 %v7992_v23, %v7992_v23  ;;  %8833 = vmatpush1.bf16.msra.mxu1 %v19988_v59  ;;  %v18215_v59 = vld [vmem:[%s25158_s4 + $0x250] sm:$0xff]   ;;  %v6945_v24 = vpop.permute.xlu0 %6944 }
 0x500   : > { %v6565_v38 = vpop.f32.mrf.mxu1  ;;  %v7994_v50 = vpop.f32.mrf.mxu0  ;;  %8834 = vmatprep.subr.bf16.mxu1 %v25301_v20 }
 0x501   : > { %6676 = vst.msk [vmem:[#allocation2 + $0x124] sm:$0xf] %vm2045_vm7, %v16532_v57  ;;  %8094 = vrot.lane.b32.xlu1 %v16612_v9, %s25203_s29  ;;  %16991 = vmatpush3.bf16.msra.mxu0 %v18211_v55  ;;  %v18158_v38 = vld [vmem:[%s25155_s1 + $0xb74] ss:$8 sps:$4 sm:$0xff]  }
 0x502   : > { %v6568_v26 = vpop.f32.mrf.mxu1  ;;  %v22912_v40 = vpop.f32.mrf.mxu0  ;;  %8301 = vmatmul.mubr.bf16.gmra.mxu1 %v18132_v4  ;;  %10714 = vmatmul.mubr.bf16.gmra.mxu0 %v18129_v7  ;;  %6981 = vst.msk [vmem:[#allocation2 + $0x124] sm:$0xf] %vm2351_vm8, %v6939_v62  ;;  %v18150_v4 = vld [vmem:[%s25155_s1 + $0xb60] ss:$8 sps:$4 sm:$0xff]   ;;  %v18174_v50 = vld [vmem:[%s25158_s4 + $0xf8] sm:$0xff]  }
 0x503   : > { %v16533_v0 = vpack.c.bf16 %v6568_v26, %v6568_v26  ;;  %8835 = vmatpush1.bf16.msra.mxu1 %v19968_v52  ;;  %10721 = vmatprep.mubr.bf16.mxu0 %v18137_v11  ;;  %v18138_v52 = vld [vmem:[%s25155_s1 + $0xb40] ss:$8 sps:$4 sm:$0xff]   ;;  %v6947_v47 = vpop.permute.xlu1 %6946 }
 0x504   : > { %v7999_v10 = vpop.f32.mrf.mxu0  ;;  %v6570_v2 = vpop.f32.mrf.mxu1  ;;  %8836 = vmatprep.subr.bf16.mxu1 %v25301_v20  ;;  %8308 = vmatprep.mubr.bf16.mxu1 %v18140_v16  ;;  %v18155_v16 = vld [vmem:[#allocation2 + $0x2ec] ss:$52 sps:$4 sm:$0xff]  }
 0x505   : > { %6677 = vst.msk [vmem:[#allocation2 + $0x158] sm:$0xf] %vm2045_vm7, %v16533_v0  ;;  %16992 = vmatprep.subr.bf16.mxu0 %v18215_v59  ;;  %v18156_v2 = vld [vmem:[%s25155_s1 + $0xb70] ss:$8 sps:$4 sm:$0xff]  }
 0x506   : > { %v6571_v28 = vpop.f32.mrf.mxu1  ;;  %v22924_v58 = vpop.f32.mrf.mxu0  ;;  %6982 = vst.msk [vmem:[#allocation2 + $0x158] sm:$0xf] %vm2351_vm8, %v6941_v48  ;;  %16993 = vmatpush3.bf16.msra.mxu0 %v18216_v41 }
 0x507   : > { %v16534_v49 = vpack.c.bf16 %v6571_v28, %v6571_v28  ;;  %8837 = vmatpush1.bf16.msra.mxu1 %v19935_v8  ;;  %16994 = vmatprep.subr.bf16.mxu0 %v18217_v27  ;;  %v6949_v55 = vpop.permute.xlu0 %6948  ;;  %v18153_v28 = vld [vmem:[#allocation2 + $0x2e8] ss:$52 sps:$4 sm:$0xff]  }
 0x508   : > { %v6573_v61 = vpop.f32.mrf.mxu1  ;;  %v8002_v22 = vpop.f32.mrf.mxu0  ;;  %8844 = vmatprep.subr.bf16.mxu1 %v25301_v20 }
 0x509   : > { %6678 = vst.msk [vmem:[#allocation2 + $0x18c] sm:$0xf] %vm2045_vm7, %v16534_v49 }
 0x50a   : > { %v6576_v35 = vpop.f32.mrf.mxu1  ;;  %v22939_v8 = vpop.f32.mrf.mxu0  ;;  %8309 = vmatmul.mubr.bf16.gmra.mxu1 %v18138_v52  ;;  %10722 = vmatmul.mubr.bf16.gmra.mxu0 %v18135_v45  ;;  %6983 = vst.msk [vmem:[#allocation2 + $0x18c] sm:$0xf] %vm2351_vm8, %v6943_v6 }
 0x50b   : > { %v16535_v51 = vpack.c.bf16 %v6576_v35, %v6576_v35  ;;  %8845 = vmatpush2.bf16.msra.mxu1 %v20199_v46  ;;  %10729 = vmatprep.mubr.bf16.mxu0 %v18143_v19  ;;  %v18144_v46 = vld [vmem:[%s25155_s1 + $0xb50] ss:$8 sps:$4 sm:$0xff]   ;;  %v6951_v11 = vpop.permute.xlu1 %6950 }
 0x50c   : > { %v8007_v5 = vpop.f32.mrf.mxu0  ;;  %v6578_v15 = vpop.f32.mrf.mxu1  ;;  %8846 = vmatprep.subr.bf16.mxu1 %v25301_v20  ;;  %8316 = vmatprep.mubr.bf16.mxu1 %v18146_v63 }
 0x50d   : > { %6679 = vst.msk [vmem:[#allocation2 + $0x1c0] sm:$0xf] %vm2045_vm7, %v16535_v51  ;;  %16995 = vmatpush3.bf16.msra.mxu0 %v18218_v17  ;;  %v18164_v5 = vld [vmem:[%s25155_s1 + $0xc14] ss:$8 sps:$4 sm:$0xff]  }
 0x50e   : > { %v6579_v54 = vpop.f32.mrf.mxu1  ;;  %v22951_v25 = vpop.f32.mrf.mxu0  ;;  %6984 = vst.msk [vmem:[#allocation2 + $0x1c0] sm:$0xf] %vm2351_vm8, %v6945_v24  ;;  %16996 = vmatprep.subr.bf16.mxu0 %v18222_v32  ;;  %v18159_v32 = vld [vmem:[%s25155_s1 + $0xc00] ss:$8 sps:$4 sm:$0xff]   ;;  %v18175_v15 = vld [vmem:[%s25158_s4 + $0xb8] sm:$0xff]  }
 0x50f   : > { %v16536_v1 = vpack.c.bf16 %v6579_v54, %v6579_v54  ;;  %8847 = vmatpush2.bf16.msra.mxu1 %v20180_v56  ;;  %v6953_v0 = vpop.permute.xlu0 %6952  ;;  %v18176_v54 = vld [vmem:[%s25158_s4 + $0xf0] sm:$0xff]  }
 0x510   : > { %v6581_v53 = vpop.f32.mrf.mxu1  ;;  %v8010_v36 = vpop.f32.mrf.mxu0  ;;  %8848 = vmatprep.subr.bf16.mxu1 %v25301_v20 }
 0x511   : > { %6680 = vst.msk [vmem:[#allocation2 + $0x1f4] sm:$0xf] %vm2045_vm7, %v16536_v1  ;;  %16997 = vmatpush3.bf16.msra.mxu0 %v18223_v34  ;;  %v18177_v36 = vld [vmem:[%s25158_s4 + $0xb0] sm:$0xff]  }
 0x512   : > { %v22963_v43 = vpop.f32.mrf.mxu0  ;;  %v6584_v13 = vpop.f32.mrf.mxu1  ;;  %8317 = vmatmul.mubr.bf16.gmra.mxu1 %v18144_v46  ;;  %10730 = vmatmul.mubr.bf16.gmra.mxu0 %v18141_v12  ;;  %6985 = vst.msk [vmem:[#allocation2 + $0x1f4] sm:$0xf] %vm2351_vm8, %v6947_v47 }
 0x513   : > { %v16537_v56 = vpack.c.bf16 %v6584_v13, %v6584_v13  ;;  %8849 = vmatpush2.bf16.msra.mxu1 %v20168_v31  ;;  %10737 = vmatprep.mubr.bf16.mxu0 %v18149_v37  ;;  %v18147_v31 = vld [vmem:[#allocation2 + $0x280] ss:$52 sps:$4 sm:$0xff]   ;;  %v6955_v45 = vpop.permute.xlu1 %6954  ;;  %v18181_v13 = vld [vmem:[%s25158_s4 + $0xe8] sm:$0xff]  }
 0x514   : > { %v8015_v42 = vpop.f32.mrf.mxu0  ;;  %v6586_v14 = vpop.f32.mrf.mxu1  ;;  %8850 = vmatprep.subr.bf16.mxu1 %v25301_v20  ;;  %8324 = vmatprep.mubr.bf16.mxu1 %v18152_v44 }
 0x515   : > { %6681 = vst.msk [vmem:[#allocation2 + $0x228] sm:$0xf] %vm2045_vm7, %v16537_v56  ;;  %v18162_v14 = vld [vmem:[%s25155_s1 + $0xc10] ss:$8 sps:$4 sm:$0xff]  }
 0x516   : > { %v22969_v29 = vpop.f32.mrf.mxu0  ;;  %v6587_v23 = vpop.f32.mrf.mxu1  ;;  %6986 = vst.msk [vmem:[#allocation2 + $0x228] sm:$0xf] %vm2351_vm8, %v6949_v55  ;;  %v16557_v55 = vpack.c.bf16 %v22645_v3, %v22645_v3 }
 0x517   : > { %v16538_v57 = vpack.c.bf16 %v6587_v23, %v6587_v23  ;;  %8851 = vmatpush2.bf16.msra.mxu1 %v20154_v21 }
 0x518   : > { %v6589_v9 = vpop.f32.mrf.mxu1  ;;  %v8018_v7 = vpop.f32.mrf.mxu0  ;;  %8852 = vmatprep.subr.bf16.mxu1 %v25301_v20 }
 0x519   : > { %6682 = vst.msk [vmem:[#allocation2 + $0x25c] sm:$0xf] %vm2045_vm7, %v16538_v57  ;;  %v18167_v57 = vld [vmem:[%s25155_s1 + $0xc24] ss:$8 sps:$4 sm:$0xff]  }
 0x51a   : > { %v22984_v62 = vpop.f32.mrf.mxu0  ;;  %v6592_v21 = vpop.f32.mrf.mxu1  ;;  %8325 = vmatmul.mubr.bf16.gmra.mxu1 %v18150_v4  ;;  %10738 = vmatmul.mubr.bf16.gmra.mxu0 %v18147_v31  ;;  %6987 = vst.msk [vmem:[#allocation2 + $0x25c] sm:$0xf] %vm2351_vm8, %v6951_v11  ;;  %v18182_v31 = vld [vmem:[%s25158_s4 + $0xa8] sm:$0xff]   ;;  %v16558_v11 = vpack.c.bf16 %v22650_v30, %v22650_v30 }
 0x51b   : > { %v16539_v59 = vpack.c.bf16 %v6592_v21, %v6592_v21  ;;  %8853 = vmatpush2.bf16.msra.mxu1 %v20126_v18  ;;  %10745 = vmatprep.mubr.bf16.mxu0 %v18155_v16  ;;  %v18161_v18 = vld [vmem:[%s25155_s1 + $0xc04] ss:$8 sps:$4 sm:$0xff]  }
 0x51c   : > { %v8023_v26 = vpop.f32.mrf.mxu0  ;;  %v6594_v41 = vpop.f32.mrf.mxu1  ;;  %8332 = vmatprep.mubr.bf16.mxu1 %v18158_v38  ;;  %16790 = vmatprep.subr.bf16.mxu1 %v18174_v50  ;;  %v18183_v50 = vld [vmem:[%s25158_s4 + $0xe0] sm:$0xff]  }
 0x51d   : > { %6683 = vst.msk [vmem:[#allocation2 + $0x290] sm:$0xf] %vm2045_vm7, %v16539_v59  ;;  %v18184_v26 = vld [vmem:[%s25158_s4 + $0xa0] sm:$0xff]  }
 0x51e   : > { %v22989_v27 = vpop.f32.mrf.mxu0  ;;  %v6595_v10 = vpop.f32.mrf.mxu1  ;;  %6988 = vst.msk [vmem:[#allocation2 + $0x290] sm:$0xf] %vm2351_vm8, %v6953_v0 }
 0x51f   : > { %v16540_v48 = vpack.c.bf16 %v6595_v10, %v6595_v10  ;;  %v7507_v44 = vpop.permute.xlu0 %7506 }
 0x520   : > { %v6597_v52 = vpop.f32.mrf.mxu1  ;;  %v8026_v49 = vpop.f32.mrf.mxu0 }
 0x521   : > { %6684 = vst.msk [vmem:[#allocation2 + $0x2c4] sm:$0xf] %vm2045_vm7, %v16540_v48 }
 0x522   : > { %v22999_v61 = vpop.f32.mrf.mxu0  ;;  %v6600_v22 = vpop.f32.mrf.mxu1  ;;  %8333 = vmatmul.mubr.bf16.gmra.mxu1 %v18156_v2  ;;  %10746 = vmatmul.mubr.bf16.gmra.mxu0 %v18153_v28  ;;  %6989 = vst.msk [vmem:[#allocation2 + $0x2c4] sm:$0xf] %vm2351_vm8, %v6955_v45  ;;  %v18189_v2 = vld [vmem:[%s25158_s4 + $0xd8] sm:$0xff]   ;;  %v16589_v28 = vpack.c.bf16 %v22819_v39, %v22819_v39  ;;  %v18224_v39 = vld [vmem:[#allocation2 + $0x20] ss:$52 sps:$4 sm:$0xff]  }
 0x523   : > { %v16541_v63 = vpack.c.bf16 %v6600_v22, %v6600_v22  ;;  %8854 = vmatprep.mubr.bf16.mxu1 %v18161_v18  ;;  %v7509_v9 = vpop.permute.xlu1 %7508  ;;  %v18165_v18 = vld [vmem:[%s25155_s1 + $0xc20] ss:$8 sps:$4 sm:$0xff]   ;;  %v18170_v45 = vld [vmem:[%s25155_s1 + $0xc34] ss:$8 sps:$4 sm:$0xff]  }
 0x524   : > { %v8031_v19 = vpop.f32.mrf.mxu0  ;;  %v6602_v6 = vpop.f32.mrf.mxu1  ;;  %v18191_v22 = vld [vmem:[%s25158_s4 + $0x98] sm:$0xff]  }
 0x525   : > { %6685 = vst.msk [vmem:[#allocation2 + $0x2f8] sm:$0xf] %vm2045_vm7, %v16541_v63 }
 0x526   : > { %v23003_v17 = vpop.f32.mrf.mxu0  ;;  %v6603_v35 = vpop.f32.mrf.mxu1 }
 0x527   : > { %v16542_v51 = vpack.c.bf16 %v6603_v35, %v6603_v35  ;;  %v7511_v41 = vpop.permute.xlu0 %7510  ;;  %v18193_v35 = vld [vmem:[%s25158_s4 + $0xd0] sm:$0xff]  }
 0x528   : > { %v6605_v24 = vpop.f32.mrf.mxu1  ;;  %v8034_v34 = vpop.f32.mrf.mxu0 }
 0x529   : > { %6686 = vst.msk [vmem:[#allocation2 + $0x32c] sm:$0xf] %vm2045_vm7, %v16542_v51 }
 0x52a   : > { %v8551_v46 = vpop.f32.mrf.mxu0  ;;  %v7122_v1 = vpop.f32.mrf.mxu1  ;;  %8855 = vmatmul.mubr.bf16.vlgmr.msra.gmra.mxu1 %v18159_v32 }
 0x52b   : > { %v16639_v12 = vpack.c.bf16 %v8551_v46, %v8551_v46  ;;  %v16559_v53 = vpack.c.bf16 %v7122_v1, %v7122_v1  ;;  %8862 = vmatprep.mubr.bf16.mxu1 %v18164_v5  ;;  %16791 = vmatpush3.bf16.msra.mxu1 %v18175_v15  ;;  %v7513_v63 = vpop.permute.xlu1 %7512  ;;  %v16590_v15 = vpack.c.bf16 %v22824_v60, %v22824_v60 }
 0x52c   : > { %v8553_v37 = vpop.f32.mrf.mxu0  ;;  %v7124_v47 = vpop.f32.mrf.mxu1  ;;  %16792 = vmatprep.subr.bf16.mxu1 %v18176_v54  ;;  %v18195_v54 = vld [vmem:[%s25158_s4 + $0x90] sm:$0xff]   ;;  %v16613_v60 = vpack.c.bf16 %v22912_v40, %v22912_v40  ;;  %v18202_v40 = vld [vmem:[%s25158_s4 + $0x88] sm:$0xff]  }
 0x52d   : > { %7249 = vst.msk [vmem:[#allocation2 + $0x24] sm:$0xf] %vm2045_vm7, %v16559_v53  ;;  %8662 = vrot.lane.b32.xlu0 %v16639_v12, %s25203_s29  ;;  %v18200_v53 = vld [vmem:[%s25158_s4 + $0xc8] sm:$0xff]   ;;  %v18168_v37 = vld [vmem:[%s25155_s1 + $0xc30] ss:$8 sps:$4 sm:$0xff]  }
 0x52e   : > { %v8554_v56 = vpop.f32.mrf.mxu0  ;;  %v7125_v42 = vpop.f32.mrf.mxu1  ;;  %7554 = vst.msk [vmem:[#allocation2 + $0x24] sm:$0xf] %vm2351_vm8, %v7507_v44 }
 0x52f   : > { %v16640_v23 = vpack.c.bf16 %v8554_v56, %v8554_v56  ;;  %v16560_v4 = vpack.c.bf16 %v7125_v42, %v7125_v42  ;;  %16793 = vmatpush3.bf16.msra.mxu1 %v18177_v36  ;;  %v7515_v46 = vpop.permute.xlu0 %7514  ;;  %v18173_v56 = vld [vmem:[%s25155_s1 + $0xc44] ss:$8 sps:$4 sm:$0xff]  }
 0x530   : > { %v7127_v7 = vpop.f32.mrf.mxu1  ;;  %v8556_v38 = vpop.f32.mrf.mxu0  ;;  %16794 = vmatprep.subr.bf16.mxu1 %v18181_v13 }
 0x531   : > { %7250 = vst.msk [vmem:[#allocation2 + $0x58] sm:$0xf] %vm2045_vm7, %v16560_v4  ;;  %8664 = vrot.lane.b32.xlu1 %v16640_v23, %s25203_s29  ;;  %6956 = vrot.lane.b32.xlu0 %v16557_v55, %s25203_s29  ;;  %v18207_v23 = vld [vmem:[%s25158_s4 + $0xc0] sm:$0xff]   ;;  %v16614_v4 = vpack.c.bf16 %v22924_v58, %v22924_v58 }
 0x532   : > { %v8559_v3 = vpop.f32.mrf.mxu0  ;;  %v7130_v16 = vpop.f32.mrf.mxu1  ;;  %8863 = vmatmul.mubr.bf16.gmra.mxu1 %v18162_v14  ;;  %7555 = vst.msk [vmem:[#allocation2 + $0x58] sm:$0xf] %vm2351_vm8, %v7509_v9  ;;  %v18209_v58 = vld [vmem:[%s25158_s4 + $0x80] sm:$0xff]  }
 0x533   : > { %v16641_v21 = vpack.c.bf16 %v8559_v3, %v8559_v3  ;;  %v16561_v59 = vpack.c.bf16 %v7130_v16, %v7130_v16  ;;  %8870 = vmatprep.mubr.bf16.mxu1 %v18167_v57  ;;  %16795 = vmatpush3.bf16.msra.mxu1 %v18182_v31  ;;  %v7517_v42 = vpop.permute.xlu1 %7516  ;;  %v18230_v57 = vld [vmem:[#allocation2 + $0x88] ss:$52 sps:$4 sm:$0xff]  }
 0x534   : > { %v7132_v0 = vpop.f32.mrf.mxu1  ;;  %v8561_v10 = vpop.f32.mrf.mxu0  ;;  %16796 = vmatprep.subr.bf16.mxu1 %v18183_v50 }
 0x535   : > { %7251 = vst.msk [vmem:[#allocation2 + $0x8c] sm:$0xf] %vm2045_vm7, %v16561_v59  ;;  %6958 = vrot.lane.b32.xlu1 %v16558_v11, %s25203_s29  ;;  %8666 = vrot.lane.b32.xlu0 %v16641_v21, %s25203_s29  ;;  %v18239_v21 = vld [vmem:[%s25158_s4 + $0x1f8] sm:$0xff]   ;;  %v16615_v59 = vpack.c.bf16 %v22939_v8, %v22939_v8  ;;  %v18171_v0 = vld [vmem:[%s25155_s1 + $0xc40] ss:$8 sps:$4 sm:$0xff]  }
 0x536   : > { %v8562_v30 = vpop.f32.mrf.mxu0  ;;  %v7133_v48 = vpop.f32.mrf.mxu1  ;;  %7556 = vst.msk [vmem:[#allocation2 + $0x8c] sm:$0xf] %vm2351_vm8, %v7511_v41 }
 0x537   : > { %v16642_v52 = vpack.c.bf16 %v8562_v30, %v8562_v30  ;;  %v16562_v49 = vpack.c.bf16 %v7133_v48, %v7133_v48  ;;  %16797 = vmatpush3.bf16.msra.mxu1 %v18184_v26  ;;  %v7519_v3 = vpop.permute.xlu0 %7518  ;;  %v18180_v30 = vld [vmem:[%s25155_s1 + $0xc54] ss:$8 sps:$4 sm:$0xff]  }
 0x538   : > { %v7135_v19 = vpop.f32.mrf.mxu1  ;;  %v8564_v6 = vpop.f32.mrf.mxu0  ;;  %16798 = vmatprep.subr.bf16.mxu1 %v18189_v2 }
 0x539   : > { %7252 = vst.msk [vmem:[#allocation2 + $0xc0] sm:$0xf] %vm2045_vm7, %v16562_v49  ;;  %8668 = vrot.lane.b32.xlu1 %v16642_v52, %s25203_s29  ;;  %7534 = vrot.lane.b32.xlu0 %v16589_v28, %s25203_s29  ;;  %v18226_v32 = vld [vmem:[#allocation2 + $0x24] ss:$52 sps:$4 sm:$0xff]   ;;  %v16616_v28 = vpack.c.bf16 %v22951_v25, %v22951_v25 }
 0x53a   : > { %v8567_v51 = vpop.f32.mrf.mxu0  ;;  %v7138_v5 = vpop.f32.mrf.mxu1  ;;  %8871 = vmatmul.mubr.bf16.gmra.mxu1 %v18165_v18  ;;  %7557 = vst.msk [vmem:[#allocation2 + $0xc0] sm:$0xf] %vm2351_vm8, %v7513_v63  ;;  %10883 = vmatprep.mubr.bf16.mxu0 %v18226_v32  ;;  %v18236_v52 = vld [vmem:[#allocation2 + $0xf0] ss:$52 sps:$4 sm:$0xff]  }
 0x53b   : > { %v16643_v24 = vpack.c.bf16 %v8567_v51, %v8567_v51  ;;  %v16563_v34 = vpack.c.bf16 %v7138_v5, %v7138_v5  ;;  %8878 = vmatprep.mubr.bf16.mxu1 %v18170_v45  ;;  %16799 = vmatpush3.bf16.msra.mxu1 %v18191_v22  ;;  %v7521_v48 = vpop.permute.xlu1 %7520  ;;  %v18178_v5 = vld [vmem:[%s25155_s1 + $0xc50] ss:$8 sps:$4 sm:$0xff]  }
 0x53c   : > { %v7140_v1 = vpop.f32.mrf.mxu1  ;;  %v8569_v12 = vpop.f32.mrf.mxu0  ;;  %16800 = vmatprep.subr.bf16.mxu1 %v18193_v35  ;;  %10884 = vmatmul.mubr.bf16.vlgmr.msra.gmra.mxu0 %v18224_v39  ;;  %v16617_v39 = vpack.c.bf16 %v22963_v43, %v22963_v43  ;;  %v16618_v43 = vpack.c.bf16 %v22969_v29, %v22969_v29 }
 0x53d   : > { %7253 = vst.msk [vmem:[#allocation2 + $0xf4] sm:$0xf] %vm2045_vm7, %v16563_v34  ;;  %7536 = vrot.lane.b32.xlu1 %v16590_v15, %s25203_s29  ;;  %8670 = vrot.lane.b32.xlu0 %v16643_v24, %s25203_s29  ;;  %v18187_v34 = vld [vmem:[%s25155_s1 + $0xc64] ss:$8 sps:$4 sm:$0xff]  }
 0x53e   : > { %v7141_v36 = vpop.f32.mrf.mxu1  ;;  %v8570_v44 = vpop.f32.mrf.mxu0  ;;  %7558 = vst.msk [vmem:[#allocation2 + $0xf4] sm:$0xf] %vm2351_vm8, %v7515_v46  ;;  %v18246_v12 = vld [vmem:[#allocation2 + $0x158] ss:$52 sps:$4 sm:$0xff]  }
 0x53f   : > { %v16564_v47 = vpack.c.bf16 %v7141_v36, %v7141_v36  ;;  %v16644_v13 = vpack.c.bf16 %v8570_v44, %v8570_v44  ;;  %16801 = vmatpush3.bf16.msra.mxu1 %v18195_v54  ;;  %v7523_v6 = vpop.permute.xlu0 %7522 }
 0x540   : > { %v7143_v14 = vpop.f32.mrf.mxu1  ;;  %v8572_v55 = vpop.f32.mrf.mxu0  ;;  %16802 = vmatprep.subr.bf16.mxu1 %v18200_v53 }
 0x541   : > { %7254 = vst.msk [vmem:[#allocation2 + $0x128] sm:$0xf] %vm2045_vm7, %v16564_v47  ;;  %8672 = vrot.lane.b32.xlu1 %v16644_v13, %s25203_s29  ;;  %v18232_v31 = vld [vmem:[#allocation2 + $0x8c] ss:$52 sps:$4 sm:$0xff]   ;;  %8096 = vrot.lane.b32.xlu0 %v16613_v60, %s25203_s29 }
 0x542   : > { %v7146_v9 = vpop.f32.mrf.mxu1  ;;  %v8575_v7 = vpop.f32.mrf.mxu0  ;;  %8879 = vmatmul.mubr.bf16.gmra.mxu1 %v18168_v37  ;;  %7559 = vst.msk [vmem:[#allocation2 + $0x128] sm:$0xf] %vm2351_vm8, %v7517_v42  ;;  %10891 = vmatprep.mubr.bf16.mxu0 %v18232_v31  ;;  %v18185_v14 = vld [vmem:[%s25155_s1 + $0xc60] ss:$8 sps:$4 sm:$0xff]  }
 0x543   : > { %v16565_v38 = vpack.c.bf16 %v7146_v9, %v7146_v9  ;;  %v16645_v50 = vpack.c.bf16 %v8575_v7, %v8575_v7  ;;  %8886 = vmatprep.mubr.bf16.mxu1 %v18173_v56  ;;  %16803 = vmatpush3.bf16.msra.mxu1 %v18202_v40  ;;  %v7525_v54 = vpop.permute.xlu1 %7524  ;;  %v16619_v56 = vpack.c.bf16 %v22984_v62, %v22984_v62  ;;  %v18256_v7 = vld [vmem:[#allocation2 + $0x1c0] ss:$52 sps:$4 sm:$0xff]  }
 0x544   : > { %v7148_v16 = vpop.f32.mrf.mxu1  ;;  %v8577_v11 = vpop.f32.mrf.mxu0  ;;  %16804 = vmatprep.subr.bf16.mxu1 %v18207_v23  ;;  %10892 = vmatmul.mubr.bf16.gmra.mxu0 %v18230_v57  ;;  %v16620_v62 = vpack.c.bf16 %v22989_v27, %v22989_v27 }
 0x545   : > { %7255 = vst.msk [vmem:[#allocation2 + $0x15c] sm:$0xf] %vm2045_vm7, %v16565_v38  ;;  %8098 = vrot.lane.b32.xlu1 %v16614_v4, %s25203_s29  ;;  %8674 = vrot.lane.b32.xlu0 %v16645_v50, %s25203_s29  ;;  %v18198_v4 = vld [vmem:[%s25155_s1 + $0xc74] ss:$8 sps:$4 sm:$0xff]  }
 0x546   : > { %v7149_v26 = vpop.f32.mrf.mxu1  ;;  %v8578_v41 = vpop.f32.mrf.mxu0  ;;  %7560 = vst.msk [vmem:[#allocation2 + $0x15c] sm:$0xf] %vm2351_vm8, %v7519_v3 }
 0x547   : > { %v16566_v10 = vpack.c.bf16 %v7149_v26, %v7149_v26  ;;  %v16646_v2 = vpack.c.bf16 %v8578_v41, %v8578_v41  ;;  %16805 = vmatpush3.bf16.msra.mxu1 %v18209_v58  ;;  %v7527_v47 = vpop.permute.xlu0 %7526 }
 0x548   : > { %v7151_v18 = vpop.f32.mrf.mxu1  ;;  %v8580_v8 = vpop.f32.mrf.mxu0  ;;  %16918 = vmatprep.subr.bf16.mxu1 %v18239_v21 }
 0x549   : > { %7256 = vst.msk [vmem:[#allocation2 + $0x190] sm:$0xf] %vm2045_vm7, %v16566_v10  ;;  %8676 = vrot.lane.b32.xlu1 %v16646_v2, %s25203_s29  ;;  %v18238_v49 = vld [vmem:[#allocation2 + $0xf4] ss:$52 sps:$4 sm:$0xff]   ;;  %8100 = vrot.lane.b32.xlu0 %v16615_v59, %s25203_s29  ;;  %v16621_v59 = vpack.c.bf16 %v22999_v61, %v22999_v61  ;;  %v18205_v8 = vld [vmem:[#allocation2 + $0xc] ss:$52 sps:$4 sm:$0xff]  }
 0x54a   : > { %v7154_v45 = vpop.f32.mrf.mxu1  ;;  %v8583_v22 = vpop.f32.mrf.mxu0  ;;  %8887 = vmatmul.mubr.bf16.gmra.mxu1 %v18171_v0  ;;  %7561 = vst.msk [vmem:[#allocation2 + $0x190] sm:$0xf] %vm2351_vm8, %v7521_v48  ;;  %10899 = vmatprep.mubr.bf16.mxu0 %v18238_v49  ;;  %v18196_v0 = vld [vmem:[%s25155_s1 + $0xc70] ss:$8 sps:$4 sm:$0xff]   ;;  %v18266_v61 = vld [vmem:[#allocation2 + $0x228] ss:$52 sps:$4 sm:$0xff]  }
 0x54b   : > { %v16567_v63 = vpack.c.bf16 %v7154_v45, %v7154_v45  ;;  %v16647_v19 = vpack.c.bf16 %v8583_v22, %v8583_v22  ;;  %8894 = vmatprep.mubr.bf16.mxu1 %v18180_v30  ;;  %v7529_v57 = vpop.permute.xlu1 %7528 }
 0x54c   : > { %v7156_v35 = vpop.f32.mrf.mxu1  ;;  %v8585_v25 = vpop.f32.mrf.mxu0  ;;  %10900 = vmatmul.mubr.bf16.gmra.mxu0 %v18236_v52 }
 0x54d   : > { %7257 = vst.msk [vmem:[#allocation2 + $0x1c4] sm:$0xf] %vm2045_vm7, %v16567_v63  ;;  %8102 = vrot.lane.b32.xlu1 %v16616_v28, %s25203_s29  ;;  %8678 = vrot.lane.b32.xlu0 %v16647_v19, %s25203_s29  ;;  %v16622_v28 = vpack.c.bf16 %v23003_v17, %v23003_v17 }
 0x54e   : > { %v7157_v32 = vpop.f32.mrf.mxu1  ;;  %v8586_v51 = vpop.f32.mrf.mxu0  ;;  %7562 = vst.msk [vmem:[#allocation2 + $0x1c4] sm:$0xf] %vm2351_vm8, %v7523_v6 }
 0x54f   : > { %v16568_v15 = vpack.c.bf16 %v7157_v32, %v7157_v32  ;;  %v16648_v24 = vpack.c.bf16 %v8586_v51, %v8586_v51  ;;  %v7531_v11 = vpop.permute.xlu0 %7530  ;;  %v18243_v32 = vld [vmem:[%s25158_s4 + $0x1b8] sm:$0xff]  }
 0x550   : > { %v7159_v46 = vpop.f32.mrf.mxu1  ;;  %v8588_v1 = vpop.f32.mrf.mxu0  ;;  %v18203_v51 = vld [vmem:[#allocation2 + $0x8] ss:$52 sps:$4 sm:$0xff]  }
 0x551   : > { %7258 = vst.msk [vmem:[#allocation2 + $0x1f8] sm:$0xf] %vm2045_vm7, %v16568_v15  ;;  %8680 = vrot.lane.b32.xlu1 %v16648_v24, %s25203_s29  ;;  %v18248_v53 = vld [vmem:[#allocation2 + $0x15c] ss:$52 sps:$4 sm:$0xff]   ;;  %8104 = vrot.lane.b32.xlu0 %v16617_v39, %s25203_s29  ;;  %v18214_v24 = vld [vmem:[#allocation2 + $0x74] ss:$52 sps:$4 sm:$0xff]  }
 0x552   : > { %v7162_v60 = vpop.f32.mrf.mxu1  ;;  %v8591_v36 = vpop.f32.mrf.mxu0  ;;  %8895 = vmatmul.mubr.bf16.gmra.mxu1 %v18178_v5  ;;  %7563 = vst.msk [vmem:[#allocation2 + $0x1f8] sm:$0xf] %vm2351_vm8, %v7525_v54  ;;  %10907 = vmatprep.mubr.bf16.mxu0 %v18248_v53  ;;  %v18276_v54 = vld [vmem:[#allocation2 + $0x290] ss:$52 sps:$4 sm:$0xff]  }
 0x553   : > { %v16569_v44 = vpack.c.bf16 %v7162_v60, %v7162_v60  ;;  %v16649_v37 = vpack.c.bf16 %v8591_v36, %v8591_v36  ;;  %8902 = vmatprep.mubr.bf16.mxu1 %v18187_v34  ;;  %v7533_v30 = vpop.permute.xlu1 %7532  ;;  %v18244_v34 = vld [vmem:[%s25158_s4 + $0x1f0] sm:$0xff]  }
 0x554   : > { %v7164_v13 = vpop.f32.mrf.mxu1  ;;  %v8593_v29 = vpop.f32.mrf.mxu0  ;;  %10908 = vmatmul.mubr.bf16.gmra.mxu0 %v18246_v12  ;;  %v18245_v53 = vld [vmem:[%s25158_s4 + $0x1b0] sm:$0xff]  }
 0x555   : > { %7259 = vst.msk [vmem:[#allocation2 + $0x22c] sm:$0xf] %vm2045_vm7, %v16569_v44  ;;  %8106 = vrot.lane.b32.xlu1 %v16618_v43, %s25203_s29  ;;  %8682 = vrot.lane.b32.xlu0 %v16649_v37, %s25203_s29  ;;  %v18249_v44 = vld [vmem:[%s25158_s4 + $0x1e8] sm:$0xff]  }
 0x556   : > { %v7165_v40 = vpop.f32.mrf.mxu1  ;;  %v8594_v42 = vpop.f32.mrf.mxu0  ;;  %7564 = vst.msk [vmem:[#allocation2 + $0x22c] sm:$0xf] %vm2351_vm8, %v7527_v47 }
 0x557   : > { %v16570_v55 = vpack.c.bf16 %v7165_v40, %v7165_v40  ;;  %v16650_v23 = vpack.c.bf16 %v8594_v42, %v8594_v42  ;;  %v18253_v40 = vld [vmem:[%s25158_s4 + $0x1a8] sm:$0xff]   ;;  %v18212_v42 = vld [vmem:[#allocation2 + $0x70] ss:$52 sps:$4 sm:$0xff]  }
 0x558   : > { %v7167_v31 = vpop.f32.mrf.mxu1  ;;  %v8596_v9 = vpop.f32.mrf.mxu0 }
 0x559   : > { %7260 = vst.msk [vmem:[#allocation2 + $0x260] sm:$0xf] %vm2045_vm7, %v16570_v55  ;;  %8684 = vrot.lane.b32.xlu1 %v16650_v23, %s25203_s29  ;;  %v18258_v38 = vld [vmem:[#allocation2 + $0x1c4] ss:$52 sps:$4 sm:$0xff]   ;;  %8108 = vrot.lane.b32.xlu0 %v16619_v56, %s25203_s29 }
 0x55a   : > { %v7170_v50 = vpop.f32.mrf.mxu1  ;;  %v8599_v58 = vpop.f32.mrf.mxu0  ;;  %8903 = vmatmul.mubr.bf16.gmra.mxu1 %v18185_v14  ;;  %7565 = vst.msk [vmem:[#allocation2 + $0x260] sm:$0xf] %vm2351_vm8, %v7529_v57  ;;  %10915 = vmatprep.mubr.bf16.mxu0 %v18258_v38  ;;  %v18254_v23 = vld [vmem:[%s25158_s4 + $0x1e0] sm:$0xff]  }
 0x55b   : > { %v16571_v3 = vpack.c.bf16 %v7170_v50, %v7170_v50  ;;  %v16651_v16 = vpack.c.bf16 %v8599_v58, %v8599_v58  ;;  %8910 = vmatprep.mubr.bf16.mxu1 %v18198_v4  ;;  %v18221_v4 = vld [vmem:[#allocation2 + $0xdc] ss:$52 sps:$4 sm:$0xff]  }
 0x55c   : > { %v7172_v21 = vpop.f32.mrf.mxu1  ;;  %v8601_v27 = vpop.f32.mrf.mxu0  ;;  %10916 = vmatmul.mubr.bf16.gmra.mxu0 %v18256_v7  ;;  %v18255_v7 = vld [vmem:[%s25158_s4 + $0x1a0] sm:$0xff]   ;;  %v18259_v58 = vld [vmem:[%s25158_s4 + $0x1d8] sm:$0xff]  }
 0x55d   : > { %7261 = vst.msk [vmem:[#allocation2 + $0x294] sm:$0xf] %vm2045_vm7, %v16571_v3  ;;  %8110 = vrot.lane.b32.xlu1 %v16620_v62, %s25203_s29  ;;  %8686 = vrot.lane.b32.xlu0 %v16651_v16, %s25203_s29 }
 0x55e   : > { %v7173_v26 = vpop.f32.mrf.mxu1  ;;  %v8602_v41 = vpop.f32.mrf.mxu0  ;;  %7566 = vst.msk [vmem:[#allocation2 + $0x294] sm:$0xf] %vm2351_vm8, %v7531_v11  ;;  %v18325_v11 = vld [vmem:[%s25158_s4 + $0x318] sm:$0xff]  }
 0x55f   : > { %v16572_v10 = vpack.c.bf16 %v7173_v26, %v7173_v26  ;;  %v16652_v2 = vpack.c.bf16 %v8602_v41, %v8602_v41  ;;  %v8085_v47 = vpop.permute.xlu0 %8084  ;;  %v18263_v26 = vld [vmem:[%s25158_s4 + $0x198] sm:$0xff]   ;;  %17369 = vmatprep.subr.bf16.mxu0 %v18325_v11 }
 0x560   : > { %v7175_v48 = vpop.f32.mrf.mxu1  ;;  %v8604_v18 = vpop.f32.mrf.mxu0  ;;  %v18219_v41 = vld [vmem:[#allocation2 + $0xd8] ss:$52 sps:$4 sm:$0xff]   ;;  %17370 = vmatpush3.bf16.msra.mxu0 %v18325_v11 }
 0x561   : > { %7262 = vst.msk [vmem:[#allocation2 + $0x2c8] sm:$0xf] %vm2045_vm7, %v16572_v10  ;;  %8688 = vrot.lane.b32.xlu1 %v16652_v2, %s25203_s29  ;;  %v18268_v52 = vld [vmem:[#allocation2 + $0x22c] ss:$52 sps:$4 sm:$0xff]   ;;  %8112 = vrot.lane.b32.xlu0 %v16621_v59, %s25203_s29  ;;  %v18264_v2 = vld [vmem:[%s25158_s4 + $0x1d0] sm:$0xff]  }
 0x562   : > { %v7178_v49 = vpop.f32.mrf.mxu1  ;;  %v8607_v45 = vpop.f32.mrf.mxu0  ;;  %8911 = vmatmul.mubr.bf16.gmra.mxu1 %v18196_v0  ;;  %7567 = vst.msk [vmem:[#allocation2 + $0x2c8] sm:$0xf] %vm2351_vm8, %v7533_v30  ;;  %10923 = vmatprep.mubr.bf16.mxu0 %v18268_v52  ;;  %v18229_v30 = vld [vmem:[#allocation2 + $0x144] ss:$52 sps:$4 sm:$0xff]   ;;  %v18326_v18 = vld [vmem:[%s25158_s4 + $0x310] sm:$0xff]  }
 0x563   : > { %v16573_v22 = vpack.c.bf16 %v7178_v49, %v7178_v49  ;;  %v16653_v63 = vpack.c.bf16 %v8607_v45, %v8607_v45  ;;  %10592 = vmatprep.mubr.bf16.mxu1 %v18205_v8  ;;  %v8087_v57 = vpop.permute.xlu1 %8086  ;;  %v18265_v52 = vld [vmem:[%s25158_s4 + $0x190] sm:$0xff]   ;;  %17371 = vmatprep.subr.bf16.mxu0 %v18326_v18 }
 0x564   : > { %v7180_v19 = vpop.f32.mrf.mxu1  ;;  %v8609_v6 = vpop.f32.mrf.mxu0  ;;  %10924 = vmatmul.mubr.bf16.gmra.mxu0 %v18266_v61 }
 0x565   : > { %7263 = vst.msk [vmem:[#allocation2 + $0x2fc] sm:$0xf] %vm2045_vm7, %v16573_v22  ;;  %8114 = vrot.lane.b32.xlu1 %v16622_v28, %s25203_s29  ;;  %8690 = vrot.lane.b32.xlu0 %v16653_v63, %s25203_s29  ;;  %v18269_v22 = vld [vmem:[%s25158_s4 + $0x1c8] sm:$0xff]  }
 0x566   : > { %v7181_v17 = vpop.f32.mrf.mxu1  ;;  %v8610_v35 = vpop.f32.mrf.mxu0  ;;  %17372 = vmatpush3.bf16.msra.mxu0 %v18326_v18  ;;  %v18330_v6 = vld [vmem:[%s25158_s4 + $0x308] sm:$0xff]  }
 0x567   : > { %v16574_v25 = vpack.c.bf16 %v7181_v17, %v7181_v17  ;;  %v16654_v39 = vpack.c.bf16 %v8610_v35, %v8610_v35  ;;  %v8089_v16 = vpop.permute.xlu0 %8088  ;;  %17373 = vmatprep.subr.bf16.mxu0 %v18330_v6 }
 0x568   : > { %v7183_v5 = vpop.f32.mrf.mxu1  ;;  %v8612_v15 = vpop.f32.mrf.mxu0 }
 0x569   : > { %7264 = vst.msk [vmem:[#allocation2 + $0x330] sm:$0xf] %vm2045_vm7, %v16574_v25  ;;  %8692 = vrot.lane.b32.xlu1 %v16654_v39, %s25203_s29  ;;  %v18278_v46 = vld [vmem:[#allocation2 + $0x294] ss:$52 sps:$4 sm:$0xff]   ;;  %v18274_v15 = vld [vmem:[%s25158_s4 + $0x1c0] sm:$0xff]   ;;  %s18848_s29 = scalar_lea.vmem %s18847_s20, 32 }
 0x56a   : > { %v7700_v1 = vpop.f32.mrf.mxu1  ;;  %v16742_v43 = vpop.f32.mrf.mxu0  ;;  %10593 = vmatmul.mubr.bf16.vlgmr.msra.gmra.mxu1 %v18203_v51  ;;  %10931 = vmatprep.mubr.bf16.mxu0 %v18278_v46  ;;  %v18270_v39 = vld [vmem:[%s25158_s4 + $0x188] sm:$0xff]   ;;  %p18850_p1 = scmp.lt.s32.totalorder %s18848_s29, %s18842_s25 }
 0x56b   : > { %v16591_v12 = vpack.c.bf16 %v7700_v1, %v7700_v1  ;;  %10600 = vmatprep.mubr.bf16.mxu1 %v18214_v24  ;;  %16919 = vmatpush3.bf16.msra.mxu1 %v18243_v32  ;;  %v8091_v48 = vpop.permute.xlu1 %8090  ;;  %v18227_v32 = vld [vmem:[#allocation2 + $0x140] ss:$52 sps:$4 sm:$0xff]  }
 0x56c   : > { %v7702_v60 = vpop.f32.mrf.mxu1  ;;  %v16743_v36 = vpop.f32.mrf.mxu0  ;;  %16920 = vmatprep.subr.bf16.mxu1 %v18244_v34  ;;  %10932 = vmatmul.mubr.bf16.gmra.mxu0 %v18276_v54  ;;  %v18235_v24 = vld [vmem:[#allocation2 + $0x1ac] ss:$52 sps:$4 sm:$0xff]   ;;  %p18851_p2 = por %p18850_p1, %p18849_p0 }
 0x56d   : > { %7827 = vst.msk [vmem:[#allocation2 + $0x28] sm:$0xf] %vm2045_vm7, %v16591_v12  ;;  %v23200_v37 = vadd.f32 %v16743_v36, %v16742_v43  ;;  %17374 = vmatpush3.bf16.msra.mxu0 %v18330_v6  ;;  %v18331_v54 = vld [vmem:[%s25158_s4 + $0x300] sm:$0xff]   ;;  %v18294_v36 = vld [vmem:[%s25158_s4 + $0x2f8] sm:$0xff]  }
 0x56e   : > { %v7703_v13 = vpop.f32.mrf.mxu1  ;;  %v23202_v29 = vpop.f32.mrf.mxu0  ;;  %8132 = vst.msk [vmem:[#allocation2 + $0x28] sm:$0xf] %vm2351_vm8, %v8085_v47  ;;  %v18275_v12 = vld [vmem:[%s25158_s4 + $0x180] sm:$0xff]   ;;  %17375 = vmatprep.subr.bf16.mxu0 %v18331_v54  ;;  %p18852_p3 = pnand %p18851_p2, %p18845_p13 }
 0x56f   : > { %v16592_v56 = vpack.c.bf16 %v7703_v13, %v7703_v13  ;;  %16921 = vmatpush3.bf16.msra.mxu1 %v18245_v53  ;;  %v8093_v19 = vpop.permute.xlu0 %8092 }
 0x570   : > { %v7705_v14 = vpop.f32.mrf.mxu1  ;;  %v23208_v55 = vpop.f32.mrf.mxu0  ;;  %16922 = vmatprep.subr.bf16.mxu1 %v18249_v44 }
 0x571   : > { %7828 = vst.msk [vmem:[#allocation2 + $0x5c] sm:$0xf] %vm2045_vm7, %v16592_v56  ;;  %17376 = vmatpush3.bf16.msra.mxu0 %v18331_v54 }
 0x572   : > { %v7708_v31 = vpop.f32.mrf.mxu1  ;;  %v16748_v9 = vpop.f32.mrf.mxu0  ;;  %10601 = vmatmul.mubr.bf16.gmra.mxu1 %v18212_v42  ;;  %8133 = vst.msk [vmem:[#allocation2 + $0x5c] sm:$0xf] %vm2351_vm8, %v8087_v57 }
 0x573   : > { %v16593_v62 = vpack.c.bf16 %v7708_v31, %v7708_v31  ;;  %10608 = vmatprep.mubr.bf16.mxu1 %v18221_v4  ;;  %16923 = vmatpush3.bf16.msra.mxu1 %v18253_v40  ;;  %v8095_v34 = vpop.permute.xlu1 %8094  ;;  %v18233_v40 = vld [vmem:[#allocation2 + $0x1a8] ss:$52 sps:$4 sm:$0xff]  }
 0x574   : > { %v7710_v38 = vpop.f32.mrf.mxu1  ;;  %v16749_v50 = vpop.f32.mrf.mxu0  ;;  %16924 = vmatprep.subr.bf16.mxu1 %v18254_v23  ;;  %v18242_v23 = vld [vmem:[#allocation2 + $0x214] ss:$52 sps:$4 sm:$0xff]  }
 0x575   : > { %7829 = vst.msk [vmem:[#allocation2 + $0x90] sm:$0xf] %vm2045_vm7, %v16593_v62  ;;  %v23222_v3 = vadd.f32 %v16749_v50, %v16748_v9 }
 0x576   : > { %v7711_v21 = vpop.f32.mrf.mxu1  ;;  %v23227_v27 = vpop.f32.mrf.mxu0  ;;  %8134 = vst.msk [vmem:[#allocation2 + $0x90] sm:$0xf] %vm2351_vm8, %v8089_v16  ;;  %v18240_v16 = vld [vmem:[#allocation2 + $0x210] ss:$52 sps:$4 sm:$0xff]  }
 0x577   : > { %v16594_v59 = vpack.c.bf16 %v7711_v21, %v7711_v21  ;;  %16925 = vmatpush3.bf16.msra.mxu1 %v18255_v7 }
 0x578   : > { %v7713_v0 = vpop.f32.mrf.mxu1  ;;  %v23233_v10 = vpop.f32.mrf.mxu0  ;;  %16926 = vmatprep.subr.bf16.mxu1 %v18259_v58 }
 0x579   : > { %7830 = vst.msk [vmem:[#allocation2 + $0xc4] sm:$0xf] %vm2045_vm7, %v16594_v59  ;;  %v18252_v59 = vld [vmem:[#allocation2 + $0x27c] ss:$52 sps:$4 sm:$0xff]  }
 0x57a   : > { %v7716_v8 = vpop.f32.mrf.mxu1  ;;  %v16754_v28 = vpop.f32.mrf.mxu0  ;;  %10609 = vmatmul.mubr.bf16.gmra.mxu1 %v18219_v41  ;;  %8135 = vst.msk [vmem:[#allocation2 + $0xc4] sm:$0xf] %vm2351_vm8, %v8091_v48 }
 0x57b   : > { %v16595_v61 = vpack.c.bf16 %v7716_v8, %v7716_v8  ;;  %10616 = vmatprep.mubr.bf16.mxu1 %v18229_v30  ;;  %16927 = vmatpush3.bf16.msra.mxu1 %v18263_v26 }
 0x57c   : > { %v7718_v49 = vpop.f32.mrf.mxu1  ;;  %v16755_v45 = vpop.f32.mrf.mxu0  ;;  %16928 = vmatprep.subr.bf16.mxu1 %v18264_v2 }
 0x57d   : > { %7831 = vst.msk [vmem:[#allocation2 + $0xf8] sm:$0xf] %vm2045_vm7, %v16595_v61  ;;  %v23250_v63 = vadd.f32 %v16755_v45, %v16754_v28  ;;  %v18250_v61 = vld [vmem:[#allocation2 + $0x278] ss:$52 sps:$4 sm:$0xff]  }
 0x57e   : > { %v7719_v17 = vpop.f32.mrf.mxu1  ;;  %v23255_v35 = vpop.f32.mrf.mxu0  ;;  %8136 = vst.msk [vmem:[#allocation2 + $0xf8] sm:$0xf] %vm2351_vm8, %v8093_v19  ;;  %v18262_v45 = vld [vmem:[#allocation2 + $0x2e4] ss:$52 sps:$4 sm:$0xff]  }
 0x57f   : > { %v16596_v25 = vpack.c.bf16 %v7719_v17, %v7719_v17  ;;  %16929 = vmatpush3.bf16.msra.mxu1 %v18265_v52 }
 0x580   : > { %v7721_v51 = vpop.f32.mrf.mxu1  ;;  %v23261_v5 = vpop.f32.mrf.mxu0  ;;  %16930 = vmatprep.subr.bf16.mxu1 %v18269_v22 }
 0x581   : > { %7832 = vst.msk [vmem:[#allocation2 + $0x12c] sm:$0xf] %vm2045_vm7, %v16596_v25 }
 0x582   : > { %v7724_v46 = vpop.f32.mrf.mxu1  ;;  %v16760_v1 = vpop.f32.mrf.mxu0  ;;  %10617 = vmatmul.mubr.bf16.gmra.mxu1 %v18227_v32  ;;  %8137 = vst.msk [vmem:[#allocation2 + $0x12c] sm:$0xf] %vm2351_vm8, %v8095_v34  ;;  %v18260_v34 = vld [vmem:[#allocation2 + $0x2e0] ss:$52 sps:$4 sm:$0xff]  }
 0x583   : > { %v16597_v43 = vpack.c.bf16 %v7724_v46, %v7724_v46  ;;  %10624 = vmatprep.mubr.bf16.mxu1 %v18235_v24  ;;  %16931 = vmatpush3.bf16.msra.mxu1 %v18270_v39 }
 0x584   : > { %v7726_v53 = vpop.f32.mrf.mxu1  ;;  %v16761_v60 = vpop.f32.mrf.mxu0  ;;  %16932 = vmatprep.subr.bf16.mxu1 %v18274_v15 }
 0x585   : > { %7833 = vst.msk [vmem:[#allocation2 + $0x160] sm:$0xf] %vm2045_vm7, %v16597_v43  ;;  %v23278_v44 = vadd.f32 %v16761_v60, %v16760_v1  ;;  %v18273_v1 = vld [vmem:[#allocation2 + $0x1c] ss:$52 sps:$4 sm:$0xff]  }
 0x586   : > { %v7727_v47 = vpop.f32.mrf.mxu1  ;;  %v23280_v13 = vpop.f32.mrf.mxu0 }
 0x587   : > { %v16598_v56 = vpack.c.bf16 %v7727_v47, %v7727_v47  ;;  %16933 = vmatpush3.bf16.msra.mxu1 %v18275_v12 }
 0x588   : > { %v7729_v42 = vpop.f32.mrf.mxu1  ;;  %v23282_v14 = vpop.f32.mrf.mxu0  ;;  %17046 = vmatprep.subr.bf16.mxu1 %v18294_v36 }
 0x589   : > { %7834 = vst.msk [vmem:[#allocation2 + $0x194] sm:$0xf] %vm2045_vm7, %v16598_v56 }
 0x58a   : > { %v7732_v4 = vpop.f32.mrf.mxu1  ;;  %v16766_v57 = vpop.f32.mrf.mxu0  ;;  %10625 = vmatmul.mubr.bf16.gmra.mxu1 %v18233_v40 }
 0x58b   : > { %v16599_v31 = vpack.c.bf16 %v7732_v4, %v7732_v4  ;;  %10632 = vmatprep.mubr.bf16.mxu1 %v18242_v23 }
 0x58c   : > { %v7734_v9 = vpop.f32.mrf.mxu1  ;;  %v16767_v62 = vpop.f32.mrf.mxu0 }
 0x58d   : > { %7835 = vst.msk [vmem:[#allocation2 + $0x1c8] sm:$0xf] %vm2045_vm7, %v16599_v31  ;;  %v23286_v7 = vadd.f32 %v16767_v62, %v16766_v57  ;;  %v18298_v9 = vld [vmem:[%s25158_s4 + $0x2b8] sm:$0xff]  }
 0x58e   : > { %v7735_v38 = vpop.f32.mrf.mxu1  ;;  %v23288_v50 = vpop.f32.mrf.mxu0  ;;  %v18271_v62 = vld [vmem:[#allocation2 + $0x18] ss:$52 sps:$4 sm:$0xff]  }
 0x58f   : > { %v16600_v58 = vpack.c.bf16 %v7735_v38, %v7735_v38 }
 0x590   : > { %v7737_v11 = vpop.f32.mrf.mxu1  ;;  %v23290_v21 = vpop.f32.mrf.mxu0 }
 0x591   : > { %7836 = vst.msk [vmem:[#allocation2 + $0x1fc] sm:$0xf] %vm2045_vm7, %v16600_v58  ;;  %v18281_v11 = vld [vmem:[#allocation2 + $0x84] ss:$52 sps:$4 sm:$0xff]  }
 0x592   : > { %v7740_v26 = vpop.f32.mrf.mxu1  ;;  %v16772_v41 = vpop.f32.mrf.mxu0  ;;  %10633 = vmatmul.mubr.bf16.gmra.mxu1 %v18240_v16  ;;  %v18299_v16 = vld [vmem:[%s25158_s4 + $0x2f0] sm:$0xff]  }
 0x593   : > { %v16601_v0 = vpack.c.bf16 %v7740_v26, %v7740_v26  ;;  %10640 = vmatprep.mubr.bf16.mxu1 %v18252_v59 }
 0x594   : > { %v7742_v2 = vpop.f32.mrf.mxu1  ;;  %v16773_v30 = vpop.f32.mrf.mxu0 }
 0x595   : > { %7837 = vst.msk [vmem:[#allocation2 + $0x230] sm:$0xf] %vm2045_vm7, %v16601_v0  ;;  %v23294_v48 = vadd.f32 %v16773_v30, %v16772_v41  ;;  %v18300_v30 = vld [vmem:[%s25158_s4 + $0x2b0] sm:$0xff]  }
 0x596   : > { %v7743_v18 = vpop.f32.mrf.mxu1  ;;  %v23296_v8 = vpop.f32.mrf.mxu0 }
 0x597   : > { %v16602_v28 = vpack.c.bf16 %v7743_v18, %v7743_v18 }
 0x598   : > { %v7745_v52 = vpop.f32.mrf.mxu1  ;;  %v23298_v49 = vpop.f32.mrf.mxu0 }
 0x599   : > { %7838 = vst.msk [vmem:[#allocation2 + $0x264] sm:$0xf] %vm2045_vm7, %v16602_v28 }
 0x59a   : > { %v7748_v22 = vpop.f32.mrf.mxu1  ;;  %v16778_v19 = vpop.f32.mrf.mxu0  ;;  %10641 = vmatmul.mubr.bf16.gmra.mxu1 %v18250_v61  ;;  %v18301_v61 = vld [vmem:[%s25158_s4 + $0x2e8] sm:$0xff]  }
 0x59b   : > { %v16603_v6 = vpack.c.bf16 %v7748_v22, %v7748_v22  ;;  %10648 = vmatprep.mubr.bf16.mxu1 %v18262_v45 }
 0x59c   : > { %v7750_v17 = vpop.f32.mrf.mxu1  ;;  %v16779_v25 = vpop.f32.mrf.mxu0 }
 0x59d   : > { %7839 = vst.msk [vmem:[#allocation2 + $0x298] sm:$0xf] %vm2045_vm7, %v16603_v6  ;;  %v23302_v39 = vadd.f32 %v16779_v25, %v16778_v19  ;;  %v18305_v17 = vld [vmem:[%s25158_s4 + $0x2a8] sm:$0xff]   ;;  %v18279_v25 = vld [vmem:[#allocation2 + $0x80] ss:$52 sps:$4 sm:$0xff]  }
 0x59e   : > { %v7751_v32 = vpop.f32.mrf.mxu1  ;;  %v23304_v51 = vpop.f32.mrf.mxu0 }
 0x59f   : > { %v16604_v15 = vpack.c.bf16 %v7751_v32, %v7751_v32  ;;  %v8663_v24 = vpop.permute.xlu0 %8662 }
 0x5a0   : > { %v7753_v54 = vpop.f32.mrf.mxu1  ;;  %v23306_v46 = vpop.f32.mrf.mxu0 }
 0x5a1   : > { %7840 = vst.msk [vmem:[#allocation2 + $0x2cc] sm:$0xf] %vm2045_vm7, %v16604_v15  ;;  %v18284_v54 = vld [vmem:[#allocation2 + $0xec] ss:$52 sps:$4 sm:$0xff]  }
 0x5a2   : > { %v7756_v43 = vpop.f32.mrf.mxu1  ;;  %v16784_v12 = vpop.f32.mrf.mxu0  ;;  %10649 = vmatmul.mubr.bf16.gmra.mxu1 %v18260_v34  ;;  %v18306_v34 = vld [vmem:[%s25158_s4 + $0x2e0] sm:$0xff]  }
 0x5a3   : > { %v16605_v53 = vpack.c.bf16 %v7756_v43, %v7756_v43  ;;  %v8665_v60 = vpop.permute.xlu1 %8664  ;;  %10786 = vmatprep.mubr.bf16.mxu1 %v18273_v1  ;;  %v6957_v36 = vpop.permute.xlu0 %6956 }
 0x5a4   : > { %6990 = vst.msk [vmem:[#allocation2 + $0x2f8] sm:$0xf] %vm2351_vm8, %v6957_v36  ;;  %v7758_v47 = vpop.f32.mrf.mxu1  ;;  %v16785_v56 = vpop.f32.mrf.mxu0  ;;  %v18307_v36 = vld [vmem:[%s25158_s4 + $0x2a0] sm:$0xff]  }
 0x5a5   : > { %7841 = vst.msk [vmem:[#allocation2 + $0x300] sm:$0xf] %vm2045_vm7, %v16605_v53  ;;  %v23311_v40 = vadd.f32 %v16785_v56, %v16784_v12 }
 0x5a6   : > { %v7759_v42 = vpop.f32.mrf.mxu1  ;;  %v23313_v23 = vpop.f32.mrf.mxu0 }
 0x5a7   : > { %v16606_v4 = vpack.c.bf16 %v7759_v42, %v7759_v42  ;;  %v6959_v57 = vpop.permute.xlu1 %6958  ;;  %v8667_v31 = vpop.permute.xlu0 %8666 }
 0x5a8   : > { %6991 = vst.msk [vmem:[#allocation2 + $0x32c] sm:$0xf] %vm2351_vm8, %v6959_v57  ;;  %v7761_v38 = vpop.f32.mrf.mxu1  ;;  %v23319_v58 = vpop.f32.mrf.mxu0 }
 0x5a9   : > { %7842 = vst.msk [vmem:[#allocation2 + $0x334] sm:$0xf] %vm2045_vm7, %v16606_v4  ;;  %v18308_v4 = vld [vmem:[%s25158_s4 + $0x2d8] sm:$0xff]  }
 0x5aa   : > { %v8278_v59 = vpop.f32.mrf.mxu1  ;;  %v16870_v26 = vpop.f32.mrf.mxu0  ;;  %10787 = vmatmul.mubr.bf16.vlgmr.msra.gmra.mxu1 %v18271_v62  ;;  %v18312_v38 = vld [vmem:[%s25158_s4 + $0x298] sm:$0xff]  }
 0x5ab   : > { %v16623_v41 = vpack.c.bf16 %v8278_v59, %v8278_v59  ;;  %v23325_v0 = vpop.permute.xlu1 %8668  ;;  %10794 = vmatprep.mubr.bf16.mxu1 %v18281_v11  ;;  %v7535_v2 = vpop.permute.xlu0 %7534  ;;  %17047 = vmatpush3.bf16.msra.mxu1 %v18298_v9 }
 0x5ac   : > { %7568 = vst.msk [vmem:[#allocation2 + $0x2fc] sm:$0xf] %vm2351_vm8, %v7535_v2  ;;  %v8280_v18 = vpop.f32.mrf.mxu1  ;;  %v16871_v28 = vpop.f32.mrf.mxu0  ;;  %17048 = vmatprep.subr.bf16.mxu1 %v18299_v16 }
 0x5ad   : > { %8405 = vst.msk [vmem:[#allocation2 + $0x2c] sm:$0xf] %vm2045_vm7, %v16623_v41  ;;  %v23335_v52 = vadd.f32 %v16871_v28, %v16870_v26  ;;  %v18282_v41 = vld [vmem:[#allocation2 + $0xe8] ss:$52 sps:$4 sm:$0xff]  }
 0x5ae   : > { %8710 = vst.msk [vmem:[#allocation2 + $0x2c] sm:$0xf] %vm2351_vm8, %v8663_v24  ;;  %v8281_v45 = vpop.f32.mrf.mxu1  ;;  %v16873_v22 = vpop.f32.mrf.mxu0  ;;  %v18290_v28 = vld [vmem:[#allocation2 + $0x154] ss:$52 sps:$4 sm:$0xff]  }
 0x5af   : > { %v16624_v19 = vpack.c.bf16 %v8281_v45, %v8281_v45  ;;  %v7537_v6 = vpop.permute.xlu1 %7536  ;;  %17049 = vmatpush3.bf16.msra.mxu1 %v18300_v30  ;;  %v8671_v1 = vpop.permute.xlu0 %8670  ;;  %v18285_v11 = vld [vmem:[#allocation2 + $0x2f8] ss:$52 sps:$4 sm:$0xff]  }
 0x5b0   : > { %7569 = vst.msk [vmem:[#allocation2 + $0x330] sm:$0xf] %vm2351_vm8, %v7537_v6  ;;  %v8283_v32 = vpop.f32.mrf.mxu1  ;;  %v16874_v15 = vpop.f32.mrf.mxu0  ;;  %17050 = vmatprep.subr.bf16.mxu1 %v18301_v61  ;;  %v18314_v6 = vld [vmem:[%s25158_s4 + $0x290] sm:$0xff]  }
 0x5b1   : > { %8406 = vst.msk [vmem:[#allocation2 + $0x60] sm:$0xf] %vm2045_vm7, %v16624_v19  ;;  %v23346_v24 = vadd.f32 %v16874_v15, %v16873_v22  ;;  %v18315_v15 = vld [vmem:[%s25158_s4 + $0x2c8] sm:$0xff]  }
 0x5b2   : > { %8711 = vst.msk [vmem:[#allocation2 + $0x60] sm:$0xf] %vm2351_vm8, %v8665_v60  ;;  %v8286_v43 = vpop.f32.mrf.mxu1  ;;  %v16876_v12 = vpop.f32.mrf.mxu0  ;;  %10795 = vmatmul.mubr.bf16.gmra.mxu1 %v18279_v25 }
 0x5b3   : > { %v16625_v53 = vpack.c.bf16 %v8286_v43, %v8286_v43  ;;  %10802 = vmatprep.mubr.bf16.mxu1 %v18284_v54  ;;  %17051 = vmatpush3.bf16.msra.mxu1 %v18305_v17  ;;  %v23352_v47 = vpop.permute.xlu1 %8672  ;;  %v8097_v57 = vpop.permute.xlu0 %8096 }
 0x5b4   : > { %v8288_v56 = vpop.f32.mrf.mxu1  ;;  %v16877_v42 = vpop.f32.mrf.mxu0  ;;  %17052 = vmatprep.subr.bf16.mxu1 %v18306_v34  ;;  %8138 = vst.msk [vmem:[#allocation2 + $0x160] sm:$0xf] %vm2351_vm8, %v8097_v57  ;;  %v18317_v57 = vld [vmem:[%s25158_s4 + $0x2c0] sm:$0xff]  }
 0x5b5   : > { %8407 = vst.msk [vmem:[#allocation2 + $0x94] sm:$0xf] %vm2045_vm7, %v16625_v53  ;;  %v23358_v60 = vadd.f32 %v16877_v42, %v16876_v12  ;;  %v18316_v53 = vld [vmem:[%s25158_s4 + $0x288] sm:$0xff]   ;;  %v18288_v56 = vld [vmem:[#allocation2 + $0x150] ss:$52 sps:$4 sm:$0xff]  }
 0x5b6   : > { %8712 = vst.msk [vmem:[#allocation2 + $0x94] sm:$0xf] %vm2351_vm8, %v8667_v31  ;;  %v8289_v9 = vpop.f32.mrf.mxu1  ;;  %v16879_v62 = vpop.f32.mrf.mxu0  ;;  %v18313_v31 = vld [vmem:[%s25158_s4 + $0x2d0] sm:$0xff]  }
 0x5b7   : > { %v16626_v16 = vpack.c.bf16 %v8289_v9, %v8289_v9  ;;  %v18287_v59 = vld [vmem:[#allocation2 + $0x2fc] ss:$52 sps:$4 sm:$0xff]   ;;  %17053 = vmatpush3.bf16.msra.mxu1 %v18307_v36  ;;  %v8099_v26 = vpop.permute.xlu1 %8098  ;;  %v8675_v61 = vpop.permute.xlu0 %8674 }
 0x5b8   : > { %v8291_v2 = vpop.f32.mrf.mxu1  ;;  %v16880_v30 = vpop.f32.mrf.mxu0  ;;  %17054 = vmatprep.subr.bf16.mxu1 %v18308_v4  ;;  %8139 = vst.msk [vmem:[#allocation2 + $0x194] sm:$0xf] %vm2351_vm8, %v8099_v26  ;;  %10939 = vmatprep.mubr.bf16.mxu0 %v18287_v59  ;;  %v18293_v9 = vld [vmem:[#allocation2 + $0x1bc] ss:$52 sps:$4 sm:$0xff]   ;;  %v18318_v59 = vld [vmem:[%s25158_s4 + $0x280] sm:$0xff]  }
 0x5b9   : > { %8408 = vst.msk [vmem:[#allocation2 + $0xc8] sm:$0xf] %vm2045_vm7, %v16626_v16  ;;  %v23370_v18 = vadd.f32 %v16880_v30, %v16879_v62  ;;  %10940 = vmatmul.mubr.bf16.gmra.mxu0 %v18285_v11 }
 0x5ba   : > { %8713 = vst.msk [vmem:[#allocation2 + $0xc8] sm:$0xf] %vm2351_vm8, %v23325_v0  ;;  %v8294_v45 = vpop.f32.mrf.mxu1  ;;  %v16882_v22 = vpop.f32.mrf.mxu0  ;;  %10803 = vmatmul.mubr.bf16.gmra.mxu1 %v18282_v41 }
 0x5bb   : > { %v16627_v19 = vpack.c.bf16 %v8294_v45, %v8294_v45  ;;  %10810 = vmatprep.mubr.bf16.mxu1 %v18290_v28  ;;  %17055 = vmatpush3.bf16.msra.mxu1 %v18312_v38  ;;  %v8677_v17 = vpop.permute.xlu1 %8676  ;;  %v8101_v34 = vpop.permute.xlu0 %8100 }
 0x5bc   : > { %v8296_v25 = vpop.f32.mrf.mxu1  ;;  %v16883_v32 = vpop.f32.mrf.mxu0  ;;  %17056 = vmatprep.subr.bf16.mxu1 %v18313_v31  ;;  %8140 = vst.msk [vmem:[#allocation2 + $0x1c8] sm:$0xf] %vm2351_vm8, %v8101_v34 }
 0x5bd   : > { %8409 = vst.msk [vmem:[#allocation2 + $0xfc] sm:$0xf] %vm2045_vm7, %v16627_v19  ;;  %v23381_v0 = vadd.f32 %v16883_v32, %v16882_v22  ;;  %v18291_v19 = vld [vmem:[#allocation2 + $0x1b8] ss:$52 sps:$4 sm:$0xff]  }
 0x5be   : > { %v8297_v54 = vpop.f32.mrf.mxu1  ;;  %v16885_v43 = vpop.f32.mrf.mxu0  ;;  %8714 = vst.msk [vmem:[#allocation2 + $0xfc] sm:$0xf] %vm2351_vm8, %v8671_v1 }
 0x5bf   : > { %v16628_v12 = vpack.c.bf16 %v8297_v54, %v8297_v54  ;;  %17057 = vmatpush3.bf16.msra.mxu1 %v18314_v6  ;;  %v8103_v36 = vpop.permute.xlu1 %8102  ;;  %v8679_v62 = vpop.permute.xlu0 %8678 }
 0x5c0   : > { %v8299_v42 = vpop.f32.mrf.mxu1  ;;  %v16886_v4 = vpop.f32.mrf.mxu0  ;;  %17058 = vmatprep.subr.bf16.mxu1 %v18315_v15  ;;  %8141 = vst.msk [vmem:[#allocation2 + $0x1fc] sm:$0xf] %vm2351_vm8, %v8103_v36  ;;  %v18297_v15 = vld [vmem:[#allocation2 + $0x224] ss:$52 sps:$4 sm:$0xff]  }
 0x5c1   : > { %8410 = vst.msk [vmem:[#allocation2 + $0x130] sm:$0xf] %vm2045_vm7, %v16628_v12  ;;  %v23393_v1 = vadd.f32 %v16886_v4, %v16885_v43 }
 0x5c2   : > { %v8302_v38 = vpop.f32.mrf.mxu1  ;;  %v16888_v16 = vpop.f32.mrf.mxu0  ;;  %10811 = vmatmul.mubr.bf16.gmra.mxu1 %v18288_v56  ;;  %8715 = vst.msk [vmem:[#allocation2 + $0x130] sm:$0xf] %vm2351_vm8, %v23352_v47 }
 0x5c3   : > { %v16629_v11 = vpack.c.bf16 %v8302_v38, %v8302_v38  ;;  %10818 = vmatprep.mubr.bf16.mxu1 %v18293_v9  ;;  %17059 = vmatpush3.bf16.msra.mxu1 %v18316_v53  ;;  %v8681_v26 = vpop.permute.xlu1 %8680  ;;  %v8105_v31 = vpop.permute.xlu0 %8104 }
 0x5c4   : > { %v8304_v41 = vpop.f32.mrf.mxu1  ;;  %v16889_v2 = vpop.f32.mrf.mxu0  ;;  %17060 = vmatprep.subr.bf16.mxu1 %v18317_v57  ;;  %8142 = vst.msk [vmem:[#allocation2 + $0x230] sm:$0xf] %vm2351_vm8, %v8105_v31 }
 0x5c5   : > { %8411 = vst.msk [vmem:[#allocation2 + $0x164] sm:$0xf] %vm2045_vm7, %v16629_v11  ;;  %v23401_v30 = vadd.f32 %v16889_v2, %v16888_v16  ;;  %v18295_v16 = vld [vmem:[#allocation2 + $0x220] ss:$52 sps:$4 sm:$0xff]  }
 0x5c6   : > { %v8305_v28 = vpop.f32.mrf.mxu1  ;;  %v16891_v45 = vpop.f32.mrf.mxu0  ;;  %8716 = vst.msk [vmem:[#allocation2 + $0x164] sm:$0xf] %vm2351_vm8, %v8675_v61  ;;  %v18304_v41 = vld [vmem:[#allocation2 + $0x28c] ss:$52 sps:$4 sm:$0xff]  }
 0x5c7   : > { %v16630_v47 = vpack.c.bf16 %v8305_v28, %v8305_v28  ;;  %17061 = vmatpush3.bf16.msra.mxu1 %v18318_v59  ;;  %v8107_v22 = vpop.permute.xlu1 %8106  ;;  %v8683_v34 = vpop.permute.xlu0 %8682 }
 0x5c8   : > { %v8307_v6 = vpop.f32.mrf.mxu1  ;;  %v16892_v25 = vpop.f32.mrf.mxu0  ;;  %8143 = vst.msk [vmem:[#allocation2 + $0x264] sm:$0xf] %vm2351_vm8, %v8107_v22 }
 0x5c9   : > { %8412 = vst.msk [vmem:[#allocation2 + $0x198] sm:$0xf] %vm2045_vm7, %v16630_v47  ;;  %v23407_v32 = vadd.f32 %v16892_v25, %v16891_v45 }
 0x5ca   : > { %v8310_v54 = vpop.f32.mrf.mxu1  ;;  %v16894_v43 = vpop.f32.mrf.mxu0  ;;  %10819 = vmatmul.mubr.bf16.gmra.mxu1 %v18291_v19  ;;  %8717 = vst.msk [vmem:[#allocation2 + $0x198] sm:$0xf] %vm2351_vm8, %v8677_v17 }
 0x5cb   : > { %v16631_v61 = vpack.c.bf16 %v8310_v54, %v8310_v54  ;;  %10826 = vmatprep.mubr.bf16.mxu1 %v18297_v15  ;;  %v8685_v12 = vpop.permute.xlu1 %8684  ;;  %v8109_v42 = vpop.permute.xlu0 %8108 }
 0x5cc   : > { %v8312_v53 = vpop.f32.mrf.mxu1  ;;  %v16895_v36 = vpop.f32.mrf.mxu0  ;;  %8144 = vst.msk [vmem:[#allocation2 + $0x298] sm:$0xf] %vm2351_vm8, %v8109_v42  ;;  %v18311_v42 = vld [vmem:[#allocation2 + $0x2f4] ss:$52 sps:$4 sm:$0xff]  }
 0x5cd   : > { %8413 = vst.msk [vmem:[#allocation2 + $0x1cc] sm:$0xf] %vm2045_vm7, %v16631_v61  ;;  %v23411_v56 = vadd.f32 %v16895_v36, %v16894_v43  ;;  %v18302_v61 = vld [vmem:[#allocation2 + $0x288] ss:$52 sps:$4 sm:$0xff]  }
 0x5ce   : > { %v8313_v4 = vpop.f32.mrf.mxu1  ;;  %v16897_v57 = vpop.f32.mrf.mxu0  ;;  %8718 = vst.msk [vmem:[#allocation2 + $0x1cc] sm:$0xf] %vm2351_vm8, %v8679_v62 }
 0x5cf   : > { %v16632_v9 = vpack.c.bf16 %v8313_v4, %v8313_v4  ;;  %v8111_v38 = vpop.permute.xlu1 %8110  ;;  %v8687_v2 = vpop.permute.xlu0 %8686 }
 0x5d0   : > { %v8315_v17 = vpop.f32.mrf.mxu1  ;;  %v16898_v11 = vpop.f32.mrf.mxu0  ;;  %8145 = vst.msk [vmem:[#allocation2 + $0x2cc] sm:$0xf] %vm2351_vm8, %v8111_v38 }
 0x5d1   : > { %8414 = vst.msk [vmem:[#allocation2 + $0x200] sm:$0xf] %vm2045_vm7, %v16632_v9  ;;  %v23417_v59 = vadd.f32 %v16898_v11, %v16897_v57 }
 0x5d2   : > { %v8318_v31 = vpop.f32.mrf.mxu1  ;;  %v16900_v28 = vpop.f32.mrf.mxu0  ;;  %10827 = vmatmul.mubr.bf16.gmra.mxu1 %v18295_v16  ;;  %8719 = vst.msk [vmem:[#allocation2 + $0x200] sm:$0xf] %vm2351_vm8, %v8681_v26 }
 0x5d3   : > { %v16633_v62 = vpack.c.bf16 %v8318_v31, %v8318_v31  ;;  %10834 = vmatprep.mubr.bf16.mxu1 %v18304_v41  ;;  %v8689_v45 = vpop.permute.xlu1 %8688  ;;  %v8113_v6 = vpop.permute.xlu0 %8112  ;;  %v18309_v31 = vld [vmem:[#allocation2 + $0x2f0] ss:$52 sps:$4 sm:$0xff]  }
 0x5d4   : > { %v8320_v47 = vpop.f32.mrf.mxu1  ;;  %v16901_v22 = vpop.f32.mrf.mxu0  ;;  %8146 = vst.msk [vmem:[#allocation2 + $0x300] sm:$0xf] %vm2351_vm8, %v8113_v6 }
 0x5d5   : > { %8415 = vst.msk [vmem:[#allocation2 + $0x234] sm:$0xf] %vm2045_vm7, %v16633_v62  ;;  %v23421_v19 = vadd.f32 %v16901_v22, %v16900_v28 }
 0x5d6   : > { %v8321_v25 = vpop.f32.mrf.mxu1  ;;  %v16903_v15 = vpop.f32.mrf.mxu0  ;;  %8720 = vst.msk [vmem:[#allocation2 + $0x234] sm:$0xf] %vm2351_vm8, %v8683_v34 }
 0x5d7   : > { %v16634_v54 = vpack.c.bf16 %v8321_v25, %v8321_v25  ;;  %v8115_v43 = vpop.permute.xlu1 %8114 }
 0x5d8   : > { %v8323_v26 = vpop.f32.mrf.mxu1  ;;  %v16904_v53 = vpop.f32.mrf.mxu0  ;;  %8147 = vst.msk [vmem:[#allocation2 + $0x334] sm:$0xf] %vm2351_vm8, %v8115_v43 }
 0x5d9   : > { %8416 = vst.msk [vmem:[#allocation2 + $0x268] sm:$0xf] %vm2045_vm7, %v16634_v54  ;;  %v23427_v36 = vadd.f32 %v16904_v53, %v16903_v15  ;;  %v8691_v15 = vpop.permute.xlu0 %8690 }
 0x5da   : > { %v8326_v4 = vpop.f32.mrf.mxu1  ;;  %v16906_v57 = vpop.f32.mrf.mxu0  ;;  %10835 = vmatmul.mubr.bf16.gmra.mxu1 %v18302_v61  ;;  %8721 = vst.msk [vmem:[#allocation2 + $0x268] sm:$0xf] %vm2351_vm8, %v8685_v12  ;;  %v18321_v12 = vld [vmem:[#allocation2 + $0x2c] ss:$52 sps:$4 sm:$0xff]  }
 0x5db   : > { %v16635_v34 = vpack.c.bf16 %v8326_v4, %v8326_v4  ;;  %10842 = vmatprep.mubr.bf16.mxu1 %v18311_v42  ;;  %v8693_v42 = vpop.permute.xlu1 %8692 }
 0x5dc   : > { %v8328_v9 = vpop.f32.mrf.mxu1  ;;  %v16907_v38 = vpop.f32.mrf.mxu0 }
 0x5dd   : > { %8417 = vst.msk [vmem:[#allocation2 + $0x29c] sm:$0xf] %vm2045_vm7, %v16635_v34  ;;  %v23431_v16 = vadd.f32 %v16907_v38, %v16906_v57  ;;  %v18319_v34 = vld [vmem:[#allocation2 + $0x28] ss:$52 sps:$4 sm:$0xff]  }
 0x5de   : > { %v8329_v17 = vpop.f32.mrf.mxu1  ;;  %v16909_v11 = vpop.f32.mrf.mxu0  ;;  %8722 = vst.msk [vmem:[#allocation2 + $0x29c] sm:$0xf] %vm2351_vm8, %v8687_v2  ;;  %v18324_v9 = vld [vmem:[#allocation2 + $0x94] ss:$52 sps:$4 sm:$0xff]  }
 0x5df   : > { %v16636_v41 = vpack.c.bf16 %v8329_v17, %v8329_v17 }
 0x5e0   : > { %v8331_v28 = vpop.f32.mrf.mxu1  ;;  %v16910_v62 = vpop.f32.mrf.mxu0 }
 0x5e1   : > { %8418 = vst.msk [vmem:[#allocation2 + $0x2d0] sm:$0xf] %vm2045_vm7, %v16636_v41  ;;  %v23435_v47 = vadd.f32 %v16910_v62, %v16909_v11  ;;  %v18322_v62 = vld [vmem:[#allocation2 + $0x90] ss:$52 sps:$4 sm:$0xff]  }
 0x5e2   : > { %v8334_v22 = vpop.f32.mrf.mxu1  ;;  %v16912_v6 = vpop.f32.mrf.mxu0  ;;  %10843 = vmatmul.mubr.bf16.gmra.mxu1 %v18309_v31  ;;  %8723 = vst.msk [vmem:[#allocation2 + $0x2d0] sm:$0xf] %vm2351_vm8, %v8689_v45 }
 0x5e3   : > { %v16637_v25 = vpack.c.bf16 %v8334_v22, %v8334_v22  ;;  %10980 = vmatprep.mubr.bf16.mxu1 %v18321_v12  ;;  %v18329_v12 = vld [vmem:[#allocation2 + $0xfc] ss:$52 sps:$4 sm:$0xff]  }
 0x5e4   : > { %v8336_v54 = vpop.f32.mrf.mxu1  ;;  %v16913_v43 = vpop.f32.mrf.mxu0 }
 0x5e5   : > { %8419 = vst.msk [vmem:[#allocation2 + $0x304] sm:$0xf] %vm2045_vm7, %v16637_v25  ;;  %v23439_v2 = vadd.f32 %v16913_v43, %v16912_v6 }
 0x5e6   : > { %v8337_v61 = vpop.f32.mrf.mxu1  ;;  %v16915_v26 = vpop.f32.mrf.mxu0  ;;  %8724 = vst.msk [vmem:[#allocation2 + $0x304] sm:$0xf] %vm2351_vm8, %v8691_v15 }
 0x5e7   : > { %v16638_v53 = vpack.c.bf16 %v8337_v61, %v8337_v61  ;;  %v18327_v61 = vld [vmem:[#allocation2 + $0xf8] ss:$52 sps:$4 sm:$0xff]  }
 0x5e8   : > { %v8339_v4 = vpop.f32.mrf.mxu1  ;;  %v16916_v57 = vpop.f32.mrf.mxu0 }
 0x5e9   : > { %8420 = vst.msk [vmem:[#allocation2 + $0x338] sm:$0xf] %vm2045_vm7, %v16638_v53  ;;  %v23443_v45 = vadd.f32 %v16916_v57, %v16915_v26  ;;  %v18334_v53 = vld [vmem:[#allocation2 + $0x164] ss:$52 sps:$4 sm:$0xff]  }
 0x5ea   : > { %v8856_v38 = vpop.f32.mrf.mxu1  ;;  %10981 = vmatmul.mubr.bf16.vlgmr.msra.gmra.mxu1 %v18319_v34  ;;  %8725 = vst.msk [vmem:[#allocation2 + $0x338] sm:$0xf] %vm2351_vm8, %v8693_v42 }
 0x5eb   : > { %v16655_v17 = vpack.c.bf16 %v8856_v38, %v8856_v38  ;;  %10988 = vmatprep.mubr.bf16.mxu1 %v18324_v9 }
 0x5ec   : > { %v8858_v11 = vpop.f32.mrf.mxu1 }
 0x5ed   : > { %8983 = vst.msk [vmem:[#allocation2 + $0x30] sm:$0xf] %vm2045_vm7, %v16655_v17 }
 0x5ee   : > { %v8859_v41 = vpop.f32.mrf.mxu1 }
 0x5ef   : > { %v16656_v31 = vpack.c.bf16 %v8859_v41, %v8859_v41  ;;  %v18332_v41 = vld [vmem:[#allocation2 + $0x160] ss:$52 sps:$4 sm:$0xff]  }
 0x5f0   : > { %v8861_v28 = vpop.f32.mrf.mxu1 }
 0x5f1   : > { %8984 = vst.msk [vmem:[#allocation2 + $0x64] sm:$0xf] %vm2045_vm7, %v16656_v31 }
 0x5f2   : > { %v8864_v22 = vpop.f32.mrf.mxu1  ;;  %10989 = vmatmul.mubr.bf16.gmra.mxu1 %v18322_v62  ;;  %v18339_v62 = vld [vmem:[#allocation2 + $0x1cc] ss:$52 sps:$4 sm:$0xff]  }
 0x5f3   : > { %v16657_v6 = vpack.c.bf16 %v8864_v22, %v8864_v22  ;;  %10996 = vmatprep.mubr.bf16.mxu1 %v18329_v12 }
 0x5f4   : > { %v8866_v25 = vpop.f32.mrf.mxu1 }
 0x5f5   : > { %8985 = vst.msk [vmem:[#allocation2 + $0x98] sm:$0xf] %vm2045_vm7, %v16657_v6 }
 0x5f6   : > { %v8867_v15 = vpop.f32.mrf.mxu1 }
 0x5f7   : > { %v16658_v54 = vpack.c.bf16 %v8867_v15, %v8867_v15 }
 0x5f8   : > { %v8869_v43 = vpop.f32.mrf.mxu1  ;;  %v18335_v26 = vld [vmem:[#allocation2 + $0x30] ss:$52 sps:$4 sm:$0xff]  }
 0x5f9   : > { %8986 = vst.msk [vmem:[#allocation2 + $0xcc] sm:$0xf] %vm2045_vm7, %v16658_v54  ;;  %17377 = vmatprep.mubr.msk.bf16.mxu0 %vm10438_vm9, %v18335_v26 }
 0x5fa   : > { %v8872_v42 = vpop.f32.mrf.mxu1  ;;  %10997 = vmatmul.mubr.bf16.gmra.mxu1 %v18327_v61 }
 0x5fb   : > { %v16659_v4 = vpack.c.bf16 %v8872_v42, %v8872_v42  ;;  %11004 = vmatprep.mubr.bf16.mxu1 %v18334_v53 }
 0x5fc   : > { %v8874_v57 = vpop.f32.mrf.mxu1  ;;  %v16998_v34 = vpop.f32.mrf.mxu0 }
 0x5fd   : > { %8987 = vst.msk [vmem:[#allocation2 + $0x100] sm:$0xf] %vm2045_vm7, %v16659_v4  ;;  %v18337_v4 = vld [vmem:[#allocation2 + $0x1c8] ss:$52 sps:$4 sm:$0xff]  }
 0x5fe   : > { %v8875_v9 = vpop.f32.mrf.mxu1  ;;  %v16999_v17 = vpop.f32.mrf.mxu0 }
 0x5ff   : > { %v16660_v38 = vpack.c.bf16 %v8875_v9, %v8875_v9  ;;  %v23452_v28 = vadd.f32 %v16999_v17, %v16998_v34  ;;  %v18342_v9 = vld [vmem:[#allocation2 + $0x234] ss:$52 sps:$4 sm:$0xff]  }
 0x600   : > { %v8877_v11 = vpop.f32.mrf.mxu1  ;;  %v18336_v31 = vld [vmem:[#allocation2 + $0x98] ss:$52 sps:$4 sm:$0xff]   ;;  %v17001_v12 = vpop.f32.mrf.mxu0 }
 0x601   : > { %8988 = vst.msk [vmem:[#allocation2 + $0x134] sm:$0xf] %vm2045_vm7, %v16660_v38  ;;  %17378 = vmatmul.mubr.msk.bf16.vlgmr.msra.gmra.mxu0 %vm10438_vm9, %v18336_v31 }
 0x602   : > { %v8880_v22 = vpop.f32.mrf.mxu1  ;;  %11005 = vmatmul.mubr.bf16.gmra.mxu1 %v18332_v41  ;;  %v17002_v25 = vpop.f32.mrf.mxu0 }
 0x603   : > { %v16661_v6 = vpack.c.bf16 %v8880_v22, %v8880_v22  ;;  %11012 = vmatprep.mubr.bf16.mxu1 %v18339_v62  ;;  %v23456_v54 = vadd.f32 %v17002_v25, %v17001_v12 }
 0x604   : > { %v8882_v15 = vpop.f32.mrf.mxu1  ;;  %v17004_v43 = vpop.f32.mrf.mxu0 }
 0x605   : > { %8989 = vst.msk [vmem:[#allocation2 + $0x168] sm:$0xf] %vm2045_vm7, %v16661_v6 }
 0x606   : > { %v8883_v61 = vpop.f32.mrf.mxu1  ;;  %v17005_v53 = vpop.f32.mrf.mxu0 }
 0x607   : > { %v16662_v26 = vpack.c.bf16 %v8883_v61, %v8883_v61  ;;  %v23459_v34 = vadd.f32 %v17005_v53, %v17004_v43  ;;  %v18340_v43 = vld [vmem:[#allocation2 + $0x230] ss:$52 sps:$4 sm:$0xff]  }
 0x608   : > { %v8885_v42 = vpop.f32.mrf.mxu1  ;;  %v18343_v57 = vld [vmem:[#allocation2 + $0x100] ss:$52 sps:$4 sm:$0xff]   ;;  %v17007_v38 = vpop.f32.mrf.mxu0  ;;  %v18347_v53 = vld [vmem:[#allocation2 + $0x29c] ss:$52 sps:$4 sm:$0xff]  }
 0x609   : > { %8990 = vst.msk [vmem:[#allocation2 + $0x19c] sm:$0xf] %vm2045_vm7, %v16662_v26  ;;  %17381 = vmatprep.mubr.msk.bf16.mxu0 %vm10438_vm9, %v18343_v57 }
 0x60a   : > { %v8888_v17 = vpop.f32.mrf.mxu1  ;;  %11013 = vmatmul.mubr.bf16.gmra.mxu1 %v18337_v4  ;;  %v17008_v41 = vpop.f32.mrf.mxu0 }
 0x60b   : > { %v16663_v11 = vpack.c.bf16 %v8888_v17, %v8888_v17  ;;  %11020 = vmatprep.mubr.bf16.mxu1 %v18342_v9  ;;  %v23463_v62 = vadd.f32 %v17008_v41, %v17007_v38 }
 0x60c   : > { %v8890_v31 = vpop.f32.mrf.mxu1  ;;  %v17010_v12 = vpop.f32.mrf.mxu0 }
 0x60d   : > { %8991 = vst.msk [vmem:[#allocation2 + $0x1d0] sm:$0xf] %vm2045_vm7, %v16663_v11 }
 0x60e   : > { %v8891_v22 = vpop.f32.mrf.mxu1  ;;  %v17011_v25 = vpop.f32.mrf.mxu0 }
 0x60f   : > { %v16664_v6 = vpack.c.bf16 %v8891_v22, %v8891_v22  ;;  %v23466_v26 = vadd.f32 %v17011_v25, %v17010_v12  ;;  %v18345_v12 = vld [vmem:[#allocation2 + $0x298] ss:$52 sps:$4 sm:$0xff]  }
 0x610   : > { %v8893_v15 = vpop.f32.mrf.mxu1  ;;  %v18344_v61 = vld [vmem:[#allocation2 + $0x168] ss:$52 sps:$4 sm:$0xff]   ;;  %v17013_v42 = vpop.f32.mrf.mxu0 }
 0x611   : > { %8992 = vst.msk [vmem:[#allocation2 + $0x204] sm:$0xf] %vm2045_vm7, %v16664_v6  ;;  %17382 = vmatmul.mubr.msk.bf16.gmra.mxu0 %vm10438_vm9, %v18344_v61  ;;  %v18350_v6 = vld [vmem:[#allocation2 + $0x304] ss:$52 sps:$4 sm:$0xff]  }
 0x612   : > { %v8896_v4 = vpop.f32.mrf.mxu1  ;;  %11021 = vmatmul.mubr.bf16.gmra.mxu1 %v18340_v43  ;;  %v17014_v9 = vpop.f32.mrf.mxu0 }
 0x613   : > { %v16665_v57 = vpack.c.bf16 %v8896_v4, %v8896_v4  ;;  %11028 = vmatprep.mubr.bf16.mxu1 %v18347_v53  ;;  %v23470_v17 = vadd.f32 %v17014_v9, %v17013_v42  ;;  %v18348_v4 = vld [vmem:[#allocation2 + $0x300] ss:$52 sps:$4 sm:$0xff]  }
 0x614   : > { %v8898_v38 = vpop.f32.mrf.mxu1 }
 0x615   : > { %8993 = vst.msk [vmem:[#allocation2 + $0x238] sm:$0xf] %vm2045_vm7, %v16665_v57 }
 0x616   : > { %v8899_v11 = vpop.f32.mrf.mxu1 }
 0x617   : > { %v16666_v41 = vpack.c.bf16 %v8899_v11, %v8899_v11 }
 0x618   : > { %v8901_v31 = vpop.f32.mrf.mxu1  ;;  %v18351_v22 = vld [vmem:[#allocation2 + $0x1d0] ss:$52 sps:$4 sm:$0xff]  }
 0x619   : > { %8994 = vst.msk [vmem:[#allocation2 + $0x26c] sm:$0xf] %vm2045_vm7, %v16666_v41  ;;  %17385 = vmatprep.mubr.msk.bf16.mxu0 %vm10438_vm9, %v18351_v22 }
 0x61a   : > { %v8904_v25 = vpop.f32.mrf.mxu1  ;;  %11029 = vmatmul.mubr.bf16.gmra.mxu1 %v18345_v12 }
 0x61b   : > { %v16667_v15 = vpack.c.bf16 %v8904_v25, %v8904_v25  ;;  %11036 = vmatprep.mubr.bf16.mxu1 %v18350_v6  ;;  %v23483_v6 = vld [vmem:[%s25159_s5] ss:$0 sm:$0xff] }
 0x61c   : > { %v8906_v43 = vpop.f32.mrf.mxu1 }
 0x61d   : > { %8995 = vst.msk [vmem:[#allocation2 + $0x2a0] sm:$0xf] %vm2045_vm7, %v16667_v15  ;;  %v10498_v43 = vadd.f32 %v23200_v37, %v23483_v6  ;;  %v10506_v37 = vadd.f32 %v23222_v3, %v23483_v6  ;;  %v10514_v3 = vadd.f32 %v23250_v63, %v23483_v6  ;;  %v10522_v63 = vadd.f32 %v23278_v44, %v23483_v6 }
 0x61e   : > { %v8907_v61 = vpop.f32.mrf.mxu1  ;;  %v10530_v44 = vadd.f32 %v23286_v7, %v23483_v6  ;;  %v10538_v7 = vadd.f32 %v23294_v48, %v23483_v6  ;;  %v10546_v48 = vadd.f32 %v23302_v39, %v23483_v6  ;;  %v10554_v39 = vadd.f32 %v23311_v40, %v23483_v6 }
 0x61f   : > { %v16668_v53 = vpack.c.bf16 %v8907_v61, %v8907_v61  ;;  %v16747_v61 = vadd.f32 %v23208_v55, %v23202_v29  ;;  %v16753_v29 = vadd.f32 %v23233_v10, %v23227_v27  ;;  %v16759_v27 = vadd.f32 %v23261_v5, %v23255_v35 }
 0x620   : > { %v8909_v42 = vpop.f32.mrf.mxu1  ;;  %v18352_v57 = vld [vmem:[#allocation2 + $0x238] ss:$52 sps:$4 sm:$0xff]   ;;  %v16765_v35 = vadd.f32 %v23282_v14, %v23280_v13  ;;  %v16771_v13 = vadd.f32 %v23290_v21, %v23288_v50  ;;  %v16777_v50 = vadd.f32 %v23298_v49, %v23296_v8  ;;  %v16783_v8 = vadd.f32 %v23306_v46, %v23304_v51 }
 0x621   : > { %8996 = vst.msk [vmem:[#allocation2 + $0x2d4] sm:$0xf] %vm2045_vm7, %v16668_v53  ;;  %17386 = vmatmul.mubr.msk.bf16.gmra.mxu0 %vm10438_vm9, %v18352_v57  ;;  %v16789_v51 = vadd.f32 %v23319_v58, %v23313_v23 }
 0x622   : > { %v8912_v9 = vpop.f32.mrf.mxu1  ;;  %11037 = vmatmul.mubr.bf16.gmra.mxu1 %v18348_v4 }
 0x623   : > { %v16669_v38 = vpack.c.bf16 %v8912_v9, %v8912_v9 }
 0x624   : > { %v8914_v11 = vpop.f32.mrf.mxu1 }
 0x625   : > { %8997 = vst.msk [vmem:[#allocation2 + $0x308] sm:$0xf] %vm2045_vm7, %v16669_v38  ;;  %v10501_v38 = vadd.f32 %v16747_v61, %v23483_v6 }
 0x626   : > { %v8915_v41 = vpop.f32.mrf.mxu1 }
 0x627   : > { %v16670_v31 = vpack.c.bf16 %v8915_v41, %v8915_v41 }
 0x628   : > { %v8917_v12 = vpop.f32.mrf.mxu1  ;;  %v18353_v22 = vld [vmem:[#allocation2 + $0x2a0] ss:$52 sps:$4 sm:$0xff]  }
 0x629   : > { %8998 = vst.msk [vmem:[#allocation2 + $0x33c] sm:$0xf] %vm2045_vm7, %v16670_v31  ;;  %17389 = vmatprep.mubr.msk.bf16.mxu0 %vm10438_vm9, %v18353_v22 }
 0x62a   : > { %v16806_v25 = vpop.f32.mrf.mxu1 }
 0x62c   : > { %v16807_v15 = vpop.f32.mrf.mxu1 }
 0x62d   : > { %v16808_v53 = vadd.f32 %v16807_v15, %v16806_v25 }
 0x62e   : > { %v16809_v42 = vpop.f32.mrf.mxu1 }
 0x62f   : > { %v10595_v4 = vadd.f32 %v16808_v53, %v10498_v43 }
 0x630   : > { %v16810_v57 = vpop.f32.mrf.mxu1  ;;  %v18354_v9 = vld [vmem:[#allocation2 + $0x308] ss:$52 sps:$4 sm:$0xff]  }
 0x631   : > { %v16811_v11 = vadd.f32 %v16810_v57, %v16809_v42  ;;  %v23492_v41 = vadd.f32 %v23335_v52, %v10595_v4  ;;  %17390 = vmatmul.mubr.msk.bf16.gmra.mxu0 %vm10438_vm9, %v18354_v9  ;;  %v10509_v52 = vadd.f32 %v16753_v29, %v23483_v6 }
 0x632   : > { %v16812_v31 = vpop.f32.mrf.mxu1 }
 0x633   : > { %v10598_v12 = vadd.f32 %v16811_v11, %v10501_v38 }
 0x634   : > { %v16813_v22 = vpop.f32.mrf.mxu1 }
 0x635   : > { %v16814_v55 = vadd.f32 %v16813_v22, %v16812_v31  ;;  %v23500_v25 = vadd.f32 %v23346_v24, %v10598_v12  ;;  %v10517_v12 = vadd.f32 %v16759_v27, %v23483_v6 }
 0x636   : > { %v16815_v15 = vpop.f32.mrf.mxu1 }
 0x637   : > { %v10603_v43 = vadd.f32 %v16814_v55, %v10506_v37 }
 0x638   : > { %v16816_v61 = vpop.f32.mrf.mxu1 }
 0x639   : > { %v16817_v53 = vadd.f32 %v16816_v61, %v16815_v15  ;;  %v23504_v42 = vadd.f32 %v23358_v60, %v10603_v43 }
 0x63a   : > { %v16818_v4 = vpop.f32.mrf.mxu1 }
 0x63b   : > { %v10606_v57 = vadd.f32 %v16817_v53, %v10509_v52  ;;  %v10525_v52 = vadd.f32 %v16765_v35, %v23483_v6 }
 0x63c   : > { %v16819_v9 = vpop.f32.mrf.mxu1 }
 0x63d   : > { %v16820_v10 = vadd.f32 %v16819_v9, %v16818_v4  ;;  %v23511_v24 = vadd.f32 %v23370_v18, %v10606_v57 }
 0x63e   : > { %v16821_v38 = vpop.f32.mrf.mxu1 }
 0x63f   : > { %v10611_v11 = vadd.f32 %v16820_v10, %v10514_v3 }
 0x640   : > { %v16822_v31 = vpop.f32.mrf.mxu1 }
 0x641   : > { %v16823_v60 = vadd.f32 %v16822_v31, %v16821_v38  ;;  %v23515_v22 = vadd.f32 %v23381_v0, %v10611_v11  ;;  %v10533_v38 = vadd.f32 %v16771_v13, %v23483_v6 }
 0x642   : > { %v16824_v37 = vpop.f32.mrf.mxu1 }
 0x643   : > { %v10614_v29 = vadd.f32 %v16823_v60, %v10517_v12 }
 0x644   : > { %v16825_v55 = vpop.f32.mrf.mxu1 }
 0x645   : > { %v16826_v5 = vadd.f32 %v16825_v55, %v16824_v37  ;;  %v23522_v18 = vadd.f32 %v23393_v1, %v10614_v29 }
 0x646   : > { %v16827_v15 = vpop.f32.mrf.mxu1 }
 0x647   : > { %v10619_v43 = vadd.f32 %v16826_v5, %v10522_v63  ;;  %v10541_v63 = vadd.f32 %v16777_v50, %v23483_v6 }
 0x648   : > { %v16828_v61 = vpop.f32.mrf.mxu1 }
 0x649   : > { %v16829_v0 = vadd.f32 %v16828_v61, %v16827_v15  ;;  %v23526_v53 = vadd.f32 %v23401_v30, %v10619_v43 }
 0x64a   : > { %v16830_v4 = vpop.f32.mrf.mxu1 }
 0x64b   : > { %v10622_v57 = vadd.f32 %v16829_v0, %v10525_v52 }
 0x64c   : > { %v16831_v9 = vpop.f32.mrf.mxu1 }
 0x64d   : > { %v16832_v14 = vadd.f32 %v16831_v9, %v16830_v4  ;;  %v23533_v1 = vadd.f32 %v23407_v32, %v10622_v57  ;;  %v10549_v4 = vadd.f32 %v16783_v8, %v23483_v6 }
 0x64e   : > { %v16833_v3 = vpop.f32.mrf.mxu1 }
 0x64f   : > { %v10627_v27 = vadd.f32 %v16832_v14, %v10530_v44 }
 0x650   : > { %v16834_v10 = vpop.f32.mrf.mxu1 }
 0x651   : > { %v16835_v30 = vadd.f32 %v16834_v10, %v16833_v3  ;;  %v23537_v11 = vadd.f32 %v23411_v56, %v10627_v27  ;;  %v10557_v10 = vadd.f32 %v16789_v51, %v23483_v6 }
 0x652   : > { %v16836_v31 = vpop.f32.mrf.mxu1 }
 0x653   : > { %v10630_v12 = vadd.f32 %v16835_v30, %v10533_v38 }
 0x654   : > { %v16837_v60 = vpop.f32.mrf.mxu1 }
 0x655   : > { %v16838_v21 = vadd.f32 %v16837_v60, %v16836_v31  ;;  %v23544_v32 = vadd.f32 %v23417_v59, %v10630_v12 }
 0x656   : > { %v16839_v37 = vpop.f32.mrf.mxu1 }
 0x657   : > { %v10635_v29 = vadd.f32 %v16838_v21, %v10538_v7 }
 0x658   : > { %v16840_v55 = vpop.f32.mrf.mxu1 }
 0x659   : > { %v16841_v56 = vadd.f32 %v16840_v55, %v16839_v37  ;;  %v23548_v35 = vadd.f32 %v23421_v19, %v10635_v29 }
 0x65a   : > { %v16842_v5 = vpop.f32.mrf.mxu1 }
 0x65b   : > { %v10638_v15 = vadd.f32 %v16841_v56, %v10541_v63  ;;  %v23584_v63 = vpop.f32.mrf.mxu0 }
 0x65c   : > { %v16843_v43 = vpop.f32.mrf.mxu1 }
 0x65d   : > { %v16844_v49 = vadd.f32 %v16843_v43, %v16842_v5  ;;  %v23555_v59 = vadd.f32 %v23427_v36, %v10638_v15  ;;  %v23590_v43 = vpop.f32.mrf.mxu0 }
 0x65e   : > { %v16845_v61 = vpop.f32.mrf.mxu1 }
 0x65f   : > { %v10643_v52 = vadd.f32 %v16844_v49, %v10546_v48  ;;  %v23596_v49 = vpop.f32.mrf.mxu0 }
 0x660   : > { %v16846_v0 = vpop.f32.mrf.mxu1 }
 0x661   : > { %v16847_v19 = vadd.f32 %v16846_v0, %v16845_v61  ;;  %v23559_v57 = vadd.f32 %v23431_v16, %v10643_v52 }
 0x662   : > { %v16848_v9 = vpop.f32.mrf.mxu1 }
 0x663   : > { %v10646_v44 = vadd.f32 %v16847_v19, %v10549_v4  ;;  %v23602_v4 = vpop.f32.mrf.mxu0 }
 0x664   : > { %v16849_v13 = vpop.f32.mrf.mxu1 }
 0x665   : > { %v16850_v46 = vadd.f32 %v16849_v13, %v16848_v9  ;;  %v23566_v36 = vadd.f32 %v23435_v47, %v10646_v44  ;;  %v23610_v13 = vpop.f32.mrf.mxu0 }
 0x666   : > { %v16851_v14 = vpop.f32.mrf.mxu1 }
 0x667   : > { %v10651_v3 = vadd.f32 %v16850_v46, %v10554_v39 }
 0x668   : > { %v16852_v27 = vpop.f32.mrf.mxu1 }
 0x669   : > { %v16853_v16 = vadd.f32 %v16852_v27, %v16851_v14  ;;  %v23570_v38 = vadd.f32 %v23439_v2, %v10651_v3 }
 0x66a   : > { %v16934_v30 = vpop.f32.mrf.mxu1 }
 0x66b   : > { %v10654_v31 = vadd.f32 %v16853_v16, %v10557_v10 }
 0x66c   : > { %v16935_v12 = vpop.f32.mrf.mxu1 }
 0x66d   : > { %v16936_v40 = vadd.f32 %v16935_v12, %v16934_v30  ;;  %v23573_v60 = vadd.f32 %v23443_v45, %v10654_v31 }
 0x66e   : > { %v16937_v23 = vpop.f32.mrf.mxu1 }
 0x66f   : > { %v10789_v58 = vadd.f32 %v16936_v40, %v23492_v41 }
 0x670   : > { %v16938_v47 = vpop.f32.mrf.mxu1 }
 0x671   : > { %v16939_v7 = vadd.f32 %v16938_v47, %v16937_v23  ;;  %v23577_v50 = vadd.f32 %v23452_v28, %v10789_v58 }
 0x672   : > { %v16940_v6 = vpop.f32.mrf.mxu1 }
 0x673   : > { %v10792_v21 = vadd.f32 %v16939_v7, %v23500_v25 }
 0x674   : > { %v16941_v2 = vpop.f32.mrf.mxu1 }
 0x675   : > { %v16942_v37 = vadd.f32 %v16941_v2, %v16940_v6  ;;  %v23581_v29 = vadd.f32 %v23456_v54, %v10792_v21 }
 0x676   : > { %v16943_v55 = vpop.f32.mrf.mxu1 }
 0x677   : > { %v10797_v45 = vadd.f32 %v16942_v37, %v23504_v42  ;;  %v18355_v37 = vld [vmem:[%s25160_s6 + $0xa8] ss:$12 sps:$4 sm:$0xff]  }
 0x678   : > { %v16944_v56 = vpop.f32.mrf.mxu1 }
 0x679   : > { %v16945_v41 = vadd.f32 %v16944_v56, %v16943_v55  ;;  %v23587_v5 = vadd.f32 %v23459_v34, %v10797_v45  ;;  %v18358_v55 = vld [vmem:[%s25160_s6 + $0x228] ss:$12 sps:$4 sm:$0xff]  }
 0x67a   : > { %v16946_v28 = vpop.f32.mrf.mxu1  ;;  %v18363_v56 = vld [vmem:[%s25160_s6 + $0x94] ss:$12 sps:$4 sm:$0xff]  }
 0x67b   : > { %v10800_v15 = vadd.f32 %v16945_v41, %v23511_v24 }
 0x67c   : > { %v16947_v25 = vpop.f32.mrf.mxu1 }
 0x67d   : > { %v16948_v48 = vadd.f32 %v16947_v25, %v16946_v28  ;;  %v23593_v54 = vadd.f32 %v23463_v62, %v10800_v15  ;;  %v18366_v28 = vld [vmem:[%s25160_s6 + $0x214] ss:$12 sps:$4 sm:$0xff]   ;;  %v18361_v25 = vld [vmem:[%s25160_s6 + $0x90] ss:$12 sps:$4 sm:$0xff]  }
 0x67e   : > { %v16949_v8 = vpop.f32.mrf.mxu1 }
 0x67f   : > { %v10805_v42 = vadd.f32 %v16948_v48, %v23515_v22 }
 0x680   : > { %v16950_v61 = vpop.f32.mrf.mxu1 }
 0x681   : > { %v16951_v52 = vadd.f32 %v16950_v61, %v16949_v8  ;;  %v23599_v34 = vadd.f32 %v23466_v26, %v10805_v42  ;;  %v18364_v42 = vld [vmem:[%s25160_s6 + $0x210] ss:$12 sps:$4 sm:$0xff]  }
 0x682   : > { %v16952_v0 = vpop.f32.mrf.mxu1 }
 0x683   : > { %v10808_v24 = vadd.f32 %v16951_v52, %v23522_v18  ;;  %v23615_v18 = vpop.f32.mrf.mxu0  ;;  %v18372_v52 = vld [vmem:[%s25160_s6 + $0x1fc] ss:$12 sps:$4 sm:$0xff]  }
 0x684   : > { %v16953_v19 = vpop.f32.mrf.mxu1 }
 0x685   : > { %v16954_v9 = vadd.f32 %v16953_v19, %v16952_v0  ;;  %v23605_v62 = vadd.f32 %v23470_v17, %v10808_v24  ;;  %v23620_v10 = vpop.f32.mrf.mxu0  ;;  %v18367_v19 = vld [vmem:[%s25160_s6 + $0x78] ss:$12 sps:$4 sm:$0xff]  }
 0x686   : > { %v16955_v44 = vpop.f32.mrf.mxu1 }
 0x687   : > { %v23608_v22 = vadd.f32 %v16954_v9, %v23526_v53  ;;  %v23625_v12 = vpop.f32.mrf.mxu0 }
 0x688   : > { %v16956_v39 = vpop.f32.mrf.mxu1 }
 0x689   : > { %v16957_v51 = vadd.f32 %v16956_v39, %v16955_v44  ;;  %v23630_v47 = vpop.f32.mrf.mxu0  ;;  %v18370_v39 = vld [vmem:[%s25160_s6 + $0x1f8] ss:$12 sps:$4 sm:$0xff]  }
 0x68a   : > { %v16958_v26 = vpop.f32.mrf.mxu1 }
 0x68b   : > { %v23613_v46 = vadd.f32 %v16957_v51, %v23533_v1  ;;  %v23635_v2 = vpop.f32.mrf.mxu0  ;;  %v18378_v51 = vld [vmem:[%s25160_s6 + $0x1e4] ss:$12 sps:$4 sm:$0xff]  }
 0x68c   : > { %v16959_v14 = vpop.f32.mrf.mxu1 }
 0x68d   : > { %v16960_v3 = vadd.f32 %v16959_v14, %v16958_v26  ;;  %v23661_v48 = vpop.f32.mrf.mxu0  ;;  %v18373_v14 = vld [vmem:[%s25160_s6 + $0x60] ss:$12 sps:$4 sm:$0xff]  }
 0x68e   : > { %v16961_v27 = vpop.f32.mrf.mxu1 }
 0x68f   : > { %v23618_v17 = vadd.f32 %v16960_v3, %v23537_v11  ;;  %v23680_v9 = vpop.f32.mrf.mxu0 }
 0x690   : > { %v16962_v53 = vpop.f32.mrf.mxu1 }
 0x691   : > { %v16963_v16 = vadd.f32 %v16962_v53, %v16961_v27  ;;  %v23698_v3 = vpop.f32.mrf.mxu0  ;;  %v18376_v53 = vld [vmem:[%s25160_s6 + $0x1e0] ss:$12 sps:$4 sm:$0xff]  }
 0x692   : > { %v16964_v30 = vpop.f32.mrf.mxu1 }
 0x693   : > { %v23623_v31 = vadd.f32 %v16963_v16, %v23544_v32  ;;  %v18381_v16 = vld [vmem:[%s25160_s6 + $0x4c] ss:$12 sps:$4 sm:$0xff]  }
 0x694   : > { %v16965_v1 = vpop.f32.mrf.mxu1 }
 0x695   : > { %25321 = vst [vmem:[#allocation32_spill] sm:$0xff] %v23623_v31  ;;  %v16966_v40 = vadd.f32 %v16965_v1, %v16964_v30  ;;  %v18384_v30 = vld [vmem:[%s25160_s6 + $0x1cc] ss:$12 sps:$4 sm:$0xff]  }
 0x696   : > { %v16967_v23 = vpop.f32.mrf.mxu1 }
 0x697   : > { %v23628_v58 = vadd.f32 %v16966_v40, %v23548_v35  ;;  %v18357_v35 = vld [vmem:[%s25160_s6 + $0xac] ss:$12 sps:$4 sm:$0xff]   ;;  %v18379_v40 = vld [vmem:[%s25160_s6 + $0x48] ss:$12 sps:$4 sm:$0xff]  }
 0x698   : > { %v16968_v11 = vpop.f32.mrf.mxu1  ;;  %13590 = vmatprep.subr.bf16.mxu1 %v18357_v35  ;;  %v18385_v35 = vld [vmem:[%s25160_s6 + $0x30] ss:$12 sps:$4 sm:$0xff]  }
 0x699   : > { %v16969_v7 = vadd.f32 %v16968_v11, %v16967_v23  ;;  %13591 = vmatpush1.bf16.msra.mxu1 %v18355_v37  ;;  %v23716_v23 = vpop.f32.mrf.mxu0 }
 0x69a   : > { %v16970_v6 = vpop.f32.mrf.mxu1  ;;  %13592 = vmatprep.subr.bf16.mxu1 %v18363_v56  ;;  %v18393_v56 = vld [vmem:[%s25160_s6 + $0x1c] ss:$12 sps:$4 sm:$0xff]  }
 0x69b   : > { %v23633_v21 = vadd.f32 %v16969_v7, %v23555_v59  ;;  %v18360_v59 = vld [vmem:[%s25160_s6 + $0x22c] ss:$12 sps:$4 sm:$0xff]   ;;  %v18382_v7 = vld [vmem:[%s25160_s6 + $0x1c8] ss:$12 sps:$4 sm:$0xff]  }
 0x69c   : > { %v16971_v32 = vpop.f32.mrf.mxu1  ;;  %13631 = vmatprep.subr.bf16.mxu0 %v18360_v59  ;;  %v18388_v59 = vld [vmem:[%s25160_s6 + $0x1b0] ss:$12 sps:$4 sm:$0xff]  }
 0x69d   : > { %v16972_v45 = vadd.f32 %v16971_v32, %v16970_v6  ;;  %13632 = vmatpush1.bf16.msra.mxu0 %v18358_v55  ;;  %13593 = vmatpush1.bf16.msra.mxu1 %v18361_v25  ;;  %v18387_v6 = vld [vmem:[%s25160_s6 + $0x34] ss:$12 sps:$4 sm:$0xff]   ;;  %v23732_v55 = vpop.f32.mrf.mxu0  ;;  %v18391_v25 = vld [vmem:[%s25160_s6 + $0x18] ss:$12 sps:$4 sm:$0xff]  }
 0x69e   : > { %v16973_v41 = vpop.f32.mrf.mxu1  ;;  %13633 = vmatprep.subr.bf16.mxu0 %v18366_v28  ;;  %v18390_v32 = vld [vmem:[%s25160_s6 + $0x1b4] ss:$12 sps:$4 sm:$0xff]  }
 0x69f   : > { %v23656_v15 = vadd.f32 %v16972_v45, %v23559_v57  ;;  %v18369_v57 = vld [vmem:[%s25160_s6 + $0x7c] ss:$12 sps:$4 sm:$0xff]  }
 0x6a0   : > { %v16974_v8 = vpop.f32.mrf.mxu1  ;;  %13594 = vmatprep.subr.bf16.mxu1 %v18369_v57  ;;  %v18394_v57 = vld [vmem:[%s25160_s6 + $0x198] ss:$12 sps:$4 sm:$0xff]  }
 0x6a1   : > { %25322 = vst [vmem:[#allocation33_spill] sm:$0xff] %v23656_v15  ;;  %v16975_v61 = vadd.f32 %v16974_v8, %v16973_v41  ;;  %13634 = vmatpush1.bf16.msra.mxu0 %v18364_v42  ;;  %13595 = vmatpush1.bf16.msra.mxu1 %v18367_v19  ;;  %v18396_v41 = vld [vmem:[%s25160_s6 + $0x19c] ss:$12 sps:$4 sm:$0xff]   ;;  %v23748_v8 = vpop.f32.mrf.mxu0 }
 0x6a2   : > { %v23672_v0 = vpop.f32.mrf.mxu1  ;;  %13635 = vmatprep.subr.bf16.mxu0 %v18372_v52  ;;  %v18402_v52 = vld [vmem:[%s25160_s6 + $0x184] ss:$12 sps:$4 sm:$0xff]  }
 0x6a3   : > { %v23675_v24 = vadd.f32 %v16975_v61, %v23566_v36  ;;  %v18375_v36 = vld [vmem:[%s25160_s6 + $0x64] ss:$12 sps:$4 sm:$0xff]   ;;  %v23759_v19 = vpop.f32.mrf.mxu0 }
 0x6a4   : > { %v23682_v44 = vpop.f32.mrf.mxu1  ;;  %13596 = vmatprep.subr.bf16.mxu1 %v18375_v36  ;;  %v18399_v61 = vld [vmem:[%s25160_s6 + $0x4] ss:$12 sps:$4 sm:$0xff]   ;;  %v18397_v36 = vld [vmem:[%s25160_s6] ss:$12 sps:$4 sm:$0xff]  }
 0x6a5   : > { %25323 = vst [vmem:[#allocation10_spill] sm:$0xff] %v23675_v24  ;;  %13636 = vmatpush1.bf16.msra.mxu0 %v18370_v39  ;;  %13597 = vmatpush1.bf16.msra.mxu1 %v18373_v14  ;;  %v18400_v14 = vld [vmem:[%s25160_s6 + $0x180] ss:$12 sps:$4 sm:$0xff]  }
 0x6a6   : > { %v23693_v26 = vpop.f32.mrf.mxu1  ;;  %13637 = vmatprep.subr.bf16.mxu0 %v18378_v51  ;;  %13598 = vmatprep.subr.bf16.mxu1 %v18381_v16  ;;  %v18408_v16 = vld [vmem:[%s25160_s6 + $0x2ec] ss:$12 sps:$4 sm:$0xff]  }
 0x6a8   : > { %v23700_v27 = vpop.f32.mrf.mxu1 }
 0x6a9   : > { %13638 = vmatpush1.bf16.msra.mxu0 %v18376_v53  ;;  %13599 = vmatpush1.bf16.msra.mxu1 %v18379_v40  ;;  %v18405_v53 = vld [vmem:[%s25160_s6 + $0x16c] ss:$12 sps:$4 sm:$0xff]  }
 0x6aa   : > { %v23711_v1 = vpop.f32.mrf.mxu1  ;;  %13639 = vmatprep.subr.bf16.mxu0 %v18384_v30  ;;  %13600 = vmatprep.subr.bf16.mxu1 %v18387_v6  ;;  %v23773_v30 = vpop.f32.mrf.mxu0 }
 0x6ac   : > { %v17063_v11 = vpop.f32.mrf.mxu1 }
 0x6ad   : > { %13640 = vmatpush1.bf16.msra.mxu0 %v18382_v7  ;;  %13601 = vmatpush1.bf16.msra.mxu1 %v18385_v35  ;;  %v18403_v7 = vld [vmem:[%s25160_s6 + $0x168] ss:$12 sps:$4 sm:$0xff]   ;;  %v23781_v35 = vpop.f32.mrf.mxu0  ;;  %v17064_v33 = vadd.f32 %v17063_v11, %v23711_v1 }
 0x6ae   : > { %v23727_v37 = vpop.f32.mrf.mxu1  ;;  %13641 = vmatprep.subr.bf16.mxu0 %v18390_v32  ;;  %13602 = vmatprep.subr.bf16.mxu1 %v18393_v56  ;;  %v18406_v32 = vld [vmem:[%s25160_s6 + $0x2e8] ss:$12 sps:$4 sm:$0xff]   ;;  %25324 = vst [vmem:[#allocation11_spill] sm:$0xff] %v23781_v35 }
 0x6af   : > { %v10983_v35 = vadd.f32 %v17064_v33, %v23577_v50 }
 0x6b0   : > { %v23734_v45 = vpop.f32.mrf.mxu1 }
 0x6b1   : > { %13642 = vmatpush1.bf16.msra.mxu0 %v18388_v59  ;;  %13603 = vmatpush1.bf16.msra.mxu1 %v18391_v25  ;;  %v17067_v11 = vadd.f32 %v23734_v45, %v23727_v37 }
 0x6b2   : > { %v17068_v28 = vpop.f32.mrf.mxu1  ;;  %13643 = vmatprep.subr.bf16.mxu0 %v18396_v41  ;;  %13604 = vmatprep.subr.bf16.mxu1 %v18399_v61  ;;  %v23783_v41 = vpop.f32.mrf.mxu0 }
 0x6b3   : > { %25325 = vst [vmem:[#allocation8_spill] sm:$0xff] %v23783_v41 }
 0x6b4   : > { %v17069_v42 = vpop.f32.mrf.mxu1 }
 0x6b5   : > { %13644 = vmatpush1.bf16.msra.mxu0 %v18394_v57  ;;  %13605 = vmatpush1.bf16.msra.mxu1 %v18397_v36  ;;  %v17070_v36 = vadd.f32 %v17069_v42, %v17068_v28 }
 0x6b6   : > { %v17071_v39 = vpop.f32.mrf.mxu1  ;;  %13645 = vmatprep.subr.bf16.mxu0 %v18402_v52  ;;  %13606 = vmatprep.subr.bf16.mxu1 %v18405_v53 }
 0x6b7   : > { %v10991_v24 = vadd.f32 %v17070_v36, %v23587_v5 }
 0x6b8   : > { %v17072_v51 = vpop.f32.mrf.mxu1 }
 0x6b9   : > { %13646 = vmatpush1.bf16.msra.mxu0 %v18400_v14  ;;  %13607 = vmatpush2.bf16.msra.mxu1 %v18403_v7 }
 0x6ba   : > { %v17074_v40 = vpop.f32.mrf.mxu1  ;;  %13647 = vmatprep.subr.bf16.mxu0 %v18408_v16  ;;  %v17073_v16 = vadd.f32 %v17072_v51, %v17071_v39 }
 0x6bc   : > { %v17075_v6 = vpop.f32.mrf.mxu1  ;;  %v10994_v5 = vadd.f32 %v17073_v16, %v23593_v54 }
 0x6bd   : > { %13648 = vmatpush2.bf16.msra.mxu0 %v18406_v32  ;;  %v17018_v32 = vadd.f32 %v23590_v43, %v23584_v63  ;;  %v17076_v42 = vadd.f32 %v17075_v6, %v17074_v40  ;;  %v17021_v63 = vadd.f32 %v23602_v4, %v23596_v49 }
 0x6be   : > { %v17077_v59 = vpop.f32.mrf.mxu1 }
 0x6bf   : > { %v10910_v1 = vadd.f32 %v17018_v32, %v23608_v22  ;;  %v10999_v6 = vadd.f32 %v17076_v42, %v23599_v34  ;;  %v10913_v37 = vadd.f32 %v17021_v63, %v23613_v46 }
 0x6c0   : > { %v17078_v56 = vpop.f32.mrf.mxu1 }
 0x6c1   : > { %v17379_v57 = vpop.f32.mrf.mxu0  ;;  %v17079_v45 = vadd.f32 %v17078_v56, %v17077_v59 }
 0x6c2   : > { %v17080_v25 = vpop.f32.mrf.mxu1  ;;  %v11088_v41 = vadd.f32 %v17379_v57, %v10991_v24 }
 0x6c3   : > { %v11079_v14 = vpop.f32.mrf.mxu0  ;;  %v11002_v32 = vadd.f32 %v17079_v45, %v23605_v62 }
 0x6c4   : > { %v17081_v61 = vpop.f32.mrf.mxu1  ;;  %v11080_v39 = vadd.f32 %v11079_v14, %v10983_v35  ;;  %v11160_v33 = vmul.f32 0.01, %v11088_v41  ;;  %vm11144_vm10 = vcmp.gt.f32.partialorder %v11088_v41, 0.0  ;;  %v10986_v35 = vadd.f32 %v17067_v11, %v23581_v29 }
 0x6c5   : > { %v17380_v15 = vpop.f32.mrf.mxu0  ;;  %v17082_v31 = vadd.f32 %v17081_v61, %v17080_v25 }
 0x6c6   : > { %v17083_v52 = vpop.f32.mrf.mxu1  ;;  %v11091_v50 = vadd.f32 %v17380_v15, %v10994_v5  ;;  %v11158_v54 = vmul.f32 0.01, %v11080_v39  ;;  %vm11142_vm12 = vcmp.gt.f32.partialorder %v11080_v39, 0.0 }
 0x6c7   : > { %v11082_v51 = vpop.f32.mrf.mxu0  ;;  %v11007_v24 = vadd.f32 %v17082_v31, %v10910_v1 }
 0x6c8   : > { %v17084_v53 = vpop.f32.mrf.mxu1  ;;  %v11161_v15 = vmul.f32 0.01, %v11091_v50  ;;  %v11083_v14 = vadd.f32 %v11082_v51, %v10986_v35  ;;  %vm11145_vm14 = vcmp.gt.f32.partialorder %v11091_v50, 0.0 }
 0x6c9   : > { %v17085_v43 = vadd.f32 %v17084_v53, %v17083_v52  ;;  %v23807_v52 = vsel %vm11144_vm10, %v11088_v41, %v11160_v33  ;;  %v23814_v41 = vsel %vm11142_vm12, %v11080_v39, %v11158_v54  ;;  %vm23884_vm12 = vmand %vm11203_vm2, %vm11204_vm6 }
 0x6ca   : > { %v23786_v20 = vpop.f32.mrf.mxu1  ;;  %v11159_v5 = vmul.f32 0.01, %v11083_v14  ;;  %vm11143_vm0 = vcmp.gt.f32.partialorder %v11083_v14, 0.0 }
 0x6cb   : > { %v11010_v31 = vadd.f32 %v17085_v43, %v10913_v37 }
 0x6cc   : > { %v23789_v7 = vpop.f32.mrf.mxu1 }
 0x6ce   : > { %v23794_v28 = vpop.f32.mrf.mxu1 }
 0x6d0   : > { %v23800_v36 = vpop.f32.mrf.mxu1 }
 0x6d1   : > { %v17383_v40 = vpop.f32.mrf.mxu0 }
 0x6d2   : > { %v17092_v25 = vpop.f32.mrf.mxu1  ;;  %v11104_v22 = vadd.f32 %v17383_v40, %v11007_v24  ;;  %v23820_v24 = vsel %vm11145_vm14, %v11091_v50, %v11161_v15  ;;  %vm11232_vm14 = vcmask 1040896  }
 0x6d3   : > { %v11095_v61 = vpop.f32.mrf.mxu0 }
 0x6d4   : > { %v17093_v57 = vpop.f32.mrf.mxu1  ;;  %vm11148_vm11 = vcmp.gt.f32.partialorder %v11104_v22, 0.0  ;;  %v11164_v49 = vmul.f32 0.01, %v11104_v22  ;;  %v11096_v4 = vadd.f32 %v11095_v61, %v10999_v6 }
 0x6d5   : > { %v17384_v16 = vpop.f32.mrf.mxu0 }
 0x6d6   : > { %v17095_v53 = vpop.f32.mrf.mxu1  ;;  %v23809_v34 = vsel %vm11148_vm11, %v11104_v22, %v11164_v49  ;;  %vm11146_vm13 = vcmp.gt.f32.partialorder %v11096_v4, 0.0  ;;  %v11162_v46 = vmul.f32 0.01, %v11096_v4  ;;  %v11107_v59 = vadd.f32 %v17384_v16, %v11010_v31 }
 0x6d7   : > { %v11192_v29 = vmax.f32 %v23807_v52, %v23809_v34  ;;  %v11098_v42 = vpop.f32.mrf.mxu0  ;;  %v23826_v22 = vsel %vm11143_vm0, %v11083_v14, %v11159_v5  ;;  %v16978_v49 = vadd.f32 %v23682_v44, %v23672_v0  ;;  %v17094_v31 = vadd.f32 %v17093_v57, %v17092_v25  ;;  %v25328_v5 = vld [vmem:[#allocation32_spill] sm:$0xff] }
 0x6d8   : > { %v17096_v56 = vpop.f32.mrf.mxu1  ;;  %v23816_v1 = vsel %vm11146_vm13, %v11096_v4, %v11162_v46  ;;  %vm11149_vm15 = vcmp.gt.f32.partialorder %v11107_v59, 0.0  ;;  %v11165_v11 = vmul.f32 0.01, %v11107_v59  ;;  %v11099_v63 = vadd.f32 %v11098_v42, %v11002_v32 }
 0x6d9   : > { %v11190_v51 = vmax.f32 %v23814_v41, %v23816_v1  ;;  %v17030_v4 = vadd.f32 %v23635_v2, %v23630_v47  ;;  %v11213_v14 = vlaneseq  ;;  %v17024_v16 = vadd.f32 %v23615_v18, %v23610_v13 }
 0x6da   : > { %v17098_v43 = vpop.f32.mrf.mxu1  ;;  %v23822_v33 = vsel %vm11149_vm15, %v11107_v59, %v11165_v11  ;;  %vm11147_vm1 = vcmp.gt.f32.partialorder %v11099_v63, 0.0  ;;  %v11163_v39 = vmul.f32 0.01, %v11099_v63  ;;  %v17027_v46 = vadd.f32 %v23625_v12, %v23620_v10  ;;  %vm24049_vm15 = vmand %vm11232_vm14, %vm11204_vm6 }
 0x6db   : > { %v11193_v62 = vmax.f32 %v23820_v24, %v23822_v33  ;;  %v17088_v59 = vadd.f32 %v23789_v7, %v23786_v20  ;;  %v10926_v32 = vadd.f32 %v17030_v4, %v23628_v58  ;;  %v17033_v0 = vadd.f32 %v23680_v9, %v23661_v48 }
 0x6dc   : > { %v17099_v40 = vpop.f32.mrf.mxu1  ;;  %v23828_v6 = vsel %vm11147_vm1, %v11099_v63, %v11163_v39  ;;  %v10845_v47 = vadd.f32 %v16978_v49, %v23570_v38  ;;  %v16981_v2 = vadd.f32 %v23700_v27, %v23693_v26  ;;  %v18908_v44 = vmov 1966171168  }
 0x6dd   : > { %v11191_v45 = vmax.f32 %v23826_v22, %v23828_v6  ;;  %v23848_v25 = vunpack.c.l.s4 %v18908_v44  ;;  %v17036_v13 = vadd.f32 %v23716_v23, %v23698_v3  ;;  %v17097_v18 = vadd.f32 %v17096_v56, %v17095_v53  ;;  %v25327_v56 = vld [vmem:[#allocation8_spill] sm:$0xff] }
 0x6de   : > { %v17101_v37 = vpop.f32.mrf.mxu1  ;;  %v11023_v10 = vadd.f32 %v17094_v31, %v10926_v32  ;;  %v10918_v20 = vadd.f32 %v17024_v16, %v23618_v17  ;;  %v17039_v58 = vadd.f32 %v23748_v8, %v23732_v55  ;;  %v17042_v38 = vadd.f32 %v23773_v30, %v23759_v19  ;;  %v25326_v8 = vld [vmem:[#allocation11_spill] sm:$0xff] }
 0x6df   : > { %v23857_v9 = vshrl.u32 %v11213_v14, 7  ;;  %v17091_v26 = vadd.f32 %v23800_v36, %v23794_v28  ;;  %v10929_v3 = vadd.f32 %v17033_v0, %v23633_v21  ;;  %v10848_v17 = vadd.f32 %v16981_v2, %v23573_v60 }
 0x6e0   : > { %v17102_v54 = vpop.f32.mrf.mxu1  ;;  %v11015_v7 = vadd.f32 %v17088_v59, %v10918_v20  ;;  %v17100_v57 = vadd.f32 %v17099_v40, %v17098_v43  ;;  %v10942_v53 = vadd.f32 %v17042_v38, %v10845_v47  ;;  %v11212_v55 = vunpack.c.0.s8 %v23848_v25 }
 0x6e1   : > { %v17387_v35 = vpop.f32.mrf.mxu0  ;;  %v17045_v19 = vadd.f32 %v25327_v56, %v25326_v8  ;;  %v11026_v11 = vadd.f32 %v17097_v18, %v10929_v3  ;;  %v10921_v63 = vadd.f32 %v17027_v46, %v25328_v5  ;;  %v17103_v21 = vadd.f32 %v17102_v54, %v17101_v37  ;;  %v25330_v46 = vld [vmem:[#allocation10_spill] sm:$0xff] }
 0x6e2   : > { %v17104_v50 = vpop.f32.mrf.mxu1  ;;  %v11120_v27 = vadd.f32 %v17387_v35, %v11023_v10  ;;  %v10937_v59 = vadd.f32 %v17039_v58, %v25330_v46  ;;  %v18409_v3 = vld [vmem:[%s25160_s6 + $0x150] ss:$12 sps:$4 sm:$0xff]   ;;  %v18414_v56 = vld [vmem:[%s25160_s6 + $0x2d4] ss:$12 sps:$4 sm:$0xff]   ;;  %v11416_v46 = vld [vmem:[#allocation3 + $0x9] sm:$0x1] }
 0x6e3   : > { %v11111_v15 = vpop.f32.mrf.mxu0  ;;  %v11018_v43 = vadd.f32 %v17091_v26, %v10921_v63  ;;  %v10945_v31 = vadd.f32 %v17045_v19, %v10848_v17  ;;  %v18412_v8 = vld [vmem:[%s25160_s6 + $0x2d0] ss:$12 sps:$4 sm:$0xff]   ;;  %v11378_v19 = vld [vmem:[#allocation3 + $0x8] sm:$0x1]  ;;  %13649 = vmatprep.subr.bf16.mxu0 %v18414_v56  ;;  %v11363_v56 = vld [vmem:[#allocation3 + $0x7] sm:$0x1] }
 0x6e4   : > { %v17105_v61 = vpop.f32.mrf.mxu1  ;;  %v11112_v30 = vadd.f32 %v11111_v15, %v11015_v7  ;;  %vm11152_vm3 = vcmp.gt.f32.partialorder %v11120_v27, 0.0  ;;  %v11034_v2 = vadd.f32 %v17103_v21, %v10937_v59  ;;  %13650 = vmatpush2.bf16.msra.mxu0 %v18412_v8  ;;  %v18418_v21 = vld [vmem:[%s25160_s6 + $0x2b8] ss:$12 sps:$4 sm:$0xff]   ;;  %vm18909_vm0 = vmmov 0  }
 0x6e5   : > { %v17388_v12 = vpop.f32.mrf.mxu0  ;;  %v17106_v48 = vadd.f32 %v17105_v61, %v17104_v50  ;;  %v25329_v50 = vld [vmem:[#allocation33_spill] sm:$0xff]  ;;  %v11168_v61 = vmul.f32 0.01, %v11120_v27  ;;  %vm14699_vm6 = vcmask 73728  }
 0x6e6   : > { %v17107_v42 = vpop.f32.mrf.mxu1  ;;  %v10934_v35 = vadd.f32 %v17036_v13, %v25329_v50  ;;  %v11123_v60 = vadd.f32 %v17388_v12, %v11026_v11  ;;  %vm11150_vm4 = vcmp.gt.f32.partialorder %v11112_v30, 0.0  ;;  %v11166_v15 = vmul.f32 0.01, %v11112_v30 }
 0x6e7   : > { %v11114_v39 = vpop.f32.mrf.mxu0  ;;  %v11039_v36 = vadd.f32 %v17106_v48, %v10942_v53  ;;  %v11184_v47 = vsel %vm11152_vm3, %v11120_v27, %v11168_v61  ;;  %v23874_v27 = vsub.s32 %v11212_v55, %v23857_v9  ;;  %v18420_v61 = vld [vmem:[%s25160_s6 + $0x2bc] ss:$12 sps:$4 sm:$0xff]   ;;  %v18439_v53 = vld [vmem:[%s25160_s6 + $0xd8] ss:$12 sps:$4 sm:$0xff]  }
 0x6e8   : > { %v17108_v23 = vpop.f32.mrf.mxu1  ;;  %v11031_v4 = vadd.f32 %v17100_v57, %v10934_v35  ;;  %v11115_v14 = vadd.f32 %v11114_v39, %v11018_v43  ;;  %v11169_v37 = vmul.f32 0.01, %v11123_v60  ;;  %v11182_v18 = vsel %vm11150_vm4, %v11112_v30, %v11166_v15  ;;  %v18415_v39 = vld [vmem:[%s25160_s6 + $0x138] ss:$12 sps:$4 sm:$0xff]   ;;  %13651 = vmatprep.subr.bf16.mxu0 %v18420_v61 }
 0x6e9   : > { %v17109_v28 = vadd.f32 %v17108_v23, %v17107_v42  ;;  %vm11153_vm8 = vcmp.gt.f32.partialorder %v11123_v60, 0.0  ;;  %v18411_v23 = vld [vmem:[%s25160_s6 + $0x154] ss:$12 sps:$4 sm:$0xff]   ;;  %13652 = vmatpush2.bf16.msra.mxu0 %v18418_v21  ;;  %v18444_v21 = vld [vmem:[%s25160_s6 + $0x25c] ss:$12 sps:$4 sm:$0xff]  }
 0x6ea   : > { %v11167_v10 = vmul.f32 0.01, %v11115_v14  ;;  %vm11151_vm11 = vcmp.gt.f32.partialorder %v11115_v14, 0.0  ;;  %v11185_v17 = vsel %vm11153_vm8, %v11123_v60, %v11169_v37  ;;  %13608 = vmatprep.subr.bf16.mxu1 %v18411_v23  ;;  %v18426_v37 = vld [vmem:[%s25160_s6 + $0x2a4] ss:$12 sps:$4 sm:$0xff]  }
 0x6eb   : > { %v11042_v0 = vadd.f32 %v17109_v28, %v10945_v31  ;;  %13609 = vmatpush2.bf16.msra.mxu1 %v18409_v3  ;;  %v18417_v28 = vld [vmem:[%s25160_s6 + $0x13c] ss:$12 sps:$4 sm:$0xff]   ;;  %v18423_v31 = vld [vmem:[%s25160_s6 + $0x124] ss:$12 sps:$4 sm:$0xff]   ;;  %13653 = vmatprep.subr.bf16.mxu0 %v18426_v37 }
 0x6ec   : > { %v11183_v30 = vsel %vm11151_vm11, %v11115_v14, %v11167_v10  ;;  %13610 = vmatprep.subr.bf16.mxu1 %v18417_v28  ;;  %v11246_v14 = vld [vmem:[#allocation3 + $0x1] sm:$0x1]  ;;  %v11331_v3 = vld [vmem:[#allocation3 + $0x5] sm:$0x1]  ;;  %v11347_v23 = vld [vmem:[#allocation3 + $0x6] sm:$0x1] }
 0x6ef   : > { %13611 = vmatpush2.bf16.msra.mxu1 %v18415_v39 }
 0x6f0   : > { %13612 = vmatprep.subr.bf16.mxu1 %v18423_v31  ;;  %v18457_v31 = vld [vmem:[%s25160_s6 + $0x52c] ss:$12 sps:$4 sm:$0xff]  }
 0x6f1   : > { %v17391_v40 = vpop.f32.mrf.mxu0 }
 0x6f2   : > { %v11136_v49 = vadd.f32 %v17391_v40, %v11039_v36  ;;  %v11463_v36 = vld [vmem:[#allocation3 + $0xc] sm:$0x1] }
 0x6f3   : > { %v11127_v16 = vpop.f32.mrf.mxu0 }
 0x6f4   : > { %vm11156_vm5 = vcmp.gt.f32.partialorder %v11136_v49, 0.0  ;;  %v11172_v32 = vmul.f32 0.01, %v11136_v49  ;;  %v11128_v42 = vadd.f32 %v11127_v16, %v11031_v4  ;;  %v18421_v4 = vld [vmem:[%s25160_s6 + $0x120] ss:$12 sps:$4 sm:$0xff]  }
 0x6f5   : > { %v17392_v54 = vpop.f32.mrf.mxu0  ;;  %v11262_v16 = vld [vmem:[#allocation3 + $0x2] sm:$0x1]  ;;  %13613 = vmatpush2.bf16.msra.mxu1 %v18421_v4  ;;  %v18453_v4 = vld [vmem:[%s25160_s6 + $0x3ac] ss:$12 sps:$4 sm:$0xff]  }
 0x6f6   : > { %v11188_v44 = vsel %vm11156_vm5, %v11136_v49, %v11172_v32  ;;  %vm11154_vm7 = vcmp.gt.f32.partialorder %v11128_v42, 0.0  ;;  %v11170_v25 = vmul.f32 0.01, %v11128_v42  ;;  %v11139_v13 = vadd.f32 %v17392_v54, %v11042_v0  ;;  %v11293_v49 = vld [vmem:[#allocation3 + $0x4] sm:$0x1] }
 0x6f7   : > { %v11196_v20 = vmax.f32 %v11184_v47, %v11188_v44  ;;  %v11130_v12 = vpop.f32.mrf.mxu0  ;;  %v18424_v47 = vld [vmem:[%s25160_s6 + $0x2a0] ss:$12 sps:$4 sm:$0xff]  }
 0x6f8   : > { %v11186_v58 = vsel %vm11154_vm7, %v11128_v42, %v11170_v25  ;;  %vm11157_vm10 = vcmp.gt.f32.partialorder %v11139_v13, 0.0  ;;  %v11173_v38 = vmul.f32 0.01, %v11139_v13  ;;  %v11131_v48 = vadd.f32 %v11130_v12, %v11034_v2  ;;  %v11278_v44 = vld [vmem:[#allocation3 + $0x3] sm:$0x1]  ;;  %13654 = vmatpush2.bf16.msra.mxu0 %v18424_v47 }
 0x6f9   : > { %v11200_v26 = vmax.f32 %v11192_v29, %v11196_v20  ;;  %v11194_v7 = vmax.f32 %v11182_v18, %v11186_v58  ;;  %v11448_v18 = vld [vmem:[#allocation3 + $0xb] sm:$0x1] }
 0x6fa   : > { %v11189_v57 = vsel %vm11157_vm10, %v11139_v13, %v11173_v38  ;;  %vm11155_vm13 = vcmp.gt.f32.partialorder %v11131_v48, 0.0  ;;  %v11171_v52 = vmul.f32 0.01, %v11131_v48  ;;  %v11432_v13 = vld [vmem:[#allocation3 + $0xa] sm:$0x1] }
 0x6fb   : > { %v11377_v34 = vpack.c.bf16 %v11200_v26, %v11200_v26  ;;  %v11198_v29 = vmax.f32 %v11190_v51, %v11194_v7  ;;  %v11197_v55 = vmax.f32 %v11185_v17, %v11189_v57  ;;  %v11206_v51 = vld [vmem:[#allocation3] sm:$0x1]  ;;  %v18427_v58 = vld [vmem:[%s25160_s6 + $0x108] ss:$12 sps:$4 sm:$0xff]   ;;  %v18429_v38 = vld [vmem:[%s25160_s6 + $0x10c] ss:$12 sps:$4 sm:$0xff]  }
 0x6fc   : > { %v11187_v11 = vsel %vm11155_vm13, %v11131_v48, %v11171_v52  ;;  %13614 = vmatprep.subr.bf16.mxu1 %v18429_v38 }
 0x6fd   : > { %v11388_v5 = vrot.slane %v11377_v34, %v23874_v27  ;;  %v11202_v63 = vpack.c.bf16 %v11198_v29, %v11198_v29  ;;  %v11201_v41 = vmax.f32 %v11193_v62, %v11197_v55  ;;  %v11195_v1 = vmax.f32 %v11183_v30, %v11187_v11  ;;  %v18432_v29 = vld [vmem:[%s25160_s6 + $0x28c] ss:$12 sps:$4 sm:$0xff]   ;;  %13615 = vmatpush2.bf16.msra.mxu1 %v18427_v58 }
 0x6fe   : > { %v11379_v50 = vsel %vm23884_vm12, %v11377_v34, %v11378_v19  ;;  %v18430_v34 = vld [vmem:[%s25160_s6 + $0x288] ss:$12 sps:$4 sm:$0xff]   ;;  %13655 = vmatprep.subr.bf16.mxu0 %v18432_v29 }
 0x6ff   : > { %v11407_v35 = vcombine.high %v11388_v5, %v11388_v5  ;;  %v11216_v24 = vrot.slane %v11202_v63, %v23874_v27  ;;  %v11462_v33 = vpack.c.bf16 %v11201_v41, %v11201_v41  ;;  %v11199_v62 = vmax.f32 %v11191_v45, %v11195_v1  ;;  %11380 = vst [vmem:[#allocation3 + $0x8] sm:$0x1] %v11379_v50  ;;  %v18433_v41 = vld [vmem:[%s25160_s6 + $0xf0] ss:$12 sps:$4 sm:$0xff]   ;;  %v18435_v1 = vld [vmem:[%s25160_s6 + $0xf4] ss:$12 sps:$4 sm:$0xff]  }
 0x700   : > { %v23921_v60 = vrot.slane %v11388_v5, %v23874_v27  ;;  %v11207_v43 = vsel %vm23884_vm12, %v11202_v63, %v11206_v51  ;;  %13656 = vmatpush2.bf16.msra.mxu0 %v18430_v34  ;;  %13616 = vmatprep.subr.bf16.mxu1 %v18435_v1  ;;  %v18438_v50 = vld [vmem:[%s25160_s6 + $0x274] ss:$12 sps:$4 sm:$0xff]  }
 0x701   : > { %v11237_v40 = vcombine.high %v11216_v24, %v11216_v24  ;;  %v11464_v22 = vsel %vm23884_vm12, %v11462_v33, %v11463_v36  ;;  %v11292_v6 = vpack.c.bf16 %v11199_v62, %v11199_v62  ;;  %v11223_v45 = vrot.slane %v11216_v24, %v23874_v27  ;;  %11208 = vst [vmem:[#allocation3] sm:$0x1] %v11207_v43  ;;  %v18436_v36 = vld [vmem:[%s25160_s6 + $0x270] ss:$12 sps:$4 sm:$0xff]   ;;  %v18442_v62 = vld [vmem:[%s25160_s6 + $0x258] ss:$12 sps:$4 sm:$0xff]  }
 0x702   : > { %11465 = vst [vmem:[#allocation3 + $0xc] sm:$0x1] %v11464_v22  ;;  %v23935_v15 = vrot.slane %v11407_v35, %v23874_v27  ;;  %v23947_v54 = vcombine.high %v23921_v60, %v23921_v60  ;;  %13617 = vmatpush2.bf16.msra.mxu1 %v18433_v41  ;;  %13657 = vmatprep.subr.bf16.mxu0 %v18438_v50  ;;  %v18441_v24 = vld [vmem:[%s25160_s6 + $0xdc] ss:$12 sps:$4 sm:$0xff]   ;;  %v18445_v43 = vld [vmem:[%s25160_s6 + $0xc0] ss:$12 sps:$4 sm:$0xff]  }
 0x703   : > { %v11303_v59 = vrot.slane %v11292_v6, %v23874_v27  ;;  %v11225_v32 = vshrl.u32 %v11223_v45, 16  ;;  %v11244_v42 = vrot.slane %v11237_v40, %v23874_v27  ;;  %v11260_v0 = vcombine.high %v11223_v45, %v11223_v45  ;;  %13618 = vmatprep.subr.bf16.mxu1 %v18441_v24  ;;  %v18447_v40 = vld [vmem:[%s25160_s6 + $0xc4] ss:$12 sps:$4 sm:$0xff]   ;;  %v18448_v45 = vld [vmem:[%s25160_s6 + $0x240] ss:$12 sps:$4 sm:$0xff]  }
 0x704   : > { %v23951_v2 = vcombine.high %v23935_v15, %v23935_v15  ;;  %v11294_v25 = vsel %vm23884_vm12, %v11292_v6, %v11293_v49  ;;  %v11417_v55 = vsel %vm23884_vm12, %v23935_v15, %v11416_v46  ;;  %v11433_v19 = vsel %vm23884_vm12, %v23947_v54, %v11432_v13  ;;  %13658 = vmatpush2.bf16.msra.mxu0 %v18436_v36  ;;  %v18450_v22 = vld [vmem:[%s25160_s6 + $0x244] ss:$12 sps:$4 sm:$0xff]   ;;  %v18451_v50 = vld [vmem:[%s25160_s6 + $0x3a8] ss:$12 sps:$4 sm:$0xff]  }
 0x705   : > { %v11322_v10 = vcombine.high %v11303_v59, %v11303_v59  ;;  %11229 = vrot.lane.b32.xlu0 %v11225_v32, %s25333_s17  ;;  %v11250_v20 = vshrl.u32 %v11244_v42, 16  ;;  %v11276_v12 = vcombine.high %v11244_v42, %v11244_v42  ;;  %11295 = vst [vmem:[#allocation3 + $0x4] sm:$0x1] %v11294_v25  ;;  %v11310_v48 = vrot.slane %v11303_v59, %v23874_v27 }
 0x706   : > { %v11247_v26 = vsel %vm23884_vm12, %v11244_v42, %v11246_v14  ;;  %v11263_v7 = vsel %vm23884_vm12, %v11260_v0, %v11262_v16  ;;  %v11266_v17 = vshrl.u32 %v11260_v0, 16  ;;  %11418 = vst [vmem:[#allocation3 + $0x9] sm:$0x1] %v11417_v55  ;;  %v11449_v30 = vsel %vm23884_vm12, %v23951_v2, %v11448_v18  ;;  %11434 = vst [vmem:[#allocation3 + $0xa] sm:$0x1] %v11433_v19 }
 0x707   : > { %11254 = vrot.lane.b32.xlu1 %v11250_v20, %s25333_s17  ;;  %v11329_v57 = vrot.slane %v11322_v10, %v23874_v27  ;;  %11248 = vst [vmem:[#allocation3 + $0x1] sm:$0x1] %v11247_v26  ;;  %11264 = vst [vmem:[#allocation3 + $0x2] sm:$0x1] %v11263_v7  ;;  %v11279_v52 = vsel %vm23884_vm12, %v11276_v12, %v11278_v44  ;;  %v11345_v8 = vcombine.high %v11310_v48, %v11310_v48 }
 0x708   : > { %11280 = vst [vmem:[#allocation3 + $0x3] sm:$0x1] %v11279_v52  ;;  %v11282_v11 = vshrl.u32 %v11276_v12, 16  ;;  %11450 = vst [vmem:[#allocation3 + $0xb] sm:$0x1] %v11449_v30  ;;  %v11312_v39 = vshrl.u32 %v11310_v48, 16  ;;  %13619 = vmatpush2.bf16.msra.mxu1 %v18439_v53  ;;  %13659 = vmatprep.subr.bf16.mxu0 %v18444_v21 }
 0x709   : > { %11270 = vrot.lane.b32.xlu0 %v11266_v17, %s25333_s17  ;;  %v11361_v5 = vcombine.high %v11329_v57, %v11329_v57  ;;  %v11332_v63 = vsel %vm23884_vm12, %v11329_v57, %v11331_v3  ;;  %v11348_v51 = vsel %vm23884_vm12, %v11345_v8, %v11347_v23  ;;  %v11335_v35 = vshrl.u32 %v11329_v57, 16  ;;  %13660 = vmatpush2.bf16.msra.mxu0 %v18442_v62  ;;  %v11234_v46 = vld [vmem:[#allocation3] sm:$0x1]  ;;  %v11404_v17 = vld [vmem:[#allocation3 + $0x8] sm:$0x1] }
 0x70a   : > { %11333 = vst [vmem:[#allocation3 + $0x5] sm:$0x1] %v11332_v63  ;;  %11349 = vst [vmem:[#allocation3 + $0x6] sm:$0x1] %v11348_v51  ;;  %v11351_v33 = vshrl.u32 %v11345_v8, 16  ;;  %v11397_v6 = vshrl.u32 %v23921_v60, 16  ;;  %13620 = vmatprep.subr.bf16.mxu1 %v18447_v40  ;;  %13661 = vmatprep.subr.bf16.mxu0 %v18450_v22 }
 0x70b   : > { %11286 = vrot.lane.b32.xlu1 %v11282_v11, %s25333_s17  ;;  %v11364_v28 = vsel %vm23884_vm12, %v11361_v5, %v11363_v56  ;;  %v11367_v61 = vshrl.u32 %v11361_v5, 16  ;;  %v11420_v49 = vshrl.u32 %v23935_v15, 16  ;;  %v11436_v60 = vshrl.u32 %v23947_v54, 16  ;;  %v18460_v62 = vld [vmem:[%s25160_s6 + $0x394] ss:$12 sps:$4 sm:$0xff]  }
 0x70c   : > { %11365 = vst [vmem:[#allocation3 + $0x7] sm:$0x1] %v11364_v28  ;;  %13621 = vmatpush2.bf16.msra.mxu1 %v18445_v43  ;;  %v11452_v14 = vshrl.u32 %v23951_v2, 16  ;;  %v11319_v13 = vld [vmem:[#allocation3 + $0x4] sm:$0x1] }
 0x70d   : > { %11316 = vrot.lane.b32.xlu0 %v11312_v39, %s25333_s17  ;;  %13662 = vmatpush2.bf16.msra.mxu0 %v18448_v45  ;;  %v11427_v34 = vld [vmem:[#allocation3 + $0x9] sm:$0x1]  ;;  %v11443_v8 = vld [vmem:[#allocation3 + $0xa] sm:$0x1]  ;;  %v18458_v43 = vld [vmem:[%s25160_s6 + $0x390] ss:$12 sps:$4 sm:$0xff]  }
 0x70e   : > { %13672 = vmatprep.subr.bf16.mxu1 %v18453_v4  ;;  %13713 = vmatprep.subr.bf16.mxu0 %v18457_v31  ;;  %v11257_v42 = vld [vmem:[#allocation3 + $0x1] sm:$0x1]  ;;  %v11273_v47 = vld [vmem:[#allocation3 + $0x2] sm:$0x1]  ;;  %v18466_v22 = vld [vmem:[%s25160_s6 + $0x37c] ss:$12 sps:$4 sm:$0xff]  }
 0x70f   : > { %11339 = vrot.lane.b32.xlu1 %v11335_v35, %s25333_s17  ;;  %v11289_v2 = vld [vmem:[#allocation3 + $0x3] sm:$0x1]  ;;  %v11459_v30 = vld [vmem:[#allocation3 + $0xb] sm:$0x1]  ;;  %v18472_v4 = vld [vmem:[%s25160_s6 + $0x364] ss:$12 sps:$4 sm:$0xff]  }
 0x710   : > { %v18469_v45 = vld [vmem:[%s25160_s6 + $0x4fc] ss:$12 sps:$4 sm:$0xff]   ;;  %v18475_v31 = vld [vmem:[%s25160_s6 + $0x4e4] ss:$12 sps:$4 sm:$0xff]   ;;  %v18478_v15 = vld [vmem:[%s25160_s6 + $0x34c] ss:$12 sps:$4 sm:$0xff]  }
 0x711   : > { %11355 = vrot.lane.b32.xlu0 %v11351_v33, %s25333_s17  ;;  %v11342_v20 = vld [vmem:[#allocation3 + $0x5] sm:$0x1]  ;;  %v11358_v38 = vld [vmem:[#allocation3 + $0x6] sm:$0x1]  ;;  %v18455_v33 = vld [vmem:[%s25160_s6 + $0x528] ss:$12 sps:$4 sm:$0xff]  }
 0x713   : > { %11371 = vrot.lane.b32.xlu1 %v11367_v61, %s25333_s17  ;;  %v11374_v7 = vld [vmem:[#allocation3 + $0x7] sm:$0x1]  ;;  %v18463_v61 = vld [vmem:[%s25160_s6 + $0x514] ss:$12 sps:$4 sm:$0xff]  }
 0x715   : > { %11401 = vrot.lane.b32.xlu0 %v11397_v6, %s25333_s17  ;;  %v18461_v6 = vld [vmem:[%s25160_s6 + $0x510] ss:$12 sps:$4 sm:$0xff]  }
 0x717   : > { %11424 = vrot.lane.b32.xlu1 %v11420_v49, %s25333_s17  ;;  %v18464_v49 = vld [vmem:[%s25160_s6 + $0x378] ss:$12 sps:$4 sm:$0xff]  }
 0x719   : > { %11440 = vrot.lane.b32.xlu0 %v11436_v60, %s25333_s17  ;;  %v18467_v60 = vld [vmem:[%s25160_s6 + $0x4f8] ss:$12 sps:$4 sm:$0xff]  }
 0x71b   : > { %11456 = vrot.lane.b32.xlu1 %v11452_v14, %s25333_s17  ;;  %v18470_v14 = vld [vmem:[%s25160_s6 + $0x360] ss:$12 sps:$4 sm:$0xff]   ;;  %s25113_s17 = scalar_lea.hbm %s25166_s12, %s16268_s26 }
 0x777   : > { %v11230_v16 = vpop.permute.xlu0 %11229 }
 0x778   : > { %v11235_v59 = vsel %vm24049_vm15, %v11230_v16, %v11234_v46  ;;  %v18473_v16 = vld [vmem:[%s25160_s6 + $0x4e0] ss:$12 sps:$4 sm:$0xff]  }
 0x779   : > { %11236 = vst [vmem:[#allocation3] sm:$0x1] %v11235_v59  ;;  %v11255_v32 = vpop.permute.xlu1 %11254  ;;  %v18481_v46 = vld [vmem:[%s25160_s6 + $0x4cc] ss:$12 sps:$4 sm:$0xff]   ;;  %v18476_v59 = vld [vmem:[%s25160_s6 + $0x348] ss:$12 sps:$4 sm:$0xff]  }
 0x77a   : > { %v11258_v0 = vsel %vm24049_vm15, %v11255_v32, %v11257_v42  ;;  %v18484_v32 = vld [vmem:[%s25160_s6 + $0x334] ss:$12 sps:$4 sm:$0xff]  }
 0x77b   : > { %11259 = vst [vmem:[#allocation3 + $0x1] sm:$0x1] %v11258_v0  ;;  %v11271_v37 = vpop.permute.xlu0 %11270  ;;  %v18479_v42 = vld [vmem:[%s25160_s6 + $0x4c8] ss:$12 sps:$4 sm:$0xff]  }
 0x77c   : > { %v11274_v54 = vsel %vm24049_vm15, %v11271_v37, %v11273_v47  ;;  %v18487_v0 = vld [vmem:[%s25160_s6 + $0x4b4] ss:$12 sps:$4 sm:$0xff]   ;;  %v18482_v47 = vld [vmem:[%s25160_s6 + $0x330] ss:$12 sps:$4 sm:$0xff]  }
 0x77d   : > { %11275 = vst [vmem:[#allocation3 + $0x2] sm:$0x1] %v11274_v54  ;;  %v11287_v44 = vpop.permute.xlu1 %11286  ;;  %v18490_v37 = vld [vmem:[%s25160_s6 + $0x31c] ss:$12 sps:$4 sm:$0xff]  }
 0x77e   : > { %v11290_v25 = vsel %vm24049_vm15, %v11287_v44, %v11289_v2  ;;  %v18485_v54 = vld [vmem:[%s25160_s6 + $0x4b0] ss:$12 sps:$4 sm:$0xff]   ;;  %v18488_v44 = vld [vmem:[%s25160_s6 + $0x318] ss:$12 sps:$4 sm:$0xff]  }
 0x77f   : > { %11291 = vst [vmem:[#allocation3 + $0x3] sm:$0x1] %v11290_v25  ;;  %v11317_v18 = vpop.permute.xlu0 %11316  ;;  %v18493_v2 = vld [vmem:[%s25160_s6 + $0x49c] ss:$12 sps:$4 sm:$0xff]   ;;  %v18496_v25 = vld [vmem:[%s25160_s6 + $0x304] ss:$12 sps:$4 sm:$0xff]  }
 0x780   : > { %v11320_v10 = vsel %vm24049_vm15, %v11317_v18, %v11319_v13  ;;  %v18491_v13 = vld [vmem:[%s25160_s6 + $0x498] ss:$12 sps:$4 sm:$0xff]  }
 0x781   : > { %11321 = vst [vmem:[#allocation3 + $0x4] sm:$0x1] %v11320_v10  ;;  %v11340_v12 = vpop.permute.xlu1 %11339  ;;  %v18499_v18 = vld [vmem:[%s25160_s6 + $0x484] ss:$12 sps:$4 sm:$0xff]   ;;  %v18494_v10 = vld [vmem:[%s25160_s6 + $0x300] ss:$12 sps:$4 sm:$0xff]  }
 0x782   : > { %v11343_v58 = vsel %vm24049_vm15, %v11340_v12, %v11342_v20  ;;  %v18502_v20 = vld [vmem:[%s25160_s6 + $0x46c] ss:$12 sps:$4 sm:$0xff]  }
 0x783   : > { %11344 = vst [vmem:[#allocation3 + $0x5] sm:$0x1] %v11343_v58  ;;  %v11356_v48 = vpop.permute.xlu0 %11355  ;;  %v18497_v12 = vld [vmem:[%s25160_s6 + $0x480] ss:$12 sps:$4 sm:$0xff]  }
 0x784   : > { %v11359_v26 = vsel %vm24049_vm15, %v11356_v48, %v11358_v38  ;;  %v18505_v58 = vld [vmem:[%s25160_s6 + $0x5ec] ss:$12 sps:$4 sm:$0xff]   ;;  %v18500_v38 = vld [vmem:[%s25160_s6 + $0x468] ss:$12 sps:$4 sm:$0xff]  }
 0x785   : > { %11360 = vst [vmem:[#allocation3 + $0x6] sm:$0x1] %v11359_v26  ;;  %v11372_v3 = vpop.permute.xlu1 %11371  ;;  %v18508_v48 = vld [vmem:[%s25160_s6 + $0x454] ss:$12 sps:$4 sm:$0xff]  }
 0x786   : > { %v11375_v23 = vsel %vm24049_vm15, %v11372_v3, %v11374_v7  ;;  %v18503_v26 = vld [vmem:[%s25160_s6 + $0x5e8] ss:$12 sps:$4 sm:$0xff]   ;;  %v18506_v3 = vld [vmem:[%s25160_s6 + $0x450] ss:$12 sps:$4 sm:$0xff]  }
 0x787   : > { %11376 = vst [vmem:[#allocation3 + $0x7] sm:$0x1] %v11375_v23  ;;  %v11402_v57 = vpop.permute.xlu0 %11401  ;;  %v18511_v7 = vld [vmem:[%s25160_s6 + $0x5d4] ss:$12 sps:$4 sm:$0xff]   ;;  %v18514_v23 = vld [vmem:[%s25160_s6 + $0x43c] ss:$12 sps:$4 sm:$0xff]  }
 0x788   : > { %v11405_v52 = vsel %vm24049_vm15, %v11402_v57, %v11404_v17  ;;  %v18509_v17 = vld [vmem:[%s25160_s6 + $0x5d0] ss:$12 sps:$4 sm:$0xff]  }
 0x789   : > { %11406 = vst [vmem:[#allocation3 + $0x8] sm:$0x1] %v11405_v52  ;;  %v11425_v29 = vpop.permute.xlu1 %11424  ;;  %v18517_v57 = vld [vmem:[%s25160_s6 + $0x5bc] ss:$12 sps:$4 sm:$0xff]   ;;  %v18512_v52 = vld [vmem:[%s25160_s6 + $0x438] ss:$12 sps:$4 sm:$0xff]  }
 0x78a   : > { %v11428_v55 = vsel %vm24049_vm15, %v11425_v29, %v11427_v34  ;;  %v18520_v34 = vld [vmem:[%s25160_s6 + $0x424] ss:$12 sps:$4 sm:$0xff]  }
 0x78b   : > { %11429 = vst [vmem:[#allocation3 + $0x9] sm:$0x1] %v11428_v55  ;;  %v11441_v56 = vpop.permute.xlu0 %11440  ;;  %v18515_v29 = vld [vmem:[%s25160_s6 + $0x5b8] ss:$12 sps:$4 sm:$0xff]  }
 0x78c   : > { %v11444_v19 = vsel %vm24049_vm15, %v11441_v56, %v11443_v8  ;;  %v18523_v55 = vld [vmem:[%s25160_s6 + $0x5a4] ss:$12 sps:$4 sm:$0xff]   ;;  %v18518_v8 = vld [vmem:[%s25160_s6 + $0x420] ss:$12 sps:$4 sm:$0xff]  }
 0x78d   : > { %11445 = vst [vmem:[#allocation3 + $0xa] sm:$0x1] %v11444_v19  ;;  %v11457_v11 = vpop.permute.xlu1 %11456  ;;  %v18526_v56 = vld [vmem:[%s25160_s6 + $0x40c] ss:$12 sps:$4 sm:$0xff]  }
 0x78e   : > { %v11460_v5 = vsel %vm24049_vm15, %v11457_v11, %v11459_v30  ;;  %v11466_v63 = vld [vmem:[#allocation3] sm:$0xff]  ;;  %v18529_v30 = vld [vmem:[%s25160_s6 + $0x58c] ss:$12 sps:$4 sm:$0xff]   ;;  %v18524_v11 = vld [vmem:[%s25160_s6 + $0x408] ss:$12 sps:$4 sm:$0xff]  }
 0x78f   : > { %11461 = vst [vmem:[#allocation3 + $0xb] sm:$0x1] %v11460_v5  ;;  %v11878_v41 = vrot.slane %v11466_v63, %v23874_v27  ;;  %v11871_v1 = vcombine.high %v11466_v63, %v11466_v63  ;;  %v18521_v19 = vld [vmem:[%s25160_s6 + $0x5a0] ss:$12 sps:$4 sm:$0xff]   ;;  %v18527_v63 = vld [vmem:[%s25160_s6 + $0x588] ss:$12 sps:$4 sm:$0xff]  }
 0x790   : > { %v18532_v5 = vld [vmem:[%s25160_s6 + $0x3f4] ss:$12 sps:$4 sm:$0xff]  }
 0x791   : > { %v11886_v51 = vcombine.high %v11878_v41, %v11878_v41  ;;  %v24079_v39 = vrot.slane %v11871_v1, %v23874_v27  ;;  %v24082_v28 = vrot.slane %v11878_v41, %v23874_v27  ;;  %v18535_v41 = vld [vmem:[%s25160_s6 + $0x574] ss:$12 sps:$4 sm:$0xff]   ;;  %v18530_v1 = vld [vmem:[%s25160_s6 + $0x3f0] ss:$12 sps:$4 sm:$0xff]  }
 0x793   : > { %v24085_v36 = vrot.slane %v11886_v51, %v23874_v27  ;;  %v11887_v35 = vcombine.high %v24079_v39, %v24079_v39  ;;  %v24108_v21 = vcombine.high %v24082_v28, %v24082_v28  ;;  %v18538_v51 = vld [vmem:[%s25160_s6 + $0x3dc] ss:$12 sps:$4 sm:$0xff]  }
 0x795   : > { %13622 = vmatprep.mubr.bf16.mxu1 %v24085_v36  ;;  %v24095_v53 = vcombine.high %v24085_v36, %v24085_v36  ;;  %v24098_v24 = vrot.slane %v11887_v35, %v23874_v27  ;;  %v18533_v35 = vld [vmem:[%s25160_s6 + $0x570] ss:$12 sps:$4 sm:$0xff]  }
 0x796   : > { %13623 = vmatmul.mubr.bf16.vlgmr.msra.gmra.mxu1 %v24082_v28 }
 0x797   : > { %13673 = vmatpush1.bf16.msra.mxu1 %v18451_v50  ;;  %13663 = vmatprep.mubr.bf16.mxu0 %v24095_v53  ;;  %v24120_v40 = vcombine.high %v24098_v24, %v24098_v24  ;;  %v24272_v50 = vld [vmem:[#allocation3 + $0x8] sm:$0x1f] }
 0x798   : > { %13704 = vmatprep.mubr.bf16.mxu1 %v24098_v24  ;;  %13664 = vmatmul.mubr.bf16.vlgmr.msra.gmra.mxu0 %v24108_v21 }
 0x799   : > { %13714 = vmatpush1.bf16.msra.mxu0 %v18455_v33  ;;  %13674 = vmatprep.subr.bf16.mxu1 %v18460_v62  ;;  %v18541_v33 = vld [vmem:[%s25160_s6 + $0x55c] ss:$12 sps:$4 sm:$0xff]   ;;  %v18536_v62 = vld [vmem:[%s25160_s6 + $0x3d8] ss:$12 sps:$4 sm:$0xff]  }
 0x79a   : > { %13745 = vmatprep.mubr.bf16.mxu0 %v24120_v40  ;;  %13715 = vmatprep.subr.bf16.mxu0 %v18463_v61  ;;  %v24285_v61 = vrot.slane %v24272_v50, %v23874_v27 }
 0x79b   : > { %13675 = vmatpush1.bf16.msra.mxu1 %v18458_v43  ;;  %v18544_v43 = vld [vmem:[%s25160_s6 + $0x3c4] ss:$12 sps:$4 sm:$0xff]  }
 0x79c   : > { %13676 = vmatprep.subr.bf16.mxu1 %v18466_v22  ;;  %v18539_v22 = vld [vmem:[%s25160_s6 + $0x558] ss:$12 sps:$4 sm:$0xff]  }
 0x79d   : > { %13716 = vmatpush1.bf16.msra.mxu0 %v18461_v6  ;;  %v18547_v6 = vld [vmem:[%s25160_s6 + $0x544] ss:$12 sps:$4 sm:$0xff]  }
 0x79e   : > { %13717 = vmatprep.subr.bf16.mxu0 %v18469_v45  ;;  %v18542_v45 = vld [vmem:[%s25160_s6 + $0x3c0] ss:$12 sps:$4 sm:$0xff]  }
 0x79f   : > { %13677 = vmatpush1.bf16.msra.mxu1 %v18464_v49  ;;  %v11935_v49 = vcombine.high %v24285_v61, %v24285_v61 }
 0x7a0   : > { %13678 = vmatprep.subr.bf16.mxu1 %v18472_v4  ;;  %v18550_v4 = vld [vmem:[%s25160_s6 + $0x6ac] ss:$12 sps:$4 sm:$0xff]  }
 0x7a1   : > { %13718 = vmatpush1.bf16.msra.mxu0 %v18467_v60  ;;  %v18545_v60 = vld [vmem:[%s25160_s6 + $0x540] ss:$12 sps:$4 sm:$0xff]  }
 0x7a2   : > { %13719 = vmatprep.subr.bf16.mxu0 %v18475_v31  ;;  %v24309_v31 = vrot.slane %v24079_v39, %v23874_v27  ;;  %v18552_v39 = vld [vmem:[%s25160_s6 + $0x828] ss:$12 sps:$4 sm:$0xff]  }
 0x7a3   : > { %13679 = vmatpush1.bf16.msra.mxu1 %v18470_v14  ;;  %v18554_v14 = vld [vmem:[%s25160_s6 + $0x82c] ss:$12 sps:$4 sm:$0xff]  }
 0x7a4   : > { %13680 = vmatprep.subr.bf16.mxu1 %v18478_v15  ;;  %v18548_v15 = vld [vmem:[%s25160_s6 + $0x6a8] ss:$12 sps:$4 sm:$0xff]  }
 0x7a5   : > { %13720 = vmatpush1.bf16.msra.mxu0 %v18473_v16  ;;  %v24318_v16 = vrot.slane %v11935_v49, %v23874_v27  ;;  %v18618_v49 = vld [vmem:[%s25160_s6 + $0x8a0] ss:$12 sps:$4 sm:$0xff]  }
 0x7a6   : > { %13721 = vmatprep.subr.bf16.mxu0 %v18481_v46  ;;  %v18557_v46 = vld [vmem:[%s25160_s6 + $0x694] ss:$12 sps:$4 sm:$0xff]  }
 0x7a7   : > { %13681 = vmatpush1.bf16.msra.mxu1 %v18476_v59  ;;  %v24329_v59 = vcombine.high %v24309_v31, %v24309_v31 }
 0x7a8   : > { %13682 = vmatprep.subr.bf16.mxu1 %v18484_v32  ;;  %v18560_v32 = vld [vmem:[%s25160_s6 + $0x814] ss:$12 sps:$4 sm:$0xff]  }
 0x7a9   : > { %13722 = vmatpush1.bf16.msra.mxu0 %v18479_v42  ;;  %v24337_v42 = vcombine.high %v24318_v16, %v24318_v16 }
 0x7aa   : > { %13723 = vmatprep.subr.bf16.mxu0 %v18487_v0  ;;  %v18555_v0 = vld [vmem:[%s25160_s6 + $0x690] ss:$12 sps:$4 sm:$0xff]  }
 0x7ab   : > { %13683 = vmatpush1.bf16.msra.mxu1 %v18482_v47  ;;  %v18563_v47 = vld [vmem:[%s25160_s6 + $0x67c] ss:$12 sps:$4 sm:$0xff]  }
 0x7ac   : > { %13684 = vmatprep.subr.bf16.mxu1 %v18490_v37  ;;  %v18558_v37 = vld [vmem:[%s25160_s6 + $0x810] ss:$12 sps:$4 sm:$0xff]  }
 0x7ad   : > { %13724 = vmatpush1.bf16.msra.mxu0 %v18485_v54  ;;  %v18566_v54 = vld [vmem:[%s25160_s6 + $0x7fc] ss:$12 sps:$4 sm:$0xff]  }
 0x7ae   : > { %13725 = vmatprep.subr.bf16.mxu0 %v18493_v2  ;;  %v18561_v2 = vld [vmem:[%s25160_s6 + $0x678] ss:$12 sps:$4 sm:$0xff]  }
 0x7af   : > { %13685 = vmatpush1.bf16.msra.mxu1 %v18488_v44  ;;  %v18569_v44 = vld [vmem:[%s25160_s6 + $0x664] ss:$12 sps:$4 sm:$0xff]  }
 0x7b0   : > { %13686 = vmatprep.subr.bf16.mxu1 %v18496_v25  ;;  %v18564_v25 = vld [vmem:[%s25160_s6 + $0x7f8] ss:$12 sps:$4 sm:$0xff]  }
 0x7b1   : > { %13726 = vmatpush1.bf16.msra.mxu0 %v18491_v13  ;;  %v18572_v13 = vld [vmem:[%s25160_s6 + $0x7e4] ss:$12 sps:$4 sm:$0xff]  }
 0x7b2   : > { %13727 = vmatprep.subr.bf16.mxu0 %v18499_v18  ;;  %v18567_v18 = vld [vmem:[%s25160_s6 + $0x660] ss:$12 sps:$4 sm:$0xff]  }
 0x7b3   : > { %13687 = vmatpush1.bf16.msra.mxu1 %v18494_v10  ;;  %v18575_v10 = vld [vmem:[%s25160_s6 + $0x64c] ss:$12 sps:$4 sm:$0xff]  }
 0x7b4   : > { %13688 = vmatprep.subr.bf16.mxu1 %v18502_v20  ;;  %v18570_v20 = vld [vmem:[%s25160_s6 + $0x7e0] ss:$12 sps:$4 sm:$0xff]  }
 0x7b5   : > { %13728 = vmatpush1.bf16.msra.mxu0 %v18497_v12  ;;  %v18578_v12 = vld [vmem:[%s25160_s6 + $0x7cc] ss:$12 sps:$4 sm:$0xff]  }
 0x7b6   : > { %13729 = vmatprep.subr.bf16.mxu0 %v18505_v58  ;;  %v18573_v58 = vld [vmem:[%s25160_s6 + $0x648] ss:$12 sps:$4 sm:$0xff]  }
 0x7b7   : > { %13689 = vmatpush2.bf16.msra.mxu1 %v18500_v38  ;;  %v18581_v38 = vld [vmem:[%s25160_s6 + $0x634] ss:$12 sps:$4 sm:$0xff]  }
 0x7b8   : > { %13690 = vmatprep.subr.bf16.mxu1 %v18508_v48  ;;  %v18576_v48 = vld [vmem:[%s25160_s6 + $0x7c8] ss:$12 sps:$4 sm:$0xff]  }
 0x7b9   : > { %13730 = vmatpush2.bf16.msra.mxu0 %v18503_v26  ;;  %v18584_v26 = vld [vmem:[%s25160_s6 + $0x7b4] ss:$12 sps:$4 sm:$0xff]  }
 0x7ba   : > { %13731 = vmatprep.subr.bf16.mxu0 %v18511_v7  ;;  %v18579_v7 = vld [vmem:[%s25160_s6 + $0x630] ss:$12 sps:$4 sm:$0xff]  }
 0x7bb   : > { %13691 = vmatpush2.bf16.msra.mxu1 %v18506_v3  ;;  %v18587_v3 = vld [vmem:[%s25160_s6 + $0x61c] ss:$12 sps:$4 sm:$0xff]  }
 0x7bc   : > { %13692 = vmatprep.subr.bf16.mxu1 %v18514_v23  ;;  %v18582_v23 = vld [vmem:[%s25160_s6 + $0x7b0] ss:$12 sps:$4 sm:$0xff]  }
 0x7bd   : > { %13732 = vmatpush2.bf16.msra.mxu0 %v18509_v17  ;;  %v18590_v17 = vld [vmem:[%s25160_s6 + $0x79c] ss:$12 sps:$4 sm:$0xff]  }
 0x7be   : > { %13733 = vmatprep.subr.bf16.mxu0 %v18517_v57  ;;  %v18585_v57 = vld [vmem:[%s25160_s6 + $0x618] ss:$12 sps:$4 sm:$0xff]  }
 0x7bf   : > { %13693 = vmatpush2.bf16.msra.mxu1 %v18512_v52  ;;  %v18593_v52 = vld [vmem:[%s25160_s6 + $0x604] ss:$12 sps:$4 sm:$0xff]  }
 0x7c0   : > { %13694 = vmatprep.subr.bf16.mxu1 %v18520_v34  ;;  %v18588_v34 = vld [vmem:[%s25160_s6 + $0x798] ss:$12 sps:$4 sm:$0xff]  }
 0x7c1   : > { %13734 = vmatpush2.bf16.msra.mxu0 %v18515_v29  ;;  %v18596_v29 = vld [vmem:[%s25160_s6 + $0x784] ss:$12 sps:$4 sm:$0xff]  }
 0x7c2   : > { %13735 = vmatprep.subr.bf16.mxu0 %v18523_v55  ;;  %v18591_v55 = vld [vmem:[%s25160_s6 + $0x600] ss:$12 sps:$4 sm:$0xff]  }
 0x7c3   : > { %13695 = vmatpush2.bf16.msra.mxu1 %v18518_v8  ;;  %v18599_v8 = vld [vmem:[%s25160_s6 + $0x76c] ss:$12 sps:$4 sm:$0xff]  }
 0x7c4   : > { %13696 = vmatprep.subr.bf16.mxu1 %v18526_v56  ;;  %v18594_v56 = vld [vmem:[%s25160_s6 + $0x780] ss:$12 sps:$4 sm:$0xff]  }
 0x7c5   : > { %13736 = vmatpush2.bf16.msra.mxu0 %v18521_v19  ;;  %v18602_v19 = vld [vmem:[%s25160_s6 + $0x8ec] ss:$12 sps:$4 sm:$0xff]  }
 0x7c6   : > { %13737 = vmatprep.subr.bf16.mxu0 %v18529_v30  ;;  %v18597_v30 = vld [vmem:[%s25160_s6 + $0x768] ss:$12 sps:$4 sm:$0xff]  }
 0x7c7   : > { %13697 = vmatpush2.bf16.msra.mxu1 %v18524_v11  ;;  %v18605_v11 = vld [vmem:[%s25160_s6 + $0x754] ss:$12 sps:$4 sm:$0xff]  }
 0x7c8   : > { %13698 = vmatprep.subr.bf16.mxu1 %v18532_v5  ;;  %v18600_v5 = vld [vmem:[%s25160_s6 + $0x8e8] ss:$12 sps:$4 sm:$0xff]  }
 0x7c9   : > { %13738 = vmatpush2.bf16.msra.mxu0 %v18527_v63  ;;  %v18608_v63 = vld [vmem:[%s25160_s6 + $0x8d4] ss:$12 sps:$4 sm:$0xff]  }
 0x7ca   : > { %13739 = vmatprep.subr.bf16.mxu0 %v18535_v41  ;;  %v18603_v41 = vld [vmem:[%s25160_s6 + $0x750] ss:$12 sps:$4 sm:$0xff]  }
 0x7cb   : > { %13699 = vmatpush2.bf16.msra.mxu1 %v18530_v1  ;;  %v18611_v1 = vld [vmem:[%s25160_s6 + $0x73c] ss:$12 sps:$4 sm:$0xff]  }
 0x7cc   : > { %13700 = vmatprep.subr.bf16.mxu1 %v18538_v51  ;;  %v18606_v51 = vld [vmem:[%s25160_s6 + $0x8d0] ss:$12 sps:$4 sm:$0xff]  }
 0x7cd   : > { %13740 = vmatpush2.bf16.msra.mxu0 %v18533_v35  ;;  %v18614_v35 = vld [vmem:[%s25160_s6 + $0x8bc] ss:$12 sps:$4 sm:$0xff]  }
 0x7ce   : > { %13741 = vmatprep.subr.bf16.mxu0 %v18541_v33  ;;  %v18609_v33 = vld [vmem:[%s25160_s6 + $0x738] ss:$12 sps:$4 sm:$0xff]  }
 0x7cf   : > { %13701 = vmatpush2.bf16.msra.mxu1 %v18536_v62  ;;  %v18617_v62 = vld [vmem:[%s25160_s6 + $0x724] ss:$12 sps:$4 sm:$0xff]  }
 0x7d0   : > { %13702 = vmatprep.subr.bf16.mxu1 %v18544_v43  ;;  %v18612_v43 = vld [vmem:[%s25160_s6 + $0x8b8] ss:$12 sps:$4 sm:$0xff]  }
 0x7d1   : > { %13742 = vmatpush2.bf16.msra.mxu0 %v18539_v22  ;;  %v18620_v22 = vld [vmem:[%s25160_s6 + $0x8a4] ss:$12 sps:$4 sm:$0xff]  }
 0x7d2   : > { %13743 = vmatprep.subr.bf16.mxu0 %v18547_v6  ;;  %v18615_v6 = vld [vmem:[%s25160_s6 + $0x720] ss:$12 sps:$4 sm:$0xff]  }
 0x7d3   : > { %13703 = vmatpush2.bf16.msra.mxu1 %v18542_v45  ;;  %v18623_v45 = vld [vmem:[%s25160_s6 + $0x70c] ss:$12 sps:$4 sm:$0xff]  }
 0x7d4   : > { %13754 = vmatprep.subr.bf16.mxu1 %v18550_v4  ;;  %v18626_v4 = vld [vmem:[%s25160_s6 + $0x88c] ss:$12 sps:$4 sm:$0xff]  }
 0x7d5   : > { %13744 = vmatpush2.bf16.msra.mxu0 %v18545_v60  ;;  %v18621_v60 = vld [vmem:[%s25160_s6 + $0x708] ss:$12 sps:$4 sm:$0xff]  }
 0x7d6   : > { %13705 = vmatmul.mubr.bf16.vlgmr.msra.gmra.mxu1 %v24309_v31  ;;  %13795 = vmatprep.subr.bf16.mxu0 %v18554_v14  ;;  %v18629_v14 = vld [vmem:[%s25160_s6 + $0x6f4] ss:$12 sps:$4 sm:$0xff]  }
 0x7d7   : > { %13755 = vmatpush1.bf16.msra.mxu1 %v18548_v15  ;;  %13786 = vmatprep.mubr.bf16.mxu1 %v24318_v16  ;;  %v18624_v15 = vld [vmem:[%s25160_s6 + $0x888] ss:$12 sps:$4 sm:$0xff]  }
 0x7d8   : > { %13746 = vmatmul.mubr.bf16.vlgmr.msra.gmra.mxu0 %v24329_v59  ;;  %13756 = vmatprep.subr.bf16.mxu1 %v18557_v46  ;;  %v18632_v46 = vld [vmem:[%s25160_s6 + $0x874] ss:$12 sps:$4 sm:$0xff]  }
 0x7d9   : > { %13796 = vmatpush1.bf16.msra.mxu0 %v18552_v39  ;;  %13827 = vmatprep.mubr.bf16.mxu0 %v24337_v42  ;;  %v18627_v39 = vld [vmem:[%s25160_s6 + $0x6f0] ss:$12 sps:$4 sm:$0xff]  }
 0x7da   : > { %13797 = vmatprep.subr.bf16.mxu0 %v18560_v32  ;;  %v18635_v32 = vld [vmem:[%s25160_s6 + $0x6dc] ss:$12 sps:$4 sm:$0xff]  }
 0x7db   : > { %13757 = vmatpush1.bf16.msra.mxu1 %v18555_v0  ;;  %v18630_v0 = vld [vmem:[%s25160_s6 + $0x870] ss:$12 sps:$4 sm:$0xff]  }
 0x7dc   : > { %13758 = vmatprep.subr.bf16.mxu1 %v18563_v47  ;;  %v18638_v47 = vld [vmem:[%s25160_s6 + $0x85c] ss:$12 sps:$4 sm:$0xff]  }
 0x7dd   : > { %13798 = vmatpush1.bf16.msra.mxu0 %v18558_v37  ;;  %v18633_v37 = vld [vmem:[%s25160_s6 + $0x6d8] ss:$12 sps:$4 sm:$0xff]  }
 0x7de   : > { %13799 = vmatprep.subr.bf16.mxu0 %v18566_v54  ;;  %v18641_v54 = vld [vmem:[%s25160_s6 + $0x6c4] ss:$12 sps:$4 sm:$0xff]  }
 0x7df   : > { %13759 = vmatpush1.bf16.msra.mxu1 %v18561_v2  ;;  %v18636_v2 = vld [vmem:[%s25160_s6 + $0x858] ss:$12 sps:$4 sm:$0xff]  }
 0x7e0   : > { %13760 = vmatprep.subr.bf16.mxu1 %v18569_v44  ;;  %v18644_v44 = vld [vmem:[%s25160_s6 + $0x844] ss:$12 sps:$4 sm:$0xff]  }
 0x7e1   : > { %13800 = vmatpush1.bf16.msra.mxu0 %v18564_v25  ;;  %v18639_v25 = vld [vmem:[%s25160_s6 + $0x6c0] ss:$12 sps:$4 sm:$0xff]  }
 0x7e2   : > { %13801 = vmatprep.subr.bf16.mxu0 %v18572_v13  ;;  %v18647_v13 = vld [vmem:[%s25160_s6 + $0x94c] ss:$12 sps:$4 sm:$0xff]  }
 0x7e3   : > { %13761 = vmatpush1.bf16.msra.mxu1 %v18567_v18  ;;  %v18642_v18 = vld [vmem:[%s25160_s6 + $0x840] ss:$12 sps:$4 sm:$0xff]  }
 0x7e4   : > { %13762 = vmatprep.subr.bf16.mxu1 %v18575_v10  ;;  %v24520_v10 = vrot.slane %v24285_v61, %v23874_v27  ;;  %v18649_v61 = vld [vmem:[%s25160_s6 + $0x230] ss:$12 sps:$4 sm:$0xff]  }
 0x7e5   : > { %13802 = vmatpush1.bf16.msra.mxu0 %v18570_v20  ;;  %v18648_v20 = vld [vmem:[%s25160_s6 + $0x2f0] ss:$12 sps:$4 sm:$0xff]  }
 0x7e6   : > { %13803 = vmatprep.subr.bf16.mxu0 %v18578_v12  ;;  %v18645_v12 = vld [vmem:[%s25160_s6 + $0x948] ss:$12 sps:$4 sm:$0xff]  }
 0x7e7   : > { %13763 = vmatpush1.bf16.msra.mxu1 %v18573_v58  ;;  %v18652_v58 = vld [vmem:[%s25160_s6 + $0x934] ss:$12 sps:$4 sm:$0xff]  }
 0x7e8   : > { %13764 = vmatprep.subr.bf16.mxu1 %v18581_v38  ;;  %v24537_v38 = vcombine.high %v24520_v10, %v24520_v10 }
 0x7e9   : > { %13804 = vmatpush1.bf16.msra.mxu0 %v18576_v48  ;;  %v18653_v48 = vld [vmem:[%s25160_s6 + $0x2d8] ss:$12 sps:$4 sm:$0xff]  }
 0x7ea   : > { %13805 = vmatprep.subr.bf16.mxu0 %v18584_v26  ;;  %v18650_v26 = vld [vmem:[%s25160_s6 + $0x930] ss:$12 sps:$4 sm:$0xff]  }
 0x7eb   : > { %13765 = vmatpush1.bf16.msra.mxu1 %v18579_v7  ;;  %v25336_v7 = vmov 0  }
 0x7ec   : > { %13766 = vmatprep.subr.bf16.mxu1 %v18587_v3  ;;  %v18657_v3 = vld [vmem:[%s25160_s6 + $0x91c] ss:$12 sps:$4 sm:$0xff]  }
 0x7ed   : > { %13806 = vmatpush1.bf16.msra.mxu0 %v18582_v23  ;;  %v18654_v23 = vld [vmem:[%s25160_s6 + $0x218] ss:$12 sps:$4 sm:$0xff]  }
 0x7ee   : > { %13807 = vmatprep.subr.bf16.mxu0 %v18590_v17  ;;  %v18658_v17 = vld [vmem:[%s25160_s6 + $0x2c0] ss:$12 sps:$4 sm:$0xff]  }
 0x7ef   : > { %13767 = vmatpush1.bf16.msra.mxu1 %v18585_v57  ;;  %v18655_v57 = vld [vmem:[%s25160_s6 + $0x918] ss:$12 sps:$4 sm:$0xff]  }
 0x7f0   : > { %13768 = vmatprep.subr.bf16.mxu1 %v18593_v52  ;;  %v11920_v52 = vcombine.high %v24272_v50, %v24272_v50  ;;  %v18660_v50 = vld [vmem:[%s25160_s6 + $0x900] ss:$12 sps:$4 sm:$0xff]  }
 0x7f1   : > { %13808 = vmatpush1.bf16.msra.mxu0 %v18588_v34  ;;  %v18659_v34 = vld [vmem:[%s25160_s6 + $0x200] ss:$12 sps:$4 sm:$0xff]  }
 0x7f2   : > { %13809 = vmatprep.subr.bf16.mxu0 %v18596_v29  ;;  %v18663_v29 = vld [vmem:[%s25160_s6 + $0x2a8] ss:$12 sps:$4 sm:$0xff]  }
 0x7f3   : > { %13769 = vmatpush1.bf16.msra.mxu1 %v18591_v55  ;;  %v11934_v55 = vrot.slane %v11920_v52, %v23874_v27  ;;  %v18713_v52 = vld [vmem:[%s25160_s6 + $0x410] ss:$12 sps:$4 sm:$0xff]  }
 0x7f4   : > { %13770 = vmatprep.subr.bf16.mxu1 %v18599_v8  ;;  %v18665_v8 = vld [vmem:[%s25160_s6 + $0x170] ss:$12 sps:$4 sm:$0xff]  }
 0x7f5   : > { %13810 = vmatpush1.bf16.msra.mxu0 %v18594_v56  ;;  %v18664_v56 = vld [vmem:[%s25160_s6 + $0x1e8] ss:$12 sps:$4 sm:$0xff]  }
 0x7f6   : > { %13811 = vmatprep.subr.bf16.mxu0 %v18602_v19  ;;  %v18667_v19 = vld [vmem:[%s25160_s6 + $0x290] ss:$12 sps:$4 sm:$0xff]  }
 0x7f7   : > { %13771 = vmatpush2.bf16.msra.mxu1 %v18597_v30  ;;  %v18666_v30 = vld [vmem:[%s25160_s6 + $0xb0] ss:$12 sps:$4 sm:$0xff]  }
 0x7f8   : > { %13772 = vmatprep.subr.bf16.mxu1 %v18605_v11  ;;  %v24588_v11 = vrot.slane %v11934_v55, %v23874_v27  ;;  %v18670_v27 = vld [vmem:[%s25160_s6 + $0x98] ss:$12 sps:$4 sm:$0xff]  }
 0x7f9   : > { %13812 = vmatpush2.bf16.msra.mxu0 %v18600_v5  ;;  %v18669_v5 = vld [vmem:[%s25160_s6 + $0x158] ss:$12 sps:$4 sm:$0xff]  }
 0x7fa   : > { %13813 = vmatprep.subr.bf16.mxu0 %v18608_v63  ;;  %v18668_v63 = vld [vmem:[%s25160_s6 + $0x1d0] ss:$12 sps:$4 sm:$0xff]  }
 0x7fb   : > { %13773 = vmatpush2.bf16.msra.mxu1 %v18603_v41  ;;  %v18671_v41 = vld [vmem:[%s25160_s6 + $0x278] ss:$12 sps:$4 sm:$0xff]  }
 0x7fc   : > { %13774 = vmatprep.subr.bf16.mxu1 %v18611_v1  ;;  %v18673_v1 = vld [vmem:[%s25160_s6 + $0x140] ss:$12 sps:$4 sm:$0xff]  }
 0x7fd   : > { %13814 = vmatpush2.bf16.msra.mxu0 %v18606_v51  ;;  %v18672_v51 = vld [vmem:[%s25160_s6 + $0x1b8] ss:$12 sps:$4 sm:$0xff]  }
 0x7fe   : > { %13815 = vmatprep.subr.bf16.mxu0 %v18614_v35  ;;  %v18675_v35 = vld [vmem:[%s25160_s6 + $0x260] ss:$12 sps:$4 sm:$0xff]  }
 0x7ff   : > { %13775 = vmatpush2.bf16.msra.mxu1 %v18609_v33  ;;  %v18677_v33 = vld [vmem:[%s25160_s6 + $0x128] ss:$12 sps:$4 sm:$0xff]  }
 0x800   : > { %13776 = vmatprep.subr.bf16.mxu1 %v18617_v62  ;;  %v18676_v62 = vld [vmem:[%s25160_s6 + $0x1a0] ss:$12 sps:$4 sm:$0xff]  }
 0x801   : > { %13816 = vmatpush2.bf16.msra.mxu0 %v18612_v43  ;;  %v18679_v43 = vld [vmem:[%s25160_s6 + $0x248] ss:$12 sps:$4 sm:$0xff]  }
 0x802   : > { %13817 = vmatprep.subr.bf16.mxu0 %v18620_v22  ;;  %v18678_v22 = vld [vmem:[%s25160_s6 + $0x68] ss:$12 sps:$4 sm:$0xff]  }
 0x803   : > { %13777 = vmatpush2.bf16.msra.mxu1 %v18615_v6  ;;  %v18681_v6 = vld [vmem:[%s25160_s6 + $0x110] ss:$12 sps:$4 sm:$0xff]  }
 0x804   : > { %13778 = vmatprep.subr.bf16.mxu1 %v18623_v45  ;;  %v18680_v45 = vld [vmem:[%s25160_s6 + $0x188] ss:$12 sps:$4 sm:$0xff]  }
 0x805   : > { %13818 = vmatpush2.bf16.msra.mxu0 %v18618_v49  ;;  %v18683_v49 = vld [vmem:[%s25160_s6 + $0x5f0] ss:$12 sps:$4 sm:$0xff]  }
 0x806   : > { %13819 = vmatprep.subr.bf16.mxu0 %v18626_v4  ;;  %v18682_v4 = vld [vmem:[%s25160_s6 + $0x50] ss:$12 sps:$4 sm:$0xff]  }
 0x807   : > { %13779 = vmatpush2.bf16.msra.mxu1 %v18621_v60  ;;  %v18685_v60 = vld [vmem:[%s25160_s6 + $0xf8] ss:$12 sps:$4 sm:$0xff]  }
 0x808   : > { %13780 = vmatprep.subr.bf16.mxu1 %v18629_v14  ;;  %v18684_v14 = vld [vmem:[%s25160_s6 + $0x530] ss:$12 sps:$4 sm:$0xff]  }
 0x809   : > { %13820 = vmatpush2.bf16.msra.mxu0 %v18624_v15  ;;  %v18687_v15 = vld [vmem:[%s25160_s6 + $0x5d8] ss:$12 sps:$4 sm:$0xff]  }
 0x80a   : > { %13821 = vmatprep.subr.bf16.mxu0 %v18632_v46  ;;  %v18686_v46 = vld [vmem:[%s25160_s6 + $0x38] ss:$12 sps:$4 sm:$0xff]  }
 0x80b   : > { %13781 = vmatpush2.bf16.msra.mxu1 %v18627_v39  ;;  %v18689_v39 = vld [vmem:[%s25160_s6 + $0xe0] ss:$12 sps:$4 sm:$0xff]  }
 0x80c   : > { %13782 = vmatprep.subr.bf16.mxu1 %v18635_v32  ;;  %v18688_v32 = vld [vmem:[%s25160_s6 + $0x518] ss:$12 sps:$4 sm:$0xff]  }
 0x80d   : > { %13822 = vmatpush2.bf16.msra.mxu0 %v18630_v0  ;;  %v18691_v0 = vld [vmem:[%s25160_s6 + $0x5c0] ss:$12 sps:$4 sm:$0xff]  }
 0x80e   : > { %13823 = vmatprep.subr.bf16.mxu0 %v18638_v47  ;;  %v18693_v47 = vld [vmem:[%s25160_s6 + $0xc8] ss:$12 sps:$4 sm:$0xff]  }
 0x80f   : > { %13783 = vmatpush2.bf16.msra.mxu1 %v18633_v37  ;;  %v18695_v37 = vld [vmem:[%s25160_s6 + $0x5a8] ss:$12 sps:$4 sm:$0xff]  }
 0x810   : > { %13784 = vmatprep.subr.bf16.mxu1 %v18641_v54  ;;  %v18694_v54 = vld [vmem:[%s25160_s6 + $0x8] ss:$12 sps:$4 sm:$0xff]  }
 0x811   : > { %13824 = vmatpush2.bf16.msra.mxu0 %v18636_v2  ;;  %v18697_v2 = vld [vmem:[%s25160_s6 + $0x470] ss:$12 sps:$4 sm:$0xff]  }
 0x812   : > { %13825 = vmatprep.subr.bf16.mxu0 %v18644_v44  ;;  %v18696_v44 = vld [vmem:[%s25160_s6 + $0x4e8] ss:$12 sps:$4 sm:$0xff]  }
 0x813   : > { %13785 = vmatpush2.bf16.msra.mxu1 %v18639_v25  ;;  %v18699_v25 = vld [vmem:[%s25160_s6 + $0x590] ss:$12 sps:$4 sm:$0xff]  }
 0x814   : > { %13844 = vmatprep.subr.bf16.mxu1 %v18647_v13  ;;  %v18698_v13 = vld [vmem:[%s25160_s6 + $0x3b0] ss:$12 sps:$4 sm:$0xff]  }
 0x815   : > { %13826 = vmatpush2.bf16.msra.mxu0 %v18642_v18  ;;  %v18701_v18 = vld [vmem:[%s25160_s6 + $0x458] ss:$12 sps:$4 sm:$0xff]  }
 0x816   : > { %13787 = vmatmul.mubr.bf16.vlgmr.msra.gmra.mxu1 %v24520_v10  ;;  %17144 = vmatprep.subr.bf16.mxu0 %v18648_v20  ;;  %v18700_v20 = vld [vmem:[%s25160_s6 + $0x4d0] ss:$12 sps:$4 sm:$0xff]  }
 0x817   : > { %13845 = vmatpush1.bf16.msra.mxu1 %v18645_v12  ;;  %13868 = vmatprep.mubr.bf16.mxu1 %v25336_v7  ;;  %v18703_v12 = vld [vmem:[%s25160_s6 + $0x578] ss:$12 sps:$4 sm:$0xff]  }
 0x818   : > { %13828 = vmatmul.mubr.bf16.vlgmr.msra.gmra.mxu0 %v24537_v38  ;;  %13846 = vmatprep.subr.bf16.mxu1 %v18652_v58  ;;  %v18702_v58 = vld [vmem:[%s25160_s6 + $0x398] ss:$12 sps:$4 sm:$0xff]  }
 0x819   : > { %17145 = vmatpush3.bf16.msra.mxu0 %v18649_v61  ;;  %13949 = vmatprep.mubr.bf16.mxu0 %v24095_v53  ;;  %v18662_v53 = vld [vmem:[%s25160_s6 + $0x904] ss:$12 sps:$4 sm:$0xff]   ;;  %v18705_v61 = vld [vmem:[%s25160_s6 + $0x440] ss:$12 sps:$4 sm:$0xff]  }
 0x81a   : > { %17146 = vmatprep.subr.bf16.mxu0 %v18653_v48  ;;  %v18707_v48 = vld [vmem:[%s25160_s6 + $0x560] ss:$12 sps:$4 sm:$0xff]  }
 0x81b   : > { %13847 = vmatpush1.bf16.msra.mxu1 %v18650_v26  ;;  %v18709_v26 = vld [vmem:[%s25160_s6 + $0x428] ss:$12 sps:$4 sm:$0xff]  }
 0x81c   : > { %13848 = vmatprep.subr.bf16.mxu1 %v18657_v3  ;;  %v18708_v3 = vld [vmem:[%s25160_s6 + $0x4a0] ss:$12 sps:$4 sm:$0xff]  }
 0x81d   : > { %17147 = vmatpush3.bf16.msra.mxu0 %v18654_v23  ;;  %v18711_v23 = vld [vmem:[%s25160_s6 + $0x548] ss:$12 sps:$4 sm:$0xff]  }
 0x81e   : > { %17148 = vmatprep.subr.bf16.mxu0 %v18658_v17  ;;  %v18710_v17 = vld [vmem:[%s25160_s6 + $0x368] ss:$12 sps:$4 sm:$0xff]  }
 0x81f   : > { %13849 = vmatpush1.bf16.msra.mxu1 %v18655_v57  ;;  %v13574_v57 = vsub.s32 0, %v23857_v9 }
 0x820   : > { %13850 = vmatprep.subr.bf16.mxu1 %v18662_v53  ;;  %v24736_v53 = vld [vmem:[%s25161_s7] sm:$0x7] }
 0x821   : > { %17149 = vmatpush3.bf16.msra.mxu0 %v18659_v34  ;;  %v18712_v34 = vld [vmem:[%s25160_s6 + $0x488] ss:$12 sps:$4 sm:$0xff]   ;;  %v13575_v55 = vrot.slane %v24736_v53, %v13574_v57 }
 0x822   : > { %17150 = vmatprep.subr.bf16.mxu0 %v18663_v29  ;;  %v13578_v29 = vsub.s32 1, %v23857_v9 }
 0x823   : > { %13851 = vmatpush1.bf16.msra.mxu1 %v18660_v50  ;;  %v18715_v50 = vld [vmem:[%s25160_s6 + $0x8f0] ss:$12 sps:$4 sm:$0xff]  }
 0x824   : > { %17122 = vmatprep.subr.bf16.mxu1 %v18665_v8  ;;  %v18714_v8 = vld [vmem:[%s25160_s6 + $0x350] ss:$12 sps:$4 sm:$0xff]  }
 0x825   : > { %17151 = vmatpush3.bf16.msra.mxu0 %v18664_v56  ;;  %v18717_v56 = vld [vmem:[%s25160_s6 + $0x3f8] ss:$12 sps:$4 sm:$0xff]  }
 0x826   : > { %16205 = vmatmul.mubr.msk.bf16.vlgmr.msra.gmra.mxu1 %vm10438_vm9, %v24588_v11  ;;  %17152 = vmatprep.subr.bf16.mxu0 %v18667_v19  ;;  %v13579_v19 = vrot.slane %v24736_v53, %v13578_v29 }
 0x827   : > { %17123 = vmatpush3.bf16.msra.mxu1 %v18666_v30  ;;  %13909 = vmatprep.mubr.bf16.mxu1 %v24085_v36  ;;  %v18674_v36 = vld [vmem:[%s25160_s6 + $0x80] ss:$12 sps:$4 sm:$0xff]   ;;  %v18716_v30 = vld [vmem:[%s25160_s6 + $0x830] ss:$12 sps:$4 sm:$0xff]  }
 0x828   : > { %17124 = vmatprep.subr.bf16.mxu1 %v18669_v5 }
 0x829   : > { %17153 = vmatpush3.bf16.msra.mxu0 %v18668_v63  ;;  %v18719_v63 = vld [vmem:[%s25160_s6 + $0x8d8] ss:$12 sps:$4 sm:$0xff]  }
 0x82a   : > { %17154 = vmatprep.subr.bf16.mxu0 %v18671_v41 }
 0x82b   : > { %17125 = vmatpush3.bf16.msra.mxu1 %v18670_v27  ;;  %v18718_v27 = vld [vmem:[%s25160_s6 + $0x338] ss:$12 sps:$4 sm:$0xff]  }
 0x82c   : > { %17126 = vmatprep.subr.bf16.mxu1 %v18673_v1 }
 0x82d   : > { %17155 = vmatpush3.bf16.msra.mxu0 %v18672_v51 }
 0x82e   : > { %17156 = vmatprep.subr.bf16.mxu0 %v18675_v35  ;;  %v18721_v35 = vld [vmem:[%s25160_s6 + $0x3e0] ss:$12 sps:$4 sm:$0xff]  }
 0x82f   : > { %17127 = vmatpush3.bf16.msra.mxu1 %v18674_v36 }
 0x830   : > { %17128 = vmatprep.subr.bf16.mxu1 %v18677_v33 }
 0x831   : > { %17157 = vmatpush3.bf16.msra.mxu0 %v18676_v62  ;;  %v18720_v62 = vld [vmem:[%s25160_s6 + $0x818] ss:$12 sps:$4 sm:$0xff]  }
 0x832   : > { %17158 = vmatprep.subr.bf16.mxu0 %v18679_v43 }
 0x833   : > { %17129 = vmatpush3.bf16.msra.mxu1 %v18678_v22 }
 0x834   : > { %17130 = vmatprep.subr.bf16.mxu1 %v18681_v6 }
 0x835   : > { %17159 = vmatpush3.bf16.msra.mxu0 %v18680_v45  ;;  %v18722_v45 = vld [vmem:[%s25160_s6 + $0x320] ss:$12 sps:$4 sm:$0xff]  }
 0x836   : > { %17188 = vmatprep.subr.bf16.mxu0 %v18683_v49 }
 0x837   : > { %17131 = vmatpush3.bf16.msra.mxu1 %v18682_v4  ;;  %v18725_v4 = vld [vmem:[%s25160_s6 + $0x3c8] ss:$12 sps:$4 sm:$0xff]  }
 0x838   : > { %13950 = vmatmul.mubr.bf16.vlgmr.msra.gmra.mxu0 %v24108_v21  ;;  %17132 = vmatprep.subr.bf16.mxu1 %v18685_v60  ;;  %v18690_v21 = vld [vmem:[%s25160_s6 + $0x20] ss:$12 sps:$4 sm:$0xff]  }
 0x839   : > { %17189 = vmatpush3.bf16.msra.mxu0 %v18684_v14  ;;  %14029 = vmatprep.mubr.bf16.mxu0 %v24120_v40  ;;  %v18692_v40 = vld [vmem:[%s25160_s6 + $0x500] ss:$12 sps:$4 sm:$0xff]  }
 0x83a   : > { %17190 = vmatprep.subr.bf16.mxu0 %v18687_v15  ;;  %v18724_v60 = vld [vmem:[%s25160_s6 + $0x800] ss:$12 sps:$4 sm:$0xff]   ;;  %v18727_v15 = vld [vmem:[%s25160_s6 + $0x8a8] ss:$12 sps:$4 sm:$0xff]  }
 0x83b   : > { %17133 = vmatpush3.bf16.msra.mxu1 %v18686_v46  ;;  %v18726_v46 = vld [vmem:[%s25160_s6 + $0x308] ss:$12 sps:$4 sm:$0xff]  }
 0x83c   : > { %17134 = vmatprep.subr.bf16.mxu1 %v18689_v39  ;;  %v18729_v39 = vld [vmem:[%s25160_s6 + $0x770] ss:$12 sps:$4 sm:$0xff]  }
 0x83d   : > { %17191 = vmatpush3.bf16.msra.mxu0 %v18688_v32  ;;  %v18728_v32 = vld [vmem:[%s25160_s6 + $0x7e8] ss:$12 sps:$4 sm:$0xff]  }
 0x83e   : > { %17192 = vmatprep.subr.bf16.mxu0 %v18691_v0  ;;  %v18731_v0 = vld [vmem:[%s25160_s6 + $0x890] ss:$12 sps:$4 sm:$0xff]  }
 0x83f   : > { %17135 = vmatpush3.bf16.msra.mxu1 %v18690_v21  ;;  %v18730_v21 = vld [vmem:[%s25160_s6 + $0x6b0] ss:$12 sps:$4 sm:$0xff]  }
 0x840   : > { %17136 = vmatprep.subr.bf16.mxu1 %v18693_v47  ;;  %v18733_v47 = vld [vmem:[%s25160_s6 + $0x758] ss:$12 sps:$4 sm:$0xff]  }
 0x841   : > { %17193 = vmatpush3.bf16.msra.mxu0 %v18692_v40  ;;  %v18732_v40 = vld [vmem:[%s25160_s6 + $0x7d0] ss:$12 sps:$4 sm:$0xff]  }
 0x842   : > { %17194 = vmatprep.subr.bf16.mxu0 %v18695_v37  ;;  %v18735_v37 = vld [vmem:[%s25160_s6 + $0x878] ss:$12 sps:$4 sm:$0xff]  }
 0x843   : > { %17137 = vmatpush3.bf16.msra.mxu1 %v18694_v54  ;;  %v18734_v54 = vld [vmem:[%s25160_s6 + $0x698] ss:$12 sps:$4 sm:$0xff]  }
 0x844   : > { %17166 = vmatprep.subr.bf16.mxu1 %v18697_v2  ;;  %v18737_v2 = vld [vmem:[%s25160_s6 + $0x740] ss:$12 sps:$4 sm:$0xff]  }
 0x845   : > { %17195 = vmatpush3.bf16.msra.mxu0 %v18696_v44  ;;  %v18739_v44 = vld [vmem:[%s25160_s6 + $0x860] ss:$12 sps:$4 sm:$0xff]  }
 0x846   : > { %13910 = vmatmul.mubr.bf16.vlgmr.msra.gmra.mxu1 %v24082_v28  ;;  %17196 = vmatprep.subr.bf16.mxu0 %v18699_v25  ;;  %v18704_v28 = vld [vmem:[%s25160_s6 + $0x4b8] ss:$12 sps:$4 sm:$0xff]   ;;  %v18741_v25 = vld [vmem:[%s25160_s6 + $0x728] ss:$12 sps:$4 sm:$0xff]  }
 0x847   : > { %17167 = vmatpush3.bf16.msra.mxu1 %v18698_v13  ;;  %13989 = vmatprep.mubr.bf16.mxu1 %v24098_v24  ;;  %v18706_v24 = vld [vmem:[%s25160_s6 + $0x380] ss:$12 sps:$4 sm:$0xff]  }
 0x848   : > { %17168 = vmatprep.subr.bf16.mxu1 %v18701_v18  ;;  %v18740_v13 = vld [vmem:[%s25160_s6 + $0x7a0] ss:$12 sps:$4 sm:$0xff]   ;;  %v18743_v18 = vld [vmem:[%s25160_s6 + $0x848] ss:$12 sps:$4 sm:$0xff]  }
 0x849   : > { %17197 = vmatpush3.bf16.msra.mxu0 %v18700_v20  ;;  %v18742_v20 = vld [vmem:[%s25160_s6 + $0x668] ss:$12 sps:$4 sm:$0xff]  }
 0x84a   : > { %17198 = vmatprep.subr.bf16.mxu0 %v18703_v12  ;;  %v18745_v12 = vld [vmem:[%s25160_s6 + $0x710] ss:$12 sps:$4 sm:$0xff]  }
 0x84b   : > { %17169 = vmatpush3.bf16.msra.mxu1 %v18702_v58  ;;  %v18744_v58 = vld [vmem:[%s25160_s6 + $0x788] ss:$12 sps:$4 sm:$0xff]  }
 0x84c   : > { %17170 = vmatprep.subr.bf16.mxu1 %v18705_v61  ;;  %v18746_v61 = vld [vmem:[%s25160_s6 + $0x650] ss:$12 sps:$4 sm:$0xff]  }
 0x84d   : > { %17199 = vmatpush3.bf16.msra.mxu0 %v18704_v28  ;;  %v18747_v28 = vld [vmem:[%s25160_s6 + $0x6f8] ss:$12 sps:$4 sm:$0xff]  }
 0x84e   : > { %17200 = vmatprep.subr.bf16.mxu0 %v18707_v48  ;;  %v18748_v48 = vld [vmem:[%s25160_s6 + $0x638] ss:$12 sps:$4 sm:$0xff]  }
 0x84f   : > { %17171 = vmatpush3.bf16.msra.mxu1 %v18706_v24  ;;  %v18749_v24 = vld [vmem:[%s25160_s6 + $0x6e0] ss:$12 sps:$4 sm:$0xff]  }
 0x850   : > { %17172 = vmatprep.subr.bf16.mxu1 %v18709_v26  ;;  %v18750_v26 = vld [vmem:[%s25160_s6 + $0x620] ss:$12 sps:$4 sm:$0xff]  }
 0x851   : > { %17201 = vmatpush3.bf16.msra.mxu0 %v18708_v3  ;;  %v18751_v3 = vld [vmem:[%s25160_s6 + $0x6c8] ss:$12 sps:$4 sm:$0xff]  }
 0x852   : > { %17202 = vmatprep.subr.bf16.mxu0 %v18711_v23  ;;  %v18753_v23 = vld [vmem:[%s25160_s6 + $0x950] ss:$12 sps:$4 sm:$0xff]  }
 0x853   : > { %17173 = vmatpush3.bf16.msra.mxu1 %v18710_v17  ;;  %v25337_v17 = vmov 0.0  }
 0x854   : > { %17174 = vmatprep.subr.bf16.mxu1 %v18713_v52  ;;  %v18754_v52 = vld [vmem:[%s25160_s6 + $0x938] ss:$12 sps:$4 sm:$0xff]  }
 0x855   : > { %17203 = vmatpush3.bf16.msra.mxu0 %v18712_v34  ;;  %v18755_v34 = vld [vmem:[%s25160_s6 + $0x920] ss:$12 sps:$4 sm:$0xff]  }
 0x856   : > { %v13624_v5 = vpop.f32.mrf.mxu1  ;;  %17232 = vmatprep.subr.bf16.mxu0 %v18715_v50  ;;  %v18759_v50 = vld [vmem:[%s25162_s8 + $0x74] ss:$8 sps:$4 sm:$0xff]  }
 0x857   : > { %v13625_v41 = vadd.f32 %v13624_v5, %v13575_v55  ;;  %17175 = vmatpush3.bf16.msra.mxu1 %v18714_v8  ;;  %v18757_v55 = vld [vmem:[%s25162_s8 + $0x70] ss:$8 sps:$4 sm:$0xff]   ;;  %v18762_v8 = vld [vmem:[%s25162_s8 + $0x64] ss:$8 sps:$4 sm:$0xff]  }
 0x858   : > { %14030 = vmatmul.mubr.bf16.vlgmr.msra.gmra.mxu0 %v24329_v59  ;;  %v13626_v1 = vpop.f32.mrf.mxu1  ;;  %v13665_v51 = vpop.f32.mrf.mxu0  ;;  %17176 = vmatprep.subr.bf16.mxu1 %v18717_v56  ;;  %v18723_v59 = vld [vmem:[%s25160_s6 + $0x8c0] ss:$12 sps:$4 sm:$0xff]  }
 0x859   : > { %v13627_v36 = vadd.f32 %v13626_v1, %v13579_v19  ;;  %v24770_v33 = vadd.f32 %v13665_v51, %v13625_v41  ;;  %17233 = vmatpush3.bf16.msra.mxu0 %v18716_v30  ;;  %14109 = vmatprep.mubr.bf16.mxu0 %v24337_v42  ;;  %v18760_v30 = vld [vmem:[%s25162_s8 + $0x60] ss:$8 sps:$4 sm:$0xff]   ;;  %v18765_v41 = vld [vmem:[%s25162_s8 + $0x54] ss:$8 sps:$4 sm:$0xff]  }
 0x85a   : > { %v13628_v43 = vpop.f32.mrf.mxu1  ;;  %v13667_v22 = vpop.f32.mrf.mxu0  ;;  %17234 = vmatprep.subr.bf16.mxu0 %v18719_v63 }
 0x85b   : > { %v24779_v6 = vadd.f32 %v13667_v22, %v13627_v36  ;;  %17177 = vmatpush3.bf16.msra.mxu1 %v18718_v27  ;;  %v18763_v36 = vld [vmem:[%s25162_s8 + $0x50] ss:$8 sps:$4 sm:$0xff]   ;;  %v18768_v43 = vld [vmem:[%s25162_s8 + $0x44] ss:$8 sps:$4 sm:$0xff]  }
 0x85c   : > { %v13629_v49 = vpop.f32.mrf.mxu1  ;;  %v13669_v42 = vpop.f32.mrf.mxu0  ;;  %17178 = vmatprep.subr.bf16.mxu1 %v18721_v35 }
 0x85d   : > { %17235 = vmatpush3.bf16.msra.mxu0 %v18720_v62  ;;  %v18774_v49 = vld [vmem:[%s25162_s8 + $0x24] ss:$8 sps:$4 sm:$0xff]   ;;  %v18772_v42 = vld [vmem:[%s25162_s8 + $0x20] ss:$8 sps:$4 sm:$0xff]  }
 0x85e   : > { %v13670_v14 = vpop.f32.mrf.mxu0  ;;  %17236 = vmatprep.subr.bf16.mxu0 %v18723_v59  ;;  %v18766_v59 = vld [vmem:[%s25162_s8 + $0x40] ss:$8 sps:$4 sm:$0xff]  }
 0x85f   : > { %17179 = vmatpush3.bf16.msra.mxu1 %v18722_v45  ;;  %v18769_v45 = vld [vmem:[%s25162_s8 + $0x30] ss:$8 sps:$4 sm:$0xff]   ;;  %v18780_v14 = vld [vmem:[%s25162_s8 + $0x4] ss:$8 sps:$4 sm:$0xff]  }
 0x860   : > { %17180 = vmatprep.subr.bf16.mxu1 %v18725_v4  ;;  %v18777_v4 = vld [vmem:[%s25162_s8 + $0x14] ss:$8 sps:$4 sm:$0xff]  }
 0x861   : > { %17237 = vmatpush3.bf16.msra.mxu0 %v18724_v60  ;;  %v18775_v60 = vld [vmem:[%s25162_s8 + $0x10] ss:$8 sps:$4 sm:$0xff]  }
 0x862   : > { %17238 = vmatprep.subr.bf16.mxu0 %v18727_v15  ;;  %v18778_v15 = vld [vmem:[%s25162_s8] ss:$8 sps:$4 sm:$0xff]  }
 0x863   : > { %17181 = vmatpush3.bf16.msra.mxu1 %v18726_v46  ;;  %v18783_v46 = vld [vmem:[%s25162_s8 + $0xf4] ss:$8 sps:$4 sm:$0xff]  }
 0x864   : > { %17210 = vmatprep.subr.bf16.mxu1 %v18729_v39  ;;  %v18781_v39 = vld [vmem:[%s25162_s8 + $0xf0] ss:$8 sps:$4 sm:$0xff]  }
 0x865   : > { %17239 = vmatpush3.bf16.msra.mxu0 %v18728_v32  ;;  %v18786_v32 = vld [vmem:[%s25162_s8 + $0xe4] ss:$8 sps:$4 sm:$0xff]  }
 0x866   : > { %13990 = vmatmul.mubr.bf16.vlgmr.msra.gmra.mxu1 %v24309_v31  ;;  %17240 = vmatprep.subr.bf16.mxu0 %v18731_v0  ;;  %v18736_v31 = vld [vmem:[%s25160_s6 + $0x7b8] ss:$12 sps:$4 sm:$0xff]   ;;  %v18784_v0 = vld [vmem:[%s25162_s8 + $0xe0] ss:$8 sps:$4 sm:$0xff]  }
 0x867   : > { %17211 = vmatpush3.bf16.msra.mxu1 %v18730_v21  ;;  %14069 = vmatprep.mubr.bf16.mxu1 %v24318_v16  ;;  %v18738_v16 = vld [vmem:[%s25160_s6 + $0x680] ss:$12 sps:$4 sm:$0xff]   ;;  %v18789_v21 = vld [vmem:[%s25162_s8 + $0xd4] ss:$8 sps:$4 sm:$0xff]  }
 0x868   : > { %17212 = vmatprep.subr.bf16.mxu1 %v18733_v47  ;;  %v18787_v47 = vld [vmem:[%s25162_s8 + $0xd0] ss:$8 sps:$4 sm:$0xff]  }
 0x869   : > { %17241 = vmatpush3.bf16.msra.mxu0 %v18732_v40  ;;  %v18792_v40 = vld [vmem:[%s25162_s8 + $0xc4] ss:$8 sps:$4 sm:$0xff]  }
 0x86a   : > { %17242 = vmatprep.subr.bf16.mxu0 %v18735_v37  ;;  %v18805_v37 = vld [vmem:[%s25162_s8 + $0x170] ss:$8 sps:$4 sm:$0xff]  }
 0x86b   : > { %17213 = vmatpush3.bf16.msra.mxu1 %v18734_v54  ;;  %v18807_v54 = vld [vmem:[%s25162_s8 + $0x174] ss:$8 sps:$4 sm:$0xff]  }
 0x86c   : > { %17214 = vmatprep.subr.bf16.mxu1 %v18737_v2  ;;  %v18790_v2 = vld [vmem:[%s25162_s8 + $0xc0] ss:$8 sps:$4 sm:$0xff]  }
 0x86d   : > { %17243 = vmatpush3.bf16.msra.mxu0 %v18736_v31  ;;  %v18810_v31 = vld [vmem:[%s25162_s8 + $0x164] ss:$8 sps:$4 sm:$0xff]  }
 0x86e   : > { %17244 = vmatprep.subr.bf16.mxu0 %v18739_v44  ;;  %v18795_v44 = vld [vmem:[%s25162_s8 + $0xb4] ss:$8 sps:$4 sm:$0xff]  }
 0x86f   : > { %17215 = vmatpush3.bf16.msra.mxu1 %v18738_v16  ;;  %v18808_v16 = vld [vmem:[%s25162_s8 + $0x160] ss:$8 sps:$4 sm:$0xff]  }
 0x870   : > { %17216 = vmatprep.subr.bf16.mxu1 %v18741_v25  ;;  %v18793_v25 = vld [vmem:[%s25162_s8 + $0xb0] ss:$8 sps:$4 sm:$0xff]  }
 0x871   : > { %17245 = vmatpush3.bf16.msra.mxu0 %v18740_v13  ;;  %v18798_v13 = vld [vmem:[%s25162_s8 + $0xa4] ss:$8 sps:$4 sm:$0xff]  }
 0x872   : > { %17246 = vmatprep.subr.bf16.mxu0 %v18743_v18  ;;  %v18811_v18 = vld [vmem:[%s25162_s8 + $0x150] ss:$8 sps:$4 sm:$0xff]  }
 0x873   : > { %17217 = vmatpush3.bf16.msra.mxu1 %v18742_v20  ;;  %v18813_v20 = vld [vmem:[%s25162_s8 + $0x154] ss:$8 sps:$4 sm:$0xff]  }
 0x874   : > { %17218 = vmatprep.subr.bf16.mxu1 %v18745_v12  ;;  %v18796_v12 = vld [vmem:[%s25162_s8 + $0xa0] ss:$8 sps:$4 sm:$0xff]  }
 0x875   : > { %17247 = vmatpush3.bf16.msra.mxu0 %v18744_v58  ;;  %v18801_v58 = vld [vmem:[%s25162_s8 + $0x94] ss:$8 sps:$4 sm:$0xff]  }
 0x876   : > { %14510 = vmatprep.subr.bf16.mxu0 %v18807_v54 }
 0x877   : > { %17219 = vmatpush3.bf16.msra.mxu1 %v18746_v61  ;;  %v18799_v61 = vld [vmem:[%s25162_s8 + $0x90] ss:$8 sps:$4 sm:$0xff]  }
 0x878   : > { %14110 = vmatmul.mubr.bf16.vlgmr.msra.gmra.mxu0 %v24537_v38  ;;  %17220 = vmatprep.subr.bf16.mxu1 %v18747_v28  ;;  %v18752_v38 = vld [vmem:[%s25160_s6 + $0x608] ss:$12 sps:$4 sm:$0xff]  }
 0x879   : > { %14542 = vmatprep.mubr.bf16.mxu0 %v25336_v7  ;;  %14511 = vmatpush1.bf16.msra.mxu0 %v18805_v37  ;;  %v18814_v28 = vld [vmem:[%s25162_s8 + $0x140] ss:$8 sps:$4 sm:$0xff]  }
 0x87a   : > { %14512 = vmatprep.subr.bf16.mxu0 %v18810_v31 }
 0x87b   : > { %17221 = vmatpush3.bf16.msra.mxu1 %v18748_v48  ;;  %v18816_v48 = vld [vmem:[%s25162_s8 + $0x144] ss:$8 sps:$4 sm:$0xff]  }
 0x87c   : > { %17222 = vmatprep.subr.bf16.mxu1 %v18749_v24  ;;  %v18804_v24 = vld [vmem:[%s25162_s8 + $0x84] ss:$8 sps:$4 sm:$0xff]  }
 0x87d   : > { %14513 = vmatpush1.bf16.msra.mxu0 %v18808_v16 }
 0x87e   : > { %14514 = vmatprep.subr.bf16.mxu0 %v18813_v20 }
 0x87f   : > { %17223 = vmatpush3.bf16.msra.mxu1 %v18750_v26  ;;  %v18819_v26 = vld [vmem:[%s25162_s8 + $0x134] ss:$8 sps:$4 sm:$0xff]  }
 0x880   : > { %17224 = vmatprep.subr.bf16.mxu1 %v18751_v3  ;;  %v18817_v3 = vld [vmem:[%s25162_s8 + $0x130] ss:$8 sps:$4 sm:$0xff]  }
 0x881   : > { %14515 = vmatpush1.bf16.msra.mxu0 %v18811_v18 }
 0x882   : > { %14516 = vmatprep.subr.bf16.mxu0 %v18816_v48 }
 0x883   : > { %17225 = vmatpush3.bf16.msra.mxu1 %v18752_v38  ;;  %v18802_v38 = vld [vmem:[%s25162_s8 + $0x80] ss:$8 sps:$4 sm:$0xff]  }
 0x884   : > { %17393 = vmatprep.subr.bf16.mxu1 %v25337_v17 }
 0x885   : > { %14517 = vmatpush1.bf16.msra.mxu0 %v18814_v28 }
 0x886   : > { %14070 = vmatmul.mubr.bf16.vlgmr.msra.gmra.mxu1 %v24520_v10  ;;  %v18756_v10 = vld [vmem:[%s25160_s6 + $0x908] ss:$12 sps:$4 sm:$0xff]   ;;  %14518 = vmatprep.subr.bf16.mxu0 %v18819_v26 }
 0x887   : > { %17394 = vmatpush3.bf16.msra.mxu1 %v18753_v23  ;;  %17401 = vmatprep.mubr.msk.bf16.mxu1 %vm18909_vm0, %v25337_v17  ;;  %v18822_v23 = vld [vmem:[%s25162_s8 + $0x124] ss:$8 sps:$4 sm:$0xff]  }
 0x888   : > { %17395 = vmatprep.subr.bf16.mxu1 %v25337_v17 }
 0x889   : > { %14519 = vmatpush1.bf16.msra.mxu0 %v18817_v3 }
 0x88a   : > { %14520 = vmatprep.subr.bf16.mxu0 %v18822_v23 }
 0x88b   : > { %17396 = vmatpush3.bf16.msra.mxu1 %v18754_v52 }
 0x88c   : > { %17397 = vmatprep.subr.bf16.mxu1 %v25337_v17 }
 0x88f   : > { %17398 = vmatpush3.bf16.msra.mxu1 %v18755_v34 }
 0x890   : > { %17399 = vmatprep.subr.bf16.mxu1 %v25337_v17  ;;  %v18820_v17 = vld [vmem:[%s25162_s8 + $0x120] ss:$8 sps:$4 sm:$0xff]  }
 0x891   : > { %14521 = vmatpush1.bf16.msra.mxu0 %v18820_v17 }
 0x893   : > { %17400 = vmatpush3.bf16.msra.mxu1 %v18756_v10 }
 0x894   : > { %14469 = vmatprep.subr.bf16.mxu1 %v18759_v50 }
 0x896   : > { %v13706_v56 = vpop.f32.mrf.mxu1  ;;  %17402 = vmatmul.mubr.msk.bf16.vlgmr.msra.gmra.mxu1 %vm10438_vm9, %v24588_v11 }
 0x897   : > { %v13707_v19 = vadd.f32 %v13706_v56, %v24770_v33  ;;  %14470 = vmatpush1.bf16.msra.mxu1 %v18757_v55 }
 0x898   : > { %v13708_v5 = vpop.f32.mrf.mxu1  ;;  %v13747_v63 = vpop.f32.mrf.mxu0  ;;  %14471 = vmatprep.subr.bf16.mxu1 %v18762_v8 }
 0x899   : > { %v13709_v27 = vadd.f32 %v13708_v5, %v24779_v6  ;;  %v24912_v1 = vadd.f32 %v13747_v63, %v13707_v19  ;;  %v18771_v6 = vld [vmem:[%s25162_s8 + $0x34] ss:$8 sps:$4 sm:$0xff]   ;;  %v18823_v19 = vld [vmem:[%s25162_s8 + $0x110] ss:$8 sps:$4 sm:$0xff]   ;;  %v18828_v5 = vld [vmem:[%s25162_s8 + $0x104] ss:$8 sps:$4 sm:$0xff]  }
 0x89a   : > { %v13710_v51 = vpop.f32.mrf.mxu1  ;;  %v13749_v11 = vpop.f32.mrf.mxu0 }
 0x89b   : > { %v24914_v35 = vadd.f32 %v13749_v11, %v13709_v27  ;;  %14472 = vmatpush1.bf16.msra.mxu1 %v18760_v30  ;;  %v18825_v30 = vld [vmem:[%s25162_s8 + $0x114] ss:$8 sps:$4 sm:$0xff]  }
 0x89c   : > { %v13711_v33 = vpop.f32.mrf.mxu1  ;;  %v13751_v62 = vpop.f32.mrf.mxu0  ;;  %14473 = vmatprep.subr.bf16.mxu1 %v18765_v41  ;;  %14522 = vmatprep.subr.bf16.mxu0 %v18825_v30  ;;  %v18826_v41 = vld [vmem:[%s25162_s8 + $0x100] ss:$8 sps:$4 sm:$0xff]  }
 0x89d   : > { %14523 = vmatpush1.bf16.msra.mxu0 %v18823_v19 }
 0x89e   : > { %v13752_v22 = vpop.f32.mrf.mxu0  ;;  %14524 = vmatprep.subr.bf16.mxu0 %v18828_v5 }
 0x89f   : > { %14474 = vmatpush1.bf16.msra.mxu1 %v18763_v36 }
 0x8a0   : > { %14475 = vmatprep.subr.bf16.mxu1 %v18768_v43 }
 0x8a1   : > { %14525 = vmatpush1.bf16.msra.mxu0 %v18826_v41 }
 0x8a2   : > { %14659 = vmatprep.subr.bf16.mxu0 %v25336_v7 }
 0x8a3   : > { %14476 = vmatpush1.bf16.msra.mxu1 %v18766_v59 }
 0x8a4   : > { %14477 = vmatprep.subr.bf16.mxu1 %v18771_v6 }
 0x8a7   : > { %14478 = vmatpush1.bf16.msra.mxu1 %v18769_v45 }
 0x8a8   : > { %14479 = vmatprep.subr.bf16.mxu1 %v18774_v49 }
 0x8ab   : > { %14480 = vmatpush1.bf16.msra.mxu1 %v18772_v42 }
 0x8ac   : > { %14481 = vmatprep.subr.bf16.mxu1 %v18777_v4 }
 0x8af   : > { %14482 = vmatpush1.bf16.msra.mxu1 %v18775_v60 }
 0x8b0   : > { %14483 = vmatprep.subr.bf16.mxu1 %v18780_v14 }
 0x8b3   : > { %14484 = vmatpush1.bf16.msra.mxu1 %v18778_v15 }
 0x8b4   : > { %14485 = vmatprep.subr.bf16.mxu1 %v18783_v46 }
 0x8b7   : > { %14486 = vmatpush2.bf16.msra.mxu1 %v18781_v39 }
 0x8b8   : > { %14487 = vmatprep.subr.bf16.mxu1 %v18786_v32  ;;  %v13582_v32 = vsub.s32 2, %v23857_v9  ;;  %v14583_v9 = vld [vmem:[%s25165_s11] sm:$0x1] }
 0x8bb   : > { %14488 = vmatpush2.bf16.msra.mxu1 %v18784_v0 }
 0x8bc   : > { %14489 = vmatprep.subr.bf16.mxu1 %v18789_v21  ;;  %v13583_v21 = vrot.slane %v24736_v53, %v13582_v32 }
 0x8bf   : > { %14490 = vmatpush2.bf16.msra.mxu1 %v18787_v47 }
 0x8c0   : > { %14491 = vmatprep.subr.bf16.mxu1 %v18792_v40 }
 0x8c3   : > { %14492 = vmatpush2.bf16.msra.mxu1 %v18790_v2 }
 0x8c4   : > { %14493 = vmatprep.subr.bf16.mxu1 %v18795_v44 }
 0x8c7   : > { %14494 = vmatpush2.bf16.msra.mxu1 %v18793_v25 }
 0x8c8   : > { %14495 = vmatprep.subr.bf16.mxu1 %v18798_v13 }
 0x8cb   : > { %14496 = vmatpush2.bf16.msra.mxu1 %v18796_v12 }
 0x8cc   : > { %14497 = vmatprep.subr.bf16.mxu1 %v18801_v58 }
 0x8cf   : > { %14498 = vmatpush2.bf16.msra.mxu1 %v18799_v61 }
 0x8d0   : > { %14499 = vmatprep.subr.bf16.mxu1 %v18804_v24 }
 0x8d3   : > { %14500 = vmatpush2.bf16.msra.mxu1 %v18802_v38 }
 0x8d6   : > { %v13788_v52 = vpop.f32.mrf.mxu1 }
 0x8d7   : > { %v13789_v27 = vadd.f32 %v13788_v52, %v24912_v1 }
 0x8d8   : > { %v13790_v34 = vpop.f32.mrf.mxu1  ;;  %v13829_v10 = vpop.f32.mrf.mxu0 }
 0x8d9   : > { %v13791_v51 = vadd.f32 %v13790_v34, %v24914_v35  ;;  %v13830_v11 = vadd.f32 %v13829_v10, %v13789_v27  ;;  %v18829_v27 = vld [vmem:[%s25164_s10 + $0x38] sm:$0xff]  }
 0x8da   : > { %v13792_v50 = vpop.f32.mrf.mxu1  ;;  %v13831_v55 = vpop.f32.mrf.mxu0 }
 0x8db   : > { %v13832_v33 = vadd.f32 %v13831_v55, %v13791_v51 }
 0x8dc   : > { %v13793_v8 = vpop.f32.mrf.mxu1  ;;  %v13833_v56 = vpop.f32.mrf.mxu0 }
 0x8de   : > { %v13834_v63 = vpop.f32.mrf.mxu0 }
 0x8e6   : > { %v13870_v36 = vpop.f32.mrf.mxu1 }
 0x8e7   : > { %v13871_v62 = vadd.f32 %v13870_v36, %v13830_v11  ;;  %v18830_v36 = vld [vmem:[%s25164_s10 + $0x30] sm:$0xff]  }
 0x8e8   : > { %v13872_v43 = vpop.f32.mrf.mxu1 }
 0x8e9   : > { %vm14157_vm1 = vcmp.gt.f32.partialorder %v13871_v62, 0.0  ;;  %v14160_v22 = vmul.f32 0.01, %v13871_v62  ;;  %v13873_v59 = vadd.f32 %v13872_v43, %v13832_v33  ;;  %v18831_v33 = vld [vmem:[%s25164_s10 + $0x28] sm:$0xff]   ;;  %v18833_v43 = vld [vmem:[%s25164_s10 + $0x18] sm:$0xff]  }
 0x8ea   : > { %v13874_v6 = vpop.f32.mrf.mxu1 }
 0x8eb   : > { %vm14158_vm2 = vcmp.gt.f32.partialorder %v13873_v59, 0.0  ;;  %v14161_v45 = vmul.f32 0.01, %v13873_v59  ;;  %v14163_v49 = vsel %vm14157_vm1, %v13871_v62, %v14160_v22  ;;  %v18832_v62 = vld [vmem:[%s25164_s10 + $0x20] sm:$0xff]   ;;  %v18834_v22 = vld [vmem:[%s25164_s10 + $0x10] sm:$0xff]  }
 0x8ec   : > { %v13875_v42 = vpop.f32.mrf.mxu1  ;;  %v14166_v60 = vpack.c.bf16 %v14163_v49, %v14163_v49  ;;  %v18836_v6 = vld [vmem:[%s25164_s10] sm:$0xff]   ;;  %v18838_v49 = vld [vmem:[%s25164_s10 + $0x50] sm:$0xff]  }
 0x8ed   : > { %v14164_v4 = vsel %vm14158_vm2, %v13873_v59, %v14161_v45  ;;  %v18835_v59 = vld [vmem:[%s25164_s10 + $0x8] sm:$0xff]   ;;  %v18837_v45 = vld [vmem:[%s25164_s10 + $0x58] sm:$0xff]  }
 0x8ee   : > { %v14167_v1 = vpack.c.bf16 %v14164_v4, %v14164_v4  ;;  %v18839_v42 = vld [vmem:[%s25164_s10 + $0x48] sm:$0xff]   ;;  %v18840_v4 = vld [vmem:[%s25164_s10 + $0x40] sm:$0xff]  }
 0x8f0   : > { %14501 = vmatprep.mubr.bf16.mxu1 %v14167_v1 }
 0x8f1   : > { %14502 = vmatmul.mubr.bf16.vlgmr.msra.gmra.mxu1 %v14166_v60 }
 0x8f8   : > { %v17160_v35 = vpop.f32.mrf.mxu0 }
 0x8fa   : > { %v17161_v14 = vpop.f32.mrf.mxu0 }
 0x8fb   : > { %v17162_v15 = vadd.f32 %v17161_v14, %v17160_v35 }
 0x8fc   : > { %v17163_v46 = vpop.f32.mrf.mxu0 }
 0x8fe   : > { %v17164_v39 = vpop.f32.mrf.mxu0 }
 0x906   : > { %v17138_v0 = vpop.f32.mrf.mxu1 }
 0x908   : > { %v17139_v47 = vpop.f32.mrf.mxu1 }
 0x909   : > { %v17140_v40 = vadd.f32 %v17139_v47, %v17138_v0 }
 0x90a   : > { %v17141_v37 = vpop.f32.mrf.mxu1 }
 0x90b   : > { %v13912_v54 = vadd.f32 %v17140_v40, %v13583_v21 }
 0x90c   : > { %v17142_v2 = vpop.f32.mrf.mxu1 }
 0x90d   : > { %v13952_v31 = vadd.f32 %v17162_v15, %v13912_v54  ;;  %v14217_v15 = vld [vmem:[%s25163_s9] sm:$0x3] }
 0x90e   : > { %v14462_v46 = vrot.slane %v14217_v15, %v13574_v57  ;;  %v14466_v39 = vrot.slane %v14217_v15, %v13578_v29 }
 0x918   : > { %v17204_v44 = vpop.f32.mrf.mxu0 }
 0x91a   : > { %v17205_v16 = vpop.f32.mrf.mxu0 }
 0x91b   : > { %v17206_v52 = vadd.f32 %v17205_v16, %v17204_v44 }
 0x91c   : > { %v17207_v25 = vpop.f32.mrf.mxu0 }
 0x91e   : > { %v17208_v13 = vpop.f32.mrf.mxu0 }
 0x926   : > { %v17182_v18 = vpop.f32.mrf.mxu1 }
 0x928   : > { %v17183_v20 = vpop.f32.mrf.mxu1 }
 0x929   : > { %v17184_v53 = vadd.f32 %v17183_v20, %v17182_v18 }
 0x92a   : > { %v17185_v12 = vpop.f32.mrf.mxu1 }
 0x92b   : > { %v13992_v23 = vadd.f32 %v17184_v53, %v13952_v31 }
 0x92c   : > { %v17186_v58 = vpop.f32.mrf.mxu1 }
 0x92d   : > { %v14032_v10 = vadd.f32 %v17206_v52, %v13992_v23 }
 0x938   : > { %v17248_v61 = vpop.f32.mrf.mxu0 }
 0x93a   : > { %v17249_v28 = vpop.f32.mrf.mxu0 }
 0x93b   : > { %v17250_v55 = vadd.f32 %v17249_v28, %v17248_v61 }
 0x93c   : > { %v17251_v48 = vpop.f32.mrf.mxu0 }
 0x93e   : > { %v17252_v24 = vpop.f32.mrf.mxu0 }
 0x946   : > { %v17226_v26 = vpop.f32.mrf.mxu1 }
 0x948   : > { %v17227_v3 = vpop.f32.mrf.mxu1 }
 0x949   : > { %v17228_v34 = vadd.f32 %v17227_v3, %v17226_v26 }
 0x94a   : > { %v17229_v38 = vpop.f32.mrf.mxu1 }
 0x94b   : > { %v14072_v50 = vadd.f32 %v17228_v34, %v14032_v10 }
 0x94c   : > { %v17230_v17 = vpop.f32.mrf.mxu1 }
 0x94d   : > { %v14112_v8 = vadd.f32 %v17250_v55, %v14072_v50 }
 0x956   : > { %v14151_v56 = vpop.f32.mrf.mxu1 }
 0x957   : > { %v14152_v19 = vadd.f32 %v14151_v56, %v14112_v8 }
 0x958   : > { %v17403_v30 = vpop.f32.mrf.mxu1 }
 0x959   : > { %vm14159_vm3 = vcmp.gt.f32.partialorder %v14152_v19, 0.0  ;;  %v14162_v5 = vmul.f32 0.01, %v14152_v19 }
 0x95a   : > { %v14154_v63 = vpop.f32.mrf.mxu1 }
 0x95b   : > { %v14165_v41 = vsel %vm14159_vm3, %v14152_v19, %v14162_v5 }
 0x95c   : > { %v14168_v51 = vpack.c.bf16 %v14165_v41, %v14165_v41  ;;  %v17404_v11 = vpop.f32.mrf.mxu1 }
 0x95e   : > { %14543 = vmatmul.mubr.bf16.vlgmr.msra.gmra.mxu0 %v14168_v51 }
 0x95f   : > { %14660 = vmatpush1.bf16.msra.mxu0 %v18829_v27 }
 0x960   : > { %14661 = vmatprep.subr.bf16.mxu0 %v25336_v7 }
 0x963   : > { %14662 = vmatpush1.bf16.msra.mxu0 %v18830_v36 }
 0x964   : > { %14663 = vmatprep.subr.bf16.mxu0 %v25336_v7 }
 0x967   : > { %14664 = vmatpush1.bf16.msra.mxu0 %v18831_v33 }
 0x968   : > { %14665 = vmatprep.subr.bf16.mxu0 %v25336_v7 }
 0x96b   : > { %14666 = vmatpush1.bf16.msra.mxu0 %v18832_v62 }
 0x96c   : > { %14667 = vmatprep.subr.bf16.mxu0 %v25336_v7 }
 0x96f   : > { %14668 = vmatpush1.bf16.msra.mxu0 %v18833_v43 }
 0x970   : > { %14669 = vmatprep.subr.bf16.mxu0 %v25336_v7 }
 0x973   : > { %14670 = vmatpush1.bf16.msra.mxu0 %v18834_v22 }
 0x974   : > { %14671 = vmatprep.subr.bf16.mxu0 %v25336_v7 }
 0x977   : > { %14672 = vmatpush1.bf16.msra.mxu0 %v18835_v59 }
 0x978   : > { %14673 = vmatprep.subr.bf16.mxu0 %v25336_v7 }
 0x97b   : > { %14674 = vmatpush1.bf16.msra.mxu0 %v18836_v6 }
 0x97c   : > { %14683 = vmatprep.subr.bf16.mxu0 %v25336_v7 }
 0x97f   : > { %14684 = vmatpush2.bf16.msra.mxu0 %v18837_v45 }
 0x980   : > { %14685 = vmatprep.subr.bf16.mxu0 %v25336_v7 }
 0x983   : > { %14686 = vmatpush2.bf16.msra.mxu0 %v18838_v49 }
 0x984   : > { %14687 = vmatprep.subr.bf16.mxu0 %v25336_v7 }
 0x987   : > { %14688 = vmatpush2.bf16.msra.mxu0 %v18839_v42 }
 0x988   : > { %14689 = vmatprep.subr.bf16.mxu0 %v25336_v7 }
 0x98b   : > { %14690 = vmatpush2.bf16.msra.mxu0 %v18840_v4 }
 0x9b1   : > { %v14503_v1 = vpop.f32.mrf.mxu1 }
 0x9b2   : > { %v14504_v32 = vadd.f32 %v14503_v1, %v14462_v46 }
 0x9b3   : > { %v14505_v60 = vpop.f32.mrf.mxu1 }
 0x9b4   : > { %v14506_v21 = vadd.f32 %v14505_v60, %v14466_v39 }
 0x9b5   : > { %v14507_v35 = vpop.f32.mrf.mxu1 }
 0x9b7   : > { %v14508_v14 = vpop.f32.mrf.mxu1 }
 0xa1e   : > { %v14544_v0 = vpop.f32.mrf.mxu0 }
 0xa1f   : > { %v14545_v7 = vadd.f32 %v14544_v0, %v14504_v32 }
 0xa20   : > { %v14546_v47 = vpop.f32.mrf.mxu0 }
 0xa21   : > { %vm14551_vm4 = vcmp.gt.f32.partialorder %v14545_v7, 0.0  ;;  %v14553_v40 = vmul.f32 0.01, %v14545_v7  ;;  %v14547_v37 = vadd.f32 %v14546_v47, %v14506_v21 }
 0xa22   : > { %v14548_v54 = vpop.f32.mrf.mxu0 }
 0xa23   : > { %vm14552_vm5 = vcmp.gt.f32.partialorder %v14547_v37, 0.0  ;;  %v14554_v2 = vmul.f32 0.01, %v14547_v37  ;;  %v14555_v31 = vsel %vm14551_vm4, %v14545_v7, %v14553_v40 }
 0xa24   : > { %v14549_v44 = vpop.f32.mrf.mxu0  ;;  %v14557_v25 = vpack.c.bf16 %v14555_v31, %v14555_v31 }
 0xa25   : > { %v14556_v16 = vsel %vm14552_vm5, %v14547_v37, %v14554_v2 }
 0xa26   : > { %v14558_v57 = vpack.c.bf16 %v14556_v16, %v14556_v16 }
 0xa28   : > { %16267 = vmatprep.mubr.msk.bf16.mxu0 %vm10438_vm9, %v14558_v57 }
 0xa29   : > { %14692 = vmatmul.mubr.bf16.vlgmr.msra.gmra.mxu0 %v14557_v25 }
 0xae9   : > { %v14693_v29 = vpop.f32.mrf.mxu0 }
 0xaea   : > { %v14694_v13 = vadd.f32 %v14693_v29, %v14583_v9 }
 0xaeb   : > { %v14695_v18 = vpop.f32.mrf.mxu0 }
 0xaec   : > { %14700 = vst.msk [vmem:[%s405_s28] sm:$0x1] %vm14699_vm6, %v14694_v13 }
 0xaed   : > { %v14696_v20 = vpop.f32.mrf.mxu0 }
 0xaee   : > { %18855 = shalt.err (!%p18852_p3)
}
 0xaef   : > { %s18856_s26 = scalar_lea.hbm %s25113_s17, 16  ;;  %s18860_s16 = scalar_lea.hbm %s25166_s12, 32 }
 0xaf0   : > { %p18857_p4 = scmp.ne.s32.totalorder %s25113_s17, %s18856_s26  ;;  %p18861_p9 = scmp.lt.s32.totalorder %s25113_s17, %s25166_s12 }
 0xaf1   : > { %p18862_p10 = scmp.lt.s32.totalorder %s18860_s16, %s18856_s26 }
 0xaf2   : > { %p18858_p7 = pnand %p18857_p4, %p19014_p5 }
 0xaf3   : > { %p18863_p11 = por %p18862_p10, %p18861_p9 }
 0xaf4   : > { %p18859_p8 = pneg %p18858_p7 }
 0xaf6   : > { %p18864_p12 = pnand %p18863_p11, %p18859_p8 }
 0xaf8   : > { %18867 = shalt.err (!%p18864_p12)
}
 0xaf9   : > { %17406 = dma.vmem_to_hbm [thread:$0]  (%p19014_p5), %s25115_s15, 16, %s25113_s17, %s14702_s18   ;;  %v14697_v12 = vpop.f32.mrf.mxu0 }
 0xafa PF: > { %p17412_p13 = scmp.ge.s32.totalorder %s18902_s24, 2  ;;  %s14726_s25 = sand.u32 1, %s18890_s21  }
 0xafb   : > { %s14727_s0 = scalar_lea.sflag [#allocation5], %s14726_s25 }
 0xafc   : > { %p17409_p0 = pnand %p17412_p13, %p19018_p6 }
 0xafe   : > { %p17410_p1 = pneg %p17409_p0 }
 0xb00   : > { %18885 = dma.done.wait (%p17410_p1), %s14727_s0, 16  }
 0xb01   : > { %18887 = vsyncadd (%p17410_p1), %s14727_s0, 4294967280  ;;  %s25338_s13 = sld [smem:[#allocation7_spill]]  ;;  %p22_p2 = scmp.ge.s32.totalorder %s19001_s27, 4  }
 0xb02   : > { %s25339_s21 = smov %s18894_s22  ;;  %s25340_s22 = smov %s18898_s23 }
 0xb03   : > { %s25342_s24 = smov %s19001_s27  ;;  %24 = sbr.rel (!%p22_p2) target bundleno = 5 (0x5), region = 103 }
 0xb07   : > { %s25341_s23 = smov %s25338_s13 }
 0xb08   :  { %14731 = vsyncpa [#allocation5], 1 }
 0xb09   :  { %14733 = vsyncpa [#allocation5 + $0x1], 1 }

</bundles_post_ra>
